<compile_context>
chip_gen: v5e
topology: v5e:2x2
jax: 0.10.0
libtpu: 0.0.40
codegen_flags: <defaults>
</compile_context>

<pallas_src>
import functools

import jax
import jax.numpy as jnp
from jax import lax
from jax.experimental import pallas as pl
from jax.experimental.pallas import tpu as pltpu

LN_EPS = 1e-5                      # torch.nn.LayerNorm default
VMEM_LIMIT = 32 * 1024 * 1024      # safe scoped limit on v5e/v6e/v7x
NEG_INF = -1e30                    # safe only because scores stay f32
TF_DIM = 128                       # time features zero-padded to a lane-dense width


def _round_up(a, b):
    return (a + b - 1) // b * b


def _pick_tiles(n):
    """Returns (n_pad, tile_dst, tile_src)."""
    if n <= 128:
        return 128, 128, 128
    if n <= 256:
        return 256, 128, 128      # >=2 dst tiles -> both TensorCores busy on v7x
    n_pad = _round_up(n, 256)
    return n_pad, 256, 128        # rectangular tiles: big dst tile, 128-wide src tile


def _layer_norm(h, g, b):
    mean = jnp.mean(h, axis=-1, keepdims=True)
    var = jnp.mean(jnp.square(h - mean), axis=-1, keepdims=True)
    return (h - mean) * lax.rsqrt(var + LN_EPS) * g + b


# --------------------------------------------------------------------------------------
# Kernel 1: tiled linear  y = x @ W + b   (bf16 MXU inputs, f32 accumulation).
# Used for the per-layer [k|v] projection (bf16 output) and the layer-0 residual proj.
# --------------------------------------------------------------------------------------
def linear_kernel(x_ref, w_ref, b_ref, o_ref):
    o_ref[...] = (jnp.dot(x_ref[...].astype(jnp.bfloat16), w_ref[...],
                          preferred_element_type=jnp.float32)
                  + b_ref[...]).astype(o_ref.dtype)


def tiled_linear(x, w, b, tile, out_dtype):
    n, din = x.shape
    dout = w.shape[1]
    return pl.pallas_call(
        linear_kernel,
        out_shape=jax.ShapeDtypeStruct((n, dout), out_dtype),
        grid_spec=pltpu.PrefetchScalarGridSpec(
            num_scalar_prefetch=0,
            grid=(n // tile,),
            in_specs=[pl.BlockSpec((tile, din), lambda i: (i, 0)),
                      pl.BlockSpec((din, dout), lambda i: (0, 0)),
                      pl.BlockSpec((1, dout), lambda i: (0, 0))],
            out_specs=pl.BlockSpec((tile, dout), lambda i: (i, 0))),
        compiler_params=pltpu.CompilerParams(
            dimension_semantics=("parallel",),
            vmem_limit_bytes=VMEM_LIMIT),
    )(x, w, b)


# --------------------------------------------------------------------------------------
# Kernel 2: fused [q|skip] projection + flash-style TransformerConv (heads=1)
#           + ReLU + residual add, with block-sparsity skipping.
#   grid = (dst_tiles, src_tiles); online softmax over src tiles in f32 VMEM scratch.
#   kv holds [k | v] per src node in bf16 (lane-dense 2H last dim).
# --------------------------------------------------------------------------------------
def flash_gnn_attention_kernel(cnt_ref, ft_ref,              # scalar-prefetch (SMEM)
                               x_ref, wqs_ref, bqs_ref,      # dst rows + fused q|skip W
                               kv_ref, adj_ref, res_ref,     # streamed src operands + res
                               o_ref,
                               m_scr, l_scr, acc_scr, qs_scr,
                               *, hidden, scale):
    i = pl.program_id(0)
    j = pl.program_id(1)

    @pl.when(j == 0)
    def _prologue():
        m_scr[...] = jnp.full_like(m_scr, NEG_INF)
        l_scr[...] = jnp.zeros_like(l_scr)
        acc_scr[...] = jnp.zeros_like(acc_scr)
        # Fused q|skip projection of the dst rows (each dst tile is visited once).
        qs_scr[...] = jnp.dot(x_ref[...].astype(jnp.bfloat16), wqs_ref[...],
                              preferred_element_type=jnp.float32) + bqs_ref[...]

    @pl.when(cnt_ref[i, j] > 0)                 # skip MXU/VPU work for empty blocks
    def _step():
        q = qs_scr[:, 0:hidden].astype(jnp.bfloat16)
        k = kv_ref[:, 0:hidden]
        v = kv_ref[:, hidden:2 * hidden]

        # scores[dst, src] = <q_dst, k_src> / sqrt(H); contract last dims (no transpose).
        s = lax.dot_general(q, k, (((1,), (1,)), ((), ())),
                            preferred_element_type=jnp.float32) * scale
        mask = adj_ref[...] != 0                 # int8 -> bool, no f32 temp
        s = jnp.where(mask, s, NEG_INF)

        m_prev = m_scr[...]
        m_new = jnp.maximum(m_prev, jnp.max(s, axis=-1, keepdims=True))
        alpha = jnp.exp(m_prev - m_new)
        p = jnp.where(mask, jnp.exp(s - m_new), 0.0)

        l_scr[...] = alpha * l_scr[...] + jnp.sum(p, axis=-1, keepdims=True)
        acc_scr[...] = alpha * acc_scr[...] + jnp.dot(
            p.astype(jnp.bfloat16), v, preferred_element_type=jnp.float32)
        m_scr[...] = m_new

    @pl.when(j == pl.num_programs(1) - 1)
    def _epilogue():
        skip = qs_scr[:, hidden:2 * hidden]
        denom = l_scr[...]
        denom = jnp.where(denom == 0.0, 1.0, denom)          # isolated nodes -> agg = 0
        agg = acc_scr[...] * pl.reciprocal(denom, approx=True)
        conv_out = jnp.maximum(agg + skip, 0.0)               # ReLU (dropout = identity)
        o_ref[...] = (conv_out + res_ref[...].astype(jnp.float32)).astype(o_ref.dtype)


def gnn_attention(x, wqs, bqs, kv, adj, residual, counts, fetch,
                  tile_dst, tile_src, hidden):
    n, din = x.shape
    n_dst = n // tile_dst
    n_src = n // tile_src
    kern = functools.partial(flash_gnn_attention_kernel,
                             hidden=hidden, scale=1.0 / float(hidden) ** 0.5)
    return pl.pallas_call(
        kern,
        out_shape=jax.ShapeDtypeStruct((n, hidden), jnp.bfloat16),
        grid_spec=pltpu.PrefetchScalarGridSpec(
            num_scalar_prefetch=2,
            grid=(n_dst, n_src),
            in_specs=[
                pl.BlockSpec((tile_dst, din), lambda i, j, cnt, ft: (i, 0)),
                pl.BlockSpec((din, 2 * hidden), lambda i, j, cnt, ft: (0, 0)),
                pl.BlockSpec((1, 2 * hidden), lambda i, j, cnt, ft: (0, 0)),
                # empty blocks repeat the previously fetched block index -> no new DMA
                pl.BlockSpec((tile_src, 2 * hidden),
                             lambda i, j, cnt, ft: (ft[i, j], 0)),
                pl.BlockSpec((tile_dst, tile_src),
                             lambda i, j, cnt, ft: (i, ft[i, j])),
                pl.BlockSpec((tile_dst, hidden), lambda i, j, cnt, ft: (i, 0)),
            ],
            out_specs=pl.BlockSpec((tile_dst, hidden),
                                   lambda i, j, cnt, ft: (i, 0)),
            scratch_shapes=[pltpu.VMEM((tile_dst, 1), jnp.float32),
                            pltpu.VMEM((tile_dst, 1), jnp.float32),
                            pltpu.VMEM((tile_dst, hidden), jnp.float32),
                            pltpu.VMEM((tile_dst, 2 * hidden), jnp.float32)]),
        compiler_params=pltpu.CompilerParams(
            dimension_semantics=("parallel", "arbitrary"),
            vmem_limit_bytes=VMEM_LIMIT),
    )(counts, fetch, x, wqs, bqs, kv, adj, residual)


# --------------------------------------------------------------------------------------
# Kernel 3: fused tail — time_encoder + (concat -> feature_fusion) + output_layer.
#   concat is eliminated by splitting the fusion weight into two HxH halves;
#   output weight/bias are padded to 128 lanes so the final store is lane-dense.
# --------------------------------------------------------------------------------------
def fusion_output_kernel(cur_ref, tf_ref,
                         wt_ref, bt_ref, gt_ref, bett_ref,
                         w1_ref, w2_ref, bf_ref, gf_ref, betf_ref,
                         wo_ref, bo_ref, o_ref):
    # time_encoder: Linear(3,H) -> ReLU -> LayerNorm  (features zero-padded to 128)
    te = jnp.dot(tf_ref[...].astype(jnp.bfloat16), wt_ref[...],
                 preferred_element_type=jnp.float32) + bt_ref[...]
    te = jnp.maximum(te, 0.0)
    te = _layer_norm(te, gt_ref[...], bett_ref[...])

    # feature_fusion: Linear(2H,H) as cur@W1 + te@W2 -> ReLU -> LayerNorm
    h = (jnp.dot(cur_ref[...].astype(jnp.bfloat16), w1_ref[...],
                 preferred_element_type=jnp.float32)
         + jnp.dot(te.astype(jnp.bfloat16), w2_ref[...],
                   preferred_element_type=jnp.float32)
         + bf_ref[...])
    h = jnp.maximum(h, 0.0)
    h = _layer_norm(h, gf_ref[...], betf_ref[...])

    # output_layer: Linear(H, out_pad)  (Dropout = identity in eval mode)
    o_ref[...] = jnp.dot(h.astype(jnp.bfloat16), wo_ref[...],
                         preferred_element_type=jnp.float32) + bo_ref[...]


def fusion_output(current, time_features, p, tile):
    n, hidden = current.shape
    out_pad = p["out_w"].shape[1]

    def rowspec(d):
        return pl.BlockSpec((tile, d), lambda i: (i, 0))

    def fullspec(a):
        return pl.BlockSpec(a.shape, lambda i: (0, 0))

    return pl.pallas_call(
        fusion_output_kernel,
        out_shape=jax.ShapeDtypeStruct((n, out_pad), jnp.float32),
        grid_spec=pltpu.PrefetchScalarGridSpec(
            num_scalar_prefetch=0,
            grid=(n // tile,),
            in_specs=[rowspec(hidden), rowspec(time_features.shape[1]),
                      fullspec(p["time_w"]), fullspec(p["time_b"]),
                      fullspec(p["time_g"]), fullspec(p["time_beta"]),
                      fullspec(p["fuse_w1"]), fullspec(p["fuse_w2"]),
                      fullspec(p["fuse_b"]), fullspec(p["fuse_g"]),
                      fullspec(p["fuse_beta"]),
                      fullspec(p["out_w"]), fullspec(p["out_b"])],
            out_specs=rowspec(out_pad)),
        compiler_params=pltpu.CompilerParams(
            dimension_semantics=("parallel",),
            vmem_limit_bytes=VMEM_LIMIT),
    )(current, time_features,
      p["time_w"], p["time_b"], p["time_g"], p["time_beta"],
      p["fuse_w1"], p["fuse_w2"], p["fuse_b"], p["fuse_g"], p["fuse_beta"],
      p["out_w"], p["out_b"])


# --------------------------------------------------------------------------------------
# Parameter init (deterministic, synthetic). Matmul weights in bf16 (MXU inputs),
# biases / LayerNorm params in f32. Per-layer weights pre-concatenated as [q|skip], [k|v].
# NOTE: bf16 weights + bf16 matmul inputs + approx reciprocal deviate from the f32 torch
# reference at roughly the 1e-2..1e-3 relative level (acceptable for inference).
# --------------------------------------------------------------------------------------
def init_params(key, in_channels, hidden, out_channels, num_layers):
    keys = iter(jax.random.split(key, 8 * num_layers + 16))

    def lin(kin, kout):
        w = (jax.random.normal(next(keys), (kin, kout), jnp.float32)
             / jnp.sqrt(float(kin))).astype(jnp.bfloat16)
        b = jax.random.normal(next(keys), (1, kout), jnp.float32) * 0.01
        return w, b

    p = {}
    tw, p["time_b"] = lin(3, hidden)
    p["time_w"] = jnp.pad(tw, ((0, TF_DIM - 3), (0, 0)))   # zero rows: exact same math
    p["time_g"] = jnp.ones((1, hidden), jnp.float32)
    p["time_beta"] = jnp.zeros((1, hidden), jnp.float32)

    p["layers"] = []
    for layer in range(num_layers):
        din = in_channels if layer == 0 else hidden        # heads=1 -> hidden*heads == hidden
        wq, bq = lin(din, hidden)
        wk, bk = lin(din, hidden)
        wv, bv = lin(din, hidden)
        ws, bs = lin(din, hidden)                          # lin_skip
        p["layers"].append({
            "wqs": jnp.concatenate([wq, ws], axis=1),
            "bqs": jnp.concatenate([bq, bs], axis=1),
            "wkv": jnp.concatenate([wk, wv], axis=1),
            "bkv": jnp.concatenate([bk, bv], axis=1),
        })

    p["proj_w"], p["proj_b"] = lin(in_channels, hidden)     # layer-0 residual projection
    p["fuse_w1"], p["fuse_b"] = lin(hidden, hidden)          # fusion half for `current`
    p["fuse_w2"], _ = lin(hidden, hidden)                    # fusion half for time_encoded
    p["fuse_g"] = jnp.ones((1, hidden), jnp.float32)
    p["fuse_beta"] = jnp.zeros((1, hidden), jnp.float32)

    ow, ob = lin(hidden, out_channels)
    out_pad = _round_up(out_channels, 128)                    # lane-dense output stores
    p["out_w"] = jnp.pad(ow, ((0, 0), (0, out_pad - out_channels)))
    p["out_b"] = jnp.pad(ob, ((0, 0), (0, out_pad - out_channels)))
    return p


# --------------------------------------------------------------------------------------
# Forward pass (matches EnhancedGNNTransformerEncoder.forward, eval mode, heads=1)
# --------------------------------------------------------------------------------------
def forward(x, edge_index, batch, params, *, in_channels, hidden,
            out_channels, num_layers):
    del batch  # accepted but unused, exactly as in the reference forward
    n = x.shape[0]
    n_pad, tile_dst, tile_src = _pick_tiles(n)

    x_p = jnp.pad(x, ((0, n_pad - n), (0, 0)))

    # glue: densify edge_index (PyG layout: row0 = src, row1 = dst) into an int8 mask.
    # adj[dst, src] = 1.  Padded rows/cols stay zero (no incoming edges).
    src, dst = edge_index[0], edge_index[1]
    adj = jnp.zeros((n_pad, n_pad), jnp.int8).at[dst, src].set(1)
    # TODO(synk): duplicate edges are deduped by the dense mask; PyG's scatter softmax
    # would weight each duplicate separately.

    # Block-occupancy table (scalar prefetch) + "repeat previous block index" fetch
    # table so empty (dst, src) blocks issue neither DMA nor compute in kernel 2.
    n_dst_t = n_pad // tile_dst
    n_src_t = n_pad // tile_src
    counts = jnp.zeros((n_dst_t, n_src_t), jnp.int32).at[
        dst // tile_dst, src // tile_src].add(1)
    jidx = jnp.broadcast_to(jnp.arange(n_src_t, dtype=jnp.int32),
                            (n_dst_t, n_src_t))
    fetch = lax.cummax(jnp.where(counts > 0, jidx, 0), axis=1).astype(jnp.int32)

    # lane-dense (zero-padded) time features; spatial_encoder(x[:, :2]) is dead in the
    # reference forward -> elided (zero effect on the returned output).
    time_features = jnp.pad(x_p[:, -3:], ((0, 0), (0, TF_DIM - 3)))

    current = x_p
    for layer in range(num_layers):
        lp = params["layers"][layer]
        if layer == 0 and in_channels != hidden:
            residual = tiled_linear(current, params["proj_w"], params["proj_b"],
                                    tile_dst, jnp.bfloat16)
        else:
            residual = current
        # streamed [k|v] in bf16 (half the bytes of the hot src operand)
        kv = tiled_linear(current, lp["wkv"], lp["bkv"], tile_dst, jnp.bfloat16)
        current = gnn_attention(current, lp["wqs"], lp["bqs"], kv, adj, residual,
                                counts, fetch, tile_dst, tile_src, hidden)

    out = fusion_output(current, time_features, params, tile_dst)
    return out[:n, :out_channels]


if __name__ == "__main__":
    # Small, shape-consistent config. heads must be 1 for the reference forward to
    # shape-check; hidden is 128 so every activation last-dim is lane-dense.
    N, IN_CH, HIDDEN, OUT_CH, NUM_LAYERS = 16, 8, 128, 4, 4
    # TODO(synk): multi-head (heads>1) TransformerConv is not implemented because the
    # reference forward's feature_fusion (Linear(hidden*2, hidden)) only shape-checks
    # with heads=1.

    key = jax.random.PRNGKey(0)
    kx, kp = jax.random.split(key, 2)

    x = jax.random.normal(kx, (N, IN_CH), jnp.float32)

    # deterministic edge_index: a ring plus a few extra edges (PyG layout: [2, num_edges])
    ring_src = jnp.arange(N, dtype=jnp.int32)
    ring_dst = (ring_src + 1) % N
    extra_src = jnp.array([0, 3, 5, 7], jnp.int32)
    extra_dst = jnp.array([8, 12, 2, 14], jnp.int32)
    edge_index = jnp.stack([jnp.concatenate([ring_src, extra_src]),
                            jnp.concatenate([ring_dst, extra_dst])], axis=0)
    batch = jnp.zeros((N,), jnp.int32)

    params = init_params(kp, IN_CH, HIDDEN, OUT_CH, NUM_LAYERS)

    fwd = jax.jit(functools.partial(forward, in_channels=IN_CH, hidden=HIDDEN,
                                    out_channels=OUT_CH, num_layers=NUM_LAYERS))
    out = jax.block_until_ready(fwd(x, edge_index, batch, params))

    assert out.shape == (N, OUT_CH)
    assert bool(jnp.all(jnp.isfinite(out)))
    print("KERNEL_OK")
</pallas_src>

<mosaic_0001>
module attributes {stable_mosaic.version = 11 : i64} {
  func.func @linear_kernel(%arg0: i32, %arg1: memref<128x8xf32, #tpu.memory_space<vmem>>, %arg2: memref<8x128xbf16, #tpu.memory_space<vmem>>, %arg3: memref<1x128xf32, #tpu.memory_space<vmem>>, %arg4: memref<128x128xbf16, #tpu.memory_space<vmem>>) attributes {dimension_semantics = [#tpu.dimension_semantics<parallel>], iteration_bounds = array<i64: 1>, scalar_prefetch = 0 : i64, scratch_operands = 0 : i64, tpu.core_type = #tpu.core_type<tc>, window_params = [{transform_indices = @transform_0, window_bounds = array<i64: 128, 8>}, {pipeline_mode = #tpu.pipeline_mode<synchronous>, transform_indices = @transform_1, window_bounds = array<i64: 8, 128>}, {pipeline_mode = #tpu.pipeline_mode<synchronous>, transform_indices = @transform_2, window_bounds = array<i64: 1, 128>}, {transform_indices = @transform_3, window_bounds = array<i64: 128, 128>}]} {
    %c0 = arith.constant 0 : index
    %c0_0 = arith.constant 0 : index
    %0 = vector.load %arg1[%c0, %c0_0] : memref<128x8xf32, #tpu.memory_space<vmem>>, vector<128x8xf32>
    %1 = arith.truncf %0 : vector<128x8xf32> to vector<128x8xbf16>
    %c0_1 = arith.constant 0 : index
    %c0_2 = arith.constant 0 : index
    %2 = vector.load %arg2[%c0_1, %c0_2] : memref<8x128xbf16, #tpu.memory_space<vmem>>, vector<8x128xbf16>
    %cst = arith.constant dense<0.000000e+00> : vector<128x128xf32>
    %3 = tpu.matmul %1, %2, %cst {dimension_numbers = #tpu.dot_dimension_numbers<[1], [0], [0], [1], [0, 0, 1, 1], [], []>} : vector<128x8xbf16>, vector<8x128xbf16>, vector<128x128xf32> -> vector<128x128xf32>
    %c0_3 = arith.constant 0 : index
    %c0_4 = arith.constant 0 : index
    %4 = vector.load %arg3[%c0_3, %c0_4] : memref<1x128xf32, #tpu.memory_space<vmem>>, vector<1x128xf32>
    %5 = vector.broadcast %4 : vector<1x128xf32> to vector<128x128xf32>
    %6 = arith.addf %3, %5 : vector<128x128xf32>
    %7 = arith.truncf %6 : vector<128x128xf32> to vector<128x128xbf16>
    %c0_5 = arith.constant 0 : index
    %c0_6 = arith.constant 0 : index
    %8 = vector.load %arg4[%c0_5, %c0_6] : memref<128x128xbf16, #tpu.memory_space<vmem>>, vector<128x128xbf16>
    tpu.vector_store %arg4[%c0_5, %c0_6], %7 {strides = array<i32>} : memref<128x128xbf16, #tpu.memory_space<vmem>>, vector<128x128xbf16>,
    return
  }
  func.func @transform_0(%arg0: i32) -> (i32, i32) {
    %c0_i32 = arith.constant 0 : i32
    %c0_i32_0 = arith.constant 0 : i32
    return %arg0, %c0_i32 : i32, i32
  }
  func.func @transform_1(%arg0: i32) -> (i32, i32) {
    %c0_i32 = arith.constant 0 : i32
    %c0_i32_0 = arith.constant 0 : i32
    %c0_i32_1 = arith.constant 0 : i32
    return %c0_i32, %c0_i32_0 : i32, i32
  }
  func.func @transform_2(%arg0: i32) -> (i32, i32) {
    %c0_i32 = arith.constant 0 : i32
    %c0_i32_0 = arith.constant 0 : i32
    %c0_i32_1 = arith.constant 0 : i32
    return %c0_i32, %c0_i32_0 : i32, i32
  }
  func.func @transform_3(%arg0: i32) -> (i32, i32) {
    %c0_i32 = arith.constant 0 : i32
    %c0_i32_0 = arith.constant 0 : i32
    return %arg0, %c0_i32 : i32, i32
  }
}

module attributes {stable_mosaic.version = 11 : i64} {
  func.func @linear_kernel(%arg0: i32, %arg1: memref<128x8xf32, #tpu.memory_space<vmem>>, %arg2: memref<8x256xbf16, #tpu.memory_space<vmem>>, %arg3: memref<1x256xf32, #tpu.memory_space<vmem>>, %arg4: memref<128x256xbf16, #tpu.memory_space<vmem>>) attributes {dimension_semantics = [#tpu.dimension_semantics<parallel>], iteration_bounds = array<i64: 1>, scalar_prefetch = 0 : i64, scratch_operands = 0 : i64, tpu.core_type = #tpu.core_type<tc>, window_params = [{transform_indices = @transform_0, window_bounds = array<i64: 128, 8>}, {pipeline_mode = #tpu.pipeline_mode<synchronous>, transform_indices = @transform_1, window_bounds = array<i64: 8, 256>}, {pipeline_mode = #tpu.pipeline_mode<synchronous>, transform_indices = @transform_2, window_bounds = array<i64: 1, 256>}, {transform_indices = @transform_3, window_bounds = array<i64: 128, 256>}]} {
    %c0 = arith.constant 0 : index
    %c0_0 = arith.constant 0 : index
    %0 = vector.load %arg1[%c0, %c0_0] : memref<128x8xf32, #tpu.memory_space<vmem>>, vector<128x8xf32>
    %1 = arith.truncf %0 : vector<128x8xf32> to vector<128x8xbf16>
    %c0_1 = arith.constant 0 : index
    %c0_2 = arith.constant 0 : index
    %2 = vector.load %arg2[%c0_1, %c0_2] : memref<8x256xbf16, #tpu.memory_space<vmem>>, vector<8x256xbf16>
    %cst = arith.constant dense<0.000000e+00> : vector<128x256xf32>
    %3 = tpu.matmul %1, %2, %cst {dimension_numbers = #tpu.dot_dimension_numbers<[1], [0], [0], [1], [0, 0, 1, 1], [], []>} : vector<128x8xbf16>, vector<8x256xbf16>, vector<128x256xf32> -> vector<128x256xf32>
    %c0_3 = arith.constant 0 : index
    %c0_4 = arith.constant 0 : index
    %4 = vector.load %arg3[%c0_3, %c0_4] : memref<1x256xf32, #tpu.memory_space<vmem>>, vector<1x256xf32>
    %5 = vector.broadcast %4 : vector<1x256xf32> to vector<128x256xf32>
    %6 = arith.addf %3, %5 : vector<128x256xf32>
    %7 = arith.truncf %6 : vector<128x256xf32> to vector<128x256xbf16>
    %c0_5 = arith.constant 0 : index
    %c0_6 = arith.constant 0 : index
    %8 = vector.load %arg4[%c0_5, %c0_6] : memref<128x256xbf16, #tpu.memory_space<vmem>>, vector<128x256xbf16>
    tpu.vector_store %arg4[%c0_5, %c0_6], %7 {strides = array<i32>} : memref<128x256xbf16, #tpu.memory_space<vmem>>, vector<128x256xbf16>,
    return
  }
  func.func @transform_0(%arg0: i32) -> (i32, i32) {
    %c0_i32 = arith.constant 0 : i32
    %c0_i32_0 = arith.constant 0 : i32
    return %arg0, %c0_i32 : i32, i32
  }
  func.func @transform_1(%arg0: i32) -> (i32, i32) {
    %c0_i32 = arith.constant 0 : i32
    %c0_i32_0 = arith.constant 0 : i32
    %c0_i32_1 = arith.constant 0 : i32
    return %c0_i32, %c0_i32_0 : i32, i32
  }
  func.func @transform_2(%arg0: i32) -> (i32, i32) {
    %c0_i32 = arith.constant 0 : i32
    %c0_i32_0 = arith.constant 0 : i32
    %c0_i32_1 = arith.constant 0 : i32
    return %c0_i32, %c0_i32_0 : i32, i32
  }
  func.func @transform_3(%arg0: i32) -> (i32, i32) {
    %c0_i32 = arith.constant 0 : i32
    %c0_i32_0 = arith.constant 0 : i32
    return %arg0, %c0_i32 : i32, i32
  }
}

module attributes {stable_mosaic.version = 11 : i64} {
  func.func @linear_kernel(%arg0: i32, %arg1: memref<128x128xbf16, #tpu.memory_space<vmem>>, %arg2: memref<128x256xbf16, #tpu.memory_space<vmem>>, %arg3: memref<1x256xf32, #tpu.memory_space<vmem>>, %arg4: memref<128x256xbf16, #tpu.memory_space<vmem>>) attributes {dimension_semantics = [#tpu.dimension_semantics<parallel>], iteration_bounds = array<i64: 1>, scalar_prefetch = 0 : i64, scratch_operands = 0 : i64, tpu.core_type = #tpu.core_type<tc>, window_params = [{transform_indices = @transform_0, window_bounds = array<i64: 128, 128>}, {pipeline_mode = #tpu.pipeline_mode<synchronous>, transform_indices = @transform_1, window_bounds = array<i64: 128, 256>}, {pipeline_mode = #tpu.pipeline_mode<synchronous>, transform_indices = @transform_2, window_bounds = array<i64: 1, 256>}, {transform_indices = @transform_3, window_bounds = array<i64: 128, 256>}]} {
    %c0 = arith.constant 0 : index
    %c0_0 = arith.constant 0 : index
    %0 = vector.load %arg1[%c0, %c0_0] : memref<128x128xbf16, #tpu.memory_space<vmem>>, vector<128x128xbf16>
    %c0_1 = arith.constant 0 : index
    %c0_2 = arith.constant 0 : index
    %1 = vector.load %arg2[%c0_1, %c0_2] : memref<128x256xbf16, #tpu.memory_space<vmem>>, vector<128x256xbf16>
    %cst = arith.constant dense<0.000000e+00> : vector<128x256xf32>
    %2 = tpu.matmul %0, %1, %cst {dimension_numbers = #tpu.dot_dimension_numbers<[1], [0], [0], [1], [0, 0, 1, 1], [], []>} : vector<128x128xbf16>, vector<128x256xbf16>, vector<128x256xf32> -> vector<128x256xf32>
    %c0_3 = arith.constant 0 : index
    %c0_4 = arith.constant 0 : index
    %3 = vector.load %arg3[%c0_3, %c0_4] : memref<1x256xf32, #tpu.memory_space<vmem>>, vector<1x256xf32>
    %4 = vector.broadcast %3 : vector<1x256xf32> to vector<128x256xf32>
    %5 = arith.addf %2, %4 : vector<128x256xf32>
    %6 = arith.truncf %5 : vector<128x256xf32> to vector<128x256xbf16>
    %c0_5 = arith.constant 0 : index
    %c0_6 = arith.constant 0 : index
    %7 = vector.load %arg4[%c0_5, %c0_6] : memref<128x256xbf16, #tpu.memory_space<vmem>>, vector<128x256xbf16>
    tpu.vector_store %arg4[%c0_5, %c0_6], %6 {strides = array<i32>} : memref<128x256xbf16, #tpu.memory_space<vmem>>, vector<128x256xbf16>,
    return
  }
  func.func @transform_0(%arg0: i32) -> (i32, i32) {
    %c0_i32 = arith.constant 0 : i32
    %c0_i32_0 = arith.constant 0 : i32
    return %arg0, %c0_i32 : i32, i32
  }
  func.func @transform_1(%arg0: i32) -> (i32, i32) {
    %c0_i32 = arith.constant 0 : i32
    %c0_i32_0 = arith.constant 0 : i32
    %c0_i32_1 = arith.constant 0 : i32
    return %c0_i32, %c0_i32_0 : i32, i32
  }
  func.func @transform_2(%arg0: i32) -> (i32, i32) {
    %c0_i32 = arith.constant 0 : i32
    %c0_i32_0 = arith.constant 0 : i32
    %c0_i32_1 = arith.constant 0 : i32
    return %c0_i32, %c0_i32_0 : i32, i32
  }
  func.func @transform_3(%arg0: i32) -> (i32, i32) {
    %c0_i32 = arith.constant 0 : i32
    %c0_i32_0 = arith.constant 0 : i32
    return %arg0, %c0_i32 : i32, i32
  }
}

module attributes {stable_mosaic.version = 11 : i64} {
  func.func @flash_gnn_attention_kernel(%arg0: i32, %arg1: i32, %arg2: memref<1x1xi32, #tpu.memory_space<smem>>, %arg3: memref<1x1xi32, #tpu.memory_space<smem>>, %arg4: memref<128x128xbf16, #tpu.memory_space<vmem>>, %arg5: memref<128x256xbf16, #tpu.memory_space<vmem>>, %arg6: memref<1x256xf32, #tpu.memory_space<vmem>>, %arg7: memref<128x256xbf16, #tpu.memory_space<vmem>>, %arg8: memref<128x128xi8, #tpu.memory_space<vmem>>, %arg9: memref<128x128xbf16, #tpu.memory_space<vmem>>, %arg10: memref<128x128xbf16, #tpu.memory_space<vmem>>, %arg11: memref<128x1xf32, #tpu.memory_space<vmem>>, %arg12: memref<128x1xf32, #tpu.memory_space<vmem>>, %arg13: memref<128x128xf32, #tpu.memory_space<vmem>>, %arg14: memref<128x256xf32, #tpu.memory_space<vmem>>) attributes {dimension_semantics = [#tpu.dimension_semantics<parallel>, #tpu.dimension_semantics<arbitrary>], iteration_bounds = array<i64: 1, 1>, scalar_prefetch = 2 : i64, scratch_operands = 4 : i64, tpu.core_type = #tpu.core_type<tc>, window_params = [{transform_indices = @transform_0, window_bounds = array<i64: 128, 128>}, {pipeline_mode = #tpu.pipeline_mode<synchronous>, transform_indices = @transform_1, window_bounds = array<i64: 128, 256>}, {pipeline_mode = #tpu.pipeline_mode<synchronous>, transform_indices = @transform_2, window_bounds = array<i64: 1, 256>}, {transform_indices = @transform_3, window_bounds = array<i64: 128, 256>}, {transform_indices = @transform_4, window_bounds = array<i64: 128, 128>}, {transform_indices = @transform_5, window_bounds = array<i64: 128, 128>}, {transform_indices = @transform_6, window_bounds = array<i64: 128, 128>}]} {
    %c0_i32 = arith.constant 0 : i32
    %0 = arith.cmpi eq, %arg1, %c0_i32 : i32
    %1 = arith.extui %0 : i1 to i32
    %c0_i32_0 = arith.constant 0 : i32
    %2 = arith.cmpi ne, %1, %c0_i32_0 : i32
    scf.if %2 {
      %cst = arith.constant -1.000000e+30 : f32
      %12 = vector.broadcast %cst : f32 to vector<128x1xf32>
      %c0 = arith.constant 0 : index
      %c0_5 = arith.constant 0 : index
      %13 = vector.load %arg11[%c0, %c0_5] : memref<128x1xf32, #tpu.memory_space<vmem>>, vector<128x1xf32>
      tpu.vector_store %arg11[%c0, %c0_5], %12 {strides = array<i32>} : memref<128x1xf32, #tpu.memory_space<vmem>>, vector<128x1xf32>,
      %cst_6 = arith.constant 0.000000e+00 : f32
      %14 = vector.broadcast %cst_6 : f32 to vector<128x1xf32>
      %c0_7 = arith.constant 0 : index
      %c0_8 = arith.constant 0 : index
      %15 = vector.load %arg12[%c0_7, %c0_8] : memref<128x1xf32, #tpu.memory_space<vmem>>, vector<128x1xf32>
      tpu.vector_store %arg12[%c0_7, %c0_8], %14 {strides = array<i32>} : memref<128x1xf32, #tpu.memory_space<vmem>>, vector<128x1xf32>,
      %cst_9 = arith.constant 0.000000e+00 : f32
      %16 = vector.broadcast %cst_9 : f32 to vector<128x128xf32>
      %c0_10 = arith.constant 0 : index
      %c0_11 = arith.constant 0 : index
      %17 = vector.load %arg13[%c0_10, %c0_11] : memref<128x128xf32, #tpu.memory_space<vmem>>, vector<128x128xf32>
      tpu.vector_store %arg13[%c0_10, %c0_11], %16 {strides = array<i32>} : memref<128x128xf32, #tpu.memory_space<vmem>>, vector<128x128xf32>,
      %c0_12 = arith.constant 0 : index
      %c0_13 = arith.constant 0 : index
      %18 = vector.load %arg4[%c0_12, %c0_13] : memref<128x128xbf16, #tpu.memory_space<vmem>>, vector<128x128xbf16>
      %c0_14 = arith.constant 0 : index
      %c0_15 = arith.constant 0 : index
      %19 = vector.load %arg5[%c0_14, %c0_15] : memref<128x256xbf16, #tpu.memory_space<vmem>>, vector<128x256xbf16>
      %cst_16 = arith.constant dense<0.000000e+00> : vector<128x256xf32>
      %20 = tpu.matmul %18, %19, %cst_16 {dimension_numbers = #tpu.dot_dimension_numbers<[1], [0], [0], [1], [0, 0, 1, 1], [], []>} : vector<128x128xbf16>, vector<128x256xbf16>, vector<128x256xf32> -> vector<128x256xf32>
      %c0_17 = arith.constant 0 : index
      %c0_18 = arith.constant 0 : index
      %21 = vector.load %arg6[%c0_17, %c0_18] : memref<1x256xf32, #tpu.memory_space<vmem>>, vector<1x256xf32>
      %22 = vector.broadcast %21 : vector<1x256xf32> to vector<128x256xf32>
      %23 = arith.addf %20, %22 : vector<128x256xf32>
      %c0_19 = arith.constant 0 : index
      %c0_20 = arith.constant 0 : index
      %24 = vector.load %arg14[%c0_19, %c0_20] : memref<128x256xf32, #tpu.memory_space<vmem>>, vector<128x256xf32>
      tpu.vector_store %arg14[%c0_19, %c0_20], %23 {strides = array<i32>} : memref<128x256xf32, #tpu.memory_space<vmem>>, vector<128x256xf32>,
    } else {
    }
    %3 = arith.index_cast %arg0 : i32 to index
    %4 = arith.index_cast %arg1 : i32 to index
    %5 = memref.load %arg2[%3, %4] : memref<1x1xi32, #tpu.memory_space<smem>>
    %c0_i32_1 = arith.constant 0 : i32
    %6 = arith.cmpi sgt, %5, %c0_i32_1 : i32
    %7 = arith.extui %6 : i1 to i32
    %c0_i32_2 = arith.constant 0 : i32
    %8 = arith.cmpi ne, %7, %c0_i32_2 : i32
    scf.if %8 {
      %c0 = arith.constant 0 : index
      %c0_5 = arith.constant 0 : index
      %12 = vector.load %arg14[%c0, %c0_5] : memref<128x256xf32, #tpu.memory_space<vmem>>, vector<128x128xf32>
      %13 = arith.truncf %12 : vector<128x128xf32> to vector<128x128xbf16>
      %c0_6 = arith.constant 0 : index
      %c0_7 = arith.constant 0 : index
      %14 = vector.load %arg7[%c0_6, %c0_7] : memref<128x256xbf16, #tpu.memory_space<vmem>>, vector<128x128xbf16>
      %c0_8 = arith.constant 0 : index
      %c128 = arith.constant 128 : index
      %15 = vector.load %arg7[%c0_8, %c128] : memref<128x256xbf16, #tpu.memory_space<vmem>>, vector<128x128xbf16>
      %cst = arith.constant dense<0.000000e+00> : vector<128x128xf32>
      %16 = tpu.matmul %13, %14, %cst {dimension_numbers = #tpu.dot_dimension_numbers<[1], [1], [0], [0], [0, 0, 1, 0], [], []>} : vector<128x128xbf16>, vector<128x128xbf16>, vector<128x128xf32> -> vector<128x128xf32>
      %cst_9 = arith.constant 0.0883883461 : f32
      %17 = vector.broadcast %cst_9 : f32 to vector<128x128xf32>
      %18 = arith.mulf %16, %17 : vector<128x128xf32>
      %c0_10 = arith.constant 0 : index
      %c0_11 = arith.constant 0 : index
      %19 = vector.load %arg8[%c0_10, %c0_11] : memref<128x128xi8, #tpu.memory_space<vmem>>, vector<128x128xi8>
      %c0_i8 = arith.constant 0 : i8
      %20 = vector.broadcast %c0_i8 : i8 to vector<128x128xi8>
      %21 = arith.cmpi ne, %19, %20 : vector<128x128xi8>
      %cst_12 = arith.constant -1.000000e+30 : f32
      %22 = vector.broadcast %cst_12 : f32 to vector<128x128xf32>
      %23 = arith.select %21, %18, %22 : vector<128x128xi1>, vector<128x128xf32>
      %c0_13 = arith.constant 0 : index
      %c0_14 = arith.constant 0 : index
      %24 = vector.load %arg11[%c0_13, %c0_14] : memref<128x1xf32, #tpu.memory_space<vmem>>, vector<128x1xf32>
      %cst_15 = arith.constant dense<0xFF800000> : vector<128xf32>
      %25 = vector.multi_reduction <maximumf>, %23, %cst_15 [1] : vector<128x128xf32> to vector<128xf32>
      %26 = vector.shape_cast %25 : vector<128xf32> to vector<128x1xf32>
      %27 = arith.maximumf %24, %26 : vector<128x1xf32>
      %28 = arith.subf %24, %27 : vector<128x1xf32>
      %29 = math.exp %28 : vector<128x1xf32>
      %30 = vector.broadcast %27 : vector<128x1xf32> to vector<128x128xf32>
      %31 = arith.subf %23, %30 : vector<128x128xf32>
      %32 = math.exp %31 : vector<128x128xf32>
      %cst_16 = arith.constant 0.000000e+00 : f32
      %33 = vector.broadcast %cst_16 : f32 to vector<128x128xf32>
      %34 = arith.select %21, %32, %33 : vector<128x128xi1>, vector<128x128xf32>
      %c0_17 = arith.constant 0 : index
      %c0_18 = arith.constant 0 : index
      %35 = vector.load %arg12[%c0_17, %c0_18] : memref<128x1xf32, #tpu.memory_space<vmem>>, vector<128x1xf32>
      %36 = arith.mulf %29, %35 : vector<128x1xf32>
      %cst_19 = arith.constant dense<0.000000e+00> : vector<128xf32>
      %37 = vector.multi_reduction <add>, %34, %cst_19 [1] : vector<128x128xf32> to vector<128xf32>
      %38 = vector.shape_cast %37 : vector<128xf32> to vector<128x1xf32>
      %39 = arith.addf %36, %38 : vector<128x1xf32>
      %c0_20 = arith.constant 0 : index
      %c0_21 = arith.constant 0 : index
      %40 = vector.load %arg12[%c0_20, %c0_21] : memref<128x1xf32, #tpu.memory_space<vmem>>, vector<128x1xf32>
      tpu.vector_store %arg12[%c0_20, %c0_21], %39 {strides = array<i32>} : memref<128x1xf32, #tpu.memory_space<vmem>>, vector<128x1xf32>,
      %c0_22 = arith.constant 0 : index
      %c0_23 = arith.constant 0 : index
      %41 = vector.load %arg13[%c0_22, %c0_23] : memref<128x128xf32, #tpu.memory_space<vmem>>, vector<128x128xf32>
      %42 = vector.broadcast %29 : vector<128x1xf32> to vector<128x128xf32>
      %43 = arith.mulf %42, %41 : vector<128x128xf32>
      %44 = arith.truncf %34 : vector<128x128xf32> to vector<128x128xbf16>
      %cst_24 = arith.constant dense<0.000000e+00> : vector<128x128xf32>
      %45 = tpu.matmul %44, %15, %cst_24 {dimension_numbers = #tpu.dot_dimension_numbers<[1], [0], [0], [1], [0, 0, 1, 1], [], []>} : vector<128x128xbf16>, vector<128x128xbf16>, vector<128x128xf32> -> vector<128x128xf32>
      %46 = arith.addf %43, %45 : vector<128x128xf32>
      %c0_25 = arith.constant 0 : index
      %c0_26 = arith.constant 0 : index
      %47 = vector.load %arg13[%c0_25, %c0_26] : memref<128x128xf32, #tpu.memory_space<vmem>>, vector<128x128xf32>
      tpu.vector_store %arg13[%c0_25, %c0_26], %46 {strides = array<i32>} : memref<128x128xf32, #tpu.memory_space<vmem>>, vector<128x128xf32>,
      %c0_27 = arith.constant 0 : index
      %c0_28 = arith.constant 0 : index
      %48 = vector.load %arg11[%c0_27, %c0_28] : memref<128x1xf32, #tpu.memory_space<vmem>>, vector<128x1xf32>
      tpu.vector_store %arg11[%c0_27, %c0_28], %27 {strides = array<i32>} : memref<128x1xf32, #tpu.memory_space<vmem>>, vector<128x1xf32>,
    } else {
    }
    %c0_i32_3 = arith.constant 0 : i32
    %9 = arith.cmpi eq, %arg1, %c0_i32_3 : i32
    %10 = arith.extui %9 : i1 to i32
    %c0_i32_4 = arith.constant 0 : i32
    %11 = arith.cmpi ne, %10, %c0_i32_4 : i32
    scf.if %11 {
      %c0 = arith.constant 0 : index
      %c128 = arith.constant 128 : index
      %12 = vector.load %arg14[%c0, %c128] : memref<128x256xf32, #tpu.memory_space<vmem>>, vector<128x128xf32>
      %c0_5 = arith.constant 0 : index
      %c0_6 = arith.constant 0 : index
      %13 = vector.load %arg12[%c0_5, %c0_6] : memref<128x1xf32, #tpu.memory_space<vmem>>, vector<128x1xf32>
      %cst = arith.constant 0.000000e+00 : f32
      %14 = vector.broadcast %cst : f32 to vector<128x1xf32>
      %15 = arith.cmpf oeq, %13, %14 : vector<128x1xf32>
      %cst_7 = arith.constant 1.000000e+00 : f32
      %16 = vector.broadcast %cst_7 : f32 to vector<128x1xf32>
      %17 = arith.select %15, %16, %13 : vector<128x1xi1>, vector<128x1xf32>
      %c0_8 = arith.constant 0 : index
      %c0_9 = arith.constant 0 : index
      %18 = vector.load %arg13[%c0_8, %c0_9] : memref<128x128xf32, #tpu.memory_space<vmem>>, vector<128x128xf32>
      %19 = tpu.reciprocal %17 {approx = true} : vector<128x1xf32> -> vector<128x1xf32>
      %20 = vector.broadcast %19 : vector<128x1xf32> to vector<128x128xf32>
      %21 = arith.mulf %18, %20 : vector<128x128xf32>
      %22 = arith.addf %21, %12 : vector<128x128xf32>
      %cst_10 = arith.constant 0.000000e+00 : f32
      %23 = vector.broadcast %cst_10 : f32 to vector<128x128xf32>
      %24 = arith.maximumf %22, %23 : vector<128x128xf32>
      %c0_11 = arith.constant 0 : index
      %c0_12 = arith.constant 0 : index
      %25 = vector.load %arg9[%c0_11, %c0_12] : memref<128x128xbf16, #tpu.memory_space<vmem>>, vector<128x128xbf16>
      %26 = arith.extf %25 : vector<128x128xbf16> to vector<128x128xf32>
      %27 = arith.addf %24, %26 : vector<128x128xf32>
      %28 = arith.truncf %27 : vector<128x128xf32> to vector<128x128xbf16>
      %c0_13 = arith.constant 0 : index
      %c0_14 = arith.constant 0 : index
      %29 = vector.load %arg10[%c0_13, %c0_14] : memref<128x128xbf16, #tpu.memory_space<vmem>>, vector<128x128xbf16>
      tpu.vector_store %arg10[%c0_13, %c0_14], %28 {strides = array<i32>} : memref<128x128xbf16, #tpu.memory_space<vmem>>, vector<128x128xbf16>,
    } else {
    }
    return
  }
  func.func @transform_0(%arg0: i32, %arg1: i32, %arg2: memref<1x1xi32, #tpu.memory_space<smem>>, %arg3: memref<1x1xi32, #tpu.memory_space<smem>>) -> (i32, i32) {
    %c0_i32 = arith.constant 0 : i32
    %c0_i32_0 = arith.constant 0 : i32
    return %arg0, %c0_i32 : i32, i32
  }
  func.func @transform_1(%arg0: i32, %arg1: i32, %arg2: memref<1x1xi32, #tpu.memory_space<smem>>, %arg3: memref<1x1xi32, #tpu.memory_space<smem>>) -> (i32, i32) {
    %c0_i32 = arith.constant 0 : i32
    %c0_i32_0 = arith.constant 0 : i32
    %c0_i32_1 = arith.constant 0 : i32
    return %c0_i32, %c0_i32_0 : i32, i32
  }
  func.func @transform_2(%arg0: i32, %arg1: i32, %arg2: memref<1x1xi32, #tpu.memory_space<smem>>, %arg3: memref<1x1xi32, #tpu.memory_space<smem>>) -> (i32, i32) {
    %c0_i32 = arith.constant 0 : i32
    %c0_i32_0 = arith.constant 0 : i32
    %c0_i32_1 = arith.constant 0 : i32
    return %c0_i32, %c0_i32_0 : i32, i32
  }
  func.func @transform_3(%arg0: i32, %arg1: i32, %arg2: memref<1x1xi32, #tpu.memory_space<smem>>, %arg3: memref<1x1xi32, #tpu.memory_space<smem>>) -> (i32, i32) {
    %0 = arith.index_cast %arg0 : i32 to index
    %1 = arith.index_cast %arg1 : i32 to index
    %2 = memref.load %arg3[%0, %1] : memref<1x1xi32, #tpu.memory_space<smem>>
    %c0_i32 = arith.constant 0 : i32
    %c0_i32_0 = arith.constant 0 : i32
    return %2, %c0_i32 : i32, i32
  }
  func.func @transform_4(%arg0: i32, %arg1: i32, %arg2: memref<1x1xi32, #tpu.memory_space<smem>>, %arg3: memref<1x1xi32, #tpu.memory_space<smem>>) -> (i32, i32) {
    %0 = arith.index_cast %arg0 : i32 to index
    %1 = arith.index_cast %arg1 : i32 to index
    %2 = memref.load %arg3[%0, %1] : memref<1x1xi32, #tpu.memory_space<smem>>
    %c0_i32 = arith.constant 0 : i32
    return %arg0, %2 : i32, i32
  }
  func.func @transform_5(%arg0: i32, %arg1: i32, %arg2: memref<1x1xi32, #tpu.memory_space<smem>>, %arg3: memref<1x1xi32, #tpu.memory_space<smem>>) -> (i32, i32) {
    %c0_i32 = arith.constant 0 : i32
    %c0_i32_0 = arith.constant 0 : i32
    return %arg0, %c0_i32 : i32, i32
  }
  func.func @transform_6(%arg0: i32, %arg1: i32, %arg2: memref<1x1xi32, #tpu.memory_space<smem>>, %arg3: memref<1x1xi32, #tpu.memory_space<smem>>) -> (i32, i32) {
    %c0_i32 = arith.constant 0 : i32
    %c0_i32_0 = arith.constant 0 : i32
    return %arg0, %c0_i32 : i32, i32
  }
}

module attributes {stable_mosaic.version = 11 : i64} {
  func.func @flash_gnn_attention_kernel(%arg0: i32, %arg1: i32, %arg2: memref<1x1xi32, #tpu.memory_space<smem>>, %arg3: memref<1x1xi32, #tpu.memory_space<smem>>, %arg4: memref<128x8xf32, #tpu.memory_space<vmem>>, %arg5: memref<8x256xbf16, #tpu.memory_space<vmem>>, %arg6: memref<1x256xf32, #tpu.memory_space<vmem>>, %arg7: memref<128x256xbf16, #tpu.memory_space<vmem>>, %arg8: memref<128x128xi8, #tpu.memory_space<vmem>>, %arg9: memref<128x128xbf16, #tpu.memory_space<vmem>>, %arg10: memref<128x128xbf16, #tpu.memory_space<vmem>>, %arg11: memref<128x1xf32, #tpu.memory_space<vmem>>, %arg12: memref<128x1xf32, #tpu.memory_space<vmem>>, %arg13: memref<128x128xf32, #tpu.memory_space<vmem>>, %arg14: memref<128x256xf32, #tpu.memory_space<vmem>>) attributes {dimension_semantics = [#tpu.dimension_semantics<parallel>, #tpu.dimension_semantics<arbitrary>], iteration_bounds = array<i64: 1, 1>, scalar_prefetch = 2 : i64, scratch_operands = 4 : i64, tpu.core_type = #tpu.core_type<tc>, window_params = [{transform_indices = @transform_0, window_bounds = array<i64: 128, 8>}, {pipeline_mode = #tpu.pipeline_mode<synchronous>, transform_indices = @transform_1, window_bounds = array<i64: 8, 256>}, {pipeline_mode = #tpu.pipeline_mode<synchronous>, transform_indices = @transform_2, window_bounds = array<i64: 1, 256>}, {transform_indices = @transform_3, window_bounds = array<i64: 128, 256>}, {transform_indices = @transform_4, window_bounds = array<i64: 128, 128>}, {transform_indices = @transform_5, window_bounds = array<i64: 128, 128>}, {transform_indices = @transform_6, window_bounds = array<i64: 128, 128>}]} {
    %c0_i32 = arith.constant 0 : i32
    %0 = arith.cmpi eq, %arg1, %c0_i32 : i32
    %1 = arith.extui %0 : i1 to i32
    %c0_i32_0 = arith.constant 0 : i32
    %2 = arith.cmpi ne, %1, %c0_i32_0 : i32
    scf.if %2 {
      %cst = arith.constant -1.000000e+30 : f32
      %12 = vector.broadcast %cst : f32 to vector<128x1xf32>
      %c0 = arith.constant 0 : index
      %c0_5 = arith.constant 0 : index
      %13 = vector.load %arg11[%c0, %c0_5] : memref<128x1xf32, #tpu.memory_space<vmem>>, vector<128x1xf32>
      tpu.vector_store %arg11[%c0, %c0_5], %12 {strides = array<i32>} : memref<128x1xf32, #tpu.memory_space<vmem>>, vector<128x1xf32>,
      %cst_6 = arith.constant 0.000000e+00 : f32
      %14 = vector.broadcast %cst_6 : f32 to vector<128x1xf32>
      %c0_7 = arith.constant 0 : index
      %c0_8 = arith.constant 0 : index
      %15 = vector.load %arg12[%c0_7, %c0_8] : memref<128x1xf32, #tpu.memory_space<vmem>>, vector<128x1xf32>
      tpu.vector_store %arg12[%c0_7, %c0_8], %14 {strides = array<i32>} : memref<128x1xf32, #tpu.memory_space<vmem>>, vector<128x1xf32>,
      %cst_9 = arith.constant 0.000000e+00 : f32
      %16 = vector.broadcast %cst_9 : f32 to vector<128x128xf32>
      %c0_10 = arith.constant 0 : index
      %c0_11 = arith.constant 0 : index
      %17 = vector.load %arg13[%c0_10, %c0_11] : memref<128x128xf32, #tpu.memory_space<vmem>>, vector<128x128xf32>
      tpu.vector_store %arg13[%c0_10, %c0_11], %16 {strides = array<i32>} : memref<128x128xf32, #tpu.memory_space<vmem>>, vector<128x128xf32>,
      %c0_12 = arith.constant 0 : index
      %c0_13 = arith.constant 0 : index
      %18 = vector.load %arg4[%c0_12, %c0_13] : memref<128x8xf32, #tpu.memory_space<vmem>>, vector<128x8xf32>
      %19 = arith.truncf %18 : vector<128x8xf32> to vector<128x8xbf16>
      %c0_14 = arith.constant 0 : index
      %c0_15 = arith.constant 0 : index
      %20 = vector.load %arg5[%c0_14, %c0_15] : memref<8x256xbf16, #tpu.memory_space<vmem>>, vector<8x256xbf16>
      %cst_16 = arith.constant dense<0.000000e+00> : vector<128x256xf32>
      %21 = tpu.matmul %19, %20, %cst_16 {dimension_numbers = #tpu.dot_dimension_numbers<[1], [0], [0], [1], [0, 0, 1, 1], [], []>} : vector<128x8xbf16>, vector<8x256xbf16>, vector<128x256xf32> -> vector<128x256xf32>
      %c0_17 = arith.constant 0 : index
      %c0_18 = arith.constant 0 : index
      %22 = vector.load %arg6[%c0_17, %c0_18] : memref<1x256xf32, #tpu.memory_space<vmem>>, vector<1x256xf32>
      %23 = vector.broadcast %22 : vector<1x256xf32> to vector<128x256xf32>
      %24 = arith.addf %21, %23 : vector<128x256xf32>
      %c0_19 = arith.constant 0 : index
      %c0_20 = arith.constant 0 : index
      %25 = vector.load %arg14[%c0_19, %c0_20] : memref<128x256xf32, #tpu.memory_space<vmem>>, vector<128x256xf32>
      tpu.vector_store %arg14[%c0_19, %c0_20], %24 {strides = array<i32>} : memref<128x256xf32, #tpu.memory_space<vmem>>, vector<128x256xf32>,
    } else {
    }
    %3 = arith.index_cast %arg0 : i32 to index
    %4 = arith.index_cast %arg1 : i32 to index
    %5 = memref.load %arg2[%3, %4] : memref<1x1xi32, #tpu.memory_space<smem>>
    %c0_i32_1 = arith.constant 0 : i32
    %6 = arith.cmpi sgt, %5, %c0_i32_1 : i32
    %7 = arith.extui %6 : i1 to i32
    %c0_i32_2 = arith.constant 0 : i32
    %8 = arith.cmpi ne, %7, %c0_i32_2 : i32
    scf.if %8 {
      %c0 = arith.constant 0 : index
      %c0_5 = arith.constant 0 : index
      %12 = vector.load %arg14[%c0, %c0_5] : memref<128x256xf32, #tpu.memory_space<vmem>>, vector<128x128xf32>
      %13 = arith.truncf %12 : vector<128x128xf32> to vector<128x128xbf16>
      %c0_6 = arith.constant 0 : index
      %c0_7 = arith.constant 0 : index
      %14 = vector.load %arg7[%c0_6, %c0_7] : memref<128x256xbf16, #tpu.memory_space<vmem>>, vector<128x128xbf16>
      %c0_8 = arith.constant 0 : index
      %c128 = arith.constant 128 : index
      %15 = vector.load %arg7[%c0_8, %c128] : memref<128x256xbf16, #tpu.memory_space<vmem>>, vector<128x128xbf16>
      %cst = arith.constant dense<0.000000e+00> : vector<128x128xf32>
      %16 = tpu.matmul %13, %14, %cst {dimension_numbers = #tpu.dot_dimension_numbers<[1], [1], [0], [0], [0, 0, 1, 0], [], []>} : vector<128x128xbf16>, vector<128x128xbf16>, vector<128x128xf32> -> vector<128x128xf32>
      %cst_9 = arith.constant 0.0883883461 : f32
      %17 = vector.broadcast %cst_9 : f32 to vector<128x128xf32>
      %18 = arith.mulf %16, %17 : vector<128x128xf32>
      %c0_10 = arith.constant 0 : index
      %c0_11 = arith.constant 0 : index
      %19 = vector.load %arg8[%c0_10, %c0_11] : memref<128x128xi8, #tpu.memory_space<vmem>>, vector<128x128xi8>
      %c0_i8 = arith.constant 0 : i8
      %20 = vector.broadcast %c0_i8 : i8 to vector<128x128xi8>
      %21 = arith.cmpi ne, %19, %20 : vector<128x128xi8>
      %cst_12 = arith.constant -1.000000e+30 : f32
      %22 = vector.broadcast %cst_12 : f32 to vector<128x128xf32>
      %23 = arith.select %21, %18, %22 : vector<128x128xi1>, vector<128x128xf32>
      %c0_13 = arith.constant 0 : index
      %c0_14 = arith.constant 0 : index
      %24 = vector.load %arg11[%c0_13, %c0_14] : memref<128x1xf32, #tpu.memory_space<vmem>>, vector<128x1xf32>
      %cst_15 = arith.constant dense<0xFF800000> : vector<128xf32>
      %25 = vector.multi_reduction <maximumf>, %23, %cst_15 [1] : vector<128x128xf32> to vector<128xf32>
      %26 = vector.shape_cast %25 : vector<128xf32> to vector<128x1xf32>
      %27 = arith.maximumf %24, %26 : vector<128x1xf32>
      %28 = arith.subf %24, %27 : vector<128x1xf32>
      %29 = math.exp %28 : vector<128x1xf32>
      %30 = vector.broadcast %27 : vector<128x1xf32> to vector<128x128xf32>
      %31 = arith.subf %23, %30 : vector<128x128xf32>
      %32 = math.exp %31 : vector<128x128xf32>
      %cst_16 = arith.constant 0.000000e+00 : f32
      %33 = vector.broadcast %cst_16 : f32 to vector<128x128xf32>
      %34 = arith.select %21, %32, %33 : vector<128x128xi1>, vector<128x128xf32>
      %c0_17 = arith.constant 0 : index
      %c0_18 = arith.constant 0 : index
      %35 = vector.load %arg12[%c0_17, %c0_18] : memref<128x1xf32, #tpu.memory_space<vmem>>, vector<128x1xf32>
      %36 = arith.mulf %29, %35 : vector<128x1xf32>
      %cst_19 = arith.constant dense<0.000000e+00> : vector<128xf32>
      %37 = vector.multi_reduction <add>, %34, %cst_19 [1] : vector<128x128xf32> to vector<128xf32>
      %38 = vector.shape_cast %37 : vector<128xf32> to vector<128x1xf32>
      %39 = arith.addf %36, %38 : vector<128x1xf32>
      %c0_20 = arith.constant 0 : index
      %c0_21 = arith.constant 0 : index
      %40 = vector.load %arg12[%c0_20, %c0_21] : memref<128x1xf32, #tpu.memory_space<vmem>>, vector<128x1xf32>
      tpu.vector_store %arg12[%c0_20, %c0_21], %39 {strides = array<i32>} : memref<128x1xf32, #tpu.memory_space<vmem>>, vector<128x1xf32>,
      %c0_22 = arith.constant 0 : index
      %c0_23 = arith.constant 0 : index
      %41 = vector.load %arg13[%c0_22, %c0_23] : memref<128x128xf32, #tpu.memory_space<vmem>>, vector<128x128xf32>
      %42 = vector.broadcast %29 : vector<128x1xf32> to vector<128x128xf32>
      %43 = arith.mulf %42, %41 : vector<128x128xf32>
      %44 = arith.truncf %34 : vector<128x128xf32> to vector<128x128xbf16>
      %cst_24 = arith.constant dense<0.000000e+00> : vector<128x128xf32>
      %45 = tpu.matmul %44, %15, %cst_24 {dimension_numbers = #tpu.dot_dimension_numbers<[1], [0], [0], [1], [0, 0, 1, 1], [], []>} : vector<128x128xbf16>, vector<128x128xbf16>, vector<128x128xf32> -> vector<128x128xf32>
      %46 = arith.addf %43, %45 : vector<128x128xf32>
      %c0_25 = arith.constant 0 : index
      %c0_26 = arith.constant 0 : index
      %47 = vector.load %arg13[%c0_25, %c0_26] : memref<128x128xf32, #tpu.memory_space<vmem>>, vector<128x128xf32>
      tpu.vector_store %arg13[%c0_25, %c0_26], %46 {strides = array<i32>} : memref<128x128xf32, #tpu.memory_space<vmem>>, vector<128x128xf32>,
      %c0_27 = arith.constant 0 : index
      %c0_28 = arith.constant 0 : index
      %48 = vector.load %arg11[%c0_27, %c0_28] : memref<128x1xf32, #tpu.memory_space<vmem>>, vector<128x1xf32>
      tpu.vector_store %arg11[%c0_27, %c0_28], %27 {strides = array<i32>} : memref<128x1xf32, #tpu.memory_space<vmem>>, vector<128x1xf32>,
    } else {
    }
    %c0_i32_3 = arith.constant 0 : i32
    %9 = arith.cmpi eq, %arg1, %c0_i32_3 : i32
    %10 = arith.extui %9 : i1 to i32
    %c0_i32_4 = arith.constant 0 : i32
    %11 = arith.cmpi ne, %10, %c0_i32_4 : i32
    scf.if %11 {
      %c0 = arith.constant 0 : index
      %c128 = arith.constant 128 : index
      %12 = vector.load %arg14[%c0, %c128] : memref<128x256xf32, #tpu.memory_space<vmem>>, vector<128x128xf32>
      %c0_5 = arith.constant 0 : index
      %c0_6 = arith.constant 0 : index
      %13 = vector.load %arg12[%c0_5, %c0_6] : memref<128x1xf32, #tpu.memory_space<vmem>>, vector<128x1xf32>
      %cst = arith.constant 0.000000e+00 : f32
      %14 = vector.broadcast %cst : f32 to vector<128x1xf32>
      %15 = arith.cmpf oeq, %13, %14 : vector<128x1xf32>
      %cst_7 = arith.constant 1.000000e+00 : f32
      %16 = vector.broadcast %cst_7 : f32 to vector<128x1xf32>
      %17 = arith.select %15, %16, %13 : vector<128x1xi1>, vector<128x1xf32>
      %c0_8 = arith.constant 0 : index
      %c0_9 = arith.constant 0 : index
      %18 = vector.load %arg13[%c0_8, %c0_9] : memref<128x128xf32, #tpu.memory_space<vmem>>, vector<128x128xf32>
      %19 = tpu.reciprocal %17 {approx = true} : vector<128x1xf32> -> vector<128x1xf32>
      %20 = vector.broadcast %19 : vector<128x1xf32> to vector<128x128xf32>
      %21 = arith.mulf %18, %20 : vector<128x128xf32>
      %22 = arith.addf %21, %12 : vector<128x128xf32>
      %cst_10 = arith.constant 0.000000e+00 : f32
      %23 = vector.broadcast %cst_10 : f32 to vector<128x128xf32>
      %24 = arith.maximumf %22, %23 : vector<128x128xf32>
      %c0_11 = arith.constant 0 : index
      %c0_12 = arith.constant 0 : index
      %25 = vector.load %arg9[%c0_11, %c0_12] : memref<128x128xbf16, #tpu.memory_space<vmem>>, vector<128x128xbf16>
      %26 = arith.extf %25 : vector<128x128xbf16> to vector<128x128xf32>
      %27 = arith.addf %24, %26 : vector<128x128xf32>
      %28 = arith.truncf %27 : vector<128x128xf32> to vector<128x128xbf16>
      %c0_13 = arith.constant 0 : index
      %c0_14 = arith.constant 0 : index
      %29 = vector.load %arg10[%c0_13, %c0_14] : memref<128x128xbf16, #tpu.memory_space<vmem>>, vector<128x128xbf16>
      tpu.vector_store %arg10[%c0_13, %c0_14], %28 {strides = array<i32>} : memref<128x128xbf16, #tpu.memory_space<vmem>>, vector<128x128xbf16>,
    } else {
    }
    return
  }
  func.func @transform_0(%arg0: i32, %arg1: i32, %arg2: memref<1x1xi32, #tpu.memory_space<smem>>, %arg3: memref<1x1xi32, #tpu.memory_space<smem>>) -> (i32, i32) {
    %c0_i32 = arith.constant 0 : i32
    %c0_i32_0 = arith.constant 0 : i32
    return %arg0, %c0_i32 : i32, i32
  }
  func.func @transform_1(%arg0: i32, %arg1: i32, %arg2: memref<1x1xi32, #tpu.memory_space<smem>>, %arg3: memref<1x1xi32, #tpu.memory_space<smem>>) -> (i32, i32) {
    %c0_i32 = arith.constant 0 : i32
    %c0_i32_0 = arith.constant 0 : i32
    %c0_i32_1 = arith.constant 0 : i32
    return %c0_i32, %c0_i32_0 : i32, i32
  }
  func.func @transform_2(%arg0: i32, %arg1: i32, %arg2: memref<1x1xi32, #tpu.memory_space<smem>>, %arg3: memref<1x1xi32, #tpu.memory_space<smem>>) -> (i32, i32) {
    %c0_i32 = arith.constant 0 : i32
    %c0_i32_0 = arith.constant 0 : i32
    %c0_i32_1 = arith.constant 0 : i32
    return %c0_i32, %c0_i32_0 : i32, i32
  }
  func.func @transform_3(%arg0: i32, %arg1: i32, %arg2: memref<1x1xi32, #tpu.memory_space<smem>>, %arg3: memref<1x1xi32, #tpu.memory_space<smem>>) -> (i32, i32) {
    %0 = arith.index_cast %arg0 : i32 to index
    %1 = arith.index_cast %arg1 : i32 to index
    %2 = memref.load %arg3[%0, %1] : memref<1x1xi32, #tpu.memory_space<smem>>
    %c0_i32 = arith.constant 0 : i32
    %c0_i32_0 = arith.constant 0 : i32
    return %2, %c0_i32 : i32, i32
  }
  func.func @transform_4(%arg0: i32, %arg1: i32, %arg2: memref<1x1xi32, #tpu.memory_space<smem>>, %arg3: memref<1x1xi32, #tpu.memory_space<smem>>) -> (i32, i32) {
    %0 = arith.index_cast %arg0 : i32 to index
    %1 = arith.index_cast %arg1 : i32 to index
    %2 = memref.load %arg3[%0, %1] : memref<1x1xi32, #tpu.memory_space<smem>>
    %c0_i32 = arith.constant 0 : i32
    return %arg0, %2 : i32, i32
  }
  func.func @transform_5(%arg0: i32, %arg1: i32, %arg2: memref<1x1xi32, #tpu.memory_space<smem>>, %arg3: memref<1x1xi32, #tpu.memory_space<smem>>) -> (i32, i32) {
    %c0_i32 = arith.constant 0 : i32
    %c0_i32_0 = arith.constant 0 : i32
    return %arg0, %c0_i32 : i32, i32
  }
  func.func @transform_6(%arg0: i32, %arg1: i32, %arg2: memref<1x1xi32, #tpu.memory_space<smem>>, %arg3: memref<1x1xi32, #tpu.memory_space<smem>>) -> (i32, i32) {
    %c0_i32 = arith.constant 0 : i32
    %c0_i32_0 = arith.constant 0 : i32
    return %arg0, %c0_i32 : i32, i32
  }
}

module attributes {stable_mosaic.version = 11 : i64} {
  func.func @fusion_output_kernel(%arg0: i32, %arg1: memref<128x128xbf16, #tpu.memory_space<vmem>>, %arg2: memref<128x128xf32, #tpu.memory_space<vmem>>, %arg3: memref<128x128xbf16, #tpu.memory_space<vmem>>, %arg4: memref<1x128xf32, #tpu.memory_space<vmem>>, %arg5: memref<1x128xf32, #tpu.memory_space<vmem>>, %arg6: memref<1x128xf32, #tpu.memory_space<vmem>>, %arg7: memref<128x128xbf16, #tpu.memory_space<vmem>>, %arg8: memref<128x128xbf16, #tpu.memory_space<vmem>>, %arg9: memref<1x128xf32, #tpu.memory_space<vmem>>, %arg10: memref<1x128xf32, #tpu.memory_space<vmem>>, %arg11: memref<1x128xf32, #tpu.memory_space<vmem>>, %arg12: memref<128x128xbf16, #tpu.memory_space<vmem>>, %arg13: memref<1x128xf32, #tpu.memory_space<vmem>>, %arg14: memref<128x128xf32, #tpu.memory_space<vmem>>) attributes {dimension_semantics = [#tpu.dimension_semantics<parallel>], iteration_bounds = array<i64: 1>, scalar_prefetch = 0 : i64, scratch_operands = 0 : i64, tpu.core_type = #tpu.core_type<tc>, window_params = [{transform_indices = @transform_0, window_bounds = array<i64: 128, 128>}, {transform_indices = @transform_1, window_bounds = array<i64: 128, 128>}, {pipeline_mode = #tpu.pipeline_mode<synchronous>, transform_indices = @transform_2, window_bounds = array<i64: 128, 128>}, {pipeline_mode = #tpu.pipeline_mode<synchronous>, transform_indices = @transform_3, window_bounds = array<i64: 1, 128>}, {pipeline_mode = #tpu.pipeline_mode<synchronous>, transform_indices = @transform_4, window_bounds = array<i64: 1, 128>}, {pipeline_mode = #tpu.pipeline_mode<synchronous>, transform_indices = @transform_5, window_bounds = array<i64: 1, 128>}, {pipeline_mode = #tpu.pipeline_mode<synchronous>, transform_indices = @transform_6, window_bounds = array<i64: 128, 128>}, {pipeline_mode = #tpu.pipeline_mode<synchronous>, transform_indices = @transform_7, window_bounds = array<i64: 128, 128>}, {pipeline_mode = #tpu.pipeline_mode<synchronous>, transform_indices = @transform_8, window_bounds = array<i64: 1, 128>}, {pipeline_mode = #tpu.pipeline_mode<synchronous>, transform_indices = @transform_9, window_bounds = array<i64: 1, 128>}, {pipeline_mode = #tpu.pipeline_mode<synchronous>, transform_indices = @transform_10, window_bounds = array<i64: 1, 128>}, {pipeline_mode = #tpu.pipeline_mode<synchronous>, transform_indices = @transform_11, window_bounds = array<i64: 128, 128>}, {pipeline_mode = #tpu.pipeline_mode<synchronous>, transform_indices = @transform_12, window_bounds = array<i64: 1, 128>}, {transform_indices = @transform_13, window_bounds = array<i64: 128, 128>}]} {
    %c0 = arith.constant 0 : index
    %c0_0 = arith.constant 0 : index
    %0 = vector.load %arg2[%c0, %c0_0] : memref<128x128xf32, #tpu.memory_space<vmem>>, vector<128x128xf32>
    %1 = arith.truncf %0 : vector<128x128xf32> to vector<128x128xbf16>
    %c0_1 = arith.constant 0 : index
    %c0_2 = arith.constant 0 : index
    %2 = vector.load %arg3[%c0_1, %c0_2] : memref<128x128xbf16, #tpu.memory_space<vmem>>, vector<128x128xbf16>
    %cst = arith.constant dense<0.000000e+00> : vector<128x128xf32>
    %3 = tpu.matmul %1, %2, %cst {dimension_numbers = #tpu.dot_dimension_numbers<[1], [0], [0], [1], [0, 0, 1, 1], [], []>} : vector<128x128xbf16>, vector<128x128xbf16>, vector<128x128xf32> -> vector<128x128xf32>
    %c0_3 = arith.constant 0 : index
    %c0_4 = arith.constant 0 : index
    %4 = vector.load %arg4[%c0_3, %c0_4] : memref<1x128xf32, #tpu.memory_space<vmem>>, vector<1x128xf32>
    %5 = vector.broadcast %4 : vector<1x128xf32> to vector<128x128xf32>
    %6 = arith.addf %3, %5 : vector<128x128xf32>
    %cst_5 = arith.constant 0.000000e+00 : f32
    %7 = vector.broadcast %cst_5 : f32 to vector<128x128xf32>
    %8 = arith.maximumf %6, %7 : vector<128x128xf32>
    %c0_6 = arith.constant 0 : index
    %c0_7 = arith.constant 0 : index
    %9 = vector.load %arg5[%c0_6, %c0_7] : memref<1x128xf32, #tpu.memory_space<vmem>>, vector<1x128xf32>
    %c0_8 = arith.constant 0 : index
    %c0_9 = arith.constant 0 : index
    %10 = vector.load %arg6[%c0_8, %c0_9] : memref<1x128xf32, #tpu.memory_space<vmem>>, vector<1x128xf32>
    %cst_10 = arith.constant dense<0.000000e+00> : vector<128xf32>
    %11 = vector.multi_reduction <add>, %8, %cst_10 [1] : vector<128x128xf32> to vector<128xf32>
    %12 = vector.shape_cast %11 : vector<128xf32> to vector<128x1xf32>
    %cst_11 = arith.constant 1.280000e+02 : f32
    %13 = vector.broadcast %cst_11 : f32 to vector<128x1xf32>
    %14 = arith.divf %12, %13 : vector<128x1xf32>
    %15 = vector.broadcast %14 : vector<128x1xf32> to vector<128x128xf32>
    %16 = arith.subf %8, %15 : vector<128x128xf32>
    %17 = arith.mulf %16, %16 : vector<128x128xf32>
    %cst_12 = arith.constant dense<0.000000e+00> : vector<128xf32>
    %18 = vector.multi_reduction <add>, %17, %cst_12 [1] : vector<128x128xf32> to vector<128xf32>
    %19 = vector.shape_cast %18 : vector<128xf32> to vector<128x1xf32>
    %cst_13 = arith.constant 1.280000e+02 : f32
    %20 = vector.broadcast %cst_13 : f32 to vector<128x1xf32>
    %21 = arith.divf %19, %20 : vector<128x1xf32>
    %22 = vector.broadcast %14 : vector<128x1xf32> to vector<128x128xf32>
    %23 = arith.subf %8, %22 : vector<128x128xf32>
    %cst_14 = arith.constant 9.99999974E-6 : f32
    %24 = vector.broadcast %cst_14 : f32 to vector<128x1xf32>
    %25 = arith.addf %21, %24 : vector<128x1xf32>
    %26 = math.rsqrt %25 : vector<128x1xf32>
    %27 = vector.broadcast %26 : vector<128x1xf32> to vector<128x128xf32>
    %28 = arith.mulf %23, %27 : vector<128x128xf32>
    %29 = vector.broadcast %9 : vector<1x128xf32> to vector<128x128xf32>
    %30 = arith.mulf %28, %29 : vector<128x128xf32>
    %31 = vector.broadcast %10 : vector<1x128xf32> to vector<128x128xf32>
    %32 = arith.addf %30, %31 : vector<128x128xf32>
    %c0_15 = arith.constant 0 : index
    %c0_16 = arith.constant 0 : index
    %33 = vector.load %arg1[%c0_15, %c0_16] : memref<128x128xbf16, #tpu.memory_space<vmem>>, vector<128x128xbf16>
    %c0_17 = arith.constant 0 : index
    %c0_18 = arith.constant 0 : index
    %34 = vector.load %arg7[%c0_17, %c0_18] : memref<128x128xbf16, #tpu.memory_space<vmem>>, vector<128x128xbf16>
    %cst_19 = arith.constant dense<0.000000e+00> : vector<128x128xf32>
    %35 = tpu.matmul %33, %34, %cst_19 {dimension_numbers = #tpu.dot_dimension_numbers<[1], [0], [0], [1], [0, 0, 1, 1], [], []>} : vector<128x128xbf16>, vector<128x128xbf16>, vector<128x128xf32> -> vector<128x128xf32>
    %36 = arith.truncf %32 : vector<128x128xf32> to vector<128x128xbf16>
    %c0_20 = arith.constant 0 : index
    %c0_21 = arith.constant 0 : index
    %37 = vector.load %arg8[%c0_20, %c0_21] : memref<128x128xbf16, #tpu.memory_space<vmem>>, vector<128x128xbf16>
    %cst_22 = arith.constant dense<0.000000e+00> : vector<128x128xf32>
    %38 = tpu.matmul %36, %37, %cst_22 {dimension_numbers = #tpu.dot_dimension_numbers<[1], [0], [0], [1], [0, 0, 1, 1], [], []>} : vector<128x128xbf16>, vector<128x128xbf16>, vector<128x128xf32> -> vector<128x128xf32>
    %39 = arith.addf %35, %38 : vector<128x128xf32>
    %c0_23 = arith.constant 0 : index
    %c0_24 = arith.constant 0 : index
    %40 = vector.load %arg9[%c0_23, %c0_24] : memref<1x128xf32, #tpu.memory_space<vmem>>, vector<1x128xf32>
    %41 = vector.broadcast %40 : vector<1x128xf32> to vector<128x128xf32>
    %42 = arith.addf %39, %41 : vector<128x128xf32>
    %cst_25 = arith.constant 0.000000e+00 : f32
    %43 = vector.broadcast %cst_25 : f32 to vector<128x128xf32>
    %44 = arith.maximumf %42, %43 : vector<128x128xf32>
    %c0_26 = arith.constant 0 : index
    %c0_27 = arith.constant 0 : index
    %45 = vector.load %arg10[%c0_26, %c0_27] : memref<1x128xf32, #tpu.memory_space<vmem>>, vector<1x128xf32>
    %c0_28 = arith.constant 0 : index
    %c0_29 = arith.constant 0 : index
    %46 = vector.load %arg11[%c0_28, %c0_29] : memref<1x128xf32, #tpu.memory_space<vmem>>, vector<1x128xf32>
    %cst_30 = arith.constant dense<0.000000e+00> : vector<128xf32>
    %47 = vector.multi_reduction <add>, %44, %cst_30 [1] : vector<128x128xf32> to vector<128xf32>
    %48 = vector.shape_cast %47 : vector<128xf32> to vector<128x1xf32>
    %cst_31 = arith.constant 1.280000e+02 : f32
    %49 = vector.broadcast %cst_31 : f32 to vector<128x1xf32>
    %50 = arith.divf %48, %49 : vector<128x1xf32>
    %51 = vector.broadcast %50 : vector<128x1xf32> to vector<128x128xf32>
    %52 = arith.subf %44, %51 : vector<128x128xf32>
    %53 = arith.mulf %52, %52 : vector<128x128xf32>
    %cst_32 = arith.constant dense<0.000000e+00> : vector<128xf32>
    %54 = vector.multi_reduction <add>, %53, %cst_32 [1] : vector<128x128xf32> to vector<128xf32>
    %55 = vector.shape_cast %54 : vector<128xf32> to vector<128x1xf32>
    %cst_33 = arith.constant 1.280000e+02 : f32
    %56 = vector.broadcast %cst_33 : f32 to vector<128x1xf32>
    %57 = arith.divf %55, %56 : vector<128x1xf32>
    %58 = vector.broadcast %50 : vector<128x1xf32> to vector<128x128xf32>
    %59 = arith.subf %44, %58 : vector<128x128xf32>
    %cst_34 = arith.constant 9.99999974E-6 : f32
    %60 = vector.broadcast %cst_34 : f32 to vector<128x1xf32>
    %61 = arith.addf %57, %60 : vector<128x1xf32>
    %62 = math.rsqrt %61 : vector<128x1xf32>
    %63 = vector.broadcast %62 : vector<128x1xf32> to vector<128x128xf32>
    %64 = arith.mulf %59, %63 : vector<128x128xf32>
    %65 = vector.broadcast %45 : vector<1x128xf32> to vector<128x128xf32>
    %66 = arith.mulf %64, %65 : vector<128x128xf32>
    %67 = vector.broadcast %46 : vector<1x128xf32> to vector<128x128xf32>
    %68 = arith.addf %66, %67 : vector<128x128xf32>
    %69 = arith.truncf %68 : vector<128x128xf32> to vector<128x128xbf16>
    %c0_35 = arith.constant 0 : index
    %c0_36 = arith.constant 0 : index
    %70 = vector.load %arg12[%c0_35, %c0_36] : memref<128x128xbf16, #tpu.memory_space<vmem>>, vector<128x128xbf16>
    %cst_37 = arith.constant dense<0.000000e+00> : vector<128x128xf32>
    %71 = tpu.matmul %69, %70, %cst_37 {dimension_numbers = #tpu.dot_dimension_numbers<[1], [0], [0], [1], [0, 0, 1, 1], [], []>} : vector<128x128xbf16>, vector<128x128xbf16>, vector<128x128xf32> -> vector<128x128xf32>
    %c0_38 = arith.constant 0 : index
    %c0_39 = arith.constant 0 : index
    %72 = vector.load %arg13[%c0_38, %c0_39] : memref<1x128xf32, #tpu.memory_space<vmem>>, vector<1x128xf32>
    %73 = vector.broadcast %72 : vector<1x128xf32> to vector<128x128xf32>
    %74 = arith.addf %71, %73 : vector<128x128xf32>
    %c0_40 = arith.constant 0 : index
    %c0_41 = arith.constant 0 : index
    %75 = vector.load %arg14[%c0_40, %c0_41] : memref<128x128xf32, #tpu.memory_space<vmem>>, vector<128x128xf32>
    tpu.vector_store %arg14[%c0_40, %c0_41], %74 {strides = array<i32>} : memref<128x128xf32, #tpu.memory_space<vmem>>, vector<128x128xf32>,
    return
  }
  func.func @transform_0(%arg0: i32) -> (i32, i32) {
    %c0_i32 = arith.constant 0 : i32
    %c0_i32_0 = arith.constant 0 : i32
    return %arg0, %c0_i32 : i32, i32
  }
  func.func @transform_1(%arg0: i32) -> (i32, i32) {
    %c0_i32 = arith.constant 0 : i32
    %c0_i32_0 = arith.constant 0 : i32
    return %arg0, %c0_i32 : i32, i32
  }
  func.func @transform_2(%arg0: i32) -> (i32, i32) {
    %c0_i32 = arith.constant 0 : i32
    %c0_i32_0 = arith.constant 0 : i32
    %c0_i32_1 = arith.constant 0 : i32
    return %c0_i32, %c0_i32_0 : i32, i32
  }
  func.func @transform_3(%arg0: i32) -> (i32, i32) {
    %c0_i32 = arith.constant 0 : i32
    %c0_i32_0 = arith.constant 0 : i32
    %c0_i32_1 = arith.constant 0 : i32
    return %c0_i32, %c0_i32_0 : i32, i32
  }
  func.func @transform_4(%arg0: i32) -> (i32, i32) {
    %c0_i32 = arith.constant 0 : i32
    %c0_i32_0 = arith.constant 0 : i32
    %c0_i32_1 = arith.constant 0 : i32
    return %c0_i32, %c0_i32_0 : i32, i32
  }
  func.func @transform_5(%arg0: i32) -> (i32, i32) {
    %c0_i32 = arith.constant 0 : i32
    %c0_i32_0 = arith.constant 0 : i32
    %c0_i32_1 = arith.constant 0 : i32
    return %c0_i32, %c0_i32_0 : i32, i32
  }
  func.func @transform_6(%arg0: i32) -> (i32, i32) {
    %c0_i32 = arith.constant 0 : i32
    %c0_i32_0 = arith.constant 0 : i32
    %c0_i32_1 = arith.constant 0 : i32
    return %c0_i32, %c0_i32_0 : i32, i32
  }
  func.func @transform_7(%arg0: i32) -> (i32, i32) {
    %c0_i32 = arith.constant 0 : i32
    %c0_i32_0 = arith.constant 0 : i32
    %c0_i32_1 = arith.constant 0 : i32
    return %c0_i32, %c0_i32_0 : i32, i32
  }
  func.func @transform_8(%arg0: i32) -> (i32, i32) {
    %c0_i32 = arith.constant 0 : i32
    %c0_i32_0 = arith.constant 0 : i32
    %c0_i32_1 = arith.constant 0 : i32
    return %c0_i32, %c0_i32_0 : i32, i32
  }
  func.func @transform_9(%arg0: i32) -> (i32, i32) {
    %c0_i32 = arith.constant 0 : i32
    %c0_i32_0 = arith.constant 0 : i32
    %c0_i32_1 = arith.constant 0 : i32
    return %c0_i32, %c0_i32_0 : i32, i32
  }
  func.func @transform_10(%arg0: i32) -> (i32, i32) {
    %c0_i32 = arith.constant 0 : i32
    %c0_i32_0 = arith.constant 0 : i32
    %c0_i32_1 = arith.constant 0 : i32
    return %c0_i32, %c0_i32_0 : i32, i32
  }
  func.func @transform_11(%arg0: i32) -> (i32, i32) {
    %c0_i32 = arith.constant 0 : i32
    %c0_i32_0 = arith.constant 0 : i32
    %c0_i32_1 = arith.constant 0 : i32
    return %c0_i32, %c0_i32_0 : i32, i32
  }
  func.func @transform_12(%arg0: i32) -> (i32, i32) {
    %c0_i32 = arith.constant 0 : i32
    %c0_i32_0 = arith.constant 0 : i32
    %c0_i32_1 = arith.constant 0 : i32
    return %c0_i32, %c0_i32_0 : i32, i32
  }
  func.func @transform_13(%arg0: i32) -> (i32, i32) {
    %c0_i32 = arith.constant 0 : i32
    %c0_i32_0 = arith.constant 0 : i32
    return %arg0, %c0_i32 : i32, i32
  }
}

</mosaic_0001>

<bundles_post_ra>
// kernel: forward.11
= control target key start
LH: loop header
LB: loop body
LE: loop exit
PB: predicated region body
PF: predicated region fallthrough
CT: control target
= control target key end

     0   :  { %vm76_vm0 = vcmask 1043456   ;;  %vm51_vm1 = vcmask 64512   ;;  %s409_s1 = inlined_call_operand.vmem [shape: bf16[8,256], index: 1, kind: input, shape index: {}]   ;;  %s410_s0 = inlined_call_operand.vmem [shape: f32[128,8], index: 0, kind: input, shape index: {}]   ;;  %s411_s2 = inlined_call_operand.vmem [shape: f32[1,256], index: 2, kind: input, shape index: {}]   ;;  %s412_s3 = inlined_call_operand.vmem [shape: bf16[128,256], index: 3, kind: output, shape index: {}]  }
   0x1   :  { %v39_v0 = vld [vmem:[%s409_s1] sm:$0xff]  ;;  %v16_v4 = vld [vmem:[%s410_s0 + $0x8] sm:$0xff]  ;;  %v17_v13 = vld [vmem:[%s410_s0 + $0x10] sm:$0xff] }
   0x2   :  { %v47_v1 = vunpack.c.l.b16 %v39_v0  ;;  %v48_v2 = vunpack.c.h.b16 %v39_v0  ;;  %v15_v3 = vld [vmem:[%s410_s0] sm:$0xff]  ;;  %v24_v6 = vld [vmem:[%s410_s0 + $0x48] sm:$0xff]  ;;  %v18_v14 = vld [vmem:[%s410_s0 + $0x18] sm:$0xff] }
   0x3   :  { %v23_v5 = vld [vmem:[%s410_s0 + $0x40] sm:$0xff]  ;;  %v31_v11 = vpack.c.bf16 %v16_v4, %v15_v3  ;;  %v25_v15 = vld [vmem:[%s410_s0 + $0x50] sm:$0xff]  ;;  %v26_v16 = vld [vmem:[%s410_s0 + $0x58] sm:$0xff]  ;;  %v32_v17 = vpack.c.bf16 %v18_v14, %v17_v13 }
   0x4   :  { %v49_v7 = vpack.c.b16 %v47_v1, %v47_v1  ;;  %v50_v8 = vpack.c.b16 %v48_v2, %v48_v2  ;;  %v35_v12 = vpack.c.bf16 %v24_v6, %v23_v5  ;;  %v36_v18 = vpack.c.bf16 %v26_v16, %v25_v15  ;;  %v19_v19 = vld [vmem:[%s410_s0 + $0x20] sm:$0xff]  ;;  %v20_v20 = vld [vmem:[%s410_s0 + $0x28] sm:$0xff]  ;;  %v21_v25 = vld [vmem:[%s410_s0 + $0x30] sm:$0xff] }
   0x5   :  { %v27_v21 = vld [vmem:[%s410_s0 + $0x60] sm:$0xff]  ;;  %v28_v22 = vld [vmem:[%s410_s0 + $0x68] sm:$0xff]  ;;  %v33_v23 = vpack.c.bf16 %v20_v20, %v19_v19  ;;  %v22_v26 = vld [vmem:[%s410_s0 + $0x38] sm:$0xff] }
   0x6   :  { %v78_v9 = vsel %vm76_vm0, %v49_v7, 0  ;;  %v81_v10 = vsel %vm76_vm0, %v50_v8, 0  ;;  %v37_v24 = vpack.c.bf16 %v28_v22, %v27_v21  ;;  %v29_v27 = vld [vmem:[%s410_s0 + $0x70] sm:$0xff]  ;;  %v30_v28 = vld [vmem:[%s410_s0 + $0x78] sm:$0xff]  ;;  %v34_v29 = vpack.c.bf16 %v22_v26, %v21_v25  ;;  %v40_v31 = vld [vmem:[%s411_s2] sm:$0x3] }
   0x7   :  { %90 = vmatpush.bf16.msra.mxu0 %v78_v9  ;;  %233 = vmatpush.bf16.msra.mxu2 %v78_v9  ;;  %v38_v30 = vpack.c.bf16 %v30_v28, %v29_v27  ;;  %v325_v32 = vperm.slane %v40_v31, 0  ;;  %v327_v33 = vperm.slane %v40_v31, 1 }
   0x8   :  { %139 = vmatpush.bf16.msra.mxu1 %v81_v10  ;;  %234 = vmatpush.bf16.msra.mxu3 %v81_v10 }
   0xa   :  { %217 = vmatmul.msk.bf16.vlgmr.msra.gmra.mxu0 %vm51_vm1, %v31_v11  ;;  %221 = vmatmul.msk.bf16.vlgmr.msra.gmra.mxu2 %vm51_vm1, %v35_v12 }
   0xb   :  { %225 = vmatmul.msk.bf16.vlgmr.msra.gmra.mxu1 %vm51_vm1, %v31_v11  ;;  %229 = vmatmul.msk.bf16.vlgmr.msra.gmra.mxu3 %vm51_vm1, %v35_v12 }
  0x1a   :  { %218 = vmatmul.msk.bf16.gmra.mxu0 %vm51_vm1, %v32_v17  ;;  %222 = vmatmul.msk.bf16.gmra.mxu2 %vm51_vm1, %v36_v18 }
  0x1b   :  { %226 = vmatmul.msk.bf16.gmra.mxu1 %vm51_vm1, %v32_v17  ;;  %230 = vmatmul.msk.bf16.gmra.mxu3 %vm51_vm1, %v36_v18 }
  0x2a   :  { %219 = vmatmul.msk.bf16.gmra.mxu0 %vm51_vm1, %v33_v23  ;;  %223 = vmatmul.msk.bf16.gmra.mxu2 %vm51_vm1, %v37_v24 }
  0x2b   :  { %227 = vmatmul.msk.bf16.gmra.mxu1 %vm51_vm1, %v33_v23  ;;  %231 = vmatmul.msk.bf16.gmra.mxu3 %vm51_vm1, %v37_v24 }
  0x3a   :  { %220 = vmatmul.msk.bf16.gmra.mxu0 %vm51_vm1, %v34_v29  ;;  %224 = vmatmul.msk.bf16.gmra.mxu2 %vm51_vm1, %v38_v30 }
  0x3b   :  { %228 = vmatmul.msk.bf16.gmra.mxu1 %vm51_vm1, %v34_v29  ;;  %232 = vmatmul.msk.bf16.gmra.mxu3 %vm51_vm1, %v38_v30 }
  0x87   :  { %v92_v34 = vpop.f32.mrf.mxu0 }
  0x88   :  { %v93_v35 = vadd.f32 %v92_v34, %v325_v32  ;;  %v141_v36 = vpop.f32.mrf.mxu1 }
  0x89   :  { %v142_v37 = vadd.f32 %v141_v36, %v327_v33 }
  0x8b   :  { %v181_v38 = vpack.c.bf16 %v142_v37, %v93_v35 }
  0x8d   :  { %197 = vst [vmem:[%s412_s3] sm:$0xff] %v181_v38  ;;  %v112_v39 = vpop.f32.mrf.mxu2 }
  0x8e   :  { %v113_v40 = vadd.f32 %v112_v39, %v325_v32  ;;  %v161_v41 = vpop.f32.mrf.mxu3 }
  0x8f   :  { %v162_v42 = vadd.f32 %v161_v41, %v327_v33  ;;  %v94_v43 = vpop.f32.mrf.mxu0 }
  0x90   :  { %v95_v44 = vadd.f32 %v94_v43, %v325_v32  ;;  %v143_v45 = vpop.f32.mrf.mxu1 }
  0x91   :  { %v189_v46 = vpack.c.bf16 %v162_v42, %v113_v40  ;;  %v144_v47 = vadd.f32 %v143_v45, %v327_v33 }
  0x93   :  { %205 = vst [vmem:[%s412_s3 + $0x40] sm:$0xff] %v189_v46  ;;  %v182_v48 = vpack.c.bf16 %v144_v47, %v95_v44 }
  0x95   :  { %198 = vst [vmem:[%s412_s3 + $0x8] sm:$0xff] %v182_v48  ;;  %v114_v49 = vpop.f32.mrf.mxu2 }
  0x96   :  { %v115_v50 = vadd.f32 %v114_v49, %v325_v32  ;;  %v163_v51 = vpop.f32.mrf.mxu3 }
  0x97   :  { %v164_v52 = vadd.f32 %v163_v51, %v327_v33  ;;  %v97_v53 = vpop.f32.mrf.mxu0 }
  0x98   :  { %v98_v54 = vadd.f32 %v97_v53, %v325_v32  ;;  %v146_v55 = vpop.f32.mrf.mxu1 }
  0x99   :  { %v190_v56 = vpack.c.bf16 %v164_v52, %v115_v50  ;;  %v147_v57 = vadd.f32 %v146_v55, %v327_v33 }
  0x9b   :  { %206 = vst [vmem:[%s412_s3 + $0x48] sm:$0xff] %v190_v56  ;;  %v183_v58 = vpack.c.bf16 %v147_v57, %v98_v54 }
  0x9d   :  { %199 = vst [vmem:[%s412_s3 + $0x10] sm:$0xff] %v183_v58  ;;  %v117_v59 = vpop.f32.mrf.mxu2 }
  0x9e   :  { %v118_v60 = vadd.f32 %v117_v59, %v325_v32  ;;  %v166_v61 = vpop.f32.mrf.mxu3 }
  0x9f   :  { %v167_v62 = vadd.f32 %v166_v61, %v327_v33  ;;  %v99_v63 = vpop.f32.mrf.mxu0 }
  0xa0   :  { %v100_v0 = vadd.f32 %v99_v63, %v325_v32  ;;  %v148_v1 = vpop.f32.mrf.mxu1 }
  0xa1   :  { %v191_v2 = vpack.c.bf16 %v167_v62, %v118_v60  ;;  %v149_v3 = vadd.f32 %v148_v1, %v327_v33 }
  0xa3   :  { %207 = vst [vmem:[%s412_s3 + $0x50] sm:$0xff] %v191_v2  ;;  %v184_v4 = vpack.c.bf16 %v149_v3, %v100_v0 }
  0xa5   :  { %200 = vst [vmem:[%s412_s3 + $0x18] sm:$0xff] %v184_v4  ;;  %v119_v5 = vpop.f32.mrf.mxu2 }
  0xa6   :  { %v120_v6 = vadd.f32 %v119_v5, %v325_v32  ;;  %v168_v7 = vpop.f32.mrf.mxu3 }
  0xa7   :  { %v169_v8 = vadd.f32 %v168_v7, %v327_v33  ;;  %v102_v9 = vpop.f32.mrf.mxu0 }
  0xa8   :  { %v103_v10 = vadd.f32 %v102_v9, %v325_v32  ;;  %v151_v11 = vpop.f32.mrf.mxu1 }
  0xa9   :  { %v192_v12 = vpack.c.bf16 %v169_v8, %v120_v6  ;;  %v152_v13 = vadd.f32 %v151_v11, %v327_v33 }
  0xab   :  { %208 = vst [vmem:[%s412_s3 + $0x58] sm:$0xff] %v192_v12  ;;  %v185_v14 = vpack.c.bf16 %v152_v13, %v103_v10 }
  0xad   :  { %201 = vst [vmem:[%s412_s3 + $0x20] sm:$0xff] %v185_v14  ;;  %v122_v15 = vpop.f32.mrf.mxu2 }
  0xae   :  { %v123_v16 = vadd.f32 %v122_v15, %v325_v32  ;;  %v171_v17 = vpop.f32.mrf.mxu3 }
  0xaf   :  { %v172_v18 = vadd.f32 %v171_v17, %v327_v33  ;;  %v104_v19 = vpop.f32.mrf.mxu0 }
  0xb0   :  { %v105_v20 = vadd.f32 %v104_v19, %v325_v32  ;;  %v153_v21 = vpop.f32.mrf.mxu1 }
  0xb1   :  { %v193_v22 = vpack.c.bf16 %v172_v18, %v123_v16  ;;  %v154_v23 = vadd.f32 %v153_v21, %v327_v33 }
  0xb3   :  { %209 = vst [vmem:[%s412_s3 + $0x60] sm:$0xff] %v193_v22  ;;  %v186_v24 = vpack.c.bf16 %v154_v23, %v105_v20 }
  0xb5   :  { %202 = vst [vmem:[%s412_s3 + $0x28] sm:$0xff] %v186_v24  ;;  %v124_v25 = vpop.f32.mrf.mxu2 }
  0xb6   :  { %v125_v26 = vadd.f32 %v124_v25, %v325_v32  ;;  %v173_v27 = vpop.f32.mrf.mxu3 }
  0xb7   :  { %v174_v28 = vadd.f32 %v173_v27, %v327_v33  ;;  %v107_v29 = vpop.f32.mrf.mxu0 }
  0xb8   :  { %v108_v30 = vadd.f32 %v107_v29, %v325_v32  ;;  %v156_v31 = vpop.f32.mrf.mxu1 }
  0xb9   :  { %v194_v34 = vpack.c.bf16 %v174_v28, %v125_v26  ;;  %v157_v35 = vadd.f32 %v156_v31, %v327_v33 }
  0xbb   :  { %210 = vst [vmem:[%s412_s3 + $0x68] sm:$0xff] %v194_v34  ;;  %v187_v36 = vpack.c.bf16 %v157_v35, %v108_v30 }
  0xbd   :  { %203 = vst [vmem:[%s412_s3 + $0x30] sm:$0xff] %v187_v36  ;;  %v127_v37 = vpop.f32.mrf.mxu2 }
  0xbe   :  { %v128_v38 = vadd.f32 %v127_v37, %v325_v32  ;;  %v176_v39 = vpop.f32.mrf.mxu3 }
  0xbf   :  { %v177_v40 = vadd.f32 %v176_v39, %v327_v33  ;;  %v109_v41 = vpop.f32.mrf.mxu0 }
  0xc0   :  { %v110_v42 = vadd.f32 %v109_v41, %v325_v32  ;;  %v158_v43 = vpop.f32.mrf.mxu1 }
  0xc1   :  { %v195_v44 = vpack.c.bf16 %v177_v40, %v128_v38  ;;  %v159_v45 = vadd.f32 %v158_v43, %v327_v33 }
  0xc3   :  { %211 = vst [vmem:[%s412_s3 + $0x70] sm:$0xff] %v195_v44  ;;  %v188_v46 = vpack.c.bf16 %v159_v45, %v110_v42 }
  0xc5   :  { %204 = vst [vmem:[%s412_s3 + $0x38] sm:$0xff] %v188_v46  ;;  %v129_v47 = vpop.f32.mrf.mxu2 }
  0xc6   :  { %v130_v48 = vadd.f32 %v129_v47, %v325_v32  ;;  %v178_v49 = vpop.f32.mrf.mxu3 }
  0xc7   :  { %v179_v50 = vadd.f32 %v178_v49, %v327_v33 }
  0xc9   :  { %v196_v51 = vpack.c.bf16 %v179_v50, %v130_v48 }
  0xcb   :  { %212 = vst [vmem:[%s412_s3 + $0x78] sm:$0xff] %v196_v51 }

// kernel: forward.10
= control target key start
LH: loop header
LB: loop body
LE: loop exit
PB: predicated region body
PF: predicated region fallthrough
CT: control target
= control target key end

     0   :  { %vm69_vm0 = vcmask 1043456   ;;  %vm44_vm1 = vcmask 64512   ;;  %s323_s1 = inlined_call_operand.vmem [shape: bf16[8,128], index: 1, kind: input, shape index: {}]   ;;  %s324_s0 = inlined_call_operand.vmem [shape: f32[128,8], index: 0, kind: input, shape index: {}]   ;;  %s325_s2 = inlined_call_operand.vmem [shape: f32[1,128], index: 2, kind: input, shape index: {}]   ;;  %s326_s3 = inlined_call_operand.vmem [shape: bf16[128,128], index: 3, kind: output, shape index: {}]  }
   0x1   :  { %v39_v0 = vld [vmem:[%s323_s1] sm:$0xf]  ;;  %v16_v2 = vld [vmem:[%s324_s0 + $0x8] sm:$0xff]  ;;  %v17_v14 = vld [vmem:[%s324_s0 + $0x10] sm:$0xff] }
   0x2   :  { %v15_v1 = vld [vmem:[%s324_s0] sm:$0xff]  ;;  %v71_v3 = vsel %vm69_vm0, %v39_v0, 0  ;;  %v20_v6 = vld [vmem:[%s324_s0 + $0x28] sm:$0xff]  ;;  %v18_v15 = vld [vmem:[%s324_s0 + $0x18] sm:$0xff] }
   0x3   :  { %v31_v4 = vpack.c.bf16 %v16_v2, %v15_v1  ;;  %v19_v5 = vld [vmem:[%s324_s0 + $0x20] sm:$0xff]  ;;  %80 = vmatpush.bf16.msra.mxu0 %v71_v3  ;;  %213 = vmatpush.bf16.msra.mxu1 %v71_v3  ;;  %v24_v9 = vld [vmem:[%s324_s0 + $0x48] sm:$0xff]  ;;  %v21_v16 = vld [vmem:[%s324_s0 + $0x30] sm:$0xff]  ;;  %v32_v22 = vpack.c.bf16 %v18_v15, %v17_v14 }
   0x4   :  { %v23_v7 = vld [vmem:[%s324_s0 + $0x40] sm:$0xff]  ;;  %v33_v8 = vpack.c.bf16 %v20_v6, %v19_v5  ;;  %v28_v11 = vld [vmem:[%s324_s0 + $0x68] sm:$0xff]  ;;  %214 = vmatpush.bf16.msra.mxu2 %v71_v3  ;;  %215 = vmatpush.bf16.msra.mxu3 %v71_v3  ;;  %v22_v17 = vld [vmem:[%s324_s0 + $0x38] sm:$0xff] }
   0x5   :  { %v27_v10 = vld [vmem:[%s324_s0 + $0x60] sm:$0xff]  ;;  %v35_v12 = vpack.c.bf16 %v24_v9, %v23_v7  ;;  %v25_v18 = vld [vmem:[%s324_s0 + $0x50] sm:$0xff]  ;;  %v26_v19 = vld [vmem:[%s324_s0 + $0x58] sm:$0xff]  ;;  %v34_v23 = vpack.c.bf16 %v22_v17, %v21_v16 }
   0x6   :  { %v37_v13 = vpack.c.bf16 %v28_v11, %v27_v10  ;;  %158 = vmatmul.msk.bf16.vlgmr.msra.gmra.mxu0 %vm44_vm1, %v31_v4  ;;  %160 = vmatmul.msk.bf16.vlgmr.msra.gmra.mxu1 %vm44_vm1, %v33_v8  ;;  %v29_v20 = vld [vmem:[%s324_s0 + $0x70] sm:$0xff]  ;;  %v30_v21 = vld [vmem:[%s324_s0 + $0x78] sm:$0xff]  ;;  %v36_v24 = vpack.c.bf16 %v26_v19, %v25_v18  ;;  %v216_v28 = vld [vmem:[%s325_s2] ss:$0 sm:$0xff] }
   0x7   :  { %162 = vmatmul.msk.bf16.vlgmr.msra.gmra.mxu2 %vm44_vm1, %v35_v12  ;;  %v38_v25 = vpack.c.bf16 %v30_v21, %v29_v20 }
   0x8   :  { %164 = vmatmul.msk.bf16.vlgmr.msra.gmra.mxu3 %vm44_vm1, %v37_v13 }
  0x16   :  { %159 = vmatmul.msk.bf16.gmra.mxu0 %vm44_vm1, %v32_v22  ;;  %161 = vmatmul.msk.bf16.gmra.mxu1 %vm44_vm1, %v34_v23 }
  0x17   :  { %163 = vmatmul.msk.bf16.gmra.mxu2 %vm44_vm1, %v36_v24 }
  0x18   :  { %165 = vmatmul.msk.bf16.gmra.mxu3 %vm44_vm1, %v38_v25 }
  0x83   :  { %v82_v26 = vpop.f32.mrf.mxu0  ;;  %v92_v27 = vpop.f32.mrf.mxu1 }
  0x84   :  { %v83_v33 = vadd.f32 %v216_v28, %v82_v26  ;;  %v93_v34 = vadd.f32 %v216_v28, %v92_v27 }
  0x8a   :  { %v102_v29 = vpop.f32.mrf.mxu2 }
  0x8b   :  { %v112_v30 = vpop.f32.mrf.mxu3  ;;  %v84_v31 = vpop.f32.mrf.mxu0  ;;  %v103_v41 = vadd.f32 %v216_v28, %v102_v29 }
  0x8c   :  { %v94_v32 = vpop.f32.mrf.mxu1  ;;  %v85_v35 = vadd.f32 %v216_v28, %v84_v31  ;;  %v113_v42 = vadd.f32 %v216_v28, %v112_v30 }
  0x8d   :  { %v95_v36 = vadd.f32 %v216_v28, %v94_v32 }
  0x8e   :  { %v169_v37 = vpack.c.bf16 %v85_v35, %v83_v33 }
  0x8f   :  { %v179_v38 = vpack.c.bf16 %v95_v36, %v93_v34 }
  0x90   :  { %170 = vst [vmem:[%s326_s3] sm:$0xff] %v169_v37  }
  0x91   :  { %207 = vst [vmem:[%s326_s3 + $0x10] sm:$0xff] %v179_v38  }
  0x92   :  { %v104_v39 = vpop.f32.mrf.mxu2 }
  0x93   :  { %v114_v40 = vpop.f32.mrf.mxu3  ;;  %v105_v43 = vadd.f32 %v216_v28, %v104_v39  ;;  %v87_v45 = vpop.f32.mrf.mxu0 }
  0x94   :  { %v115_v44 = vadd.f32 %v216_v28, %v114_v40  ;;  %v97_v46 = vpop.f32.mrf.mxu1  ;;  %v88_v53 = vadd.f32 %v216_v28, %v87_v45 }
  0x95   :  { %v189_v47 = vpack.c.bf16 %v105_v43, %v103_v41  ;;  %v98_v54 = vadd.f32 %v216_v28, %v97_v46 }
  0x96   :  { %v199_v48 = vpack.c.bf16 %v115_v44, %v113_v42 }
  0x97   :  { %209 = vst [vmem:[%s326_s3 + $0x20] sm:$0xff] %v189_v47  }
  0x98   :  { %211 = vst [vmem:[%s326_s3 + $0x30] sm:$0xff] %v199_v48  }
  0x9a   :  { %v107_v49 = vpop.f32.mrf.mxu2 }
  0x9b   :  { %v117_v50 = vpop.f32.mrf.mxu3  ;;  %v89_v51 = vpop.f32.mrf.mxu0  ;;  %v108_v61 = vadd.f32 %v216_v28, %v107_v49 }
  0x9c   :  { %v99_v52 = vpop.f32.mrf.mxu1  ;;  %v90_v55 = vadd.f32 %v216_v28, %v89_v51  ;;  %v118_v62 = vadd.f32 %v216_v28, %v117_v50 }
  0x9d   :  { %v100_v56 = vadd.f32 %v216_v28, %v99_v52 }
  0x9e   :  { %v174_v57 = vpack.c.bf16 %v90_v55, %v88_v53 }
  0x9f   :  { %v184_v58 = vpack.c.bf16 %v100_v56, %v98_v54 }
  0xa0   :  { %206 = vst [vmem:[%s326_s3 + $0x8] sm:$0xff] %v174_v57  }
  0xa1   :  { %208 = vst [vmem:[%s326_s3 + $0x18] sm:$0xff] %v184_v58  }
  0xa2   :  { %v109_v59 = vpop.f32.mrf.mxu2 }
  0xa3   :  { %v119_v60 = vpop.f32.mrf.mxu3  ;;  %v110_v63 = vadd.f32 %v216_v28, %v109_v59 }
  0xa4   :  { %v120_v0 = vadd.f32 %v216_v28, %v119_v60 }
  0xa5   :  { %v194_v1 = vpack.c.bf16 %v110_v63, %v108_v61 }
  0xa6   :  { %v204_v2 = vpack.c.bf16 %v120_v0, %v118_v62 }
  0xa7   :  { %210 = vst [vmem:[%s326_s3 + $0x28] sm:$0xff] %v194_v1  }
  0xa8   :  { %212 = vst [vmem:[%s326_s3 + $0x38] sm:$0xff] %v204_v2  }

// kernel: forward.13
= control target key start
LH: loop header
LB: loop body
LE: loop exit
PB: predicated region body
PF: predicated region fallthrough
CT: control target
= control target key end

     0   :  { %s677_s1 = inlined_call_operand.vmem [shape: bf16[128,256], index: 1, kind: input, shape index: {}]   ;;  %s678_s0 = inlined_call_operand.vmem [shape: bf16[128,128], index: 0, kind: input, shape index: {}]   ;;  %s679_s2 = inlined_call_operand.vmem [shape: f32[1,256], index: 2, kind: input, shape index: {}]   ;;  %s680_s3 = inlined_call_operand.vmem [shape: bf16[128,256], index: 3, kind: output, shape index: {}]  }
   0x1   :  { %v404_v0 = vld [vmem:[%s677_s1 + $0x70] sm:$0xf]  ;;  %v433_v1 = vld [vmem:[%s677_s1 + $0x74] sm:$0xf0]  ;;  %v432_v2 = vld [vmem:[%s677_s1 + $0x74] sm:$0xf] }
   0x2   :  { %v405_v3 = vor.u32 %v433_v1, %v404_v0  ;;  %v406_v4 = vld [vmem:[%s677_s1 + $0x78] sm:$0xf0]  ;;  %v396_v5 = vld [vmem:[%s677_s1 + $0x60] sm:$0xf]  ;;  %v431_v6 = vld [vmem:[%s677_s1 + $0x64] sm:$0xf0] }
   0x3   :  { %v409_v7 = vor.u32 %v432_v2, %v406_v4  ;;  %v430_v8 = vld [vmem:[%s677_s1 + $0x64] sm:$0xf]  ;;  %v398_v9 = vld [vmem:[%s677_s1 + $0x68] sm:$0xf0]  ;;  %v397_v10 = vor.u32 %v431_v6, %v396_v5  ;;  %v388_v12 = vld [vmem:[%s677_s1 + $0x50] sm:$0xf] }
   0x4   :  { %180 = vmatpush.bf16.msra.mxu0 %v405_v3  ;;  %434 = vmatpush.bf16.msra.mxu2 %v405_v3  ;;  %v401_v11 = vor.u32 %v430_v8, %v398_v9  ;;  %v429_v13 = vld [vmem:[%s677_s1 + $0x54] sm:$0xf0]  ;;  %v428_v14 = vld [vmem:[%s677_s1 + $0x54] sm:$0xf]  ;;  %v390_v15 = vld [vmem:[%s677_s1 + $0x58] sm:$0xf0] }
   0x5   :  { %229 = vmatpush.bf16.msra.mxu1 %v409_v7  ;;  %442 = vmatpush.bf16.msra.mxu3 %v409_v7  ;;  %v389_v16 = vor.u32 %v429_v13, %v388_v12  ;;  %v393_v17 = vor.u32 %v428_v14, %v390_v15  ;;  %v380_v18 = vld [vmem:[%s677_s1 + $0x40] sm:$0xf]  ;;  %v427_v19 = vld [vmem:[%s677_s1 + $0x44] sm:$0xf0]  ;;  %v426_v20 = vld [vmem:[%s677_s1 + $0x44] sm:$0xf] }
   0x6   :  { %v382_v21 = vld [vmem:[%s677_s1 + $0x48] sm:$0xf0]  ;;  %v381_v22 = vor.u32 %v427_v19, %v380_v18  ;;  %v372_v24 = vld [vmem:[%s677_s1 + $0x30] sm:$0xf]  ;;  %v425_v25 = vld [vmem:[%s677_s1 + $0x34] sm:$0xf0] }
   0x7   :  { %v385_v23 = vor.u32 %v426_v20, %v382_v21  ;;  %v424_v26 = vld [vmem:[%s677_s1 + $0x34] sm:$0xf]  ;;  %v374_v27 = vld [vmem:[%s677_s1 + $0x38] sm:$0xf0]  ;;  %v373_v28 = vor.u32 %v425_v25, %v372_v24  ;;  %v364_v30 = vld [vmem:[%s677_s1 + $0x20] sm:$0xf] }
   0x8   :  { %181 = vmatpush.bf16.msra.mxu0 %v397_v10  ;;  %435 = vmatpush.bf16.msra.mxu2 %v397_v10  ;;  %v377_v29 = vor.u32 %v424_v26, %v374_v27  ;;  %v423_v31 = vld [vmem:[%s677_s1 + $0x24] sm:$0xf0]  ;;  %v422_v32 = vld [vmem:[%s677_s1 + $0x24] sm:$0xf]  ;;  %v366_v33 = vld [vmem:[%s677_s1 + $0x28] sm:$0xf0] }
   0x9   :  { %230 = vmatpush.bf16.msra.mxu1 %v401_v11  ;;  %443 = vmatpush.bf16.msra.mxu3 %v401_v11  ;;  %v365_v34 = vor.u32 %v423_v31, %v364_v30  ;;  %v369_v35 = vor.u32 %v422_v32, %v366_v33  ;;  %v356_v36 = vld [vmem:[%s677_s1 + $0x10] sm:$0xf]  ;;  %v421_v37 = vld [vmem:[%s677_s1 + $0x14] sm:$0xf0]  ;;  %v420_v38 = vld [vmem:[%s677_s1 + $0x14] sm:$0xf] }
   0xa   :  { %v358_v39 = vld [vmem:[%s677_s1 + $0x18] sm:$0xf0]  ;;  %v357_v40 = vor.u32 %v421_v37, %v356_v36  ;;  %v348_v42 = vld [vmem:[%s677_s1] sm:$0xf]  ;;  %v419_v43 = vld [vmem:[%s677_s1 + $0x4] sm:$0xf0] }
   0xb   :  { %v361_v41 = vor.u32 %v420_v38, %v358_v39  ;;  %v418_v44 = vld [vmem:[%s677_s1 + $0x4] sm:$0xf]  ;;  %v350_v45 = vld [vmem:[%s677_s1 + $0x8] sm:$0xf0]  ;;  %v349_v46 = vor.u32 %v419_v43, %v348_v42  ;;  %v412_v52 = vld [vmem:[%s678_s0 + $0x10] sm:$0xff] }
   0xc   :  { %182 = vmatpush.bf16.msra.mxu0 %v389_v16  ;;  %436 = vmatpush.bf16.msra.mxu2 %v389_v16  ;;  %v353_v47 = vor.u32 %v418_v44, %v350_v45  ;;  %v410_v48 = vld [vmem:[%s678_s0] sm:$0xff]  ;;  %v411_v50 = vld [vmem:[%s678_s0 + $0x8] sm:$0xff]  ;;  %v416_v53 = vld [vmem:[%s678_s0 + $0x30] sm:$0xff] }
   0xd   :  { %231 = vmatpush.bf16.msra.mxu1 %v393_v17  ;;  %444 = vmatpush.bf16.msra.mxu3 %v393_v17  ;;  %v414_v49 = vld [vmem:[%s678_s0 + $0x20] sm:$0xff]  ;;  %v415_v51 = vld [vmem:[%s678_s0 + $0x28] sm:$0xff]  ;;  %v413_v54 = vld [vmem:[%s678_s0 + $0x18] sm:$0xff] }
   0xe   :  { %v417_v55 = vld [vmem:[%s678_s0 + $0x38] sm:$0xff]  ;;  %v46_v56 = vld [vmem:[%s679_s2] sm:$0x3] }
   0xf   :  { %v593_v57 = vperm.slane %v46_v56, 0  ;;  %v595_v58 = vperm.slane %v46_v56, 1 }
  0x10   :  { %183 = vmatpush.bf16.msra.mxu0 %v381_v22  ;;  %437 = vmatpush.bf16.msra.mxu2 %v381_v22 }
  0x11   :  { %232 = vmatpush.bf16.msra.mxu1 %v385_v23  ;;  %445 = vmatpush.bf16.msra.mxu3 %v385_v23 }
  0x14   :  { %184 = vmatpush.bf16.msra.mxu0 %v373_v28  ;;  %438 = vmatpush.bf16.msra.mxu2 %v373_v28 }
  0x15   :  { %233 = vmatpush.bf16.msra.mxu1 %v377_v29  ;;  %446 = vmatpush.bf16.msra.mxu3 %v377_v29 }
  0x18   :  { %185 = vmatpush.bf16.msra.mxu0 %v365_v34  ;;  %439 = vmatpush.bf16.msra.mxu2 %v365_v34 }
  0x19   :  { %234 = vmatpush.bf16.msra.mxu1 %v369_v35  ;;  %447 = vmatpush.bf16.msra.mxu3 %v369_v35 }
  0x1c   :  { %186 = vmatpush.bf16.msra.mxu0 %v357_v40  ;;  %440 = vmatpush.bf16.msra.mxu2 %v357_v40 }
  0x1d   :  { %235 = vmatpush.bf16.msra.mxu1 %v361_v41  ;;  %448 = vmatpush.bf16.msra.mxu3 %v361_v41 }
  0x20   :  { %187 = vmatpush.bf16.msra.mxu0 %v349_v46  ;;  %441 = vmatpush.bf16.msra.mxu2 %v349_v46 }
  0x21   :  { %236 = vmatpush.bf16.msra.mxu1 %v353_v47  ;;  %449 = vmatpush.bf16.msra.mxu3 %v353_v47 }
  0x23   :  { %188 = vmatmul.bf16.vlgmr.msra.gmra.mxu0 %v410_v48  ;;  %208 = vmatmul.bf16.vlgmr.msra.gmra.mxu2 %v414_v49 }
  0x24   :  { %237 = vmatmul.bf16.vlgmr.msra.gmra.mxu1 %v410_v48  ;;  %257 = vmatmul.bf16.vlgmr.msra.gmra.mxu3 %v414_v49 }
  0x33   :  { %193 = vmatmul.bf16.gmra.mxu0 %v411_v50  ;;  %213 = vmatmul.bf16.gmra.mxu2 %v415_v51 }
  0x34   :  { %242 = vmatmul.bf16.gmra.mxu1 %v411_v50  ;;  %262 = vmatmul.bf16.gmra.mxu3 %v415_v51 }
  0x43   :  { %198 = vmatmul.bf16.gmra.mxu0 %v412_v52  ;;  %218 = vmatmul.bf16.gmra.mxu2 %v416_v53 }
  0x44   :  { %247 = vmatmul.bf16.gmra.mxu1 %v412_v52  ;;  %267 = vmatmul.bf16.gmra.mxu3 %v416_v53 }
  0x53   :  { %203 = vmatmul.bf16.gmra.mxu0 %v413_v54  ;;  %223 = vmatmul.bf16.gmra.mxu2 %v417_v55 }
  0x54   :  { %252 = vmatmul.bf16.gmra.mxu1 %v413_v54  ;;  %272 = vmatmul.bf16.gmra.mxu3 %v417_v55 }
  0xa0   :  { %v189_v59 = vpop.f32.mrf.mxu0 }
  0xa1   :  { %v190_v60 = vadd.f32 %v189_v59, %v593_v57  ;;  %v238_v61 = vpop.f32.mrf.mxu1 }
  0xa2   :  { %v239_v62 = vadd.f32 %v238_v61, %v595_v58 }
  0xa4   :  { %v278_v63 = vpack.c.bf16 %v239_v62, %v190_v60 }
  0xa6   :  { %294 = vst [vmem:[%s680_s3] sm:$0xff] %v278_v63  ;;  %v209_v0 = vpop.f32.mrf.mxu2 }
  0xa7   :  { %v210_v1 = vadd.f32 %v209_v0, %v593_v57  ;;  %v258_v2 = vpop.f32.mrf.mxu3 }
  0xa8   :  { %v259_v3 = vadd.f32 %v258_v2, %v595_v58  ;;  %v191_v4 = vpop.f32.mrf.mxu0 }
  0xa9   :  { %v192_v5 = vadd.f32 %v191_v4, %v593_v57  ;;  %v240_v6 = vpop.f32.mrf.mxu1 }
  0xaa   :  { %v286_v7 = vpack.c.bf16 %v259_v3, %v210_v1  ;;  %v241_v8 = vadd.f32 %v240_v6, %v595_v58 }
  0xac   :  { %302 = vst [vmem:[%s680_s3 + $0x40] sm:$0xff] %v286_v7  ;;  %v279_v9 = vpack.c.bf16 %v241_v8, %v192_v5 }
  0xae   :  { %295 = vst [vmem:[%s680_s3 + $0x8] sm:$0xff] %v279_v9  ;;  %v211_v10 = vpop.f32.mrf.mxu2 }
  0xaf   :  { %v212_v11 = vadd.f32 %v211_v10, %v593_v57  ;;  %v260_v12 = vpop.f32.mrf.mxu3 }
  0xb0   :  { %v261_v13 = vadd.f32 %v260_v12, %v595_v58  ;;  %v194_v14 = vpop.f32.mrf.mxu0 }
  0xb1   :  { %v195_v15 = vadd.f32 %v194_v14, %v593_v57  ;;  %v243_v16 = vpop.f32.mrf.mxu1 }
  0xb2   :  { %v287_v17 = vpack.c.bf16 %v261_v13, %v212_v11  ;;  %v244_v18 = vadd.f32 %v243_v16, %v595_v58 }
  0xb4   :  { %303 = vst [vmem:[%s680_s3 + $0x48] sm:$0xff] %v287_v17  ;;  %v280_v19 = vpack.c.bf16 %v244_v18, %v195_v15 }
  0xb6   :  { %296 = vst [vmem:[%s680_s3 + $0x10] sm:$0xff] %v280_v19  ;;  %v214_v20 = vpop.f32.mrf.mxu2 }
  0xb7   :  { %v215_v21 = vadd.f32 %v214_v20, %v593_v57  ;;  %v263_v22 = vpop.f32.mrf.mxu3 }
  0xb8   :  { %v264_v23 = vadd.f32 %v263_v22, %v595_v58  ;;  %v196_v24 = vpop.f32.mrf.mxu0 }
  0xb9   :  { %v197_v25 = vadd.f32 %v196_v24, %v593_v57  ;;  %v245_v26 = vpop.f32.mrf.mxu1 }
  0xba   :  { %v288_v27 = vpack.c.bf16 %v264_v23, %v215_v21  ;;  %v246_v28 = vadd.f32 %v245_v26, %v595_v58 }
  0xbc   :  { %304 = vst [vmem:[%s680_s3 + $0x50] sm:$0xff] %v288_v27  ;;  %v281_v29 = vpack.c.bf16 %v246_v28, %v197_v25 }
  0xbe   :  { %297 = vst [vmem:[%s680_s3 + $0x18] sm:$0xff] %v281_v29  ;;  %v216_v30 = vpop.f32.mrf.mxu2 }
  0xbf   :  { %v217_v31 = vadd.f32 %v216_v30, %v593_v57  ;;  %v265_v32 = vpop.f32.mrf.mxu3 }
  0xc0   :  { %v266_v33 = vadd.f32 %v265_v32, %v595_v58  ;;  %v199_v34 = vpop.f32.mrf.mxu0 }
  0xc1   :  { %v200_v35 = vadd.f32 %v199_v34, %v593_v57  ;;  %v248_v36 = vpop.f32.mrf.mxu1 }
  0xc2   :  { %v289_v37 = vpack.c.bf16 %v266_v33, %v217_v31  ;;  %v249_v38 = vadd.f32 %v248_v36, %v595_v58 }
  0xc4   :  { %305 = vst [vmem:[%s680_s3 + $0x58] sm:$0xff] %v289_v37  ;;  %v282_v39 = vpack.c.bf16 %v249_v38, %v200_v35 }
  0xc6   :  { %298 = vst [vmem:[%s680_s3 + $0x20] sm:$0xff] %v282_v39  ;;  %v219_v40 = vpop.f32.mrf.mxu2 }
  0xc7   :  { %v220_v41 = vadd.f32 %v219_v40, %v593_v57  ;;  %v268_v42 = vpop.f32.mrf.mxu3 }
  0xc8   :  { %v269_v43 = vadd.f32 %v268_v42, %v595_v58  ;;  %v201_v44 = vpop.f32.mrf.mxu0 }
  0xc9   :  { %v202_v45 = vadd.f32 %v201_v44, %v593_v57  ;;  %v250_v46 = vpop.f32.mrf.mxu1 }
  0xca   :  { %v290_v47 = vpack.c.bf16 %v269_v43, %v220_v41  ;;  %v251_v48 = vadd.f32 %v250_v46, %v595_v58 }
  0xcc   :  { %306 = vst [vmem:[%s680_s3 + $0x60] sm:$0xff] %v290_v47  ;;  %v283_v49 = vpack.c.bf16 %v251_v48, %v202_v45 }
  0xce   :  { %299 = vst [vmem:[%s680_s3 + $0x28] sm:$0xff] %v283_v49  ;;  %v221_v50 = vpop.f32.mrf.mxu2 }
  0xcf   :  { %v222_v51 = vadd.f32 %v221_v50, %v593_v57  ;;  %v270_v52 = vpop.f32.mrf.mxu3 }
  0xd0   :  { %v271_v53 = vadd.f32 %v270_v52, %v595_v58  ;;  %v204_v54 = vpop.f32.mrf.mxu0 }
  0xd1   :  { %v205_v55 = vadd.f32 %v204_v54, %v593_v57  ;;  %v253_v56 = vpop.f32.mrf.mxu1 }
  0xd2   :  { %v291_v59 = vpack.c.bf16 %v271_v53, %v222_v51  ;;  %v254_v60 = vadd.f32 %v253_v56, %v595_v58 }
  0xd4   :  { %307 = vst [vmem:[%s680_s3 + $0x68] sm:$0xff] %v291_v59  ;;  %v284_v61 = vpack.c.bf16 %v254_v60, %v205_v55 }
  0xd6   :  { %300 = vst [vmem:[%s680_s3 + $0x30] sm:$0xff] %v284_v61  ;;  %v224_v62 = vpop.f32.mrf.mxu2 }
  0xd7   :  { %v225_v63 = vadd.f32 %v224_v62, %v593_v57  ;;  %v273_v0 = vpop.f32.mrf.mxu3 }
  0xd8   :  { %v274_v1 = vadd.f32 %v273_v0, %v595_v58  ;;  %v206_v2 = vpop.f32.mrf.mxu0 }
  0xd9   :  { %v207_v3 = vadd.f32 %v206_v2, %v593_v57  ;;  %v255_v4 = vpop.f32.mrf.mxu1 }
  0xda   :  { %v292_v5 = vpack.c.bf16 %v274_v1, %v225_v63  ;;  %v256_v6 = vadd.f32 %v255_v4, %v595_v58 }
  0xdc   :  { %308 = vst [vmem:[%s680_s3 + $0x70] sm:$0xff] %v292_v5  ;;  %v285_v7 = vpack.c.bf16 %v256_v6, %v207_v3 }
  0xde   :  { %301 = vst [vmem:[%s680_s3 + $0x38] sm:$0xff] %v285_v7  ;;  %v226_v8 = vpop.f32.mrf.mxu2 }
  0xdf   :  { %v227_v9 = vadd.f32 %v226_v8, %v593_v57  ;;  %v275_v10 = vpop.f32.mrf.mxu3 }
  0xe0   :  { %v276_v11 = vadd.f32 %v275_v10, %v595_v58 }
  0xe2   :  { %v293_v12 = vpack.c.bf16 %v276_v11, %v227_v9 }
  0xe4   :  { %309 = vst [vmem:[%s680_s3 + $0x78] sm:$0xff] %v293_v12 }

// kernel: forward.12
= control target key start
LH: loop header
LB: loop body
LE: loop exit
PB: predicated region body
PF: predicated region fallthrough
CT: control target
= control target key end

     0   :  { %vm2743_vm0 = vcmask 7168   ;;  %v1903_v0 = vmov -1e+30   ;;  %vm216_vm1 = vcmask 1043456   ;;  %vm191_vm2 = vcmask 64512   ;;  %s2734_s0 = inlined_call_operand.<no memory space> [shape: s32[1,1], index: 0, kind: input, shape index: {}]   ;;  %s2735_s1 = inlined_call_operand.<no memory space> [shape: s32[1,1], index: 1, kind: input, shape index: {}]   ;;  %s2736_s3 = inlined_call_operand.vmem [shape: bf16[8,256], index: 3, kind: input, shape index: {}]   ;;  %s2737_s7 = inlined_call_operand.vmem [shape: bf16[128,128], index: 7, kind: input, shape index: {}]   ;;  %s2738_s8 = inlined_call_operand.vmem [shape: bf16[128,128], index: 8, kind: output, shape index: {}]   ;;  %s2739_s2 = inlined_call_operand.vmem [shape: f32[128,8], index: 2, kind: input, shape index: {}]   ;;  %s2740_s6 = inlined_call_operand.vmem [shape: s8[128,128], index: 6, kind: input, shape index: {}]   ;;  %s2741_s5 = inlined_call_operand.vmem [shape: bf16[128,256], index: 5, kind: input, shape index: {}]   ;;  %s2742_s4 = inlined_call_operand.vmem [shape: f32[1,256], index: 4, kind: input, shape index: {}]  }
   0x1   :  { %s1567_s29 = sshll.u32 %s2735_s1, 4  ;;  %p91_p0 = scmp.lt.s32.totalorder %s2735_s1, 0  ;;  %107 = vst.msk [vmem:[#allocation2] sm:$0xff] %vm2743_vm0, %v1903_v0  ;;  %v179_v1 = vld [vmem:[%s2736_s3] sm:$0xff]  ;;  %v156_v5 = vld [vmem:[%s2739_s2 + $0x8] sm:$0xff]  ;;  %v1904_v14 = vmov 0.0  }
   0x2   :  { %p77_p1 = scmp.lt.s32.totalorder %s1567_s29, 15  ;;  %108 = vst.msk [vmem:[#allocation2 + $0x8] sm:$0xff] %vm2743_vm0, %v1903_v0  ;;  %v187_v2 = vunpack.c.l.b16 %v179_v1  ;;  %v188_v3 = vunpack.c.h.b16 %v179_v1  ;;  %v155_v4 = vld [vmem:[%s2739_s2] sm:$0xff]  ;;  %v164_v7 = vld [vmem:[%s2739_s2 + $0x48] sm:$0xff]  ;;  %v157_v15 = vld [vmem:[%s2739_s2 + $0x10] sm:$0xff]  ;;  %p1587_p2 = scmp.le.s32.totalorder %s2734_s0, 0 }
   0x3   :  { %s2842_s1 = smov (!%p91_p0, %s2735_s1), 0  ;;  %109 = vst.msk [vmem:[#allocation2 + $0x10] sm:$0xff] %vm2743_vm0, %v1903_v0  ;;  %v163_v6 = vld [vmem:[%s2739_s2 + $0x40] sm:$0xff]  ;;  %v171_v12 = vpack.c.bf16 %v156_v5, %v155_v4  ;;  %v158_v16 = vld [vmem:[%s2739_s2 + $0x18] sm:$0xff]  ;;  %v165_v17 = vld [vmem:[%s2739_s2 + $0x50] sm:$0xff] }
   0x4   :  { %s2844_s29 = smov (!%p77_p1, %s1567_s29), 15  ;;  %110 = vst.msk [vmem:[#allocation2 + $0x18] sm:$0xff] %vm2743_vm0, %v1903_v0  ;;  %v189_v8 = vpack.c.b16 %v187_v2, %v187_v2  ;;  %v190_v9 = vpack.c.b16 %v188_v3, %v188_v3  ;;  %s1570_s21 = sshll.u32 %s2842_s1, 1  ;;  %v175_v13 = vpack.c.bf16 %v164_v7, %v163_v6  ;;  %v166_v18 = vld [vmem:[%s2739_s2 + $0x58] sm:$0xff]  ;;  %v172_v19 = vpack.c.bf16 %v158_v16, %v157_v15  ;;  %v159_v21 = vld [vmem:[%s2739_s2 + $0x20] sm:$0xff]  ;;  %v160_v22 = vld [vmem:[%s2739_s2 + $0x28] sm:$0xff] }
   0x5   :  { %111 = vst.msk [vmem:[#allocation2 + $0x20] sm:$0xff] %vm2743_vm0, %v1903_v0  ;;  %s1676_s22 = sshll.u32 %s2844_s29, 3  ;;  %s1984_s25 = scalar_lea.vmem %s2740_s6, %s1570_s21  ;;  %v176_v20 = vpack.c.bf16 %v166_v18, %v165_v17  ;;  %v167_v23 = vld [vmem:[%s2739_s2 + $0x60] sm:$0xff]  ;;  %v168_v24 = vld [vmem:[%s2739_s2 + $0x68] sm:$0xff]  ;;  %v173_v25 = vpack.c.bf16 %v160_v22, %v159_v21  ;;  %v161_v27 = vld [vmem:[%s2739_s2 + $0x30] sm:$0xff] }
   0x6   :  { %112 = vst.msk [vmem:[#allocation2 + $0x28] sm:$0xff] %vm2743_vm0, %v1903_v0  ;;  %v218_v10 = vsel %vm216_vm1, %v189_v8, 0  ;;  %v221_v11 = vsel %vm216_vm1, %v190_v9, 0  ;;  %s1990_s28 = scalar_lea.vmem %s2741_s5, %s1676_s22  ;;  %v177_v26 = vpack.c.bf16 %v168_v24, %v167_v23  ;;  %v162_v28 = vld [vmem:[%s2739_s2 + $0x38] sm:$0xff]  ;;  %v169_v29 = vld [vmem:[%s2739_s2 + $0x70] sm:$0xff] }
   0x7   :  { %113 = vst.msk [vmem:[#allocation2 + $0x30] sm:$0xff] %vm2743_vm0, %v1903_v0  ;;  %230 = vmatpush.bf16.msra.mxu0 %v218_v10  ;;  %1779 = vmatpush.bf16.msra.mxu2 %v218_v10  ;;  %v170_v30 = vld [vmem:[%s2739_s2 + $0x78] sm:$0xff]  ;;  %v174_v31 = vpack.c.bf16 %v162_v28, %v161_v27  ;;  %v180_v33 = vld [vmem:[%s2742_s4] sm:$0x3] }
   0x8   :  { %114 = vst.msk [vmem:[#allocation2 + $0x38] sm:$0xff] %vm2743_vm0, %v1903_v0  ;;  %279 = vmatpush.bf16.msra.mxu1 %v221_v11  ;;  %1780 = vmatpush.bf16.msra.mxu3 %v221_v11  ;;  %v178_v32 = vpack.c.bf16 %v170_v30, %v169_v29  ;;  %v2073_v34 = vperm.slane %v180_v33, 0  ;;  %v2075_v35 = vperm.slane %v180_v33, 1 }
   0x9   :  { %115 = vst.msk [vmem:[#allocation2 + $0x40] sm:$0xff] %vm2743_vm0, %v1903_v0 }
   0xa   :  { %116 = vst.msk [vmem:[#allocation2 + $0x48] sm:$0xff] %vm2743_vm0, %v1903_v0  ;;  %1571 = vmatmul.msk.bf16.vlgmr.msra.gmra.mxu0 %vm191_vm2, %v171_v12  ;;  %1575 = vmatmul.msk.bf16.vlgmr.msra.gmra.mxu2 %vm191_vm2, %v175_v13 }
   0xb   :  { %117 = vst.msk [vmem:[#allocation2 + $0x50] sm:$0xff] %vm2743_vm0, %v1903_v0  ;;  %1579 = vmatmul.msk.bf16.vlgmr.msra.gmra.mxu1 %vm191_vm2, %v171_v12  ;;  %1583 = vmatmul.msk.bf16.vlgmr.msra.gmra.mxu3 %vm191_vm2, %v175_v13 }
   0xc   :  { %118 = vst.msk [vmem:[#allocation2 + $0x58] sm:$0xff] %vm2743_vm0, %v1903_v0 }
   0xd   :  { %119 = vst.msk [vmem:[#allocation2 + $0x60] sm:$0xff] %vm2743_vm0, %v1903_v0 }
   0xe   :  { %120 = vst.msk [vmem:[#allocation2 + $0x68] sm:$0xff] %vm2743_vm0, %v1903_v0 }
   0xf   :  { %121 = vst.msk [vmem:[#allocation2 + $0x70] sm:$0xff] %vm2743_vm0, %v1903_v0 }
  0x10   :  { %122 = vst.msk [vmem:[#allocation2 + $0x78] sm:$0xff] %vm2743_vm0, %v1903_v0 }
  0x11   :  { %123 = vst.msk [vmem:[#allocation3] sm:$0xff] %vm2743_vm0, %v1904_v14 }
  0x12   :  { %124 = vst.msk [vmem:[#allocation3 + $0x8] sm:$0xff] %vm2743_vm0, %v1904_v14 }
  0x13   :  { %125 = vst.msk [vmem:[#allocation3 + $0x10] sm:$0xff] %vm2743_vm0, %v1904_v14 }
  0x14   :  { %126 = vst.msk [vmem:[#allocation3 + $0x18] sm:$0xff] %vm2743_vm0, %v1904_v14 }
  0x15   :  { %127 = vst.msk [vmem:[#allocation3 + $0x20] sm:$0xff] %vm2743_vm0, %v1904_v14 }
  0x16   :  { %128 = vst.msk [vmem:[#allocation3 + $0x28] sm:$0xff] %vm2743_vm0, %v1904_v14 }
  0x17   :  { %129 = vst.msk [vmem:[#allocation3 + $0x30] sm:$0xff] %vm2743_vm0, %v1904_v14 }
  0x18   :  { %130 = vst.msk [vmem:[#allocation3 + $0x38] sm:$0xff] %vm2743_vm0, %v1904_v14 }
  0x19   :  { %131 = vst.msk [vmem:[#allocation3 + $0x40] sm:$0xff] %vm2743_vm0, %v1904_v14 }
  0x1a   :  { %132 = vst.msk [vmem:[#allocation3 + $0x48] sm:$0xff] %vm2743_vm0, %v1904_v14  ;;  %1572 = vmatmul.msk.bf16.gmra.mxu0 %vm191_vm2, %v172_v19  ;;  %1576 = vmatmul.msk.bf16.gmra.mxu2 %vm191_vm2, %v176_v20 }
  0x1b   :  { %133 = vst.msk [vmem:[#allocation3 + $0x50] sm:$0xff] %vm2743_vm0, %v1904_v14  ;;  %1580 = vmatmul.msk.bf16.gmra.mxu1 %vm191_vm2, %v172_v19  ;;  %1584 = vmatmul.msk.bf16.gmra.mxu3 %vm191_vm2, %v176_v20 }
  0x1c   :  { %134 = vst.msk [vmem:[#allocation3 + $0x58] sm:$0xff] %vm2743_vm0, %v1904_v14 }
  0x1d   :  { %135 = vst.msk [vmem:[#allocation3 + $0x60] sm:$0xff] %vm2743_vm0, %v1904_v14 }
  0x1e   :  { %136 = vst.msk [vmem:[#allocation3 + $0x68] sm:$0xff] %vm2743_vm0, %v1904_v14 }
  0x1f   :  { %137 = vst.msk [vmem:[#allocation3 + $0x70] sm:$0xff] %vm2743_vm0, %v1904_v14 }
  0x20   :  { %138 = vst.msk [vmem:[#allocation3 + $0x78] sm:$0xff] %vm2743_vm0, %v1904_v14 }
  0x21   :  { %139 = vst [vmem:[#allocation4 + $0x30] sm:$0xff] %v1904_v14 }
  0x22   :  { %140 = vst [vmem:[#allocation4] sm:$0xff] %v1904_v14 }
  0x23   :  { %141 = vst [vmem:[#allocation4 + $0x58] sm:$0xff] %v1904_v14 }
  0x24   :  { %142 = vst [vmem:[#allocation4 + $0x18] sm:$0xff] %v1904_v14 }
  0x25   :  { %143 = vst [vmem:[#allocation4 + $0x50] sm:$0xff] %v1904_v14 }
  0x26   :  { %144 = vst [vmem:[#allocation4 + $0x68] sm:$0xff] %v1904_v14 }
  0x27   :  { %145 = vst [vmem:[#allocation4 + $0x8] sm:$0xff] %v1904_v14 }
  0x28   :  { %146 = vst [vmem:[#allocation4 + $0x48] sm:$0xff] %v1904_v14 }
  0x29   :  { %147 = vst [vmem:[#allocation4 + $0x40] sm:$0xff] %v1904_v14 }
  0x2a   :  { %148 = vst [vmem:[#allocation4 + $0x20] sm:$0xff] %v1904_v14  ;;  %1573 = vmatmul.msk.bf16.gmra.mxu0 %vm191_vm2, %v173_v25  ;;  %1577 = vmatmul.msk.bf16.gmra.mxu2 %vm191_vm2, %v177_v26 }
  0x2b   :  { %149 = vst [vmem:[#allocation4 + $0x10] sm:$0xff] %v1904_v14  ;;  %1581 = vmatmul.msk.bf16.gmra.mxu1 %vm191_vm2, %v173_v25  ;;  %1585 = vmatmul.msk.bf16.gmra.mxu3 %vm191_vm2, %v177_v26 }
  0x2c   :  { %150 = vst [vmem:[#allocation4 + $0x38] sm:$0xff] %v1904_v14 }
  0x2d   :  { %151 = vst [vmem:[#allocation4 + $0x60] sm:$0xff] %v1904_v14 }
  0x2e   :  { %152 = vst [vmem:[#allocation4 + $0x70] sm:$0xff] %v1904_v14 }
  0x2f   :  { %153 = vst [vmem:[#allocation4 + $0x78] sm:$0xff] %v1904_v14 }
  0x30   :  { %154 = vst [vmem:[#allocation4 + $0x28] sm:$0xff] %v1904_v14 }
  0x3a   :  { %1574 = vmatmul.msk.bf16.gmra.mxu0 %vm191_vm2, %v174_v31  ;;  %1578 = vmatmul.msk.bf16.gmra.mxu2 %vm191_vm2, %v178_v32 }
  0x3b   :  { %1582 = vmatmul.msk.bf16.gmra.mxu1 %vm191_vm2, %v174_v31  ;;  %1586 = vmatmul.msk.bf16.gmra.mxu3 %vm191_vm2, %v178_v32 }
  0x87   :  { %v232_v36 = vpop.f32.mrf.mxu0 }
  0x88   :  { %v233_v37 = vadd.f32 %v232_v36, %v2073_v34  ;;  %v281_v38 = vpop.f32.mrf.mxu1 }
  0x89   :  { %v282_v39 = vadd.f32 %v281_v38, %v2075_v35 }
  0x8a   :  { %321 = vst [vmem:[#allocation5 + $0xa8] sm:$0xff] %v233_v37 }
  0x8b   :  { %322 = vst [vmem:[#allocation5 + $0x68] sm:$0xff] %v282_v39 }
  0x8d   :  { %v252_v40 = vpop.f32.mrf.mxu2 }
  0x8e   :  { %v253_v41 = vadd.f32 %v252_v40, %v2073_v34  ;;  %v301_v42 = vpop.f32.mrf.mxu3 }
  0x8f   :  { %v302_v43 = vadd.f32 %v301_v42, %v2075_v35  ;;  %v234_v44 = vpop.f32.mrf.mxu0 }
  0x90   :  { %337 = vst [vmem:[#allocation5 + $0xb8] sm:$0xff] %v253_v41  ;;  %v235_v45 = vadd.f32 %v234_v44, %v2073_v34  ;;  %v283_v46 = vpop.f32.mrf.mxu1 }
  0x91   :  { %338 = vst [vmem:[#allocation5 + $0xd0] sm:$0xff] %v302_v43  ;;  %v284_v47 = vadd.f32 %v283_v46, %v2075_v35 }
  0x92   :  { %323 = vst [vmem:[#allocation5 + $0x10] sm:$0xff] %v235_v45 }
  0x93   :  { %324 = vst [vmem:[#allocation5 + $0xc0] sm:$0xff] %v284_v47 }
  0x95   :  { %v254_v48 = vpop.f32.mrf.mxu2 }
  0x96   :  { %v255_v49 = vadd.f32 %v254_v48, %v2073_v34  ;;  %v303_v50 = vpop.f32.mrf.mxu3 }
  0x97   :  { %v304_v51 = vadd.f32 %v303_v50, %v2075_v35  ;;  %v237_v52 = vpop.f32.mrf.mxu0 }
  0x98   :  { %339 = vst [vmem:[#allocation5 + $0xd8] sm:$0xff] %v255_v49  ;;  %v238_v53 = vadd.f32 %v237_v52, %v2073_v34  ;;  %v286_v54 = vpop.f32.mrf.mxu1 }
  0x99   :  { %340 = vst [vmem:[#allocation5 + $0x58] sm:$0xff] %v304_v51  ;;  %v287_v55 = vadd.f32 %v286_v54, %v2075_v35 }
  0x9a   :  { %325 = vst [vmem:[#allocation5 + $0xc8] sm:$0xff] %v238_v53 }
  0x9b   :  { %326 = vst [vmem:[#allocation5 + $0xb0] sm:$0xff] %v287_v55 }
  0x9d   :  { %v257_v56 = vpop.f32.mrf.mxu2 }
  0x9e   :  { %v258_v57 = vadd.f32 %v257_v56, %v2073_v34  ;;  %v306_v58 = vpop.f32.mrf.mxu3 }
  0x9f   :  { %v307_v59 = vadd.f32 %v306_v58, %v2075_v35  ;;  %v239_v60 = vpop.f32.mrf.mxu0 }
  0xa0   :  { %341 = vst [vmem:[#allocation5 + $0x80] sm:$0xff] %v258_v57  ;;  %v240_v61 = vadd.f32 %v239_v60, %v2073_v34  ;;  %v288_v62 = vpop.f32.mrf.mxu1 }
  0xa1   :  { %342 = vst [vmem:[#allocation5 + $0x40] sm:$0xff] %v307_v59  ;;  %v289_v63 = vadd.f32 %v288_v62, %v2075_v35 }
  0xa2   :  { %327 = vst [vmem:[#allocation5 + $0x70] sm:$0xff] %v240_v61 }
  0xa3   :  { %328 = vst [vmem:[#allocation5 + $0x38] sm:$0xff] %v289_v63 }
  0xa5   :  { %v259_v0 = vpop.f32.mrf.mxu2 }
  0xa6   :  { %v260_v1 = vadd.f32 %v259_v0, %v2073_v34  ;;  %v308_v2 = vpop.f32.mrf.mxu3 }
  0xa7   :  { %v309_v3 = vadd.f32 %v308_v2, %v2075_v35  ;;  %v242_v4 = vpop.f32.mrf.mxu0 }
  0xa8   :  { %343 = vst [vmem:[#allocation5 + $0x28] sm:$0xff] %v260_v1  ;;  %v243_v5 = vadd.f32 %v242_v4, %v2073_v34  ;;  %v291_v6 = vpop.f32.mrf.mxu1 }
  0xa9   :  { %344 = vst [vmem:[#allocation5] sm:$0xff] %v309_v3  ;;  %v292_v7 = vadd.f32 %v291_v6, %v2075_v35 }
  0xaa   :  { %329 = vst [vmem:[#allocation5 + $0x48] sm:$0xff] %v243_v5 }
  0xab   :  { %330 = vst [vmem:[#allocation5 + $0xf8] sm:$0xff] %v292_v7 }
  0xad   :  { %v262_v8 = vpop.f32.mrf.mxu2 }
  0xae   :  { %v263_v9 = vadd.f32 %v262_v8, %v2073_v34  ;;  %v311_v10 = vpop.f32.mrf.mxu3 }
  0xaf   :  { %v312_v11 = vadd.f32 %v311_v10, %v2075_v35  ;;  %v244_v12 = vpop.f32.mrf.mxu0 }
  0xb0   :  { %345 = vst [vmem:[#allocation5 + $0x90] sm:$0xff] %v263_v9  ;;  %v245_v13 = vadd.f32 %v244_v12, %v2073_v34  ;;  %v293_v14 = vpop.f32.mrf.mxu1 }
  0xb1   :  { %346 = vst [vmem:[#allocation5 + $0xe8] sm:$0xff] %v312_v11  ;;  %v294_v15 = vadd.f32 %v293_v14, %v2075_v35 }
  0xb2   :  { %331 = vst [vmem:[#allocation5 + $0x78] sm:$0xff] %v245_v13 }
  0xb3   :  { %332 = vst [vmem:[#allocation5 + $0x88] sm:$0xff] %v294_v15 }
  0xb5   :  { %v264_v16 = vpop.f32.mrf.mxu2 }
  0xb6   :  { %v265_v17 = vadd.f32 %v264_v16, %v2073_v34  ;;  %v313_v18 = vpop.f32.mrf.mxu3 }
  0xb7   :  { %v314_v19 = vadd.f32 %v313_v18, %v2075_v35  ;;  %v247_v20 = vpop.f32.mrf.mxu0 }
  0xb8   :  { %347 = vst [vmem:[#allocation5 + $0xa0] sm:$0xff] %v265_v17  ;;  %v248_v21 = vadd.f32 %v247_v20, %v2073_v34  ;;  %v296_v22 = vpop.f32.mrf.mxu1 }
  0xb9   :  { %348 = vst [vmem:[#allocation5 + $0x20] sm:$0xff] %v314_v19  ;;  %v297_v23 = vadd.f32 %v296_v22, %v2075_v35 }
  0xba   :  { %333 = vst [vmem:[#allocation5 + $0xf0] sm:$0xff] %v248_v21 }
  0xbb   :  { %334 = vst [vmem:[#allocation5 + $0x18] sm:$0xff] %v297_v23 }
  0xbd   :  { %v267_v24 = vpop.f32.mrf.mxu2 }
  0xbe   :  { %v268_v25 = vadd.f32 %v267_v24, %v2073_v34  ;;  %v316_v26 = vpop.f32.mrf.mxu3 }
  0xbf   :  { %v317_v27 = vadd.f32 %v316_v26, %v2075_v35  ;;  %v249_v28 = vpop.f32.mrf.mxu0 }
  0xc0   :  { %349 = vst [vmem:[#allocation5 + $0x8] sm:$0xff] %v268_v25  ;;  %v250_v29 = vadd.f32 %v249_v28, %v2073_v34  ;;  %v298_v30 = vpop.f32.mrf.mxu1 }
  0xc1   :  { %350 = vst [vmem:[#allocation5 + $0xe0] sm:$0xff] %v317_v27  ;;  %v299_v31 = vadd.f32 %v298_v30, %v2075_v35 }
  0xc2   :  { %335 = vst [vmem:[#allocation5 + $0x30] sm:$0xff] %v250_v29 }
  0xc3   :  { %336 = vst [vmem:[#allocation5 + $0x50] sm:$0xff] %v299_v31 }
  0xc5   :  { %v269_v32 = vpop.f32.mrf.mxu2  ;;  %360 = sbr.rel (%p1587_p2) target bundleno = 876 (0x36c), region = 33 }
  0xc6   :  { %v270_v33 = vadd.f32 %v269_v32, %v2073_v34  ;;  %v318_v36 = vpop.f32.mrf.mxu3 }
  0xc7   :  { %v319_v37 = vadd.f32 %v318_v36, %v2075_v35 }
  0xc8   :  { %351 = vst [vmem:[#allocation5 + $0x60] sm:$0xff] %v270_v33 }
  0xc9   :  { %352 = vst [vmem:[#allocation5 + $0x98] sm:$0xff] %v319_v37 }
  0xca   :  { %v1618_v38 = vld [vmem:[%s1990_s28 + $0x70] sm:$0xf]  ;;  %v1684_v34 = vld [vmem:[%s1990_s28 + $0x74] sm:$0xf0]  ;;  %v1614_v35 = vld [vmem:[%s1990_s28 + $0x60] sm:$0xf] }
  0xcb   :  { %v1619_v39 = vor.u32 %v1684_v34, %v1618_v38  ;;  %v1683_v40 = vld [vmem:[%s1990_s28 + $0x64] sm:$0xf0]  ;;  %v1610_v42 = vld [vmem:[%s1990_s28 + $0x50] sm:$0xf]  ;;  %v1682_v43 = vld [vmem:[%s1990_s28 + $0x54] sm:$0xf0] }
  0xcc   :  { %v1615_v41 = vor.u32 %v1683_v40, %v1614_v35  ;;  %v1611_v44 = vor.u32 %v1682_v43, %v1610_v42  ;;  %v1606_v45 = vld [vmem:[%s1990_s28 + $0x40] sm:$0xf]  ;;  %v1681_v46 = vld [vmem:[%s1990_s28 + $0x44] sm:$0xf0]  ;;  %v1602_v48 = vld [vmem:[%s1990_s28 + $0x30] sm:$0xf] }
  0xcd   :  { %465 = vmatpush.bf16.xpose.msra.mxu0 %v1619_v39  ;;  %1781 = vmatpush.bf16.xpose.msra.mxu2 %v1619_v39  ;;  %v1607_v47 = vor.u32 %v1681_v46, %v1606_v45  ;;  %v1680_v49 = vld [vmem:[%s1990_s28 + $0x34] sm:$0xf0]  ;;  %v1598_v51 = vld [vmem:[%s1990_s28 + $0x20] sm:$0xf]  ;;  %v1679_v52 = vld [vmem:[%s1990_s28 + $0x24] sm:$0xf0] }
  0xce   :  { %v1603_v50 = vor.u32 %v1680_v49, %v1602_v48  ;;  %v1599_v53 = vor.u32 %v1679_v52, %v1598_v51  ;;  %v1594_v54 = vld [vmem:[%s1990_s28 + $0x10] sm:$0xf]  ;;  %v1678_v55 = vld [vmem:[%s1990_s28 + $0x14] sm:$0xf0]  ;;  %v1590_v57 = vld [vmem:[%s1990_s28] sm:$0xf] }
  0xcf   :  { %v1595_v56 = vor.u32 %v1678_v55, %v1594_v54  ;;  %v1677_v58 = vld [vmem:[%s1990_s28 + $0x4] sm:$0xf0]  ;;  %v362_v61 = vld [vmem:[#allocation5 + $0x10] sm:$0xff]  ;;  %v369_v4 = vld [vmem:[#allocation5 + $0xb8] sm:$0xff]  ;;  %v1905_v20 = vmov 0  }
  0xd0   :  { %v1591_v59 = vor.u32 %v1677_v58, %v1590_v57  ;;  %v361_v60 = vld [vmem:[#allocation5 + $0xa8] sm:$0xff]  ;;  %v367_v62 = vld [vmem:[#allocation5 + $0xf0] sm:$0xff]  ;;  %v370_v5 = vld [vmem:[#allocation5 + $0xd8] sm:$0xff]  ;;  %1801 = vset.pattern.permute.xlu1 %v1905_v20  ;;  %1802 = vset.pattern.permute.xlu2 %v1905_v20 }
  0xd1   :  { %v368_v63 = vld [vmem:[#allocation5 + $0x30] sm:$0xff]  ;;  %v377_v0 = vpack.c.bf16 %v362_v61, %v361_v60  ;;  %v363_v2 = vld [vmem:[#allocation5 + $0xc8] sm:$0xff]  ;;  %v381_v7 = vpack.c.bf16 %v370_v5, %v369_v4  ;;  %v366_v9 = vld [vmem:[#allocation5 + $0x78] sm:$0xff]  ;;  %1803 = vset.pattern.permute.xlu0 %v1905_v20 }
  0xd2   :  { %v380_v1 = vpack.c.bf16 %v368_v63, %v367_v62  ;;  %v364_v3 = vld [vmem:[#allocation5 + $0x70] sm:$0xff]  ;;  %v365_v8 = vld [vmem:[#allocation5 + $0x48] sm:$0xff]  ;;  %v371_v10 = vld [vmem:[#allocation5 + $0x80] sm:$0xff]  ;;  %v2771_v62 = vmov 0 }
  0xd3   :  { %v378_v6 = vpack.c.bf16 %v364_v3, %v363_v2  ;;  %v372_v11 = vld [vmem:[#allocation5 + $0x28] sm:$0xff]  ;;  %v379_v12 = vpack.c.bf16 %v366_v9, %v365_v8  ;;  %v373_v14 = vld [vmem:[#allocation5 + $0x90] sm:$0xff]  ;;  %v374_v15 = vld [vmem:[#allocation5 + $0xa0] sm:$0xff] }
  0xd4   :  { %v382_v13 = vpack.c.bf16 %v372_v11, %v371_v10  ;;  %v383_v16 = vpack.c.bf16 %v374_v15, %v373_v14  ;;  %v375_v17 = vld [vmem:[#allocation5 + $0x8] sm:$0xff]  ;;  %v376_v18 = vld [vmem:[#allocation5 + $0x60] sm:$0xff]  ;;  %v538_v40 = vld [vmem:[%s1984_s25 + $0x10] sm:$0x3] }
  0xd5   :  { %466 = vmatpush.bf16.xpose.msra.mxu0 %v1615_v41  ;;  %1782 = vmatpush.bf16.xpose.msra.mxu2 %v1615_v41  ;;  %v384_v19 = vpack.c.bf16 %v376_v18, %v375_v17  ;;  %v530_v21 = vld [vmem:[%s1984_s25] sm:$0x3]  ;;  %v536_v23 = vld [vmem:[%s1984_s25 + $0xc] sm:$0x3]  ;;  %v537_v29 = vld [vmem:[%s1984_s25 + $0xe] sm:$0x3]  ;;  %vm554_vm10 = vnez %v538_v40 }
  0xd6   :  { %vm546_vm3 = vnez %v530_v21  ;;  %vm552_vm4 = vnez %v536_v23  ;;  %v531_v31 = vld [vmem:[%s1984_s25 + $0x2] sm:$0x3]  ;;  %vm553_vm6 = vnez %v537_v29  ;;  %v532_v38 = vld [vmem:[%s1984_s25 + $0x4] sm:$0x3]  ;;  %v570_v49 = vsel %vm554_vm10, 16843009, %v1905_v20 }
  0xd7   :  { %v562_v22 = vsel %vm546_vm3, 16843009, %v1905_v20  ;;  %v568_v28 = vsel %vm552_vm4, 16843009, %v1905_v20  ;;  %vm547_vm7 = vnez %v531_v31  ;;  %v569_v37 = vsel %vm553_vm6, 16843009, %v1905_v20 }
  0xd8   :  { %v578_v24 = vunpack.c.0.s8 %v562_v22  ;;  %v584_v32 = vunpack.c.0.s8 %v568_v28  ;;  %v563_v35 = vsel %vm547_vm7, 16843009, %v1905_v20  ;;  %v585_v41 = vunpack.c.0.s8 %v569_v37  ;;  %v539_v55 = vld [vmem:[%s1984_s25 + $0x12] sm:$0x3]  ;;  %v535_v9 = vld [vmem:[%s1984_s25 + $0xa] sm:$0x3] }
  0xd9   :  { %vm548_vm9 = vnez %v532_v38  ;;  %v579_v43 = vunpack.c.0.s8 %v563_v35  ;;  %vm555_vm15 = vnez %v539_v55  ;;  %vm551_vm4 = vnez %v535_v9  ;;  %v542_v35 = vld [vmem:[%s1984_s25 + $0x18] sm:$0x3] }
  0xda   :  { %vm2134_vm5 = vcmp.ne.s32.totalorder %v578_v24, 0  ;;  %vm2148_vm8 = vcmp.ne.s32.totalorder %v584_v32, 0  ;;  %vm2160_vm11 = vcmp.ne.s32.totalorder %v585_v41, 0  ;;  %v571_v2 = vsel %vm555_vm15, 16843009, %v1905_v20 }
  0xdb   :  { %vm2165_vm12 = vcmp.ne.s32.totalorder %v579_v43, 0  ;;  %v2792_v9 = vmov 0 }
  0xdd   :  { %467 = vmatpush.bf16.xpose.msra.mxu0 %v1611_v44  ;;  %1783 = vmatpush.bf16.xpose.msra.mxu2 %v1611_v44  ;;  %v564_v44 = vsel %vm548_vm9, 16843009, %v1905_v20 }
  0xde   :  { %v580_v52 = vunpack.c.0.s8 %v564_v44 }
  0xe0   :  { %vm2182_vm14 = vcmp.ne.s32.totalorder %v580_v52, 0 }
  0xe5   :  { %468 = vmatpush.bf16.xpose.msra.mxu0 %v1607_v47  ;;  %1784 = vmatpush.bf16.xpose.msra.mxu2 %v1607_v47 }
  0xed   :  { %469 = vmatpush.bf16.xpose.msra.mxu0 %v1603_v50  ;;  %1785 = vmatpush.bf16.xpose.msra.mxu2 %v1603_v50 }
  0xf5   :  { %470 = vmatpush.bf16.xpose.msra.mxu0 %v1599_v53  ;;  %1786 = vmatpush.bf16.xpose.msra.mxu2 %v1599_v53  ;;  %v533_v53 = vld [vmem:[%s1984_s25 + $0x6] sm:$0x3] }
  0xf6   :  { %vm549_vm13 = vnez %v533_v53 }
  0xf7   :  { %v565_v63 = vsel %vm549_vm13, 16843009, %v1905_v20 }
  0xf8   :  { %v581_v8 = vunpack.c.0.s8 %v565_v63 }
  0xfa   :  { %vm2209_vm7 = vcmp.ne.s32.totalorder %v581_v8, 0 }
  0xfd   :  { %471 = vmatpush.bf16.xpose.msra.mxu0 %v1595_v56  ;;  %1787 = vmatpush.bf16.xpose.msra.mxu2 %v1595_v56  ;;  %v586_v56 = vunpack.c.0.s8 %v570_v49 }
  0xff   :  { %vm2186_vm1 = vcmp.ne.s32.totalorder %v586_v56, 0 }
 0x100   :  { %v2772_v62 = vsel %vm2186_vm1, 4294967295, %v2771_v62 }
 0x101   :  { %2773 = vst [vmem:[#allocation9_spill] sm:$0xff] %v2772_v62 }
 0x105   :  { %472 = vmatpush.bf16.xpose.msra.mxu0 %v1591_v59  ;;  %1788 = vmatpush.bf16.xpose.msra.mxu2 %v1591_v59  ;;  %v534_v59 = vld [vmem:[%s1984_s25 + $0x8] sm:$0x3] }
 0x106   :  { %vm550_vm2 = vnez %v534_v59  ;;  %v544_v59 = vld [vmem:[%s1984_s25 + $0x1c] sm:$0x3] }
 0x107   :  { %v566_v5 = vsel %vm550_vm2, 16843009, %v1905_v20  ;;  %vm558_vm2 = vnez %v542_v35  ;;  %v2326_v35 = vld [vmem:[#allocation2 + $0x8] sm:$0xff] }
 0x108   :  { %v582_v10 = vunpack.c.0.s8 %v566_v5 }
 0x10a   :  { %vm2214_vm9 = vcmp.ne.s32.totalorder %v582_v10, 0 }
 0x10c   :  { %473 = vmatmul.bf16.vlgmr.msra.gmra.mxu0 %v377_v0  ;;  %488 = vmatmul.bf16.vlgmr.msra.gmra.mxu2 %v380_v1 }
 0x11c   :  { %478 = vmatmul.bf16.gmra.mxu0 %v378_v6  ;;  %493 = vmatmul.bf16.gmra.mxu2 %v381_v7  ;;  %v540_v6 = vld [vmem:[%s1984_s25 + $0x14] sm:$0x3]  ;;  %v587_v7 = vunpack.c.0.s8 %v571_v2 }
 0x11d   :  { %vm556_vm3 = vnez %v540_v6  ;;  %v545_v6 = vld [vmem:[%s1984_s25 + $0x1e] sm:$0x3] }
 0x11e   :  { %vm2205_vm6 = vcmp.ne.s32.totalorder %v587_v7, 0 }
 0x12c   :  { %483 = vmatmul.bf16.gmra.mxu0 %v379_v12  ;;  %498 = vmatmul.bf16.gmra.mxu2 %v382_v13  ;;  %v2774_v13 = vmov 0 }
 0x12d   :  { %v2775_v13 = vsel %vm2205_vm6, 4294967295, %v2774_v13 }
 0x12e   :  { %2776 = vst [vmem:[#allocation10_spill] sm:$0xff] %v2775_v13  ;;  %v1650_v13 = vld [vmem:[%s1990_s28 + $0x74] sm:$0xf] }
 0x13c   :  { %503 = vmatmul.bf16.gmra.mxu2 %v383_v16  ;;  %v572_v16 = vsel %vm556_vm3, 16843009, %v1905_v20 }
 0x13d   :  { %v588_v24 = vunpack.c.0.s8 %v572_v16 }
 0x13f   :  { %vm2235_vm13 = vcmp.ne.s32.totalorder %v588_v24, 0 }
 0x14c   :  { %508 = vmatmul.bf16.gmra.mxu2 %v384_v19  ;;  %v567_v19 = vsel %vm551_vm4, 16843009, %v1905_v20 }
 0x14d   :  { %v583_v28 = vunpack.c.0.s8 %v567_v19 }
 0x14f   :  { %vm2239_vm15 = vcmp.ne.s32.totalorder %v583_v28, 0  ;;  %v2315_v28 = vld [vmem:[#allocation2 + $0x30] sm:$0xff] }
 0x189   :  { %v474_v25 = vpop.f32.mrf.mxu0 }
 0x18a   :  { %v514_v27 = vmul.f32 0.088388346, %v474_v25  ;;  %v541_v25 = vld [vmem:[%s1984_s25 + $0x16] sm:$0x3] }
 0x18b   :  { %vm557_vm10 = vnez %v541_v25 }
 0x18c   :  { %v2142_v30 = vsel %vm2134_vm5, %v514_v27, -1e+30  ;;  %v573_v37 = vsel %vm557_vm10, 16843009, %v1905_v20 }
 0x18d   :  { %642 = vmax.xlane.f32.xlu0 %v2142_v30  ;;  %v589_v41 = vunpack.c.0.s8 %v573_v37  ;;  %v2324_v37 = vld [vmem:[#allocation2 + $0x38] sm:$0xff] }
 0x18f   :  { %v489_v33 = vpop.f32.mrf.mxu2  ;;  %vm2256_vm3 = vcmp.ne.s32.totalorder %v589_v41, 0 }
 0x190   :  { %v520_v36 = vmul.f32 0.088388346, %v489_v33 }
 0x191   :  { %v476_v34 = vpop.f32.mrf.mxu0 }
 0x192   :  { %v2156_v42 = vsel %vm2148_vm8, %v520_v36, -1e+30  ;;  %v515_v47 = vmul.f32 0.088388346, %v476_v34 }
 0x194   :  { %v2178_v58 = vsel %vm2165_vm12, %v515_v47, -1e+30 }
 0x195   :  { %654 = vmax.xlane.f32.xlu0 %v2156_v42 }
 0x197   :  { %v491_v45 = vpop.f32.mrf.mxu2 }
 0x198   :  { %v521_v48 = vmul.f32 0.088388346, %v491_v45  ;;  %v574_v45 = vsel %vm558_vm2, 16843009, %v1905_v20  ;;  %vm560_vm2 = vnez %v544_v59 }
 0x199   :  { %v479_v50 = vpop.f32.mrf.mxu0  ;;  %v590_v49 = vunpack.c.0.s8 %v574_v45 }
 0x19a   :  { %v2172_v54 = vsel %vm2160_vm11, %v521_v48, -1e+30  ;;  %v516_v57 = vmul.f32 0.088388346, %v479_v50  ;;  %v543_v48 = vld [vmem:[%s1984_s25 + $0x1a] sm:$0x3] }
 0x19b   :  { %656 = vmax.xlane.f32.xlu1 %v2172_v54  ;;  %vm559_vm4 = vnez %v543_v48  ;;  %vm2266_vm10 = vcmp.ne.s32.totalorder %v590_v49, 0  ;;  %v2341_v48 = vld [vmem:[#allocation2 + $0x40] sm:$0xff]  ;;  %v2343_v49 = vld [vmem:[#allocation2 + $0x10] sm:$0xff] }
 0x19c   :  { %v2193_v1 = vsel %vm2182_vm14, %v516_v57, -1e+30  ;;  %v575_v56 = vsel %vm559_vm4, 16843009, %v1905_v20  ;;  %vm561_vm4 = vnez %v545_v6 }
 0x19d   :  { %644 = vmax.xlane.f32.xlu0 %v2178_v58 }
 0x19f   :  { %v494_v61 = vpop.f32.mrf.mxu2 }
 0x1a0   :  { %v522_v0 = vmul.f32 0.088388346, %v494_v61  ;;  %v591_v61 = vunpack.c.0.s8 %v575_v56 }
 0x1a1   :  { %v481_v3 = vpop.f32.mrf.mxu0 }
 0x1a2   :  { %v2198_v4 = vsel %vm2186_vm1, %v522_v0, -1e+30  ;;  %v517_v11 = vmul.f32 0.088388346, %v481_v3  ;;  %vm2277_vm0 = vcmp.ne.s32.totalorder %v591_v61, 0 }
 0x1a3   :  { %658 = vmax.xlane.f32.xlu2 %v2198_v4  ;;  %646 = vmax.xlane.f32.xlu1 %v2193_v1  ;;  %v576_v3 = vsel %vm560_vm2, 16843009, %v1905_v20 }
 0x1a4   :  { %v2225_v23 = vsel %vm2209_vm7, %v517_v11, -1e+30  ;;  %v592_v7 = vunpack.c.0.s8 %v576_v3  ;;  %v577_v11 = vsel %vm561_vm4, 16843009, %v1905_v20  ;;  %v2307_v20 = vld [vmem:[#allocation2] sm:$0xff]  ;;  %vm2798_vm4 = vcmask 7168  }
 0x1a7   :  { %v496_v12 = vpop.f32.mrf.mxu2 }
 0x1a8   :  { %v523_v15 = vmul.f32 0.088388346, %v496_v12 }
 0x1a9   :  { %v484_v17 = vpop.f32.mrf.mxu0 }
 0x1aa   :  { %v518_v21 = vmul.f32 0.088388346, %v484_v17  ;;  %v2221_v22 = vsel %vm2205_vm6, %v523_v15, -1e+30  ;;  %vm2288_vm6 = vcmp.ne.s32.totalorder %v592_v7, 0  ;;  %v593_v15 = vunpack.c.0.s8 %v577_v11  ;;  %v2360_v7 = vld [vmem:[#allocation2 + $0x20] sm:$0xff] }
 0x1ab   :  { %2781 = vst [vmem:[#allocation11_spill] sm:$0xff] %v2221_v22  ;;  %660 = vmax.xlane.f32.xlu0 %v2221_v22  ;;  %648 = vmax.xlane.f32.xlu1 %v2225_v23  ;;  %v2793_v9 = vsel %vm2288_vm6, 4294967295, %v2792_v9  ;;  %v2795_v17 = vmov 0 }
 0x1ac   :  { %v2232_v27 = vsel %vm2214_vm9, %v518_v21, -1e+30  ;;  %2794 = vst [vmem:[#allocation12_spill] sm:$0xff] %v2793_v9  ;;  %vm2298_vm2 = vcmp.ne.s32.totalorder %v593_v15, 0  ;;  %v1691_v9 = vld [vmem:[%s1990_s28 + $0x68] sm:$0xf0] }
 0x1ad   :  { %650 = vmax.xlane.f32.xlu2 %v2232_v27  ;;  %v2796_v17 = vsel %vm2298_vm2, 4294967295, %v2795_v17 }
 0x1ae   :  { %2797 = vst [vmem:[#allocation13_spill] sm:$0xff] %v2796_v17  ;;  %v1692_v17 = vld [vmem:[%s1990_s28 + $0x78] sm:$0xf0] }
 0x1af   :  { %v499_v29 = vpop.f32.mrf.mxu2 }
 0x1b0   :  { %v524_v32 = vmul.f32 0.088388346, %v499_v29 }
 0x1b1   :  { %v486_v33 = vpop.f32.mrf.mxu0 }
 0x1b2   :  { %v519_v38 = vmul.f32 0.088388346, %v486_v33  ;;  %v2246_v34 = vsel %vm2235_vm13, %v524_v32, -1e+30 }
 0x1b3   :  { %662 = vmax.xlane.f32.xlu1 %v2246_v34 }
 0x1b4   :  { %v2252_v40 = vsel %vm2239_vm15, %v519_v38, -1e+30 }
 0x1b5   :  { %652 = vmax.xlane.f32.xlu2 %v2252_v40 }
 0x1b7   :  { %v501_v43 = vpop.f32.mrf.mxu2 }
 0x1b8   :  { %v525_v44 = vmul.f32 0.088388346, %v501_v43 }
 0x1ba   :  { %v2263_v50 = vsel %vm2256_vm3, %v525_v44, -1e+30 }
 0x1bd   :  { %664 = vmax.xlane.f32.xlu2 %v2263_v50 }
 0x1bf   :  { %v504_v52 = vpop.f32.mrf.mxu2 }
 0x1c0   :  { %v526_v55 = vmul.f32 0.088388346, %v504_v52 }
 0x1c2   :  { %v2273_v57 = vsel %vm2266_vm10, %v526_v55, -1e+30 }
 0x1c3   :  { %666 = vmax.xlane.f32.xlu0 %v2273_v57 }
 0x1c7   :  { %v506_v63 = vpop.f32.mrf.mxu2 }
 0x1c8   :  { %v527_v2 = vmul.f32 0.088388346, %v506_v63  ;;  %v2358_v63 = vld [vmem:[#allocation2 + $0x48] sm:$0xff] }
 0x1ca   :  { %v2284_v5 = vsel %vm2277_vm0, %v527_v2, -1e+30  ;;  %v629_v2 = vld [vmem:[#allocation2 + $0x18] sm:$0xff] }
 0x1cb   :  { %668 = vmax.xlane.f32.xlu1 %v2284_v5 }
 0x1cf   :  { %v509_v8 = vpop.f32.mrf.mxu2 }
 0x1d0   :  { %v528_v10 = vmul.f32 0.088388346, %v509_v8 }
 0x1d2   :  { %v2295_v12 = vsel %vm2288_vm6, %v528_v10, -1e+30 }
 0x1d3   :  { %670 = vmax.xlane.f32.xlu2 %v2295_v12 }
 0x1d7   :  { %v511_v16 = vpop.f32.mrf.mxu2 }
 0x1d8   :  { %v529_v19 = vmul.f32 0.088388346, %v511_v16  ;;  %v2374_v16 = vld [vmem:[#allocation2 + $0x50] sm:$0xff] }
 0x1da   :  { %v2304_v21 = vsel %vm2298_vm2, %v529_v19, -1e+30  ;;  %vm2799_vm2 = vmmov %vm2798_vm4 }
 0x1db   :  { %672 = vmax.xlane.f32.xlu0 %v2304_v21  ;;  %vm2802_vm6 = vmmov %vm2799_vm2 }
 0x200   :  { %v643_v24 = vpop.xlane.xlu0 %642 }
 0x201   :  { %v2310_v25 = vmax.f32 %v2307_v20, %v643_v24  ;;  %v2376_v24 = vld [vmem:[#allocation2 + $0x28] sm:$0xff] }
 0x203   :  { %1228 = vst.msk [vmem:[#allocation2] sm:$0xff] %vm2798_vm4, %v2310_v25  ;;  %740 = vperm.xlu1 %1801, %v2310_v25   ;;  %vm2800_vm4 = vmmov %vm2799_vm2 }
 0x208   :  { %v655_v29 = vpop.xlane.xlu0 %654 }
 0x209   :  { %v2318_v32 = vmax.f32 %v2315_v28, %v655_v29 }
 0x20b   :  { %1234 = vst.msk [vmem:[#allocation2 + $0x30] sm:$0xff] %vm2799_vm2, %v2318_v32 }
 0x20e   :  { %v657_v38 = vpop.xlane.xlu1 %656 }
 0x20f   :  { %v2329_v41 = vmax.f32 %v2324_v37, %v657_v38 }
 0x210   :  { %v645_v43 = vpop.xlane.xlu0 %644 }
 0x211   :  { %1235 = vst.msk [vmem:[#allocation2 + $0x38] sm:$0xff] %vm2800_vm4, %v2329_v41  ;;  %v2336_v45 = vmax.f32 %v2326_v35, %v645_v43  ;;  %vm2801_vm4 = vmmov %vm2799_vm2 }
 0x213   :  { %1229 = vst.msk [vmem:[#allocation2 + $0x8] sm:$0xff] %vm2799_vm2, %v2336_v45  ;;  %745 = vperm.xlu2 %1802, %v2336_v45   ;;  %v691_v62 = vsub.f32 %v2326_v35, %v2336_v45  ;;  %v2444_v45 = vld [vmem:[#allocation2 + $0x78] sm:$0xff] }
 0x216   :  { %v659_v52 = vpop.xlane.xlu2 %658  ;;  %v647_v55 = vpop.xlane.xlu1 %646 }
 0x217   :  { %v2346_v56 = vmax.f32 %v2341_v48, %v659_v52  ;;  %v2349_v59 = vmax.f32 %v2343_v49, %v647_v55  ;;  %v2390_v52 = vld [vmem:[#allocation2 + $0x58] sm:$0xff] }
 0x219   :  { %1236 = vst.msk [vmem:[#allocation2 + $0x40] sm:$0xff] %vm2801_vm4, %v2346_v56  ;;  %750 = vperm.xlu0 %1803, %v2349_v59   ;;  %vm2803_vm4 = vmmov %vm2799_vm2 }
 0x21a   :  { %1230 = vst.msk [vmem:[#allocation2 + $0x10] sm:$0xff] %vm2799_vm2, %v2349_v59 }
 0x21e   :  { %v661_v3 = vpop.xlane.xlu0 %660  ;;  %v649_v6 = vpop.xlane.xlu1 %648 }
 0x21f   :  { %v2363_v8 = vmax.f32 %v2358_v63, %v661_v3  ;;  %v677_v10 = vmax.f32 %v629_v2, %v649_v6  ;;  %v2399_v6 = vld [vmem:[#allocation2 + $0x60] sm:$0xff] }
 0x220   :  { %v651_v11 = vpop.xlane.xlu2 %650 }
 0x221   :  { %1237 = vst.msk [vmem:[#allocation2 + $0x48] sm:$0xff] %vm2802_vm6, %v2363_v8  ;;  %v2368_v15 = vmax.f32 %v2360_v7, %v651_v11  ;;  %755 = vperm.xlu2 %1802, %v677_v10   ;;  %vm2804_vm6 = vmmov %vm2799_vm2 }
 0x222   :  { %1231 = vst.msk [vmem:[#allocation2 + $0x18] sm:$0xff] %vm2803_vm4, %v677_v10  ;;  %vm2805_vm4 = vmmov %vm2799_vm2 }
 0x223   :  { %1232 = vst.msk [vmem:[#allocation2 + $0x20] sm:$0xff] %vm2799_vm2, %v2368_v15  ;;  %760 = vperm.xlu1 %1801, %v2368_v15  }
 0x226   :  { %v663_v19 = vpop.xlane.xlu1 %662 }
 0x227   :  { %v2379_v29 = vmax.f32 %v2374_v16, %v663_v19 }
 0x228   :  { %v653_v38 = vpop.xlane.xlu2 %652 }
 0x229   :  { %1238 = vst.msk [vmem:[#allocation2 + $0x50] sm:$0xff] %vm2804_vm6, %v2379_v29  ;;  %v2384_v43 = vmax.f32 %v2376_v24, %v653_v38  ;;  %vm2806_vm6 = vmmov %vm2799_vm2  ;;  %v690_v38 = vsub.f32 %v2307_v20, %v2310_v25  ;;  %v1651_v20 = vor.u32 %v1692_v17, %v1650_v13  ;;  %v1646_v25 = vld [vmem:[%s1990_s28 + $0x64] sm:$0xf]  ;;  %v692_v17 = vsub.f32 %v2343_v49, %v2349_v59 }
 0x22a   :  { %v1647_v33 = vor.u32 %v1691_v9, %v1646_v25  ;;  %v1638_v25 = vld [vmem:[%s1990_s28 + $0x44] sm:$0xf] }
 0x22b   :  { %1233 = vst.msk [vmem:[#allocation2 + $0x28] sm:$0xff] %vm2805_vm4, %v2384_v43  ;;  %790 = vperm.xlu1 %1801, %v2379_v29   ;;  %765 = vperm.xlu2 %1802, %v2384_v43   ;;  %vm2809_vm4 = vmmov %vm2799_vm2 }
 0x22c   :  { %1147 = vmatpush.bf16.msra.mxu1 %v1651_v20  ;;  %1789 = vmatpush.bf16.msra.mxu3 %v1651_v20 }
 0x230   :  { %v665_v55 = vpop.xlane.xlu2 %664  ;;  %1148 = vmatpush.bf16.msra.mxu1 %v1647_v33  ;;  %1790 = vmatpush.bf16.msra.mxu3 %v1647_v33  ;;  %v2810_v33 = vsub.f32 %v2315_v28, %v2318_v32  ;;  %v695_v28 = vsub.f32 %v2376_v24, %v2384_v43 }
 0x231   :  { %v2393_v3 = vmax.f32 %v2390_v52, %v665_v55  ;;  %v2410_v55 = vld [vmem:[#allocation2 + $0x68] sm:$0xff] }
 0x232   :  { %2807 = vst [vmem:[#allocation14_spill] sm:$0xff] %v2410_v55 }
 0x233   :  { %1239 = vst.msk [vmem:[#allocation2 + $0x58] sm:$0xff] %vm2799_vm2, %v2393_v3  ;;  %770 = vperm.xlu1 %1801, %v2318_v32   ;;  %795 = vperm.xlu2 %1802, %v2393_v3   ;;  %v1634_v32 = vld [vmem:[%s1990_s28 + $0x34] sm:$0xf] }
 0x236   :  { %v667_v11 = vpop.xlane.xlu0 %666 }
 0x237   :  { %v2402_v19 = vmax.f32 %v2399_v6, %v667_v11  ;;  %v706_v11 = vmul.f32 1.442695, %v690_v38  ;;  %v2425_v38 = vld [vmem:[#allocation2 + $0x70] sm:$0xff] }
 0x239   :  { %1240 = vst.msk [vmem:[#allocation2 + $0x60] sm:$0xff] %vm2806_vm6, %v2402_v19  ;;  %800 = vperm.xlu0 %1803, %v2402_v19   ;;  %1804 = vpow2.f32 %v706_v11  ;;  %v710_v11 = vmul.f32 1.442695, %v692_v17  ;;  %vm2811_vm6 = vmmov %vm2799_vm2 }
 0x23b   :  { %775 = vperm.xlu1 %1801, %v2329_v41  }
 0x23e   :  { %v669_v61 = vpop.xlane.xlu1 %668 }
 0x23f   :  { %v2413_v44 = vmax.f32 %v2410_v55, %v669_v61  ;;  %v693_v61 = vsub.f32 %v629_v2, %v677_v10  ;;  %v2437_v9 = vpop.eup %1804  ;;  %v1642_v2 = vld [vmem:[%s1990_s28 + $0x54] sm:$0xf]  ;;  %v1690_v10 = vld [vmem:[%s1990_s28 + $0x58] sm:$0xf0] }
 0x240   :  { %v1643_v35 = vor.u32 %v1690_v10, %v1642_v2  ;;  %v718_v2 = vmul.f32 1.442695, %v2810_v33  ;;  %v699_v10 = vsub.f32 %v2358_v63, %v2363_v8 }
 0x241   :  { %2808 = vst [vmem:[#allocation15_spill] sm:$0xff] %v2413_v44  ;;  %805 = vperm.xlu2 %1802, %v2413_v44  }
 0x242   :  { %1241 = vst.msk [vmem:[#allocation2 + $0x68] sm:$0xff] %vm2809_vm4, %v2413_v44  ;;  %v712_v44 = vmul.f32 1.442695, %v693_v61  ;;  %1149 = vmatpush.bf16.msra.mxu1 %v1643_v35  ;;  %v1689_v61 = vld [vmem:[%s1990_s28 + $0x48] sm:$0xf0]  ;;  %1791 = vmatpush.bf16.msra.mxu3 %v1643_v35  ;;  %vm1652_vm4 = vmpackc.low %vm2165_vm12, %vm2134_vm5 }
 0x243   :  { %780 = vperm.xlu1 %1801, %v2346_v56   ;;  %v1639_v59 = vor.u32 %v1689_v61, %v1638_v25  ;;  %v724_v61 = vmul.f32 1.442695, %v699_v10  ;;  %v1685_v10 = vld [vmem:[%s1990_s28 + $0x8] sm:$0xf0] }
 0x244   :  { %1806 = vpow2.f32 %v712_v44 }
 0x246   :  { %v671_v55 = vpop.xlane.xlu2 %670  ;;  %1150 = vmatpush.bf16.msra.mxu1 %v1639_v59  ;;  %1792 = vmatpush.bf16.msra.mxu3 %v1639_v59  ;;  %v1686_v59 = vld [vmem:[%s1990_s28 + $0x18] sm:$0xf0] }
 0x247   :  { %v2428_v22 = vmax.f32 %v2425_v38, %v671_v55  ;;  %v708_v55 = vmul.f32 1.442695, %v691_v62  ;;  %v694_v62 = vsub.f32 %v2360_v7, %v2368_v15  ;;  %v1688_v7 = vld [vmem:[%s1990_s28 + $0x38] sm:$0xf0] }
 0x248   :  { %v1635_v15 = vor.u32 %v1688_v7, %v1634_v32  ;;  %v2813_v32 = vsub.f32 %v2341_v48, %v2346_v56 }
 0x249   :  { %v704_v13 = vsub.f32 %v2425_v38, %v2428_v22  ;;  %1242 = vst.msk [vmem:[#allocation2 + $0x70] sm:$0xff] %vm2799_vm2, %v2428_v22  ;;  %810 = vperm.xlu0 %1803, %v2428_v22   ;;  %1808 = vpow2.f32 %v708_v55  ;;  %v714_v35 = vmul.f32 1.442695, %v694_v62  ;;  %v716_v55 = vmul.f32 1.442695, %v695_v28  ;;  %vm1655_vm2 = vmpackc.low %vm2209_vm7, %vm2182_vm14 }
 0x24a   :  { %v2462_v17 = vpop.eup %1806  ;;  %1810 = vpow2.f32 %v710_v11  ;;  %1151 = vmatpush.bf16.msra.mxu1 %v1635_v15  ;;  %v1630_v11 = vld [vmem:[%s1990_s28 + $0x24] sm:$0xf]  ;;  %1793 = vmatpush.bf16.msra.mxu3 %v1635_v15  ;;  %v2812_v62 = vsub.f32 %v2324_v37, %v2329_v41  ;;  %v722_v7 = vmul.f32 1.442695, %v2813_v32  ;;  %v701_v41 = vsub.f32 %v2390_v52, %v2393_v3 }
 0x24b   :  { %997 = vperm.xlu1 %1801, %v2437_v9   ;;  %1812 = vpow2.f32 %v718_v2  ;;  %v702_v2 = vsub.f32 %v2399_v6, %v2402_v19  ;;  %v1622_v15 = vld [vmem:[%s1990_s28 + $0x4] sm:$0xf]  ;;  %v700_v6 = vsub.f32 %v2374_v16, %v2379_v29 }
 0x24c   :  { %1814 = vpow2.f32 %v714_v35  ;;  %v720_v28 = vmul.f32 1.442695, %v2812_v62  ;;  %v728_v56 = vmul.f32 1.442695, %v701_v41 }
 0x24d   :  { %1816 = vpow2.f32 %v716_v55  ;;  %v1623_v55 = vor.u32 %v1685_v10, %v1622_v15  ;;  %v726_v48 = vmul.f32 1.442695, %v700_v6 }
 0x24e   :  { %v673_v20 = vpop.xlane.xlu0 %672  ;;  %1818 = vpow2.f32 %v724_v61 }
 0x24f   :  { %v2449_v49 = vmax.f32 %v2444_v45, %v673_v20  ;;  %v1687_v20 = vld [vmem:[%s1990_s28 + $0x28] sm:$0xf0]  ;;  %v2473_v24 = vpop.eup %1808  ;;  %1820 = vpow2.f32 %v720_v28 }
 0x250   :  { %v1631_v43 = vor.u32 %v1687_v20, %v1630_v11  ;;  %v2475_v25 = vpop.eup %1810  ;;  %v730_v20 = vmul.f32 1.442695, %v702_v2  ;;  %1822 = vpow2.f32 %v722_v7 }
 0x251   :  { %v705_v44 = vsub.f32 %v2444_v45, %v2449_v49  ;;  %1243 = vst.msk [vmem:[#allocation2 + $0x78] sm:$0xff] %vm2811_vm6, %v2449_v49  ;;  %815 = vperm.xlu2 %1802, %v2449_v49   ;;  %785 = vperm.xlu0 %1803, %v2363_v8   ;;  %v2479_v63 = vpop.eup %1812  ;;  %v1626_v8 = vld [vmem:[%s1990_s28 + $0x14] sm:$0xf]  ;;  %vm1661_vm6 = vmpackc.low %vm2160_vm11, %vm2148_vm8  ;;  %v734_v45 = vmul.f32 1.442695, %v704_v13  ;;  %v980_v13 = vld [vmem:[#allocation4] sm:$0xff] }
 0x252   :  { %1152 = vmatpush.bf16.msra.mxu1 %v1631_v43  ;;  %1794 = vmatpush.bf16.msra.mxu3 %v1631_v43  ;;  %v1627_v33 = vor.u32 %v1686_v59, %v1626_v8  ;;  %v2494_v35 = vpop.eup %1814  ;;  %1824 = vpow2.f32 %v730_v20 }
 0x253   :  { %1012 = vperm.xlu1 %1801, %v2462_v17   ;;  %v2496_v11 = vpop.eup %1816  ;;  %1826 = vpow2.f32 %v726_v48  ;;  %v736_v36 = vmul.f32 1.442695, %v705_v44 }
 0x254   :  { %v2502_v37 = vpop.eup %1818  ;;  %1828 = vpow2.f32 %v728_v56 }
 0x255   :  { %v2507_v19 = vpop.eup %1820 }
 0x256   :  { %1153 = vmatpush.bf16.msra.mxu1 %v1627_v33  ;;  %1795 = vmatpush.bf16.msra.mxu3 %v1627_v33  ;;  %v2509_v16 = vpop.eup %1822 }
 0x258   :  { %v2513_v29 = vpop.eup %1824 }
 0x259   :  { %1002 = vperm.xlu2 %1802, %v2473_v24   ;;  %1007 = vperm.xlu0 %1803, %v2475_v25   ;;  %v2516_v3 = vpop.eup %1826 }
 0x25a   :  { %1154 = vmatpush.bf16.msra.mxu1 %v1623_v55  ;;  %1796 = vmatpush.bf16.msra.mxu3 %v1623_v55  ;;  %v2518_v43 = vpop.eup %1828 }
 0x25b   :  { %1027 = vperm.xlu1 %1801, %v2479_v63  }
 0x261   :  { %1022 = vperm.xlu2 %1802, %v2496_v11   ;;  %1017 = vperm.xlu0 %1803, %v2494_v35  }
 0x263   :  { %1042 = vperm.xlu1 %1801, %v2502_v37  }
 0x269   :  { %1037 = vperm.xlu2 %1802, %v2509_v16   ;;  %1032 = vperm.xlu0 %1803, %v2507_v19  }
 0x26b   :  { %1057 = vperm.xlu1 %1801, %v2513_v29  }
 0x26d   :  { %v746_v52 = vpop.permute.xlu2 %745 }
 0x26e   :  { %v819_v61 = vsub.f32 %v2178_v58, %v746_v52 }
 0x270   :  { %v836_v8 = vmul.f32 1.442695, %v819_v61 }
 0x271   :  { %1052 = vperm.xlu2 %1802, %v2518_v43   ;;  %1047 = vperm.xlu0 %1803, %v2516_v3  }
 0x272   :  { %1830 = vpow2.f32 %v836_v8 }
 0x275   :  { %v741_v59 = vpop.permute.xlu1 %740 }
 0x276   :  { %v818_v33 = vsub.f32 %v2142_v30, %v741_v59 }
 0x278   :  { %v834_v2 = vmul.f32 1.442695, %v818_v33  ;;  %v1831_v62 = vpop.eup %1830 }
 0x279   :  { %v867_v6 = vsel %vm2165_vm12, %v1831_v62, 0.0  ;;  %vm1667_vm12 = vmpackc.low %vm2256_vm3, %vm2235_vm13 }
 0x27a   :  { %1832 = vpow2.f32 %v834_v2 }
 0x27b   :  { %v756_v58 = vpop.permute.xlu2 %755 }
 0x27c   :  { %v821_v7 = vsub.f32 %v2225_v23, %v756_v58 }
 0x27e   :  { %v840_v15 = vmul.f32 1.442695, %v821_v7 }
 0x280   :  { %v1833_v28 = vpop.eup %1832  ;;  %1834 = vpow2.f32 %v840_v15 }
 0x281   :  { %v1653_v32 = vpack.c.bf16 %v1831_v62, %v1833_v28  ;;  %v866_v8 = vsel %vm2134_vm5, %v1833_v28, 0.0  ;;  %vm1658_vm5 = vmpackc.low %vm2239_vm15, %vm2214_vm9 }
 0x283   :  { %1654 = vmatmul.msk.bf16.vlgmr.msra.gmra.mxu1 %vm1652_vm4, %v1653_v32  ;;  %vm1670_vm4 = vmpackc.low %vm2277_vm0, %vm2266_vm10 }
 0x285   :  { %v766_v55 = vpop.permute.xlu2 %765 }
 0x286   :  { %v2532_v41 = vpop.eup %1834  ;;  %v823_v51 = vsub.f32 %v2252_v40, %v766_v55 }
 0x287   :  { %v869_v18 = vsel %vm2209_vm7, %v2532_v41, 0.0 }
 0x288   :  { %v844_v33 = vmul.f32 1.442695, %v823_v51 }
 0x28b   :  { %v751_v10 = vpop.permute.xlu0 %750 }
 0x28c   :  { %v820_v30 = vsub.f32 %v2193_v1, %v751_v10 }
 0x28d   :  { %v796_v52 = vpop.permute.xlu2 %795 }
 0x28e   :  { %v838_v20 = vmul.f32 1.442695, %v820_v30  ;;  %v829_v61 = vsub.f32 %v2263_v50, %v796_v52 }
 0x290   :  { %1836 = vpow2.f32 %v838_v20 }
 0x295   :  { %v761_v48 = vpop.permute.xlu1 %760  ;;  %916 = vadd.xlane.f32.xlu1 %v867_v6 }
 0x296   :  { %v2534_v56 = vpop.eup %1836  ;;  %v822_v23 = vsub.f32 %v2232_v27, %v761_v48  ;;  %v856_v27 = vmul.f32 1.442695, %v829_v61 }
 0x297   :  { %v1656_v1 = vpack.c.bf16 %v2532_v41, %v2534_v56 }
 0x298   :  { %v842_v59 = vmul.f32 1.442695, %v822_v23 }
 0x299   :  { %1657 = vmatmul.msk.bf16.gmra.mxu1 %vm1655_vm2, %v1656_v1 }
 0x29a   :  { %914 = vadd.xlane.f32.xlu2 %v866_v8  ;;  %1838 = vpow2.f32 %v842_v59 }
 0x29b   :  { %1840 = vpow2.f32 %v844_v33  ;;  %v806_v50 = vpop.permute.xlu2 %805 }
 0x29c   :  { %1842 = vpow2.f32 %v856_v27  ;;  %v831_v55 = vsub.f32 %v2284_v5, %v806_v50 }
 0x29d   :  { %v791_v2 = vpop.permute.xlu1 %790 }
 0x29e   :  { %v828_v62 = vsub.f32 %v2246_v34, %v791_v2  ;;  %v860_v6 = vmul.f32 1.442695, %v831_v55  ;;  %v868_v2 = vsel %vm2182_vm14, %v2534_v56, 0.0  ;;  %v2815_v55 = vld [vmem:[#allocation11_spill] sm:$0xff] }
 0x2a0   :  { %v854_v32 = vmul.f32 1.442695, %v828_v62  ;;  %v1839_v58 = vpop.eup %1838 }
 0x2a1   :  { %v2548_v7 = vpop.eup %1840  ;;  %v870_v56 = vsel %vm2214_vm9, %v1839_v58, 0.0 }
 0x2a2   :  { %1844 = vpow2.f32 %v854_v32  ;;  %v2555_v28 = vpop.eup %1842  ;;  %v1659_v34 = vpack.c.bf16 %v2548_v7, %v1839_v58  ;;  %v871_v14 = vsel %vm2239_vm15, %v2548_v7, 0.0 }
 0x2a5   :  { %v771_v40 = vpop.permute.xlu1 %770 }
 0x2a6   :  { %v824_v26 = vsub.f32 %v2156_v42, %v771_v40 }
 0x2a8   :  { %v1845_v15 = vpop.eup %1844  ;;  %v846_v10 = vmul.f32 1.442695, %v824_v26 }
 0x2a9   :  { %1660 = vmatmul.msk.bf16.gmra.mxu1 %vm1658_vm5, %v1659_v34  ;;  %v1668_v42 = vpack.c.bf16 %v2555_v28, %v1845_v15 }
 0x2aa   :  { %1846 = vpow2.f32 %v846_v10 }
 0x2ab   :  { %v801_v30 = vpop.permute.xlu0 %800  ;;  %1669 = vmatmul.msk.bf16.vlgmr.msra.gmra.mxu3 %vm1667_vm12, %v1668_v42 }
 0x2ac   :  { %v830_v20 = vsub.f32 %v2273_v57, %v801_v30  ;;  %v816_v57 = vpop.permute.xlu2 %815 }
 0x2ad   :  { %v776_v48 = vpop.permute.xlu1 %775  ;;  %v833_v39 = vsub.f32 %v2304_v21, %v816_v57 }
 0x2ae   :  { %v858_v52 = vmul.f32 1.442695, %v830_v20  ;;  %v825_v23 = vsub.f32 %v2172_v54, %v776_v48  ;;  %v2818_v48 = vld [vmem:[#allocation13_spill] sm:$0xff] }
 0x2af   :  { %v864_v26 = vmul.f32 1.442695, %v833_v39 }
 0x2b0   :  { %v1847_v1 = vpop.eup %1846  ;;  %1848 = vpow2.f32 %v858_v52  ;;  %v848_v51 = vmul.f32 1.442695, %v825_v23  ;;  %v876_v52 = vsel %vm2235_vm13, %v1845_v15, 0.0 }
 0x2b1   :  { %1850 = vpow2.f32 %v860_v6  ;;  %v872_v5 = vsel %vm2148_vm8, %v1847_v1, 0.0 }
 0x2b2   :  { %1852 = vpow2.f32 %v848_v51  ;;  %926 = vadd.xlane.f32.xlu0 %v872_v5 }
 0x2b4   :  { %v1003_v7 = vpop.permute.xlu2 %1002 }
 0x2b5   :  { %v781_v61 = vpop.permute.xlu1 %780 }
 0x2b6   :  { %v1849_v8 = vpop.eup %1848  ;;  %v826_v59 = vsub.f32 %v2198_v4, %v781_v61  ;;  %v877_v61 = vsel %vm2256_vm3, %v2555_v28, 0.0 }
 0x2b7   :  { %v1851_v33 = vpop.eup %1850  ;;  %v878_v41 = vsel %vm2266_vm10, %v1849_v8, 0.0 }
 0x2b8   :  { %v1853_v54 = vpop.eup %1852  ;;  %v850_v27 = vmul.f32 1.442695, %v826_v59  ;;  %v1671_v32 = vpack.c.bf16 %v1851_v33, %v1849_v8  ;;  %v879_v31 = vsel %vm2277_vm0, %v1851_v33, 0.0  ;;  %v2822_v8 = vld [vmem:[#allocation14_spill] sm:$0xff]  ;;  %v2823_v33 = vld [vmem:[#allocation15_spill] sm:$0xff]  ;;  %vm2825_vm0 = vcmask 7168  }
 0x2b9   :  { %v873_v4 = vsel %vm2160_vm11, %v1853_v54, 0.0  ;;  %v1662_v62 = vpack.c.bf16 %v1853_v54, %v1847_v1  ;;  %vm2819_vm11 = vnez %v2818_v48  ;;  %v2820_v1 = vld [vmem:[#allocation10_spill] sm:$0xff]  ;;  %v2824_v47 = vsub.f32 %v2822_v8, %v2823_v33  ;;  %vm2827_vm7 = vmmov %vm2825_vm0 }
 0x2ba   :  { %1854 = vpow2.f32 %v850_v27  ;;  %918 = vadd.xlane.f32.xlu0 %v868_v2  ;;  %928 = vadd.xlane.f32.xlu1 %v873_v4  ;;  %vm2821_vm9 = vnez %v2820_v1  ;;  %v984_v8 = vld [vmem:[#allocation4 + $0x68] sm:$0xff]  ;;  %vm2828_vm13 = vmmov %vm2825_vm0 }
 0x2bb   :  { %v811_v40 = vpop.permute.xlu0 %810  ;;  %1663 = vmatmul.msk.bf16.gmra.mxu1 %vm1661_vm6, %v1662_v62  ;;  %1672 = vmatmul.msk.bf16.gmra.mxu3 %vm1670_vm4, %v1671_v32  ;;  %vm1664_vm2 = vmpackc.low %vm2821_vm9, %vm2186_vm1  ;;  %v732_v28 = vmul.f32 1.442695, %v2824_v47  ;;  %v979_v62 = vld [vmem:[#allocation4 + $0x30] sm:$0xff] }
 0x2bc   :  { %v832_v50 = vsub.f32 %v2295_v12, %v811_v40  ;;  %v2816_v12 = vld [vmem:[#allocation12_spill] sm:$0xff]  ;;  %v1023_v49 = vpop.permute.xlu2 %1022  ;;  %vm2829_vm15 = vmmov %vm2825_vm0 }
 0x2bd   :  { %vm2817_vm8 = vnez %v2816_v12  ;;  %v998_v15 = vpop.permute.xlu1 %997  ;;  %v981_v12 = vld [vmem:[#allocation4 + $0x58] sm:$0xff]  ;;  %vm2830_vm3 = vmmov %vm2825_vm0 }
 0x2be   :  { %v862_v34 = vmul.f32 1.442695, %v832_v50  ;;  %vm1673_vm14 = vmpackc.low %vm2819_vm11, %vm2817_vm8  ;;  %v1075_v32 = vmul.f32 %v998_v15, %v979_v62  ;;  %v883_v50 = vld [vmem:[#allocation3 + $0x8] sm:$0xff] }
 0x2bf   :  { %vm2831_vm10 = vmmov %vm2825_vm0 }
 0x2c0   :  { %v1855_v10 = vpop.eup %1854  ;;  %1856 = vpow2.f32 %v862_v34  ;;  %v1076_v34 = vmul.f32 %v1003_v7, %v980_v13  ;;  %v889_v7 = vld [vmem:[#allocation3 + $0x38] sm:$0xff]  ;;  %vm2832_vm5 = vmmov %vm2825_vm0 }
 0x2c1   :  { %v874_v46 = vsel %vm2186_vm1, %v1855_v10, 0.0  ;;  %1858 = vpow2.f32 %v864_v26  ;;  %vm2826_vm1 = vmmov %vm2825_vm0  ;;  %v905_v47 = vmul.f32 %v2507_v19, %v889_v7 }
 0x2c2   :  { %930 = vadd.xlane.f32.xlu2 %v874_v46  ;;  %922 = vadd.xlane.f32.xlu1 %v870_v56  ;;  %vm2833_vm12 = vmmov %vm2825_vm0 }
 0x2c3   :  { %v786_v21 = vpop.permute.xlu0 %785  ;;  %vm2834_vm6 = vmmov %vm2825_vm0 }
 0x2c4   :  { %v827_v42 = vsub.f32 %v2815_v55, %v786_v21  ;;  %v2640_v4 = vpop.permute.xlu2 %1037  ;;  %vm2835_vm4 = vmmov %vm2825_vm0 }
 0x2c5   :  { %v1013_v53 = vpop.permute.xlu1 %1012 }
 0x2c6   :  { %v1857_v30 = vpop.eup %1856  ;;  %v852_v20 = vmul.f32 1.442695, %v827_v42  ;;  %v882_v42 = vld [vmem:[#allocation3] sm:$0xff] }
 0x2c7   :  { %v1859_v6 = vpop.eup %1858  ;;  %v880_v0 = vsel %vm2817_vm8, %v1857_v30, 0.0  ;;  %vm2836_vm8 = vmmov %vm2825_vm0 }
 0x2c8   :  { %1860 = vpow2.f32 %v852_v20  ;;  %v1674_v58 = vpack.c.bf16 %v1859_v6, %v1857_v30  ;;  %v881_v59 = vsel %vm2819_vm11, %v1859_v6, 0.0  ;;  %v898_v30 = vmul.f32 %v2437_v9, %v882_v42  ;;  %vm2837_vm11 = vmmov %vm2825_vm0 }
 0x2c9   :  { %1862 = vpow2.f32 %v736_v36 }
 0x2ca   :  { %934 = vadd.xlane.f32.xlu1 %v876_v52  ;;  %920 = vadd.xlane.f32.xlu2 %v869_v18  ;;  %1864 = vpow2.f32 %v732_v28  ;;  %v1080_v28 = vmul.f32 %v1023_v49, %v984_v8 }
 0x2cb   :  { %1675 = vmatmul.msk.bf16.gmra.mxu3 %vm1673_vm14, %v1674_v58  ;;  %1866 = vpow2.f32 %v734_v45  ;;  %v1008_v39 = vpop.permute.xlu0 %1007  ;;  %v982_v58 = vld [vmem:[#allocation4 + $0x18] sm:$0xff]  ;;  %vm2838_vm14 = vmmov %vm2825_vm0 }
 0x2cc   :  { %v2644_v26 = vpop.permute.xlu2 %1052  ;;  %v1077_v52 = vmul.f32 %v1008_v39, %v981_v12 }
 0x2cd   :  { %v2627_v54 = vpop.permute.xlu1 %1027 }
 0x2ce   :  { %v1861_v23 = vpop.eup %1860 }
 0x2cf   :  { %v875_v51 = vsel %vm2821_vm9, %v1861_v23, 0.0  ;;  %v1665_v5 = vpack.c.bf16 %v1861_v23, %v1855_v10  ;;  %v2624_v57 = vpop.eup %1862  ;;  %v899_v10 = vmul.f32 %v2473_v24, %v883_v50  ;;  %v1078_v23 = vmul.f32 %v1013_v53, %v982_v58  ;;  %v989_v53 = vld [vmem:[#allocation4 + $0x10] sm:$0xff]  ;;  %vm2839_vm9 = vmmov %vm2825_vm0 }
 0x2d0   :  { %932 = vadd.xlane.f32.xlu0 %v875_v51  ;;  %v2632_v44 = vpop.eup %1864 }
 0x2d1   :  { %1666 = vmatmul.msk.bf16.gmra.mxu1 %vm1664_vm2, %v1665_v5  ;;  %v2637_v2 = vpop.eup %1866  ;;  %vm2840_vm2 = vmmov %vm2825_vm0 }
 0x2d2   :  { %924 = vadd.xlane.f32.xlu2 %v871_v14  ;;  %940 = vadd.xlane.f32.xlu1 %v879_v31  ;;  %v888_v14 = vld [vmem:[#allocation3 + $0x30] sm:$0xff] }
 0x2d3   :  { %v1018_v56 = vpop.permute.xlu0 %1017  ;;  %v983_v31 = vld [vmem:[#allocation4 + $0x50] sm:$0xff]  ;;  %v904_v9 = vmul.f32 %v2479_v63, %v888_v14 }
 0x2d5   :  { %v2635_v27 = vpop.permute.xlu1 %1042 }
 0x2d8   :  { %938 = vadd.xlane.f32.xlu0 %v878_v41  ;;  %v1079_v41 = vmul.f32 %v1018_v56, %v983_v31 }
 0x2da   :  { %936 = vadd.xlane.f32.xlu2 %v877_v61 }
 0x2db   :  { %v2650_v48 = vpop.permute.xlu0 %1032 }
 0x2dd   :  { %v2642_v40 = vpop.permute.xlu1 %1057 }
 0x2e0   :  { %944 = vadd.xlane.f32.xlu0 %v881_v59 }
 0x2e2   :  { %942 = vadd.xlane.f32.xlu2 %v880_v0  ;;  %v884_v0 = vld [vmem:[#allocation3 + $0x10] sm:$0xff] }
 0x2e3   :  { %v1048_v1 = vpop.permute.xlu0 %1047  ;;  %v900_v33 = vmul.f32 %v2475_v25, %v884_v0  ;;  %v985_v25 = vld [vmem:[#allocation4 + $0x8] sm:$0xff] }
 0x2e4   :  { %v1085_v45 = vmul.f32 %v1048_v1, %v989_v53 }
 0x2eb   :  { %1072 = vperm.xlu1 %1801, %v2624_v57  }
 0x2f4   :  { %1062 = vperm.xlu0 %1803, %v2632_v44  }
 0x2fa   :  { %1067 = vperm.xlu2 %1802, %v2637_v2  }
 0x300   :  { %v1156_v22 = vpop.f32.mrf.mxu1 }
 0x301   :  { %v1196_v38 = vadd.f32 %v1156_v22, %v1075_v32 }
 0x303   :  { %1212 = vst [vmem:[#allocation4 + $0x30] sm:$0xff] %v1196_v38 }
 0x308   :  { %v1158_v60 = vpop.f32.mrf.mxu1  ;;  %v917_v46 = vpop.xlane.xlu1 %916 }
 0x309   :  { %v1197_v21 = vadd.f32 %v1158_v60, %v1076_v34  ;;  %v947_v55 = vadd.f32 %v917_v46, %v899_v10  ;;  %v886_v34 = vld [vmem:[#allocation3 + $0x20] sm:$0xff]  ;;  %v990_v60 = vld [vmem:[#allocation4 + $0x38] sm:$0xff] }
 0x30a   :  { %v890_v10 = vld [vmem:[#allocation3 + $0x40] sm:$0xff]  ;;  %v902_v19 = vmul.f32 %v2494_v35, %v886_v34  ;;  %v1086_v46 = vmul.f32 %v2644_v26, %v990_v60  ;;  %v885_v35 = vld [vmem:[#allocation3 + $0x18] sm:$0xff]  ;;  %v896_v34 = vld [vmem:[#allocation3 + $0x70] sm:$0xff] }
 0x30b   :  { %1213 = vst [vmem:[#allocation4] sm:$0xff] %v1197_v21  ;;  %v906_v49 = vmul.f32 %v2509_v16, %v890_v10  ;;  %v986_v16 = vld [vmem:[#allocation4 + $0x48] sm:$0xff]  ;;  %v901_v58 = vmul.f32 %v2462_v17, %v885_v35  ;;  %v988_v10 = vld [vmem:[#allocation4 + $0x20] sm:$0xff] }
 0x30c   :  { %964 = vst.msk [vmem:[#allocation3 + $0x8] sm:$0xff] %vm2825_vm0, %v947_v55  ;;  %v1082_v31 = vmul.f32 %v2650_v48, %v986_v16 }
 0x30d   :  { %v915_v20 = vpop.xlane.xlu2 %914 }
 0x30e   :  { %v946_v6 = vadd.f32 %v915_v20, %v898_v30  ;;  %v1081_v20 = vmul.f32 %v2627_v54, %v985_v25 }
 0x310   :  { %963 = vst.msk [vmem:[#allocation3] sm:$0xff] %vm2826_vm1, %v946_v6 }
 0x316   :  { %v1161_v24 = vpop.f32.mrf.mxu1 }
 0x317   :  { %v1198_v18 = vadd.f32 %v1161_v24, %v1077_v52  ;;  %v892_v24 = vld [vmem:[#allocation3 + $0x50] sm:$0xff] }
 0x318   :  { %v908_v26 = vmul.f32 %v2516_v3, %v892_v24  ;;  %v895_v3 = vld [vmem:[#allocation3 + $0x68] sm:$0xff] }
 0x319   :  { %1214 = vst [vmem:[#allocation4 + $0x58] sm:$0xff] %v1198_v18  ;;  %v991_v18 = vld [vmem:[#allocation4 + $0x60] sm:$0xff]  ;;  %v911_v0 = vmul.f32 %v2632_v44, %v895_v3 }
 0x31e   :  { %v1163_v51 = vpop.f32.mrf.mxu1 }
 0x31f   :  { %v1199_v5 = vadd.f32 %v1163_v51, %v1078_v23  ;;  %v1087_v23 = vmul.f32 %v2642_v40, %v991_v18 }
 0x321   :  { %1215 = vst [vmem:[#allocation4 + $0x18] sm:$0xff] %v1199_v5 }
 0x325   :  { %v927_v15 = vpop.xlane.xlu0 %926 }
 0x326   :  { %v952_v61 = vadd.f32 %v927_v15, %v904_v9  ;;  %v1166_v59 = vpop.f32.mrf.mxu1 }
 0x327   :  { %v1200_v36 = vadd.f32 %v1166_v59, %v1079_v41  ;;  %v891_v41 = vld [vmem:[#allocation3 + $0x48] sm:$0xff] }
 0x328   :  { %969 = vst.msk [vmem:[#allocation3 + $0x30] sm:$0xff] %vm2827_vm7, %v952_v61  ;;  %v887_v59 = vld [vmem:[#allocation3 + $0x28] sm:$0xff]  ;;  %v907_v17 = vmul.f32 %v2502_v37, %v891_v41  ;;  %v987_v37 = vld [vmem:[#allocation4 + $0x40] sm:$0xff] }
 0x329   :  { %1216 = vst [vmem:[#allocation4 + $0x50] sm:$0xff] %v1200_v36  ;;  %v903_v48 = vmul.f32 %v2496_v11, %v887_v59 }
 0x32d   :  { %v919_v62 = vpop.xlane.xlu0 %918  ;;  %v929_v63 = vpop.xlane.xlu1 %928 }
 0x32e   :  { %v948_v32 = vadd.f32 %v919_v62, %v900_v33  ;;  %v953_v39 = vadd.f32 %v929_v63, %v905_v47  ;;  %v1168_v22 = vpop.f32.mrf.mxu1  ;;  %v1181_v38 = vpop.f32.mrf.mxu3  ;;  %v894_v47 = vld [vmem:[#allocation3 + $0x60] sm:$0xff] }
 0x32f   :  { %v1201_v13 = vadd.f32 %v1168_v22, %v1080_v28  ;;  %v1206_v50 = vadd.f32 %v1181_v38, %v1085_v45  ;;  %v893_v28 = vld [vmem:[#allocation3 + $0x58] sm:$0xff]  ;;  %v910_v45 = vmul.f32 %v2513_v29, %v894_v47 }
 0x330   :  { %965 = vst.msk [vmem:[#allocation3 + $0x10] sm:$0xff] %vm2828_vm13, %v948_v32  ;;  %v909_v11 = vmul.f32 %v2518_v43, %v893_v28  ;;  %v1083_v32 = vmul.f32 %v2640_v4, %v987_v37  ;;  %v912_v43 = vmul.f32 %v2637_v2, %v896_v34  ;;  %v1084_v4 = vmul.f32 %v2635_v27, %v988_v10  ;;  %v992_v27 = vld [vmem:[#allocation4 + $0x70] sm:$0xff] }
 0x331   :  { %970 = vst.msk [vmem:[#allocation3 + $0x38] sm:$0xff] %vm2829_vm15, %v953_v39 }
 0x332   :  { %1217 = vst [vmem:[#allocation4 + $0x68] sm:$0xff] %v1201_v13 }
 0x333   :  { %1222 = vst [vmem:[#allocation4 + $0x10] sm:$0xff] %v1206_v50  ;;  %v897_v50 = vld [vmem:[#allocation3 + $0x78] sm:$0xff] }
 0x334   :  { %v913_v29 = vmul.f32 %v2624_v57, %v897_v50 }
 0x335   :  { %v923_v56 = vpop.xlane.xlu1 %922  ;;  %v931_v21 = vpop.xlane.xlu2 %930 }
 0x336   :  { %v950_v55 = vadd.f32 %v923_v56, %v902_v19  ;;  %v954_v42 = vadd.f32 %v931_v21, %v906_v49  ;;  %v1183_v30 = vpop.f32.mrf.mxu3 }
 0x337   :  { %v1207_v6 = vadd.f32 %v1183_v30, %v1086_v46 }
 0x338   :  { %967 = vst.msk [vmem:[#allocation3 + $0x20] sm:$0xff] %vm2830_vm3, %v950_v55  ;;  %v1171_v12 = vpop.f32.mrf.mxu1  ;;  %v994_v55 = vld [vmem:[#allocation4 + $0x28] sm:$0xff] }
 0x339   :  { %971 = vst.msk [vmem:[#allocation3 + $0x40] sm:$0xff] %vm2831_vm10, %v954_v42  ;;  %v1202_v52 = vadd.f32 %v1171_v12, %v1081_v20  ;;  %v993_v42 = vld [vmem:[#allocation4 + $0x78] sm:$0xff] }
 0x33a   :  { %1223 = vst [vmem:[#allocation4 + $0x38] sm:$0xff] %v1207_v6 }
 0x33b   :  { %1218 = vst [vmem:[#allocation4 + $0x8] sm:$0xff] %v1202_v52 }
 0x33d   :  { %v935_v54 = vpop.xlane.xlu1 %934  ;;  %v921_v1 = vpop.xlane.xlu2 %920 }
 0x33e   :  { %v956_v51 = vadd.f32 %v935_v54, %v908_v26  ;;  %v949_v5 = vadd.f32 %v921_v1, %v901_v58  ;;  %v1186_v14 = vpop.f32.mrf.mxu3 }
 0x33f   :  { %v1208_v9 = vadd.f32 %v1186_v14, %v1087_v23 }
 0x340   :  { %973 = vst.msk [vmem:[#allocation3 + $0x50] sm:$0xff] %vm2832_vm5, %v956_v51  ;;  %v1173_v15 = vpop.f32.mrf.mxu1 }
 0x341   :  { %966 = vst.msk [vmem:[#allocation3 + $0x18] sm:$0xff] %vm2833_vm12, %v949_v5  ;;  %v1203_v61 = vadd.f32 %v1173_v15, %v1082_v31 }
 0x342   :  { %1224 = vst [vmem:[#allocation4 + $0x60] sm:$0xff] %v1208_v9 }
 0x343   :  { %1219 = vst [vmem:[#allocation4 + $0x48] sm:$0xff] %v1203_v61  ;;  %v933_v40 = vpop.xlane.xlu0 %932 }
 0x344   :  { %v955_v36 = vadd.f32 %v933_v40, %v907_v17 }
 0x345   :  { %v941_v7 = vpop.xlane.xlu1 %940  ;;  %v925_v8 = vpop.xlane.xlu2 %924 }
 0x346   :  { %972 = vst.msk [vmem:[#allocation3 + $0x48] sm:$0xff] %vm2834_vm6, %v955_v36  ;;  %v959_v53 = vadd.f32 %v941_v7, %v911_v0  ;;  %v951_v33 = vadd.f32 %v925_v8, %v903_v48  ;;  %v1188_v62 = vpop.f32.mrf.mxu3 }
 0x348   :  { %976 = vst.msk [vmem:[#allocation3 + $0x68] sm:$0xff] %vm2835_vm4, %v959_v53 }
 0x349   :  { %968 = vst.msk [vmem:[#allocation3 + $0x28] sm:$0xff] %vm2836_vm8, %v951_v33 }
 0x34b   :  { %v939_v63 = vpop.xlane.xlu0 %938 }
 0x34c   :  { %v958_v44 = vadd.f32 %v939_v63, %v910_v45 }
 0x34d   :  { %v937_v39 = vpop.xlane.xlu2 %936 }
 0x34e   :  { %975 = vst.msk [vmem:[#allocation3 + $0x60] sm:$0xff] %vm2837_vm11, %v958_v44  ;;  %v957_v22 = vadd.f32 %v937_v39, %v909_v11  ;;  %v1176_v38 = vpop.f32.mrf.mxu1  ;;  %v1191_v19 = vpop.f32.mrf.mxu3 }
 0x34f   :  { %v1204_v13 = vadd.f32 %v1176_v38, %v1083_v32 }
 0x350   :  { %974 = vst.msk [vmem:[#allocation3 + $0x58] sm:$0xff] %vm2838_vm14, %v957_v22 }
 0x351   :  { %1220 = vst [vmem:[#allocation4 + $0x40] sm:$0xff] %v1204_v13 }
 0x353   :  { %v945_v60 = vpop.xlane.xlu0 %944 }
 0x354   :  { %v961_v25 = vadd.f32 %v945_v60, %v913_v29 }
 0x355   :  { %v943_v49 = vpop.xlane.xlu2 %942 }
 0x356   :  { %978 = vst.msk [vmem:[#allocation3 + $0x78] sm:$0xff] %vm2839_vm9, %v961_v25  ;;  %v960_v46 = vadd.f32 %v943_v49, %v912_v43  ;;  %v1178_v56 = vpop.f32.mrf.mxu1  ;;  %v1193_v12 = vpop.f32.mrf.mxu3 }
 0x357   :  { %v1205_v21 = vadd.f32 %v1178_v56, %v1084_v4 }
 0x358   :  { %977 = vst.msk [vmem:[#allocation3 + $0x70] sm:$0xff] %vm2840_vm2, %v960_v46 }
 0x359   :  { %1221 = vst [vmem:[#allocation4 + $0x20] sm:$0xff] %v1205_v21 }
 0x35d   :  { %v1073_v30 = vpop.permute.xlu1 %1072  ;;  %v1068_v57 = vpop.permute.xlu2 %1067 }
 0x35e   :  { %v1090_v20 = vmul.f32 %v1073_v30, %v994_v55  ;;  %v1089_v6 = vmul.f32 %v1068_v57, %v993_v42 }
 0x360   :  { %v1211_v2 = vadd.f32 %v1193_v12, %v1090_v20  ;;  %v1210_v52 = vadd.f32 %v1191_v19, %v1089_v6 }
 0x362   :  { %1227 = vst [vmem:[#allocation4 + $0x28] sm:$0xff] %v1211_v2 }
 0x363   :  { %1226 = vst [vmem:[#allocation4 + $0x78] sm:$0xff] %v1210_v52 }
 0x366   :  { %v1063_v24 = vpop.permute.xlu0 %1062 }
 0x367   :  { %v1088_v35 = vmul.f32 %v1063_v24, %v992_v27 }
 0x369   :  { %v1209_v18 = vadd.f32 %v1188_v62, %v1088_v35 }
 0x36b   :  { %1225 = vst [vmem:[#allocation4 + $0x70] sm:$0xff] %v1209_v18 }
 0x36c PF:  { %v1267_v16 = vld [vmem:[#allocation3 + $0x20] sm:$0xff]  ;;  %v1265_v26 = vld [vmem:[#allocation3 + $0x10] sm:$0xff]  ;;  %v1906_v23 = vmov 0   ;;  %v1268_v54 = vld [vmem:[#allocation3 + $0x28] sm:$0xff] }
 0x36d   :  { %v1263_v58 = vld [vmem:[#allocation3] sm:$0xff]  ;;  %1870 = vset.pattern.permute.xlu2 %v1906_v23  ;;  %1869 = vset.pattern.permute.xlu1 %v1906_v23  ;;  %vm1283_vm0 = vcmp.eq.f32.partialorder %v1267_v16, 0.0  ;;  %vm1281_vm1 = vcmp.eq.f32.partialorder %v1265_v26, 0.0  ;;  %v1266_v1 = vld [vmem:[#allocation3 + $0x18] sm:$0xff]  ;;  %v1264_v31 = vld [vmem:[#allocation3 + $0x8] sm:$0xff]  ;;  %vm1284_vm13 = vcmp.eq.f32.partialorder %v1268_v54, 0.0 }
 0x36e   :  { %vm1279_vm7 = vcmp.eq.f32.partialorder %v1263_v58, 0.0  ;;  %1868 = vset.pattern.permute.xlu0 %v1906_v23  ;;  %v1299_v51 = vsel %vm1283_vm0, 1.0, %v1267_v16  ;;  %v1297_v5 = vsel %vm1281_vm1, 1.0, %v1265_v26  ;;  %vm1282_vm15 = vcmp.eq.f32.partialorder %v1266_v1, 0.0  ;;  %v1271_v61 = vld [vmem:[#allocation3 + $0x40] sm:$0xff]  ;;  %v1270_v59 = vld [vmem:[#allocation3 + $0x38] sm:$0xff] }
 0x36f   :  { %v1295_v14 = vsel %vm1279_vm7, 1.0, %v1263_v58  ;;  %1871 = vrcp.f32 %v1299_v51  ;;  %vm1280_vm3 = vcmp.eq.f32.partialorder %v1264_v31, 0.0  ;;  %v1300_v9 = vsel %vm1284_vm13, 1.0, %v1268_v54  ;;  %v1269_v40 = vld [vmem:[#allocation3 + $0x30] sm:$0xff]  ;;  %v1274_v33 = vld [vmem:[#allocation3 + $0x58] sm:$0xff]  ;;  %v1272_v37 = vld [vmem:[#allocation3 + $0x48] sm:$0xff] }
 0x370   :  { %1873 = vrcp.f32 %v1297_v5  ;;  %v1298_v41 = vsel %vm1282_vm15, 1.0, %v1266_v1  ;;  %v1296_v15 = vsel %vm1280_vm3, 1.0, %v1264_v31  ;;  %vm1287_vm10 = vcmp.eq.f32.partialorder %v1271_v61, 0.0  ;;  %v1273_v28 = vld [vmem:[#allocation3 + $0x50] sm:$0xff]  ;;  %v1276_v22 = vld [vmem:[#allocation3 + $0x68] sm:$0xff]  ;;  %v1275_v38 = vld [vmem:[#allocation3 + $0x60] sm:$0xff] }
 0x371   :  { %1875 = vrcp.f32 %v1295_v14  ;;  %vm1286_vm5 = vcmp.eq.f32.partialorder %v1270_v59, 0.0  ;;  %vm1285_vm12 = vcmp.eq.f32.partialorder %v1269_v40, 0.0  ;;  %v1303_v0 = vsel %vm1287_vm10, 1.0, %v1271_v61  ;;  %v1277_v32 = vld [vmem:[#allocation3 + $0x70] sm:$0xff]  ;;  %v1278_v25 = vld [vmem:[#allocation3 + $0x78] sm:$0xff]  ;;  %v1316_v20 = vld [vmem:[#allocation4 + $0x68] sm:$0xff] }
 0x372   :  { %1877 = vrcp.f32 %v1300_v9  ;;  %v1302_v7 = vsel %vm1286_vm5, 1.0, %v1270_v59  ;;  %v1301_v53 = vsel %vm1285_vm12, 1.0, %v1269_v40  ;;  %vm1290_vm6 = vcmp.eq.f32.partialorder %v1274_v33, 0.0  ;;  %v1315_v56 = vld [vmem:[#allocation4 + $0x50] sm:$0xff]  ;;  %v1251_v42 = vld [vmem:[#allocation5 + $0xf8] sm:$0xff]  ;;  %v1252_v12 = vld [vmem:[#allocation5 + $0x88] sm:$0xff] }
 0x373   :  { %1879 = vrcp.f32 %v1298_v41  ;;  %vm1289_vm4 = vcmp.eq.f32.partialorder %v1273_v28, 0.0  ;;  %vm1288_vm8 = vcmp.eq.f32.partialorder %v1272_v37, 0.0  ;;  %v1306_v45 = vsel %vm1290_vm6, 1.0, %v1274_v33  ;;  %v1766_v57 = vld [vmem:[%s2737_s7 + $0x10] sm:$0xff]   ;;  %v1313_v23 = vld [vmem:[#allocation4 + $0x58] sm:$0xff]  ;;  %v1247_v41 = vld [vmem:[#allocation5 + $0x68] sm:$0xff] }
 0x374   :  { %1881 = vrcp.f32 %v1296_v15  ;;  %v1305_v63 = vsel %vm1289_vm4, 1.0, %v1273_v28  ;;  %v1304_v11 = vsel %vm1288_vm8, 1.0, %v1272_v37  ;;  %vm1293_vm11 = vcmp.eq.f32.partialorder %v1277_v32, 0.0  ;;  %v1311_v51 = vld [vmem:[#allocation4 + $0x30] sm:$0xff]  ;;  %v1765_v15 = vld [vmem:[%s2737_s7 + $0x8] sm:$0xff]   ;;  %v1314_v61 = vld [vmem:[#allocation4 + $0x18] sm:$0xff] }
 0x375   :  { %v1872_v3 = vpop.eup %1871  ;;  %1883 = vrcp.f32 %v1303_v0  ;;  %vm1292_vm14 = vcmp.eq.f32.partialorder %v1276_v22, 0.0  ;;  %vm1291_vm9 = vcmp.eq.f32.partialorder %v1275_v38, 0.0  ;;  %v1309_v13 = vsel %vm1293_vm11, 1.0, %v1277_v32  ;;  %v1249_v14 = vld [vmem:[#allocation5 + $0xb0] sm:$0xff]  ;;  %v1248_v33 = vld [vmem:[#allocation5 + $0xc0] sm:$0xff] }
 0x376   :  { %v1874_v17 = vpop.eup %1873  ;;  %1365 = vperm.xlu2 %1870, %v1872_v3   ;;  %1885 = vrcp.f32 %v1302_v7  ;;  %v1308_v34 = vsel %vm1292_vm14, 1.0, %v1276_v22  ;;  %v1307_v29 = vsel %vm1291_vm9, 1.0, %v1275_v38  ;;  %vm1294_vm2 = vcmp.eq.f32.partialorder %v1278_v25, 0.0  ;;  %v1312_v3 = vld [vmem:[#allocation4] sm:$0xff]  ;;  %v1318_v22 = vld [vmem:[#allocation4 + $0x48] sm:$0xff] }
 0x377   :  { %v1876_v36 = vpop.eup %1875  ;;  %1355 = vperm.xlu1 %1869, %v1874_v17   ;;  %1887 = vrcp.f32 %v1301_v53  ;;  %v1310_v19 = vsel %vm1294_vm2, 1.0, %v1278_v25  ;;  %v1703_v2 = vunpack.c.l.bf16 %v1766_v57  ;;  %v1704_v24 = vunpack.c.h.bf16 %v1766_v57  ;;  %v1694_v7 = vld [vmem:[%s2737_s7] sm:$0xff]   ;;  %v1254_v25 = vld [vmem:[#allocation5 + $0x50] sm:$0xff] }
 0x378   :  { %1345 = vperm.xlu0 %1868, %v1876_v36   ;;  %v1878_v48 = vpop.eup %1877  ;;  %1889 = vrcp.f32 %v1306_v45  ;;  %v1250_v36 = vld [vmem:[#allocation5 + $0x38] sm:$0xff]  ;;  %v1699_v0 = vunpack.c.l.bf16 %v1765_v15  ;;  %v1700_v28 = vunpack.c.h.bf16 %v1765_v15  ;;  %v1695_v45 = vunpack.c.l.bf16 %v1694_v7 }
 0x379   :  { %v1880_v8 = vpop.eup %1879  ;;  %1891 = vrcp.f32 %v1305_v63  ;;  %v1696_v63 = vunpack.c.h.bf16 %v1694_v7 }
 0x37a   :  { %v1882_v47 = vpop.eup %1881  ;;  %1893 = vrcp.f32 %v1304_v11 }
 0x37b   :  { %v1884_v62 = vpop.eup %1883  ;;  %1895 = vrcp.f32 %v1309_v13  ;;  %v1317_v13 = vld [vmem:[#allocation4 + $0x8] sm:$0xff] }
 0x37c   :  { %v1886_v44 = vpop.eup %1885  ;;  %1897 = vrcp.f32 %v1308_v34 }
 0x37d   :  { %v1888_v39 = vpop.eup %1887  ;;  %1899 = vrcp.f32 %v1307_v29  ;;  %v1767_v29 = vld [vmem:[%s2737_s7 + $0x18] sm:$0xff]  }
 0x37e   :  { %1370 = vperm.xlu2 %1870, %v1878_v48   ;;  %v1890_v50 = vpop.eup %1889  ;;  %1901 = vrcp.f32 %v1310_v19 }
 0x37f   :  { %1360 = vperm.xlu1 %1869, %v1880_v8   ;;  %v1892_v10 = vpop.eup %1891 }
 0x380   :  { %1350 = vperm.xlu0 %1868, %v1882_v47   ;;  %v1894_v60 = vpop.eup %1893 }
 0x381   :  { %v1896_v43 = vpop.eup %1895 }
 0x382   :  { %v1898_v4 = vpop.eup %1897 }
 0x383   :  { %v1900_v49 = vpop.eup %1899 }
 0x384   :  { %v1902_v46 = vpop.eup %1901 }
 0x386   :  { %1385 = vperm.xlu2 %1870, %v1884_v62  }
 0x387   :  { %1380 = vperm.xlu1 %1869, %v1886_v44  }
 0x388   :  { %1375 = vperm.xlu0 %1868, %v1888_v39  }
 0x38e   :  { %1400 = vperm.xlu2 %1870, %v1890_v50   ;;  %v1322_v50 = vld [vmem:[#allocation4 + $0x38] sm:$0xff] }
 0x38f   :  { %1395 = vperm.xlu1 %1869, %v1892_v10  }
 0x390   :  { %1390 = vperm.xlu0 %1868, %v1894_v60  }
 0x396   :  { %1415 = vperm.xlu2 %1870, %v1896_v43   ;;  %v1319_v43 = vld [vmem:[#allocation4 + $0x40] sm:$0xff] }
 0x397   :  { %1410 = vperm.xlu1 %1869, %v1898_v4  }
 0x398   :  { %1405 = vperm.xlu0 %1868, %v1900_v49  }
 0x3a0   :  { %1420 = vperm.xlu0 %1868, %v1902_v46   ;;  %v1253_v46 = vld [vmem:[#allocation5 + $0x18] sm:$0xff] }
 0x3d0   :  { %v1366_v21 = vpop.permute.xlu2 %1365 }
 0x3d1   :  { %v1427_v55 = vmul.f32 %v1366_v21, %v1315_v56 }
 0x3d3   :  { %v1443_v30 = vadd.f32 %v1427_v55, %v1251_v42 }
 0x3d5   :  { %v1459_v52 = vmax.f32 %v1443_v30, 0.0  ;;  %v1708_v30 = vunpack.c.h.bf16 %v1767_v29 }
 0x3d7   :  { %v1507_v18 = vadd.f32 %v1703_v2, %v1459_v52  ;;  %v1255_v52 = vld [vmem:[#allocation5 + $0xd0] sm:$0xff] }
 0x3d8   :  { %v1371_v6 = vpop.permute.xlu2 %1370 }
 0x3d9   :  { %v1428_v27 = vmul.f32 %v1371_v6, %v1316_v20  ;;  %v1258_v6 = vld [vmem:[#allocation5] sm:$0xff] }
 0x3db   :  { %v1444_v35 = vadd.f32 %v1428_v27, %v1252_v12  ;;  %v1707_v12 = vunpack.c.l.bf16 %v1767_v29 }
 0x3dd   :  { %v1460_v16 = vmax.f32 %v1444_v35, 0.0  ;;  %v1321_v35 = vld [vmem:[#allocation4 + $0x10] sm:$0xff] }
 0x3df   :  { %v1508_v26 = vadd.f32 %v1704_v24, %v1460_v16 }
 0x3e0   :  { %v1386_v59 = vpop.permute.xlu2 %1385 }
 0x3e1   :  { %v1738_v58 = vpack.c.bf16 %v1508_v26, %v1507_v18  ;;  %v1431_v20 = vmul.f32 %v1386_v59, %v1319_v43  ;;  %v1320_v26 = vld [vmem:[#allocation4 + $0x20] sm:$0xff] }
 0x3e3   :  { %1773 = vst [vmem:[%s2738_s8 + $0x10] sm:$0xff] %v1738_v58   ;;  %v1447_v58 = vadd.f32 %v1431_v20, %v1255_v52 }
 0x3e8   :  { %v1401_v56 = vpop.permute.xlu2 %1400 }
 0x3e9   :  { %v1356_v54 = vpop.permute.xlu1 %1355  ;;  %v1434_v42 = vmul.f32 %v1401_v56, %v1322_v50  ;;  %v1326_v56 = vld [vmem:[#allocation4 + $0x28] sm:$0xff] }
 0x3ea   :  { %v1425_v1 = vmul.f32 %v1356_v54, %v1313_v23  ;;  %v1346_v5 = vpop.permute.xlu0 %1345  ;;  %v1769_v23 = vld [vmem:[%s2737_s7 + $0x28] sm:$0xff]  }
 0x3eb   :  { %v1423_v31 = vmul.f32 %v1346_v5, %v1311_v51  ;;  %v1450_v18 = vadd.f32 %v1434_v42, %v1258_v6  ;;  %v1257_v51 = vld [vmem:[#allocation5 + $0x40] sm:$0xff]  ;;  %v1715_v59 = vunpack.c.l.bf16 %v1769_v23  ;;  %v1771_v42 = vld [vmem:[%s2737_s7 + $0x38] sm:$0xff]  }
 0x3ec   :  { %v1441_v9 = vadd.f32 %v1425_v1, %v1249_v14  ;;  %v1768_v5 = vld [vmem:[%s2737_s7 + $0x20] sm:$0xff]   ;;  %v1724_v52 = vunpack.c.h.bf16 %v1771_v42 }
 0x3ed   :  { %v1439_v17 = vadd.f32 %v1423_v31, %v1247_v41 }
 0x3ee   :  { %v1457_v48 = vmax.f32 %v1441_v9, 0.0  ;;  %v1256_v9 = vld [vmem:[#allocation5 + $0x58] sm:$0xff] }
 0x3ef   :  { %v1455_v62 = vmax.f32 %v1439_v17, 0.0 }
 0x3f0   :  { %v1505_v11 = vadd.f32 %v1699_v0, %v1457_v48  ;;  %v1712_v0 = vunpack.c.h.bf16 %v1768_v5 }
 0x3f1   :  { %v1361_v40 = vpop.permute.xlu1 %1360  ;;  %v1503_v34 = vadd.f32 %v1695_v45, %v1455_v62  ;;  %v1770_v62 = vld [vmem:[%s2737_s7 + $0x30] sm:$0xff]  }
 0x3f2   :  { %v1426_v8 = vmul.f32 %v1361_v40, %v1314_v61  ;;  %v1351_v53 = vpop.permute.xlu0 %1350  ;;  %v1716_v61 = vunpack.c.h.bf16 %v1769_v23  ;;  %v1711_v40 = vunpack.c.l.bf16 %v1768_v5 }
 0x3f3   :  { %v1424_v47 = vmul.f32 %v1351_v53, %v1312_v3  ;;  %v1466_v3 = vmax.f32 %v1450_v18, 0.0  ;;  %v1324_v53 = vld [vmem:[#allocation4 + $0x70] sm:$0xff] }
 0x3f4   :  { %v1442_v37 = vadd.f32 %v1426_v8, %v1250_v36  ;;  %v1463_v36 = vmax.f32 %v1447_v58, 0.0 }
 0x3f5   :  { %v1440_v44 = vadd.f32 %v1424_v47, %v1248_v33  ;;  %v1514_v33 = vadd.f32 %v1716_v61, %v1466_v3 }
 0x3f6   :  { %v1458_v32 = vmax.f32 %v1442_v37, 0.0  ;;  %v1511_v37 = vadd.f32 %v1711_v40, %v1463_v36 }
 0x3f7   :  { %v1456_v39 = vmax.f32 %v1440_v44, 0.0  ;;  %v1260_v44 = vld [vmem:[#allocation5 + $0x20] sm:$0xff] }
 0x3f8   :  { %v1506_v38 = vadd.f32 %v1700_v28, %v1458_v32  ;;  %v1323_v28 = vld [vmem:[#allocation4 + $0x60] sm:$0xff]  ;;  %v1416_v32 = vpop.permute.xlu2 %1415 }
 0x3f9   :  { %v1504_v10 = vadd.f32 %v1696_v63, %v1456_v39  ;;  %v1381_v60 = vpop.permute.xlu1 %1380 }
 0x3fa   :  { %v1733_v4 = vpack.c.bf16 %v1506_v38, %v1505_v11  ;;  %v1430_v19 = vmul.f32 %v1381_v60, %v1318_v22  ;;  %v1376_v49 = vpop.permute.xlu0 %1375  ;;  %v1325_v11 = vld [vmem:[#allocation4 + $0x78] sm:$0xff] }
 0x3fb   :  { %v1728_v21 = vpack.c.bf16 %v1504_v10, %v1503_v34  ;;  %v1429_v55 = vmul.f32 %v1376_v49, %v1317_v13  ;;  %v1259_v13 = vld [vmem:[#allocation5 + $0xe8] sm:$0xff]  ;;  %v1720_v10 = vunpack.c.h.bf16 %v1770_v62  ;;  %v1437_v60 = vmul.f32 %v1416_v32, %v1325_v11 }
 0x3fc   :  { %1772 = vst [vmem:[%s2738_s8 + $0x8] sm:$0xff] %v1733_v4   ;;  %v1446_v57 = vadd.f32 %v1430_v19, %v1254_v25  ;;  %v1719_v25 = vunpack.c.l.bf16 %v1770_v62  ;;  %v1261_v4 = vld [vmem:[#allocation5 + $0xe0] sm:$0xff] }
 0x3fd   :  { %1729 = vst [vmem:[%s2738_s8] sm:$0xff] %v1728_v21   ;;  %v1445_v2 = vadd.f32 %v1429_v55, %v1253_v46  ;;  %v1453_v21 = vadd.f32 %v1437_v60, %v1261_v4 }
 0x3fe   :  { %v1462_v27 = vmax.f32 %v1446_v57, 0.0  ;;  %v1262_v57 = vld [vmem:[#allocation5 + $0x98] sm:$0xff] }
 0x3ff   :  { %v1461_v24 = vmax.f32 %v1445_v2, 0.0  ;;  %v1469_v2 = vmax.f32 %v1453_v21, 0.0 }
 0x400   :  { %v1510_v16 = vadd.f32 %v1708_v30, %v1462_v27 }
 0x401   :  { %v1509_v54 = vadd.f32 %v1707_v12, %v1461_v24  ;;  %v1396_v1 = vpop.permute.xlu1 %1395  ;;  %v1723_v12 = vunpack.c.l.bf16 %v1771_v42 }
 0x402   :  { %v1433_v14 = vmul.f32 %v1396_v1, %v1321_v35  ;;  %v1391_v31 = vpop.permute.xlu0 %1390 }
 0x403   :  { %v1743_v41 = vpack.c.bf16 %v1510_v16, %v1509_v54  ;;  %v1432_v15 = vmul.f32 %v1391_v31, %v1320_v26  ;;  %v1517_v35 = vadd.f32 %v1723_v12, %v1469_v2 }
 0x404   :  { %v1449_v17 = vadd.f32 %v1433_v14, %v1257_v51 }
 0x405   :  { %1774 = vst [vmem:[%s2738_s8 + $0x18] sm:$0xff] %v1743_v41   ;;  %v1448_v48 = vadd.f32 %v1432_v15, %v1256_v9 }
 0x406   :  { %v1465_v7 = vmax.f32 %v1449_v17, 0.0 }
 0x407   :  { %v1464_v8 = vmax.f32 %v1448_v48, 0.0 }
 0x408   :  { %v1513_v47 = vadd.f32 %v1715_v59, %v1465_v7 }
 0x409   :  { %v1512_v45 = vadd.f32 %v1712_v0, %v1464_v8  ;;  %v1411_v63 = vpop.permute.xlu1 %1410 }
 0x40a   :  { %v1753_v39 = vpack.c.bf16 %v1514_v33, %v1513_v47  ;;  %v1436_v22 = vmul.f32 %v1411_v63, %v1324_v53  ;;  %v1406_v38 = vpop.permute.xlu0 %1405 }
 0x40b   :  { %v1748_v50 = vpack.c.bf16 %v1512_v45, %v1511_v37  ;;  %v1435_v34 = vmul.f32 %v1406_v38, %v1323_v28 }
 0x40c   :  { %1776 = vst [vmem:[%s2738_s8 + $0x28] sm:$0xff] %v1753_v39   ;;  %v1452_v29 = vadd.f32 %v1436_v22, %v1260_v44 }
 0x40d   :  { %1775 = vst [vmem:[%s2738_s8 + $0x20] sm:$0xff] %v1748_v50   ;;  %v1451_v43 = vadd.f32 %v1435_v34, %v1259_v13 }
 0x40e   :  { %v1468_v19 = vmax.f32 %v1452_v29, 0.0 }
 0x40f   :  { %v1467_v49 = vmax.f32 %v1451_v43, 0.0 }
 0x410   :  { %v1516_v46 = vadd.f32 %v1720_v10, %v1468_v19 }
 0x411   :  { %v1515_v55 = vadd.f32 %v1719_v25, %v1467_v49 }
 0x412   :  { %v1421_v30 = vpop.permute.xlu0 %1420 }
 0x413   :  { %v1758_v20 = vpack.c.bf16 %v1516_v46, %v1515_v55  ;;  %v1438_v6 = vmul.f32 %v1421_v30, %v1326_v56 }
 0x415   :  { %1777 = vst [vmem:[%s2738_s8 + $0x30] sm:$0xff] %v1758_v20   ;;  %v1454_v27 = vadd.f32 %v1438_v6, %v1262_v57 }
 0x417   :  { %v1470_v24 = vmax.f32 %v1454_v27, 0.0 }
 0x419   :  { %v1518_v18 = vadd.f32 %v1724_v52, %v1470_v24 }
 0x41b   :  { %v1763_v16 = vpack.c.bf16 %v1518_v18, %v1517_v35 }
 0x41d   :  { %1778 = vst [vmem:[%s2738_s8 + $0x38] sm:$0xff] %v1763_v16  }

// kernel: forward.14
= control target key start
LH: loop header
LB: loop body
LE: loop exit
PB: predicated region body
PF: predicated region fallthrough
CT: control target
= control target key end

     0   :  { %vm3059_vm0 = vcmask 7168   ;;  %v2118_v0 = vmov -1e+30   ;;  %v2119_v29 = vmov 0.0   ;;  %s3050_s0 = inlined_call_operand.<no memory space> [shape: s32[1,1], index: 0, kind: input, shape index: {}]   ;;  %s3051_s1 = inlined_call_operand.<no memory space> [shape: s32[1,1], index: 1, kind: input, shape index: {}]   ;;  %s3052_s3 = inlined_call_operand.vmem [shape: bf16[128,256], index: 3, kind: input, shape index: {}]   ;;  %s3053_s7 = inlined_call_operand.vmem [shape: bf16[128,128], index: 7, kind: input, shape index: {}, may-alias: {2,7}]   ;;  %s3054_s8 = inlined_call_operand.vmem [shape: bf16[128,128], index: 8, kind: output, shape index: {}]   ;;  %s3055_s6 = inlined_call_operand.vmem [shape: s8[128,128], index: 6, kind: input, shape index: {}]   ;;  %s3056_s5 = inlined_call_operand.vmem [shape: bf16[128,256], index: 5, kind: input, shape index: {}]   ;;  %s3057_s2 = inlined_call_operand.vmem [shape: bf16[128,128], index: 2, kind: input, shape index: {}, may-alias: {2,7}]   ;;  %s3058_s4 = inlined_call_operand.vmem [shape: f32[1,256], index: 4, kind: input, shape index: {}]  }
   0x1   :  { %s1664_s29 = sshll.u32 %s3051_s1, 4  ;;  %p91_p0 = scmp.lt.s32.totalorder %s3051_s1, 0  ;;  %106 = vst.msk [vmem:[#allocation2] sm:$0xff] %vm3059_vm0, %v2118_v0  ;;  %v1758_v1 = vld [vmem:[%s3052_s3 + $0x70] sm:$0xf]  ;;  %v1854_v50 = vld [vmem:[%s3057_s2] sm:$0xff] }
   0x2   :  { %p77_p1 = scmp.lt.s32.totalorder %s1664_s29, 15  ;;  %107 = vst.msk [vmem:[#allocation2 + $0x8] sm:$0xff] %vm3059_vm0, %v2118_v0  ;;  %v1877_v2 = vld [vmem:[%s3052_s3 + $0x74] sm:$0xf0]  ;;  %v1876_v3 = vld [vmem:[%s3052_s3 + $0x74] sm:$0xf] }
   0x3   :  { %s3158_s1 = smov (!%p91_p0, %s3051_s1), 0  ;;  %108 = vst.msk [vmem:[#allocation2 + $0x10] sm:$0xff] %vm3059_vm0, %v2118_v0  ;;  %v1759_v4 = vor.u32 %v1877_v2, %v1758_v1  ;;  %v1760_v5 = vld [vmem:[%s3052_s3 + $0x78] sm:$0xf0]  ;;  %v1750_v6 = vld [vmem:[%s3052_s3 + $0x60] sm:$0xf] }
   0x4   :  { %s3160_s29 = smov (!%p77_p1, %s1664_s29), 15  ;;  %109 = vst.msk [vmem:[#allocation2 + $0x18] sm:$0xff] %vm3059_vm0, %v2118_v0  ;;  %v1763_v7 = vor.u32 %v1876_v3, %v1760_v5  ;;  %v1875_v8 = vld [vmem:[%s3052_s3 + $0x64] sm:$0xf0]  ;;  %v1874_v9 = vld [vmem:[%s3052_s3 + $0x64] sm:$0xf] }
   0x5   :  { %s1667_s26 = sshll.u32 %s3158_s1, 1  ;;  %110 = vst.msk [vmem:[#allocation2 + $0x20] sm:$0xff] %vm3059_vm0, %v2118_v0  ;;  %320 = vmatpush.bf16.msra.mxu0 %v1759_v4  ;;  %1980 = vmatpush.bf16.msra.mxu2 %v1759_v4  ;;  %v1751_v10 = vor.u32 %v1875_v8, %v1750_v6  ;;  %v1752_v11 = vld [vmem:[%s3052_s3 + $0x68] sm:$0xf0]  ;;  %s1853_s30 = sshll.u32 %s3160_s29, 3  ;;  %v1858_v51 = vld [vmem:[%s3057_s2 + $0x20] sm:$0xff] }
   0x6   :  { %s2213_s11 = scalar_lea.vmem %s3055_s6, %s1667_s26  ;;  %111 = vst.msk [vmem:[#allocation2 + $0x28] sm:$0xff] %vm3059_vm0, %v2118_v0  ;;  %369 = vmatpush.bf16.msra.mxu1 %v1763_v7  ;;  %1988 = vmatpush.bf16.msra.mxu3 %v1763_v7  ;;  %v1755_v12 = vor.u32 %v1874_v9, %v1752_v11  ;;  %v1742_v13 = vld [vmem:[%s3052_s3 + $0x50] sm:$0xf]  ;;  %v1873_v14 = vld [vmem:[%s3052_s3 + $0x54] sm:$0xf0]  ;;  %s2226_s16 = scalar_lea.vmem %s3056_s5, %s1853_s30  ;;  %v1855_v52 = vld [vmem:[%s3057_s2 + $0x8] sm:$0xff] }
   0x7   :  { %112 = vst.msk [vmem:[#allocation2 + $0x30] sm:$0xff] %vm3059_vm0, %v2118_v0  ;;  %v1872_v15 = vld [vmem:[%s3052_s3 + $0x54] sm:$0xf]  ;;  %v1744_v16 = vld [vmem:[%s3052_s3 + $0x58] sm:$0xf0]  ;;  %v1743_v17 = vor.u32 %v1873_v14, %v1742_v13  ;;  %v1859_v53 = vld [vmem:[%s3057_s2 + $0x28] sm:$0xff] }
   0x8   :  { %113 = vst.msk [vmem:[#allocation2 + $0x38] sm:$0xff] %vm3059_vm0, %v2118_v0  ;;  %v1747_v18 = vor.u32 %v1872_v15, %v1744_v16  ;;  %v1734_v19 = vld [vmem:[%s3052_s3 + $0x40] sm:$0xf]  ;;  %v1871_v20 = vld [vmem:[%s3052_s3 + $0x44] sm:$0xf0]  ;;  %v1856_v54 = vld [vmem:[%s3057_s2 + $0x10] sm:$0xff] }
   0x9   :  { %114 = vst.msk [vmem:[#allocation2 + $0x40] sm:$0xff] %vm3059_vm0, %v2118_v0  ;;  %321 = vmatpush.bf16.msra.mxu0 %v1751_v10  ;;  %1981 = vmatpush.bf16.msra.mxu2 %v1751_v10  ;;  %v1870_v21 = vld [vmem:[%s3052_s3 + $0x44] sm:$0xf]  ;;  %v1736_v22 = vld [vmem:[%s3052_s3 + $0x48] sm:$0xf0]  ;;  %v1735_v23 = vor.u32 %v1871_v20, %v1734_v19  ;;  %v1860_v55 = vld [vmem:[%s3057_s2 + $0x30] sm:$0xff] }
   0xa   :  { %115 = vst.msk [vmem:[#allocation2 + $0x48] sm:$0xff] %vm3059_vm0, %v2118_v0  ;;  %370 = vmatpush.bf16.msra.mxu1 %v1755_v12  ;;  %1989 = vmatpush.bf16.msra.mxu3 %v1755_v12  ;;  %v1739_v24 = vor.u32 %v1870_v21, %v1736_v22  ;;  %v1726_v25 = vld [vmem:[%s3052_s3 + $0x30] sm:$0xf]  ;;  %v1869_v26 = vld [vmem:[%s3052_s3 + $0x34] sm:$0xf0]  ;;  %p1764_p2 = scmp.le.s32.totalorder %s3050_s0, 0 }
   0xb   :  { %116 = vst.msk [vmem:[#allocation2 + $0x50] sm:$0xff] %vm3059_vm0, %v2118_v0  ;;  %v1868_v27 = vld [vmem:[%s3052_s3 + $0x34] sm:$0xf]  ;;  %v1728_v28 = vld [vmem:[%s3052_s3 + $0x38] sm:$0xf0]  ;;  %v1727_v30 = vor.u32 %v1869_v26, %v1726_v25 }
   0xc   :  { %117 = vst.msk [vmem:[#allocation2 + $0x58] sm:$0xff] %vm3059_vm0, %v2118_v0  ;;  %v1731_v31 = vor.u32 %v1868_v27, %v1728_v28  ;;  %v1718_v32 = vld [vmem:[%s3052_s3 + $0x20] sm:$0xf]  ;;  %v1867_v33 = vld [vmem:[%s3052_s3 + $0x24] sm:$0xf0]  ;;  %v1857_v56 = vld [vmem:[%s3057_s2 + $0x18] sm:$0xff] }
   0xd   :  { %118 = vst.msk [vmem:[#allocation2 + $0x60] sm:$0xff] %vm3059_vm0, %v2118_v0  ;;  %322 = vmatpush.bf16.msra.mxu0 %v1743_v17  ;;  %1982 = vmatpush.bf16.msra.mxu2 %v1743_v17  ;;  %v1866_v34 = vld [vmem:[%s3052_s3 + $0x24] sm:$0xf]  ;;  %v1720_v35 = vld [vmem:[%s3052_s3 + $0x28] sm:$0xf0]  ;;  %v1719_v36 = vor.u32 %v1867_v33, %v1718_v32  ;;  %v1861_v57 = vld [vmem:[%s3057_s2 + $0x38] sm:$0xff] }
   0xe   :  { %119 = vst.msk [vmem:[#allocation2 + $0x68] sm:$0xff] %vm3059_vm0, %v2118_v0  ;;  %371 = vmatpush.bf16.msra.mxu1 %v1747_v18  ;;  %1990 = vmatpush.bf16.msra.mxu3 %v1747_v18  ;;  %v1723_v37 = vor.u32 %v1866_v34, %v1720_v35  ;;  %v1710_v38 = vld [vmem:[%s3052_s3 + $0x10] sm:$0xf]  ;;  %v1865_v39 = vld [vmem:[%s3052_s3 + $0x14] sm:$0xf0] }
   0xf   :  { %120 = vst.msk [vmem:[#allocation2 + $0x70] sm:$0xff] %vm3059_vm0, %v2118_v0  ;;  %v1864_v40 = vld [vmem:[%s3052_s3 + $0x14] sm:$0xf]  ;;  %v1712_v41 = vld [vmem:[%s3052_s3 + $0x18] sm:$0xf0]  ;;  %v1711_v42 = vor.u32 %v1865_v39, %v1710_v38 }
  0x10   :  { %121 = vst.msk [vmem:[#allocation2 + $0x78] sm:$0xff] %vm3059_vm0, %v2118_v0  ;;  %v1715_v43 = vor.u32 %v1864_v40, %v1712_v41  ;;  %v1702_v44 = vld [vmem:[%s3052_s3] sm:$0xf]  ;;  %v1863_v45 = vld [vmem:[%s3052_s3 + $0x4] sm:$0xf0] }
  0x11   :  { %122 = vst.msk [vmem:[#allocation3] sm:$0xff] %vm3059_vm0, %v2119_v29  ;;  %323 = vmatpush.bf16.msra.mxu0 %v1735_v23  ;;  %1983 = vmatpush.bf16.msra.mxu2 %v1735_v23  ;;  %v1862_v46 = vld [vmem:[%s3052_s3 + $0x4] sm:$0xf]  ;;  %v1704_v47 = vld [vmem:[%s3052_s3 + $0x8] sm:$0xf0]  ;;  %v1703_v48 = vor.u32 %v1863_v45, %v1702_v44 }
  0x12   :  { %123 = vst.msk [vmem:[#allocation3 + $0x8] sm:$0xff] %vm3059_vm0, %v2119_v29  ;;  %372 = vmatpush.bf16.msra.mxu1 %v1739_v24  ;;  %1991 = vmatpush.bf16.msra.mxu3 %v1739_v24  ;;  %v1707_v49 = vor.u32 %v1862_v46, %v1704_v47  ;;  %v186_v58 = vld [vmem:[%s3058_s4] sm:$0x3] }
  0x13   :  { %124 = vst.msk [vmem:[#allocation3 + $0x10] sm:$0xff] %vm3059_vm0, %v2119_v29  ;;  %v2389_v59 = vperm.slane %v186_v58, 0  ;;  %v2391_v60 = vperm.slane %v186_v58, 1 }
  0x14   :  { %125 = vst.msk [vmem:[#allocation3 + $0x18] sm:$0xff] %vm3059_vm0, %v2119_v29 }
  0x15   :  { %126 = vst.msk [vmem:[#allocation3 + $0x20] sm:$0xff] %vm3059_vm0, %v2119_v29  ;;  %324 = vmatpush.bf16.msra.mxu0 %v1727_v30  ;;  %1984 = vmatpush.bf16.msra.mxu2 %v1727_v30 }
  0x16   :  { %127 = vst.msk [vmem:[#allocation3 + $0x28] sm:$0xff] %vm3059_vm0, %v2119_v29  ;;  %373 = vmatpush.bf16.msra.mxu1 %v1731_v31  ;;  %1992 = vmatpush.bf16.msra.mxu3 %v1731_v31 }
  0x17   :  { %128 = vst.msk [vmem:[#allocation3 + $0x30] sm:$0xff] %vm3059_vm0, %v2119_v29 }
  0x18   :  { %129 = vst.msk [vmem:[#allocation3 + $0x38] sm:$0xff] %vm3059_vm0, %v2119_v29 }
  0x19   :  { %130 = vst.msk [vmem:[#allocation3 + $0x40] sm:$0xff] %vm3059_vm0, %v2119_v29  ;;  %325 = vmatpush.bf16.msra.mxu0 %v1719_v36  ;;  %1985 = vmatpush.bf16.msra.mxu2 %v1719_v36 }
  0x1a   :  { %131 = vst.msk [vmem:[#allocation3 + $0x48] sm:$0xff] %vm3059_vm0, %v2119_v29  ;;  %374 = vmatpush.bf16.msra.mxu1 %v1723_v37  ;;  %1993 = vmatpush.bf16.msra.mxu3 %v1723_v37 }
  0x1b   :  { %132 = vst.msk [vmem:[#allocation3 + $0x50] sm:$0xff] %vm3059_vm0, %v2119_v29 }
  0x1c   :  { %133 = vst.msk [vmem:[#allocation3 + $0x58] sm:$0xff] %vm3059_vm0, %v2119_v29 }
  0x1d   :  { %134 = vst.msk [vmem:[#allocation3 + $0x60] sm:$0xff] %vm3059_vm0, %v2119_v29  ;;  %326 = vmatpush.bf16.msra.mxu0 %v1711_v42  ;;  %1986 = vmatpush.bf16.msra.mxu2 %v1711_v42 }
  0x1e   :  { %135 = vst.msk [vmem:[#allocation3 + $0x68] sm:$0xff] %vm3059_vm0, %v2119_v29  ;;  %375 = vmatpush.bf16.msra.mxu1 %v1715_v43  ;;  %1994 = vmatpush.bf16.msra.mxu3 %v1715_v43 }
  0x1f   :  { %136 = vst.msk [vmem:[#allocation3 + $0x70] sm:$0xff] %vm3059_vm0, %v2119_v29 }
  0x20   :  { %137 = vst.msk [vmem:[#allocation3 + $0x78] sm:$0xff] %vm3059_vm0, %v2119_v29 }
  0x21   :  { %138 = vst [vmem:[#allocation4 + $0x30] sm:$0xff] %v2119_v29  ;;  %327 = vmatpush.bf16.msra.mxu0 %v1703_v48  ;;  %1987 = vmatpush.bf16.msra.mxu2 %v1703_v48 }
  0x22   :  { %139 = vst [vmem:[#allocation4] sm:$0xff] %v2119_v29  ;;  %376 = vmatpush.bf16.msra.mxu1 %v1707_v49  ;;  %1995 = vmatpush.bf16.msra.mxu3 %v1707_v49 }
  0x23   :  { %140 = vst [vmem:[#allocation4 + $0x58] sm:$0xff] %v2119_v29 }
  0x24   :  { %141 = vst [vmem:[#allocation4 + $0x18] sm:$0xff] %v2119_v29  ;;  %328 = vmatmul.bf16.vlgmr.msra.gmra.mxu0 %v1854_v50  ;;  %348 = vmatmul.bf16.vlgmr.msra.gmra.mxu2 %v1858_v51 }
  0x25   :  { %142 = vst [vmem:[#allocation4 + $0x50] sm:$0xff] %v2119_v29  ;;  %377 = vmatmul.bf16.vlgmr.msra.gmra.mxu1 %v1854_v50  ;;  %397 = vmatmul.bf16.vlgmr.msra.gmra.mxu3 %v1858_v51 }
  0x26   :  { %143 = vst [vmem:[#allocation4 + $0x68] sm:$0xff] %v2119_v29 }
  0x27   :  { %144 = vst [vmem:[#allocation4 + $0x8] sm:$0xff] %v2119_v29 }
  0x28   :  { %145 = vst [vmem:[#allocation4 + $0x48] sm:$0xff] %v2119_v29 }
  0x29   :  { %146 = vst [vmem:[#allocation4 + $0x40] sm:$0xff] %v2119_v29 }
  0x2a   :  { %147 = vst [vmem:[#allocation4 + $0x20] sm:$0xff] %v2119_v29 }
  0x2b   :  { %148 = vst [vmem:[#allocation4 + $0x10] sm:$0xff] %v2119_v29 }
  0x2c   :  { %149 = vst [vmem:[#allocation4 + $0x38] sm:$0xff] %v2119_v29 }
  0x2d   :  { %150 = vst [vmem:[#allocation4 + $0x60] sm:$0xff] %v2119_v29 }
  0x2e   :  { %151 = vst [vmem:[#allocation4 + $0x70] sm:$0xff] %v2119_v29 }
  0x2f   :  { %152 = vst [vmem:[#allocation4 + $0x78] sm:$0xff] %v2119_v29 }
  0x30   :  { %153 = vst [vmem:[#allocation4 + $0x28] sm:$0xff] %v2119_v29 }
  0x34   :  { %333 = vmatmul.bf16.gmra.mxu0 %v1855_v52  ;;  %353 = vmatmul.bf16.gmra.mxu2 %v1859_v53 }
  0x35   :  { %382 = vmatmul.bf16.gmra.mxu1 %v1855_v52  ;;  %402 = vmatmul.bf16.gmra.mxu3 %v1859_v53 }
  0x44   :  { %338 = vmatmul.bf16.gmra.mxu0 %v1856_v54  ;;  %358 = vmatmul.bf16.gmra.mxu2 %v1860_v55 }
  0x45   :  { %387 = vmatmul.bf16.gmra.mxu1 %v1856_v54  ;;  %407 = vmatmul.bf16.gmra.mxu3 %v1860_v55 }
  0x54   :  { %343 = vmatmul.bf16.gmra.mxu0 %v1857_v56  ;;  %363 = vmatmul.bf16.gmra.mxu2 %v1861_v57 }
  0x55   :  { %392 = vmatmul.bf16.gmra.mxu1 %v1857_v56  ;;  %412 = vmatmul.bf16.gmra.mxu3 %v1861_v57 }
  0xa1   :  { %v329_v61 = vpop.f32.mrf.mxu0 }
  0xa2   :  { %v330_v62 = vadd.f32 %v329_v61, %v2389_v59  ;;  %v378_v63 = vpop.f32.mrf.mxu1 }
  0xa3   :  { %v379_v0 = vadd.f32 %v378_v63, %v2391_v60 }
  0xa4   :  { %418 = vst [vmem:[#allocation5 + $0xa8] sm:$0xff] %v330_v62 }
  0xa5   :  { %419 = vst [vmem:[#allocation5 + $0x68] sm:$0xff] %v379_v0 }
  0xa7   :  { %v349_v1 = vpop.f32.mrf.mxu2 }
  0xa8   :  { %v350_v2 = vadd.f32 %v349_v1, %v2389_v59  ;;  %v398_v3 = vpop.f32.mrf.mxu3 }
  0xa9   :  { %v399_v4 = vadd.f32 %v398_v3, %v2391_v60  ;;  %v331_v5 = vpop.f32.mrf.mxu0 }
  0xaa   :  { %434 = vst [vmem:[#allocation5 + $0xb8] sm:$0xff] %v350_v2  ;;  %v332_v6 = vadd.f32 %v331_v5, %v2389_v59  ;;  %v380_v7 = vpop.f32.mrf.mxu1 }
  0xab   :  { %435 = vst [vmem:[#allocation5 + $0xd0] sm:$0xff] %v399_v4  ;;  %v381_v8 = vadd.f32 %v380_v7, %v2391_v60 }
  0xac   :  { %420 = vst [vmem:[#allocation5 + $0x10] sm:$0xff] %v332_v6 }
  0xad   :  { %421 = vst [vmem:[#allocation5 + $0xc0] sm:$0xff] %v381_v8 }
  0xaf   :  { %v351_v9 = vpop.f32.mrf.mxu2 }
  0xb0   :  { %v352_v10 = vadd.f32 %v351_v9, %v2389_v59  ;;  %v400_v11 = vpop.f32.mrf.mxu3 }
  0xb1   :  { %v401_v12 = vadd.f32 %v400_v11, %v2391_v60  ;;  %v334_v13 = vpop.f32.mrf.mxu0 }
  0xb2   :  { %436 = vst [vmem:[#allocation5 + $0xd8] sm:$0xff] %v352_v10  ;;  %v335_v14 = vadd.f32 %v334_v13, %v2389_v59  ;;  %v383_v15 = vpop.f32.mrf.mxu1 }
  0xb3   :  { %437 = vst [vmem:[#allocation5 + $0x58] sm:$0xff] %v401_v12  ;;  %v384_v16 = vadd.f32 %v383_v15, %v2391_v60 }
  0xb4   :  { %422 = vst [vmem:[#allocation5 + $0xc8] sm:$0xff] %v335_v14 }
  0xb5   :  { %423 = vst [vmem:[#allocation5 + $0xb0] sm:$0xff] %v384_v16 }
  0xb7   :  { %v354_v17 = vpop.f32.mrf.mxu2 }
  0xb8   :  { %v355_v18 = vadd.f32 %v354_v17, %v2389_v59  ;;  %v403_v19 = vpop.f32.mrf.mxu3 }
  0xb9   :  { %v404_v20 = vadd.f32 %v403_v19, %v2391_v60  ;;  %v336_v21 = vpop.f32.mrf.mxu0 }
  0xba   :  { %438 = vst [vmem:[#allocation5 + $0x80] sm:$0xff] %v355_v18  ;;  %v337_v22 = vadd.f32 %v336_v21, %v2389_v59  ;;  %v385_v23 = vpop.f32.mrf.mxu1 }
  0xbb   :  { %439 = vst [vmem:[#allocation5 + $0x40] sm:$0xff] %v404_v20  ;;  %v386_v24 = vadd.f32 %v385_v23, %v2391_v60 }
  0xbc   :  { %424 = vst [vmem:[#allocation5 + $0x70] sm:$0xff] %v337_v22 }
  0xbd   :  { %425 = vst [vmem:[#allocation5 + $0x38] sm:$0xff] %v386_v24 }
  0xbf   :  { %v356_v25 = vpop.f32.mrf.mxu2 }
  0xc0   :  { %v357_v26 = vadd.f32 %v356_v25, %v2389_v59  ;;  %v405_v27 = vpop.f32.mrf.mxu3 }
  0xc1   :  { %v406_v28 = vadd.f32 %v405_v27, %v2391_v60  ;;  %v339_v29 = vpop.f32.mrf.mxu0 }
  0xc2   :  { %440 = vst [vmem:[#allocation5 + $0x28] sm:$0xff] %v357_v26  ;;  %v340_v30 = vadd.f32 %v339_v29, %v2389_v59  ;;  %v388_v31 = vpop.f32.mrf.mxu1 }
  0xc3   :  { %441 = vst [vmem:[#allocation5] sm:$0xff] %v406_v28  ;;  %v389_v32 = vadd.f32 %v388_v31, %v2391_v60 }
  0xc4   :  { %426 = vst [vmem:[#allocation5 + $0x48] sm:$0xff] %v340_v30 }
  0xc5   :  { %427 = vst [vmem:[#allocation5 + $0xf8] sm:$0xff] %v389_v32 }
  0xc7   :  { %v359_v33 = vpop.f32.mrf.mxu2 }
  0xc8   :  { %v360_v34 = vadd.f32 %v359_v33, %v2389_v59  ;;  %v408_v35 = vpop.f32.mrf.mxu3 }
  0xc9   :  { %v409_v36 = vadd.f32 %v408_v35, %v2391_v60  ;;  %v341_v37 = vpop.f32.mrf.mxu0 }
  0xca   :  { %442 = vst [vmem:[#allocation5 + $0x90] sm:$0xff] %v360_v34  ;;  %v342_v38 = vadd.f32 %v341_v37, %v2389_v59  ;;  %v390_v39 = vpop.f32.mrf.mxu1 }
  0xcb   :  { %443 = vst [vmem:[#allocation5 + $0xe8] sm:$0xff] %v409_v36  ;;  %v391_v40 = vadd.f32 %v390_v39, %v2391_v60 }
  0xcc   :  { %428 = vst [vmem:[#allocation5 + $0x78] sm:$0xff] %v342_v38 }
  0xcd   :  { %429 = vst [vmem:[#allocation5 + $0x88] sm:$0xff] %v391_v40 }
  0xcf   :  { %v361_v41 = vpop.f32.mrf.mxu2 }
  0xd0   :  { %v362_v42 = vadd.f32 %v361_v41, %v2389_v59  ;;  %v410_v43 = vpop.f32.mrf.mxu3 }
  0xd1   :  { %v411_v44 = vadd.f32 %v410_v43, %v2391_v60  ;;  %v344_v45 = vpop.f32.mrf.mxu0 }
  0xd2   :  { %444 = vst [vmem:[#allocation5 + $0xa0] sm:$0xff] %v362_v42  ;;  %v345_v46 = vadd.f32 %v344_v45, %v2389_v59  ;;  %v393_v47 = vpop.f32.mrf.mxu1 }
  0xd3   :  { %445 = vst [vmem:[#allocation5 + $0x20] sm:$0xff] %v411_v44  ;;  %v394_v48 = vadd.f32 %v393_v47, %v2391_v60 }
  0xd4   :  { %430 = vst [vmem:[#allocation5 + $0xf0] sm:$0xff] %v345_v46 }
  0xd5   :  { %431 = vst [vmem:[#allocation5 + $0x18] sm:$0xff] %v394_v48 }
  0xd7   :  { %v364_v49 = vpop.f32.mrf.mxu2 }
  0xd8   :  { %v365_v50 = vadd.f32 %v364_v49, %v2389_v59  ;;  %v413_v51 = vpop.f32.mrf.mxu3 }
  0xd9   :  { %v414_v52 = vadd.f32 %v413_v51, %v2391_v60  ;;  %v346_v53 = vpop.f32.mrf.mxu0 }
  0xda   :  { %446 = vst [vmem:[#allocation5 + $0x8] sm:$0xff] %v365_v50  ;;  %v347_v54 = vadd.f32 %v346_v53, %v2389_v59  ;;  %v395_v55 = vpop.f32.mrf.mxu1 }
  0xdb   :  { %447 = vst [vmem:[#allocation5 + $0xe0] sm:$0xff] %v414_v52  ;;  %v396_v56 = vadd.f32 %v395_v55, %v2391_v60 }
  0xdc   :  { %432 = vst [vmem:[#allocation5 + $0x30] sm:$0xff] %v347_v54 }
  0xdd   :  { %433 = vst [vmem:[#allocation5 + $0x50] sm:$0xff] %v396_v56 }
  0xdf   :  { %v366_v57 = vpop.f32.mrf.mxu2  ;;  %457 = sbr.rel (%p1764_p2) target bundleno = 902 (0x386), region = 33 }
  0xe0   :  { %v367_v58 = vadd.f32 %v366_v57, %v2389_v59  ;;  %v415_v61 = vpop.f32.mrf.mxu3 }
  0xe1   :  { %v416_v62 = vadd.f32 %v415_v61, %v2391_v60 }
  0xe2   :  { %448 = vst [vmem:[#allocation5 + $0x60] sm:$0xff] %v367_v58 }
  0xe3   :  { %449 = vst [vmem:[#allocation5 + $0x98] sm:$0xff] %v416_v62 }
  0xe4   :  { %v1795_v63 = vld [vmem:[%s2226_s16 + $0x70] sm:$0xf]  ;;  %v1885_v59 = vld [vmem:[%s2226_s16 + $0x74] sm:$0xf0]  ;;  %v1791_v60 = vld [vmem:[%s2226_s16 + $0x60] sm:$0xf] }
  0xe5   :  { %v1796_v0 = vor.u32 %v1885_v59, %v1795_v63  ;;  %v1884_v1 = vld [vmem:[%s2226_s16 + $0x64] sm:$0xf0]  ;;  %v1787_v3 = vld [vmem:[%s2226_s16 + $0x50] sm:$0xf]  ;;  %v1883_v4 = vld [vmem:[%s2226_s16 + $0x54] sm:$0xf0] }
  0xe6   :  { %v1792_v2 = vor.u32 %v1884_v1, %v1791_v60  ;;  %v1788_v5 = vor.u32 %v1883_v4, %v1787_v3  ;;  %v1783_v6 = vld [vmem:[%s2226_s16 + $0x40] sm:$0xf]  ;;  %v1882_v7 = vld [vmem:[%s2226_s16 + $0x44] sm:$0xf0]  ;;  %v1779_v9 = vld [vmem:[%s2226_s16 + $0x30] sm:$0xf] }
  0xe7   :  { %562 = vmatpush.bf16.xpose.msra.mxu0 %v1796_v0  ;;  %1996 = vmatpush.bf16.xpose.msra.mxu2 %v1796_v0  ;;  %v1784_v8 = vor.u32 %v1882_v7, %v1783_v6  ;;  %v1881_v10 = vld [vmem:[%s2226_s16 + $0x34] sm:$0xf0]  ;;  %v1775_v12 = vld [vmem:[%s2226_s16 + $0x20] sm:$0xf]  ;;  %v1880_v13 = vld [vmem:[%s2226_s16 + $0x24] sm:$0xf0] }
  0xe8   :  { %v1780_v11 = vor.u32 %v1881_v10, %v1779_v9  ;;  %v1776_v14 = vor.u32 %v1880_v13, %v1775_v12  ;;  %v1771_v15 = vld [vmem:[%s2226_s16 + $0x10] sm:$0xf]  ;;  %v1879_v16 = vld [vmem:[%s2226_s16 + $0x14] sm:$0xf0]  ;;  %v1767_v18 = vld [vmem:[%s2226_s16] sm:$0xf] }
  0xe9   :  { %v1772_v17 = vor.u32 %v1879_v16, %v1771_v15  ;;  %v1878_v19 = vld [vmem:[%s2226_s16 + $0x4] sm:$0xf0]  ;;  %v459_v22 = vld [vmem:[#allocation5 + $0x10] sm:$0xff]  ;;  %v466_v29 = vld [vmem:[#allocation5 + $0xb8] sm:$0xff]  ;;  %v2120_v45 = vmov 0  }
  0xea   :  { %v1768_v20 = vor.u32 %v1878_v19, %v1767_v18  ;;  %v458_v21 = vld [vmem:[#allocation5 + $0xa8] sm:$0xff]  ;;  %v464_v23 = vld [vmem:[#allocation5 + $0xf0] sm:$0xff]  ;;  %v467_v30 = vld [vmem:[#allocation5 + $0xd8] sm:$0xff]  ;;  %2016 = vset.pattern.permute.xlu1 %v2120_v45  ;;  %2017 = vset.pattern.permute.xlu2 %v2120_v45 }
  0xeb   :  { %v465_v24 = vld [vmem:[#allocation5 + $0x30] sm:$0xff]  ;;  %v474_v25 = vpack.c.bf16 %v459_v22, %v458_v21  ;;  %v460_v27 = vld [vmem:[#allocation5 + $0xc8] sm:$0xff]  ;;  %v478_v32 = vpack.c.bf16 %v467_v30, %v466_v29  ;;  %v463_v34 = vld [vmem:[#allocation5 + $0x78] sm:$0xff]  ;;  %2018 = vset.pattern.permute.xlu0 %v2120_v45 }
  0xec   :  { %v477_v26 = vpack.c.bf16 %v465_v24, %v464_v23  ;;  %v461_v28 = vld [vmem:[#allocation5 + $0x70] sm:$0xff]  ;;  %v462_v33 = vld [vmem:[#allocation5 + $0x48] sm:$0xff]  ;;  %v468_v35 = vld [vmem:[#allocation5 + $0x80] sm:$0xff]  ;;  %v3087_v23 = vmov 0 }
  0xed   :  { %v475_v31 = vpack.c.bf16 %v461_v28, %v460_v27  ;;  %v469_v36 = vld [vmem:[#allocation5 + $0x28] sm:$0xff]  ;;  %v476_v37 = vpack.c.bf16 %v463_v34, %v462_v33  ;;  %v470_v39 = vld [vmem:[#allocation5 + $0x90] sm:$0xff]  ;;  %v471_v40 = vld [vmem:[#allocation5 + $0xa0] sm:$0xff] }
  0xee   :  { %v479_v38 = vpack.c.bf16 %v469_v36, %v468_v35  ;;  %v480_v41 = vpack.c.bf16 %v471_v40, %v470_v39  ;;  %v472_v42 = vld [vmem:[#allocation5 + $0x8] sm:$0xff]  ;;  %v473_v43 = vld [vmem:[#allocation5 + $0x60] sm:$0xff]  ;;  %v635_v1 = vld [vmem:[%s2213_s11 + $0x10] sm:$0x3] }
  0xef   :  { %563 = vmatpush.bf16.xpose.msra.mxu0 %v1792_v2  ;;  %1997 = vmatpush.bf16.xpose.msra.mxu2 %v1792_v2  ;;  %v481_v44 = vpack.c.bf16 %v473_v43, %v472_v42  ;;  %v627_v46 = vld [vmem:[%s2213_s11] sm:$0x3]  ;;  %v633_v48 = vld [vmem:[%s2213_s11 + $0xc] sm:$0x3]  ;;  %v634_v54 = vld [vmem:[%s2213_s11 + $0xe] sm:$0x3]  ;;  %vm651_vm8 = vnez %v635_v1 }
  0xf0   :  { %vm643_vm1 = vnez %v627_v46  ;;  %vm649_vm2 = vnez %v633_v48  ;;  %v628_v56 = vld [vmem:[%s2213_s11 + $0x2] sm:$0x3]  ;;  %vm650_vm4 = vnez %v634_v54  ;;  %v629_v63 = vld [vmem:[%s2213_s11 + $0x4] sm:$0x3]  ;;  %v667_v10 = vsel %vm651_vm8, 16843009, %v2120_v45 }
  0xf1   :  { %v659_v47 = vsel %vm643_vm1, 16843009, %v2120_v45  ;;  %v665_v53 = vsel %vm649_vm2, 16843009, %v2120_v45  ;;  %vm644_vm5 = vnez %v628_v56  ;;  %v666_v62 = vsel %vm650_vm4, 16843009, %v2120_v45 }
  0xf2   :  { %v675_v49 = vunpack.c.0.s8 %v659_v47  ;;  %v681_v57 = vunpack.c.0.s8 %v665_v53  ;;  %v660_v60 = vsel %vm644_vm5, 16843009, %v2120_v45  ;;  %v682_v2 = vunpack.c.0.s8 %v666_v62  ;;  %v636_v16 = vld [vmem:[%s2213_s11 + $0x12] sm:$0x3]  ;;  %v632_v34 = vld [vmem:[%s2213_s11 + $0xa] sm:$0x3] }
  0xf3   :  { %vm645_vm7 = vnez %v629_v63  ;;  %v676_v4 = vunpack.c.0.s8 %v660_v60  ;;  %vm652_vm13 = vnez %v636_v16  ;;  %vm648_vm2 = vnez %v632_v34  ;;  %v639_v60 = vld [vmem:[%s2213_s11 + $0x18] sm:$0x3] }
  0xf4   :  { %vm2450_vm3 = vcmp.ne.s32.totalorder %v675_v49, 0  ;;  %vm2464_vm6 = vcmp.ne.s32.totalorder %v681_v57, 0  ;;  %vm2476_vm9 = vcmp.ne.s32.totalorder %v682_v2, 0  ;;  %v668_v27 = vsel %vm652_vm13, 16843009, %v2120_v45 }
  0xf5   :  { %vm2481_vm10 = vcmp.ne.s32.totalorder %v676_v4, 0  ;;  %v3108_v34 = vmov 0 }
  0xf7   :  { %564 = vmatpush.bf16.xpose.msra.mxu0 %v1788_v5  ;;  %1998 = vmatpush.bf16.xpose.msra.mxu2 %v1788_v5  ;;  %v661_v5 = vsel %vm645_vm7, 16843009, %v2120_v45 }
  0xf8   :  { %v677_v13 = vunpack.c.0.s8 %v661_v5 }
  0xfa   :  { %vm2498_vm12 = vcmp.ne.s32.totalorder %v677_v13, 0 }
  0xff   :  { %565 = vmatpush.bf16.xpose.msra.mxu0 %v1784_v8  ;;  %1999 = vmatpush.bf16.xpose.msra.mxu2 %v1784_v8 }
 0x107   :  { %566 = vmatpush.bf16.xpose.msra.mxu0 %v1780_v11  ;;  %2000 = vmatpush.bf16.xpose.msra.mxu2 %v1780_v11 }
 0x10f   :  { %567 = vmatpush.bf16.xpose.msra.mxu0 %v1776_v14  ;;  %2001 = vmatpush.bf16.xpose.msra.mxu2 %v1776_v14  ;;  %v630_v14 = vld [vmem:[%s2213_s11 + $0x6] sm:$0x3] }
 0x110   :  { %vm646_vm11 = vnez %v630_v14 }
 0x111   :  { %v662_v24 = vsel %vm646_vm11, 16843009, %v2120_v45 }
 0x112   :  { %v678_v33 = vunpack.c.0.s8 %v662_v24 }
 0x114   :  { %vm2525_vm5 = vcmp.ne.s32.totalorder %v678_v33, 0 }
 0x117   :  { %568 = vmatpush.bf16.xpose.msra.mxu0 %v1772_v17  ;;  %2002 = vmatpush.bf16.xpose.msra.mxu2 %v1772_v17  ;;  %v683_v17 = vunpack.c.0.s8 %v667_v10 }
 0x119   :  { %vm2502_vm14 = vcmp.ne.s32.totalorder %v683_v17, 0 }
 0x11a   :  { %v3088_v23 = vsel %vm2502_vm14, 4294967295, %v3087_v23 }
 0x11b   :  { %3089 = vst [vmem:[#allocation9_spill] sm:$0xff] %v3088_v23 }
 0x11f   :  { %569 = vmatpush.bf16.xpose.msra.mxu0 %v1768_v20  ;;  %2003 = vmatpush.bf16.xpose.msra.mxu2 %v1768_v20  ;;  %v631_v20 = vld [vmem:[%s2213_s11 + $0x8] sm:$0x3] }
 0x120   :  { %vm647_vm15 = vnez %v631_v20  ;;  %v641_v20 = vld [vmem:[%s2213_s11 + $0x1c] sm:$0x3] }
 0x121   :  { %v663_v30 = vsel %vm647_vm15, 16843009, %v2120_v45  ;;  %vm655_vm15 = vnez %v639_v60  ;;  %v2642_v60 = vld [vmem:[#allocation2 + $0x8] sm:$0xff] }
 0x122   :  { %v679_v35 = vunpack.c.0.s8 %v663_v30 }
 0x124   :  { %vm2530_vm7 = vcmp.ne.s32.totalorder %v679_v35, 0 }
 0x126   :  { %570 = vmatmul.bf16.vlgmr.msra.gmra.mxu0 %v474_v25  ;;  %585 = vmatmul.bf16.vlgmr.msra.gmra.mxu2 %v477_v26 }
 0x136   :  { %575 = vmatmul.bf16.gmra.mxu0 %v475_v31  ;;  %590 = vmatmul.bf16.gmra.mxu2 %v478_v32  ;;  %v637_v31 = vld [vmem:[%s2213_s11 + $0x14] sm:$0x3]  ;;  %v684_v32 = vunpack.c.0.s8 %v668_v27 }
 0x137   :  { %vm653_vm1 = vnez %v637_v31  ;;  %v642_v31 = vld [vmem:[%s2213_s11 + $0x1e] sm:$0x3] }
 0x138   :  { %vm2521_vm4 = vcmp.ne.s32.totalorder %v684_v32, 0 }
 0x146   :  { %580 = vmatmul.bf16.gmra.mxu0 %v476_v37  ;;  %595 = vmatmul.bf16.gmra.mxu2 %v479_v38  ;;  %v3090_v38 = vmov 0 }
 0x147   :  { %v3091_v38 = vsel %vm2521_vm4, 4294967295, %v3090_v38 }
 0x148   :  { %3092 = vst [vmem:[#allocation10_spill] sm:$0xff] %v3091_v38  ;;  %v1827_v38 = vld [vmem:[%s2226_s16 + $0x74] sm:$0xf] }
 0x156   :  { %600 = vmatmul.bf16.gmra.mxu2 %v480_v41  ;;  %v669_v41 = vsel %vm653_vm1, 16843009, %v2120_v45 }
 0x157   :  { %v685_v49 = vunpack.c.0.s8 %v669_v41 }
 0x159   :  { %vm2551_vm11 = vcmp.ne.s32.totalorder %v685_v49, 0 }
 0x166   :  { %605 = vmatmul.bf16.gmra.mxu2 %v481_v44  ;;  %v664_v44 = vsel %vm648_vm2, 16843009, %v2120_v45 }
 0x167   :  { %v680_v53 = vunpack.c.0.s8 %v664_v44 }
 0x169   :  { %vm2555_vm13 = vcmp.ne.s32.totalorder %v680_v53, 0  ;;  %v2631_v53 = vld [vmem:[#allocation2 + $0x30] sm:$0xff] }
 0x1a3   :  { %v571_v50 = vpop.f32.mrf.mxu0 }
 0x1a4   :  { %v611_v52 = vmul.f32 0.088388346, %v571_v50  ;;  %v638_v50 = vld [vmem:[%s2213_s11 + $0x16] sm:$0x3] }
 0x1a5   :  { %vm654_vm8 = vnez %v638_v50 }
 0x1a6   :  { %v2458_v55 = vsel %vm2450_vm3, %v611_v52, -1e+30  ;;  %v670_v62 = vsel %vm654_vm8, 16843009, %v2120_v45 }
 0x1a7   :  { %739 = vmax.xlane.f32.xlu0 %v2458_v55  ;;  %v686_v2 = vunpack.c.0.s8 %v670_v62  ;;  %v2640_v62 = vld [vmem:[#allocation2 + $0x38] sm:$0xff] }
 0x1a9   :  { %v586_v58 = vpop.f32.mrf.mxu2  ;;  %vm2572_vm1 = vcmp.ne.s32.totalorder %v686_v2, 0 }
 0x1aa   :  { %v617_v61 = vmul.f32 0.088388346, %v586_v58 }
 0x1ab   :  { %v573_v59 = vpop.f32.mrf.mxu0 }
 0x1ac   :  { %v2472_v3 = vsel %vm2464_vm6, %v617_v61, -1e+30  ;;  %v612_v8 = vmul.f32 0.088388346, %v573_v59 }
 0x1ae   :  { %v2494_v19 = vsel %vm2481_vm10, %v612_v8, -1e+30 }
 0x1af   :  { %751 = vmax.xlane.f32.xlu0 %v2472_v3 }
 0x1b1   :  { %v588_v6 = vpop.f32.mrf.mxu2 }
 0x1b2   :  { %v618_v9 = vmul.f32 0.088388346, %v588_v6  ;;  %v671_v6 = vsel %vm655_vm15, 16843009, %v2120_v45  ;;  %vm657_vm15 = vnez %v641_v20 }
 0x1b3   :  { %v576_v11 = vpop.f32.mrf.mxu0  ;;  %v687_v10 = vunpack.c.0.s8 %v671_v6 }
 0x1b4   :  { %v2488_v15 = vsel %vm2476_vm9, %v618_v9, -1e+30  ;;  %v613_v18 = vmul.f32 0.088388346, %v576_v11  ;;  %v640_v9 = vld [vmem:[%s2213_s11 + $0x1a] sm:$0x3] }
 0x1b5   :  { %753 = vmax.xlane.f32.xlu1 %v2488_v15  ;;  %vm656_vm2 = vnez %v640_v9  ;;  %vm2582_vm8 = vcmp.ne.s32.totalorder %v687_v10, 0  ;;  %v2657_v9 = vld [vmem:[#allocation2 + $0x40] sm:$0xff]  ;;  %v2659_v10 = vld [vmem:[#allocation2 + $0x10] sm:$0xff] }
 0x1b6   :  { %v2509_v26 = vsel %vm2498_vm12, %v613_v18, -1e+30  ;;  %v672_v17 = vsel %vm656_vm2, 16843009, %v2120_v45  ;;  %vm658_vm2 = vnez %v642_v31 }
 0x1b7   :  { %741 = vmax.xlane.f32.xlu0 %v2494_v19 }
 0x1b9   :  { %v591_v22 = vpop.f32.mrf.mxu2 }
 0x1ba   :  { %v619_v25 = vmul.f32 0.088388346, %v591_v22  ;;  %v688_v22 = vunpack.c.0.s8 %v672_v17 }
 0x1bb   :  { %v578_v28 = vpop.f32.mrf.mxu0 }
 0x1bc   :  { %v2514_v29 = vsel %vm2502_vm14, %v619_v25, -1e+30  ;;  %v614_v36 = vmul.f32 0.088388346, %v578_v28  ;;  %vm2593_vm0 = vcmp.ne.s32.totalorder %v688_v22, 0 }
 0x1bd   :  { %755 = vmax.xlane.f32.xlu2 %v2514_v29  ;;  %743 = vmax.xlane.f32.xlu1 %v2509_v26  ;;  %v673_v28 = vsel %vm657_vm15, 16843009, %v2120_v45 }
 0x1be   :  { %v2541_v48 = vsel %vm2525_vm5, %v614_v36, -1e+30  ;;  %v689_v32 = vunpack.c.0.s8 %v673_v28  ;;  %v674_v36 = vsel %vm658_vm2, 16843009, %v2120_v45  ;;  %v2623_v45 = vld [vmem:[#allocation2] sm:$0xff]  ;;  %vm3114_vm2 = vcmask 7168  }
 0x1c1   :  { %v593_v37 = vpop.f32.mrf.mxu2 }
 0x1c2   :  { %v620_v40 = vmul.f32 0.088388346, %v593_v37 }
 0x1c3   :  { %v581_v42 = vpop.f32.mrf.mxu0 }
 0x1c4   :  { %v615_v46 = vmul.f32 0.088388346, %v581_v42  ;;  %v2537_v47 = vsel %vm2521_vm4, %v620_v40, -1e+30  ;;  %vm2604_vm4 = vcmp.ne.s32.totalorder %v689_v32, 0  ;;  %v690_v40 = vunpack.c.0.s8 %v674_v36  ;;  %v2676_v32 = vld [vmem:[#allocation2 + $0x20] sm:$0xff] }
 0x1c5   :  { %3097 = vst [vmem:[#allocation11_spill] sm:$0xff] %v2537_v47  ;;  %757 = vmax.xlane.f32.xlu0 %v2537_v47  ;;  %745 = vmax.xlane.f32.xlu1 %v2541_v48  ;;  %v3109_v34 = vsel %vm2604_vm4, 4294967295, %v3108_v34  ;;  %v3111_v42 = vmov 0 }
 0x1c6   :  { %v2548_v52 = vsel %vm2530_vm7, %v615_v46, -1e+30  ;;  %3110 = vst [vmem:[#allocation12_spill] sm:$0xff] %v3109_v34  ;;  %vm2614_vm15 = vcmp.ne.s32.totalorder %v690_v40, 0  ;;  %v1892_v34 = vld [vmem:[%s2226_s16 + $0x68] sm:$0xf0] }
 0x1c7   :  { %747 = vmax.xlane.f32.xlu2 %v2548_v52  ;;  %v3112_v42 = vsel %vm2614_vm15, 4294967295, %v3111_v42 }
 0x1c8   :  { %3113 = vst [vmem:[#allocation13_spill] sm:$0xff] %v3112_v42  ;;  %v1893_v42 = vld [vmem:[%s2226_s16 + $0x78] sm:$0xf0] }
 0x1c9   :  { %v596_v54 = vpop.f32.mrf.mxu2 }
 0x1ca   :  { %v621_v57 = vmul.f32 0.088388346, %v596_v54 }
 0x1cb   :  { %v583_v58 = vpop.f32.mrf.mxu0 }
 0x1cc   :  { %v616_v63 = vmul.f32 0.088388346, %v583_v58  ;;  %v2562_v59 = vsel %vm2551_vm11, %v621_v57, -1e+30 }
 0x1cd   :  { %759 = vmax.xlane.f32.xlu1 %v2562_v59 }
 0x1ce   :  { %v2568_v1 = vsel %vm2555_vm13, %v616_v63, -1e+30 }
 0x1cf   :  { %749 = vmax.xlane.f32.xlu2 %v2568_v1 }
 0x1d1   :  { %v598_v4 = vpop.f32.mrf.mxu2 }
 0x1d2   :  { %v622_v5 = vmul.f32 0.088388346, %v598_v4 }
 0x1d4   :  { %v2579_v11 = vsel %vm2572_vm1, %v622_v5, -1e+30 }
 0x1d7   :  { %761 = vmax.xlane.f32.xlu2 %v2579_v11 }
 0x1d9   :  { %v601_v13 = vpop.f32.mrf.mxu2 }
 0x1da   :  { %v623_v16 = vmul.f32 0.088388346, %v601_v13 }
 0x1dc   :  { %v2589_v18 = vsel %vm2582_vm8, %v623_v16, -1e+30 }
 0x1dd   :  { %763 = vmax.xlane.f32.xlu0 %v2589_v18 }
 0x1e1   :  { %v603_v24 = vpop.f32.mrf.mxu2 }
 0x1e2   :  { %v624_v27 = vmul.f32 0.088388346, %v603_v24  ;;  %v2674_v24 = vld [vmem:[#allocation2 + $0x48] sm:$0xff] }
 0x1e4   :  { %v2600_v30 = vsel %vm2593_vm0, %v624_v27, -1e+30  ;;  %v726_v27 = vld [vmem:[#allocation2 + $0x18] sm:$0xff] }
 0x1e5   :  { %765 = vmax.xlane.f32.xlu1 %v2600_v30 }
 0x1e9   :  { %v606_v33 = vpop.f32.mrf.mxu2 }
 0x1ea   :  { %v625_v35 = vmul.f32 0.088388346, %v606_v33 }
 0x1ec   :  { %v2611_v37 = vsel %vm2604_vm4, %v625_v35, -1e+30  ;;  %vm3118_vm4 = vmmov %vm3114_vm2 }
 0x1ed   :  { %767 = vmax.xlane.f32.xlu2 %v2611_v37 }
 0x1f1   :  { %v608_v41 = vpop.f32.mrf.mxu2 }
 0x1f2   :  { %v626_v44 = vmul.f32 0.088388346, %v608_v41  ;;  %v2690_v41 = vld [vmem:[#allocation2 + $0x50] sm:$0xff] }
 0x1f4   :  { %v2620_v46 = vsel %vm2614_vm15, %v626_v44, -1e+30  ;;  %vm3115_vm15 = vmmov %vm3114_vm2 }
 0x1f5   :  { %769 = vmax.xlane.f32.xlu0 %v2620_v46 }
 0x21a   :  { %v740_v49 = vpop.xlane.xlu0 %739 }
 0x21b   :  { %v2626_v50 = vmax.f32 %v2623_v45, %v740_v49  ;;  %v2692_v49 = vld [vmem:[#allocation2 + $0x28] sm:$0xff] }
 0x21d   :  { %1325 = vst.msk [vmem:[#allocation2] sm:$0xff] %vm3114_vm2, %v2626_v50  ;;  %837 = vperm.xlu1 %2016, %v2626_v50  }
 0x222   :  { %v752_v54 = vpop.xlane.xlu0 %751 }
 0x223   :  { %v2634_v57 = vmax.f32 %v2631_v53, %v752_v54 }
 0x225   :  { %1331 = vst.msk [vmem:[#allocation2 + $0x30] sm:$0xff] %vm3115_vm15, %v2634_v57  ;;  %vm3116_vm15 = vmmov %vm3114_vm2 }
 0x228   :  { %v754_v63 = vpop.xlane.xlu1 %753 }
 0x229   :  { %v2645_v2 = vmax.f32 %v2640_v62, %v754_v63 }
 0x22a   :  { %v742_v4 = vpop.xlane.xlu0 %741 }
 0x22b   :  { %1332 = vst.msk [vmem:[#allocation2 + $0x38] sm:$0xff] %vm3114_vm2, %v2645_v2  ;;  %v2652_v6 = vmax.f32 %v2642_v60, %v742_v4 }
 0x22d   :  { %1326 = vst.msk [vmem:[#allocation2 + $0x8] sm:$0xff] %vm3116_vm15, %v2652_v6  ;;  %842 = vperm.xlu2 %2017, %v2652_v6   ;;  %vm3117_vm15 = vmmov %vm3114_vm2  ;;  %v788_v23 = vsub.f32 %v2642_v60, %v2652_v6  ;;  %v2760_v6 = vld [vmem:[#allocation2 + $0x78] sm:$0xff] }
 0x230   :  { %v756_v13 = vpop.xlane.xlu2 %755  ;;  %v744_v16 = vpop.xlane.xlu1 %743 }
 0x231   :  { %v2662_v17 = vmax.f32 %v2657_v9, %v756_v13  ;;  %v2665_v20 = vmax.f32 %v2659_v10, %v744_v16  ;;  %v2706_v13 = vld [vmem:[#allocation2 + $0x58] sm:$0xff] }
 0x233   :  { %1333 = vst.msk [vmem:[#allocation2 + $0x40] sm:$0xff] %vm3114_vm2, %v2662_v17  ;;  %847 = vperm.xlu0 %2018, %v2665_v20  }
 0x234   :  { %1327 = vst.msk [vmem:[#allocation2 + $0x10] sm:$0xff] %vm3117_vm15, %v2665_v20  ;;  %vm3119_vm15 = vmmov %vm3114_vm2 }
 0x238   :  { %v758_v28 = vpop.xlane.xlu0 %757  ;;  %v746_v31 = vpop.xlane.xlu1 %745 }
 0x239   :  { %v2679_v33 = vmax.f32 %v2674_v24, %v758_v28  ;;  %v774_v35 = vmax.f32 %v726_v27, %v746_v31  ;;  %v2715_v31 = vld [vmem:[#allocation2 + $0x60] sm:$0xff] }
 0x23a   :  { %v748_v36 = vpop.xlane.xlu2 %747 }
 0x23b   :  { %1334 = vst.msk [vmem:[#allocation2 + $0x48] sm:$0xff] %vm3118_vm4, %v2679_v33  ;;  %v2684_v40 = vmax.f32 %v2676_v32, %v748_v36  ;;  %852 = vperm.xlu2 %2017, %v774_v35   ;;  %vm3120_vm4 = vmmov %vm3114_vm2 }
 0x23c   :  { %1328 = vst.msk [vmem:[#allocation2 + $0x18] sm:$0xff] %vm3114_vm2, %v774_v35 }
 0x23d   :  { %1329 = vst.msk [vmem:[#allocation2 + $0x20] sm:$0xff] %vm3119_vm15, %v2684_v40  ;;  %857 = vperm.xlu1 %2016, %v2684_v40   ;;  %vm3121_vm15 = vmmov %vm3114_vm2 }
 0x240   :  { %v760_v44 = vpop.xlane.xlu1 %759 }
 0x241   :  { %v2695_v54 = vmax.f32 %v2690_v41, %v760_v44 }
 0x242   :  { %v750_v63 = vpop.xlane.xlu2 %749 }
 0x243   :  { %1335 = vst.msk [vmem:[#allocation2 + $0x50] sm:$0xff] %vm3120_vm4, %v2695_v54  ;;  %v2700_v4 = vmax.f32 %v2692_v49, %v750_v63  ;;  %vm3122_vm4 = vmmov %vm3114_vm2  ;;  %v787_v63 = vsub.f32 %v2623_v45, %v2626_v50  ;;  %v1828_v45 = vor.u32 %v1893_v42, %v1827_v38  ;;  %v1823_v50 = vld [vmem:[%s2226_s16 + $0x64] sm:$0xf]  ;;  %v789_v42 = vsub.f32 %v2659_v10, %v2665_v20 }
 0x244   :  { %v1824_v58 = vor.u32 %v1892_v34, %v1823_v50  ;;  %v1815_v50 = vld [vmem:[%s2226_s16 + $0x44] sm:$0xf] }
 0x245   :  { %1330 = vst.msk [vmem:[#allocation2 + $0x28] sm:$0xff] %vm3114_vm2, %v2700_v4  ;;  %887 = vperm.xlu1 %2016, %v2695_v54   ;;  %862 = vperm.xlu2 %2017, %v2700_v4  }
 0x246   :  { %1244 = vmatpush.bf16.msra.mxu1 %v1828_v45  ;;  %2004 = vmatpush.bf16.msra.mxu3 %v1828_v45 }
 0x24a   :  { %v762_v16 = vpop.xlane.xlu2 %761  ;;  %1245 = vmatpush.bf16.msra.mxu1 %v1824_v58  ;;  %2005 = vmatpush.bf16.msra.mxu3 %v1824_v58  ;;  %v3126_v58 = vsub.f32 %v2631_v53, %v2634_v57  ;;  %v792_v53 = vsub.f32 %v2692_v49, %v2700_v4 }
 0x24b   :  { %v2709_v28 = vmax.f32 %v2706_v13, %v762_v16  ;;  %v2726_v16 = vld [vmem:[#allocation2 + $0x68] sm:$0xff] }
 0x24c   :  { %3123 = vst [vmem:[#allocation14_spill] sm:$0xff] %v2726_v16 }
 0x24d   :  { %1336 = vst.msk [vmem:[#allocation2 + $0x58] sm:$0xff] %vm3121_vm15, %v2709_v28  ;;  %867 = vperm.xlu1 %2016, %v2634_v57   ;;  %892 = vperm.xlu2 %2017, %v2709_v28   ;;  %vm3125_vm15 = vmmov %vm3114_vm2  ;;  %v1811_v57 = vld [vmem:[%s2226_s16 + $0x34] sm:$0xf] }
 0x250   :  { %v764_v36 = vpop.xlane.xlu0 %763 }
 0x251   :  { %v2718_v44 = vmax.f32 %v2715_v31, %v764_v36  ;;  %v803_v36 = vmul.f32 1.442695, %v787_v63  ;;  %v2741_v63 = vld [vmem:[#allocation2 + $0x70] sm:$0xff] }
 0x253   :  { %1337 = vst.msk [vmem:[#allocation2 + $0x60] sm:$0xff] %vm3122_vm4, %v2718_v44  ;;  %897 = vperm.xlu0 %2018, %v2718_v44   ;;  %2019 = vpow2.f32 %v803_v36  ;;  %v807_v36 = vmul.f32 1.442695, %v789_v42  ;;  %vm3127_vm4 = vmmov %vm3114_vm2 }
 0x255   :  { %872 = vperm.xlu1 %2016, %v2645_v2  }
 0x258   :  { %v766_v22 = vpop.xlane.xlu1 %765 }
 0x259   :  { %v2729_v5 = vmax.f32 %v2726_v16, %v766_v22  ;;  %v790_v22 = vsub.f32 %v726_v27, %v774_v35  ;;  %v2753_v34 = vpop.eup %2019  ;;  %v1819_v27 = vld [vmem:[%s2226_s16 + $0x54] sm:$0xf]  ;;  %v1891_v35 = vld [vmem:[%s2226_s16 + $0x58] sm:$0xf0] }
 0x25a   :  { %v1820_v60 = vor.u32 %v1891_v35, %v1819_v27  ;;  %v815_v27 = vmul.f32 1.442695, %v3126_v58  ;;  %v796_v35 = vsub.f32 %v2674_v24, %v2679_v33 }
 0x25b   :  { %3124 = vst [vmem:[#allocation15_spill] sm:$0xff] %v2729_v5  ;;  %902 = vperm.xlu2 %2017, %v2729_v5  }
 0x25c   :  { %1338 = vst.msk [vmem:[#allocation2 + $0x68] sm:$0xff] %vm3114_vm2, %v2729_v5  ;;  %v809_v5 = vmul.f32 1.442695, %v790_v22  ;;  %1246 = vmatpush.bf16.msra.mxu1 %v1820_v60  ;;  %v1890_v22 = vld [vmem:[%s2226_s16 + $0x48] sm:$0xf0]  ;;  %2006 = vmatpush.bf16.msra.mxu3 %v1820_v60  ;;  %vm1829_vm2 = vmpackc.low %vm2481_vm10, %vm2450_vm3 }
 0x25d   :  { %877 = vperm.xlu1 %2016, %v2662_v17   ;;  %v1816_v20 = vor.u32 %v1890_v22, %v1815_v50  ;;  %v821_v22 = vmul.f32 1.442695, %v796_v35  ;;  %v1886_v35 = vld [vmem:[%s2226_s16 + $0x8] sm:$0xf0] }
 0x25e   :  { %2021 = vpow2.f32 %v809_v5 }
 0x260   :  { %v768_v16 = vpop.xlane.xlu2 %767  ;;  %1247 = vmatpush.bf16.msra.mxu1 %v1816_v20  ;;  %2007 = vmatpush.bf16.msra.mxu3 %v1816_v20  ;;  %v1887_v20 = vld [vmem:[%s2226_s16 + $0x18] sm:$0xf0] }
 0x261   :  { %v2744_v47 = vmax.f32 %v2741_v63, %v768_v16  ;;  %v805_v16 = vmul.f32 1.442695, %v788_v23  ;;  %v791_v23 = vsub.f32 %v2676_v32, %v2684_v40  ;;  %v1889_v32 = vld [vmem:[%s2226_s16 + $0x38] sm:$0xf0] }
 0x262   :  { %v1812_v40 = vor.u32 %v1889_v32, %v1811_v57  ;;  %v3129_v57 = vsub.f32 %v2657_v9, %v2662_v17 }
 0x263   :  { %v801_v38 = vsub.f32 %v2741_v63, %v2744_v47  ;;  %1339 = vst.msk [vmem:[#allocation2 + $0x70] sm:$0xff] %vm3125_vm15, %v2744_v47  ;;  %907 = vperm.xlu0 %2018, %v2744_v47   ;;  %2023 = vpow2.f32 %v805_v16  ;;  %v811_v60 = vmul.f32 1.442695, %v791_v23  ;;  %v813_v16 = vmul.f32 1.442695, %v792_v53  ;;  %vm1832_vm15 = vmpackc.low %vm2525_vm5, %vm2498_vm12 }
 0x264   :  { %v2778_v42 = vpop.eup %2021  ;;  %2025 = vpow2.f32 %v807_v36  ;;  %1248 = vmatpush.bf16.msra.mxu1 %v1812_v40  ;;  %v1807_v36 = vld [vmem:[%s2226_s16 + $0x24] sm:$0xf]  ;;  %2008 = vmatpush.bf16.msra.mxu3 %v1812_v40  ;;  %v3128_v23 = vsub.f32 %v2640_v62, %v2645_v2  ;;  %v819_v32 = vmul.f32 1.442695, %v3129_v57  ;;  %v798_v2 = vsub.f32 %v2706_v13, %v2709_v28 }
 0x265   :  { %1094 = vperm.xlu1 %2016, %v2753_v34   ;;  %2027 = vpow2.f32 %v815_v27  ;;  %v799_v27 = vsub.f32 %v2715_v31, %v2718_v44  ;;  %v1799_v40 = vld [vmem:[%s2226_s16 + $0x4] sm:$0xf]  ;;  %v797_v31 = vsub.f32 %v2690_v41, %v2695_v54 }
 0x266   :  { %2029 = vpow2.f32 %v811_v60  ;;  %v817_v53 = vmul.f32 1.442695, %v3128_v23  ;;  %v825_v17 = vmul.f32 1.442695, %v798_v2 }
 0x267   :  { %2031 = vpow2.f32 %v813_v16  ;;  %v1800_v16 = vor.u32 %v1886_v35, %v1799_v40  ;;  %v823_v9 = vmul.f32 1.442695, %v797_v31 }
 0x268   :  { %v770_v45 = vpop.xlane.xlu0 %769  ;;  %2033 = vpow2.f32 %v821_v22 }
 0x269   :  { %v2765_v10 = vmax.f32 %v2760_v6, %v770_v45  ;;  %v1888_v45 = vld [vmem:[%s2226_s16 + $0x28] sm:$0xf0]  ;;  %v2789_v49 = vpop.eup %2023  ;;  %2035 = vpow2.f32 %v817_v53 }
 0x26a   :  { %v1808_v4 = vor.u32 %v1888_v45, %v1807_v36  ;;  %v2791_v50 = vpop.eup %2025  ;;  %v827_v45 = vmul.f32 1.442695, %v799_v27  ;;  %2037 = vpow2.f32 %v819_v32 }
 0x26b   :  { %v802_v5 = vsub.f32 %v2760_v6, %v2765_v10  ;;  %1340 = vst.msk [vmem:[#allocation2 + $0x78] sm:$0xff] %vm3127_vm4, %v2765_v10  ;;  %912 = vperm.xlu2 %2017, %v2765_v10   ;;  %882 = vperm.xlu0 %2018, %v2679_v33   ;;  %v2795_v24 = vpop.eup %2027  ;;  %v1803_v33 = vld [vmem:[%s2226_s16 + $0x14] sm:$0xf]  ;;  %vm1838_vm4 = vmpackc.low %vm2476_vm9, %vm2464_vm6  ;;  %v831_v6 = vmul.f32 1.442695, %v801_v38  ;;  %v1077_v38 = vld [vmem:[#allocation4] sm:$0xff] }
 0x26c   :  { %1249 = vmatpush.bf16.msra.mxu1 %v1808_v4  ;;  %2009 = vmatpush.bf16.msra.mxu3 %v1808_v4  ;;  %v1804_v58 = vor.u32 %v1887_v20, %v1803_v33  ;;  %v2810_v60 = vpop.eup %2029  ;;  %2039 = vpow2.f32 %v827_v45 }
 0x26d   :  { %1109 = vperm.xlu1 %2016, %v2778_v42   ;;  %v2812_v36 = vpop.eup %2031  ;;  %2041 = vpow2.f32 %v823_v9  ;;  %v833_v61 = vmul.f32 1.442695, %v802_v5 }
 0x26e   :  { %v2818_v62 = vpop.eup %2033  ;;  %2043 = vpow2.f32 %v825_v17 }
 0x26f   :  { %v2823_v44 = vpop.eup %2035 }
 0x270   :  { %1250 = vmatpush.bf16.msra.mxu1 %v1804_v58  ;;  %2010 = vmatpush.bf16.msra.mxu3 %v1804_v58  ;;  %v2825_v41 = vpop.eup %2037 }
 0x272   :  { %v2829_v54 = vpop.eup %2039 }
 0x273   :  { %1099 = vperm.xlu2 %2017, %v2789_v49   ;;  %1104 = vperm.xlu0 %2018, %v2791_v50   ;;  %v2832_v28 = vpop.eup %2041 }
 0x274   :  { %1251 = vmatpush.bf16.msra.mxu1 %v1800_v16  ;;  %2011 = vmatpush.bf16.msra.mxu3 %v1800_v16  ;;  %v2834_v4 = vpop.eup %2043 }
 0x275   :  { %1124 = vperm.xlu1 %2016, %v2795_v24  }
 0x27b   :  { %1119 = vperm.xlu2 %2017, %v2812_v36   ;;  %1114 = vperm.xlu0 %2018, %v2810_v60  }
 0x27d   :  { %1139 = vperm.xlu1 %2016, %v2818_v62  }
 0x283   :  { %1134 = vperm.xlu2 %2017, %v2825_v41   ;;  %1129 = vperm.xlu0 %2018, %v2823_v44  }
 0x285   :  { %1154 = vperm.xlu1 %2016, %v2829_v54  }
 0x287   :  { %v843_v13 = vpop.permute.xlu2 %842 }
 0x288   :  { %v916_v22 = vsub.f32 %v2494_v19, %v843_v13 }
 0x28a   :  { %v933_v33 = vmul.f32 1.442695, %v916_v22 }
 0x28b   :  { %1149 = vperm.xlu2 %2017, %v2834_v4   ;;  %1144 = vperm.xlu0 %2018, %v2832_v28  }
 0x28c   :  { %2045 = vpow2.f32 %v933_v33 }
 0x28f   :  { %v838_v20 = vpop.permute.xlu1 %837 }
 0x290   :  { %v915_v58 = vsub.f32 %v2458_v55, %v838_v20 }
 0x292   :  { %v931_v27 = vmul.f32 1.442695, %v915_v58  ;;  %v2046_v23 = vpop.eup %2045 }
 0x293   :  { %v964_v31 = vsel %vm2481_vm10, %v2046_v23, 0.0  ;;  %vm1844_vm10 = vmpackc.low %vm2572_vm1, %vm2551_vm11 }
 0x294   :  { %2047 = vpow2.f32 %v931_v27 }
 0x295   :  { %v853_v19 = vpop.permute.xlu2 %852 }
 0x296   :  { %v918_v32 = vsub.f32 %v2541_v48, %v853_v19 }
 0x298   :  { %v937_v40 = vmul.f32 1.442695, %v918_v32 }
 0x29a   :  { %v2048_v53 = vpop.eup %2047  ;;  %2049 = vpow2.f32 %v937_v40 }
 0x29b   :  { %v1830_v57 = vpack.c.bf16 %v2046_v23, %v2048_v53  ;;  %v963_v33 = vsel %vm2450_vm3, %v2048_v53, 0.0  ;;  %vm1835_vm3 = vmpackc.low %vm2555_vm13, %vm2530_vm7 }
 0x29d   :  { %1831 = vmatmul.msk.bf16.vlgmr.msra.gmra.mxu1 %vm1829_vm2, %v1830_v57  ;;  %vm1847_vm2 = vmpackc.low %vm2593_vm0, %vm2582_vm8 }
 0x29f   :  { %v863_v16 = vpop.permute.xlu2 %862 }
 0x2a0   :  { %v2848_v2 = vpop.eup %2049  ;;  %v920_v12 = vsub.f32 %v2568_v1, %v863_v16 }
 0x2a1   :  { %v966_v43 = vsel %vm2525_vm5, %v2848_v2, 0.0 }
 0x2a2   :  { %v941_v58 = vmul.f32 1.442695, %v920_v12 }
 0x2a5   :  { %v848_v35 = vpop.permute.xlu0 %847 }
 0x2a6   :  { %v917_v55 = vsub.f32 %v2509_v26, %v848_v35 }
 0x2a7   :  { %v893_v13 = vpop.permute.xlu2 %892 }
 0x2a8   :  { %v935_v45 = vmul.f32 1.442695, %v917_v55  ;;  %v926_v22 = vsub.f32 %v2579_v11, %v893_v13 }
 0x2aa   :  { %2051 = vpow2.f32 %v935_v45 }
 0x2af   :  { %v858_v9 = vpop.permute.xlu1 %857  ;;  %1013 = vadd.xlane.f32.xlu1 %v964_v31 }
 0x2b0   :  { %v2850_v17 = vpop.eup %2051  ;;  %v919_v48 = vsub.f32 %v2548_v52, %v858_v9  ;;  %v953_v52 = vmul.f32 1.442695, %v926_v22 }
 0x2b1   :  { %v1833_v26 = vpack.c.bf16 %v2848_v2, %v2850_v17 }
 0x2b2   :  { %v939_v20 = vmul.f32 1.442695, %v919_v48 }
 0x2b3   :  { %1834 = vmatmul.msk.bf16.gmra.mxu1 %vm1832_vm15, %v1833_v26 }
 0x2b4   :  { %1011 = vadd.xlane.f32.xlu2 %v963_v33  ;;  %2053 = vpow2.f32 %v939_v20 }
 0x2b5   :  { %2055 = vpow2.f32 %v941_v58  ;;  %v903_v11 = vpop.permute.xlu2 %902 }
 0x2b6   :  { %2057 = vpow2.f32 %v953_v52  ;;  %v928_v16 = vsub.f32 %v2600_v30, %v903_v11 }
 0x2b7   :  { %v888_v27 = vpop.permute.xlu1 %887 }
 0x2b8   :  { %v925_v23 = vsub.f32 %v2562_v59, %v888_v27  ;;  %v957_v31 = vmul.f32 1.442695, %v928_v16  ;;  %v965_v27 = vsel %vm2498_vm12, %v2850_v17, 0.0  ;;  %v3131_v16 = vld [vmem:[#allocation11_spill] sm:$0xff] }
 0x2ba   :  { %v951_v57 = vmul.f32 1.442695, %v925_v23  ;;  %v2054_v19 = vpop.eup %2053 }
 0x2bb   :  { %v2864_v32 = vpop.eup %2055  ;;  %v967_v17 = vsel %vm2530_vm7, %v2054_v19, 0.0 }
 0x2bc   :  { %2059 = vpow2.f32 %v951_v57  ;;  %v2871_v53 = vpop.eup %2057  ;;  %v1836_v59 = vpack.c.bf16 %v2864_v32, %v2054_v19  ;;  %v968_v39 = vsel %vm2555_vm13, %v2864_v32, 0.0 }
 0x2bf   :  { %v868_v1 = vpop.permute.xlu1 %867 }
 0x2c0   :  { %v921_v51 = vsub.f32 %v2472_v3, %v868_v1 }
 0x2c2   :  { %v2060_v40 = vpop.eup %2059  ;;  %v943_v35 = vmul.f32 1.442695, %v921_v51 }
 0x2c3   :  { %1837 = vmatmul.msk.bf16.gmra.mxu1 %vm1835_vm3, %v1836_v59  ;;  %v1845_v3 = vpack.c.bf16 %v2871_v53, %v2060_v40 }
 0x2c4   :  { %2061 = vpow2.f32 %v943_v35 }
 0x2c5   :  { %v898_v55 = vpop.permute.xlu0 %897  ;;  %1846 = vmatmul.msk.bf16.vlgmr.msra.gmra.mxu3 %vm1844_vm10, %v1845_v3 }
 0x2c6   :  { %v927_v45 = vsub.f32 %v2589_v18, %v898_v55  ;;  %v913_v18 = vpop.permute.xlu2 %912 }
 0x2c7   :  { %v873_v9 = vpop.permute.xlu1 %872  ;;  %v930_v0 = vsub.f32 %v2620_v46, %v913_v18 }
 0x2c8   :  { %v955_v13 = vmul.f32 1.442695, %v927_v45  ;;  %v922_v48 = vsub.f32 %v2488_v15, %v873_v9  ;;  %v3134_v9 = vld [vmem:[#allocation13_spill] sm:$0xff] }
 0x2c9   :  { %v961_v51 = vmul.f32 1.442695, %v930_v0 }
 0x2ca   :  { %v2062_v26 = vpop.eup %2061  ;;  %2063 = vpow2.f32 %v955_v13  ;;  %v945_v12 = vmul.f32 1.442695, %v922_v48  ;;  %v973_v13 = vsel %vm2551_vm11, %v2060_v40, 0.0 }
 0x2cb   :  { %2065 = vpow2.f32 %v957_v31  ;;  %v969_v30 = vsel %vm2464_vm6, %v2062_v26, 0.0 }
 0x2cc   :  { %2067 = vpow2.f32 %v945_v12  ;;  %1023 = vadd.xlane.f32.xlu0 %v969_v30 }
 0x2ce   :  { %v1100_v32 = vpop.permute.xlu2 %1099 }
 0x2cf   :  { %v878_v22 = vpop.permute.xlu1 %877 }
 0x2d0   :  { %v2064_v33 = vpop.eup %2063  ;;  %v923_v20 = vsub.f32 %v2514_v29, %v878_v22  ;;  %v974_v22 = vsel %vm2572_vm1, %v2871_v53, 0.0 }
 0x2d1   :  { %v2066_v58 = vpop.eup %2065  ;;  %v975_v2 = vsel %vm2582_vm8, %v2064_v33, 0.0 }
 0x2d2   :  { %v2068_v15 = vpop.eup %2067  ;;  %v947_v52 = vmul.f32 1.442695, %v923_v20  ;;  %v1848_v57 = vpack.c.bf16 %v2066_v58, %v2064_v33  ;;  %v976_v56 = vsel %vm2593_vm0, %v2066_v58, 0.0  ;;  %v3138_v33 = vld [vmem:[#allocation14_spill] sm:$0xff]  ;;  %v3139_v58 = vld [vmem:[#allocation15_spill] sm:$0xff]  ;;  %vm3141_vm0 = vcmask 7168  }
 0x2d3   :  { %v970_v29 = vsel %vm2476_vm9, %v2068_v15, 0.0  ;;  %v1839_v23 = vpack.c.bf16 %v2068_v15, %v2062_v26  ;;  %vm3135_vm9 = vnez %v3134_v9  ;;  %v3136_v26 = vld [vmem:[#allocation10_spill] sm:$0xff]  ;;  %v3140_v8 = vsub.f32 %v3138_v33, %v3139_v58  ;;  %vm3143_vm5 = vmmov %vm3141_vm0 }
 0x2d4   :  { %2069 = vpow2.f32 %v947_v52  ;;  %1015 = vadd.xlane.f32.xlu0 %v965_v27  ;;  %1025 = vadd.xlane.f32.xlu1 %v970_v29  ;;  %vm3137_vm7 = vnez %v3136_v26  ;;  %v1081_v33 = vld [vmem:[#allocation4 + $0x68] sm:$0xff]  ;;  %vm3144_vm11 = vmmov %vm3141_vm0 }
 0x2d5   :  { %v908_v1 = vpop.permute.xlu0 %907  ;;  %1840 = vmatmul.msk.bf16.gmra.mxu1 %vm1838_vm4, %v1839_v23  ;;  %1849 = vmatmul.msk.bf16.gmra.mxu3 %vm1847_vm2, %v1848_v57  ;;  %vm1841_vm15 = vmpackc.low %vm3137_vm7, %vm2502_vm14  ;;  %v829_v53 = vmul.f32 1.442695, %v3140_v8  ;;  %v1076_v23 = vld [vmem:[#allocation4 + $0x30] sm:$0xff] }
 0x2d6   :  { %v929_v11 = vsub.f32 %v2611_v37, %v908_v1  ;;  %v3132_v37 = vld [vmem:[#allocation12_spill] sm:$0xff]  ;;  %v1120_v10 = vpop.permute.xlu2 %1119  ;;  %vm3145_vm13 = vmmov %vm3141_vm0 }
 0x2d7   :  { %vm3133_vm6 = vnez %v3132_v37  ;;  %v1095_v40 = vpop.permute.xlu1 %1094  ;;  %v1078_v37 = vld [vmem:[#allocation4 + $0x58] sm:$0xff]  ;;  %vm3146_vm1 = vmmov %vm3141_vm0 }
 0x2d8   :  { %v959_v59 = vmul.f32 1.442695, %v929_v11  ;;  %vm1850_vm12 = vmpackc.low %vm3135_vm9, %vm3133_vm6  ;;  %v1172_v57 = vmul.f32 %v1095_v40, %v1076_v23  ;;  %v980_v11 = vld [vmem:[#allocation3 + $0x8] sm:$0xff] }
 0x2d9   :  { %vm3147_vm8 = vmmov %vm3141_vm0 }
 0x2da   :  { %v2070_v35 = vpop.eup %2069  ;;  %2071 = vpow2.f32 %v959_v59  ;;  %v1173_v59 = vmul.f32 %v1100_v32, %v1077_v38  ;;  %v986_v32 = vld [vmem:[#allocation3 + $0x38] sm:$0xff]  ;;  %vm3148_vm3 = vmmov %vm3141_vm0 }
 0x2db   :  { %v971_v7 = vsel %vm2502_vm14, %v2070_v35, 0.0  ;;  %2073 = vpow2.f32 %v961_v51  ;;  %vm3142_vm14 = vmmov %vm3141_vm0  ;;  %v1002_v8 = vmul.f32 %v2823_v44, %v986_v32 }
 0x2dc   :  { %1027 = vadd.xlane.f32.xlu2 %v971_v7  ;;  %1019 = vadd.xlane.f32.xlu1 %v967_v17  ;;  %vm3149_vm10 = vmmov %vm3141_vm0 }
 0x2dd   :  { %v883_v46 = vpop.permute.xlu0 %882  ;;  %vm3150_vm4 = vmmov %vm3141_vm0 }
 0x2de   :  { %v924_v3 = vsub.f32 %v3131_v16, %v883_v46  ;;  %v2956_v29 = vpop.permute.xlu2 %1134  ;;  %vm3151_vm2 = vmmov %vm3141_vm0 }
 0x2df   :  { %v1110_v14 = vpop.permute.xlu1 %1109 }
 0x2e0   :  { %v2072_v55 = vpop.eup %2071  ;;  %v949_v45 = vmul.f32 1.442695, %v924_v3  ;;  %v979_v3 = vld [vmem:[#allocation3] sm:$0xff] }
 0x2e1   :  { %v2074_v31 = vpop.eup %2073  ;;  %v977_v25 = vsel %vm3133_vm6, %v2072_v55, 0.0  ;;  %vm3152_vm6 = vmmov %vm3141_vm0 }
 0x2e2   :  { %2075 = vpow2.f32 %v949_v45  ;;  %v1851_v19 = vpack.c.bf16 %v2074_v31, %v2072_v55  ;;  %v978_v20 = vsel %vm3135_vm9, %v2074_v31, 0.0  ;;  %v995_v55 = vmul.f32 %v2753_v34, %v979_v3  ;;  %vm3153_vm9 = vmmov %vm3141_vm0 }
 0x2e3   :  { %2077 = vpow2.f32 %v833_v61 }
 0x2e4   :  { %1031 = vadd.xlane.f32.xlu1 %v973_v13  ;;  %1017 = vadd.xlane.f32.xlu2 %v966_v43  ;;  %2079 = vpow2.f32 %v829_v53  ;;  %v1177_v53 = vmul.f32 %v1120_v10, %v1081_v33 }
 0x2e5   :  { %1852 = vmatmul.msk.bf16.gmra.mxu3 %vm1850_vm12, %v1851_v19  ;;  %2081 = vpow2.f32 %v831_v6  ;;  %v1105_v0 = vpop.permute.xlu0 %1104  ;;  %v1079_v19 = vld [vmem:[#allocation4 + $0x18] sm:$0xff]  ;;  %vm3154_vm12 = vmmov %vm3141_vm0 }
 0x2e6   :  { %v2960_v51 = vpop.permute.xlu2 %1149  ;;  %v1174_v13 = vmul.f32 %v1105_v0, %v1078_v37 }
 0x2e7   :  { %v2943_v15 = vpop.permute.xlu1 %1124 }
 0x2e8   :  { %v2076_v48 = vpop.eup %2075 }
 0x2e9   :  { %v972_v12 = vsel %vm3137_vm7, %v2076_v48, 0.0  ;;  %v1842_v30 = vpack.c.bf16 %v2076_v48, %v2070_v35  ;;  %v2940_v18 = vpop.eup %2077  ;;  %v996_v35 = vmul.f32 %v2789_v49, %v980_v11  ;;  %v1175_v48 = vmul.f32 %v1110_v14, %v1079_v19  ;;  %v1086_v14 = vld [vmem:[#allocation4 + $0x10] sm:$0xff]  ;;  %vm3155_vm7 = vmmov %vm3141_vm0 }
 0x2ea   :  { %1029 = vadd.xlane.f32.xlu0 %v972_v12  ;;  %v2948_v5 = vpop.eup %2079 }
 0x2eb   :  { %1843 = vmatmul.msk.bf16.gmra.mxu1 %vm1841_vm15, %v1842_v30  ;;  %v2953_v27 = vpop.eup %2081  ;;  %vm3156_vm15 = vmmov %vm3141_vm0 }
 0x2ec   :  { %1021 = vadd.xlane.f32.xlu2 %v968_v39  ;;  %1037 = vadd.xlane.f32.xlu1 %v976_v56  ;;  %v985_v39 = vld [vmem:[#allocation3 + $0x30] sm:$0xff] }
 0x2ed   :  { %v1115_v17 = vpop.permute.xlu0 %1114  ;;  %v1080_v56 = vld [vmem:[#allocation4 + $0x50] sm:$0xff]  ;;  %v1001_v34 = vmul.f32 %v2795_v24, %v985_v39 }
 0x2ef   :  { %v2951_v52 = vpop.permute.xlu1 %1139 }
 0x2f2   :  { %1035 = vadd.xlane.f32.xlu0 %v975_v2  ;;  %v1176_v2 = vmul.f32 %v1115_v17, %v1080_v56 }
 0x2f4   :  { %1033 = vadd.xlane.f32.xlu2 %v974_v22 }
 0x2f5   :  { %v2966_v9 = vpop.permute.xlu0 %1129 }
 0x2f7   :  { %v2958_v1 = vpop.permute.xlu1 %1154 }
 0x2fa   :  { %1041 = vadd.xlane.f32.xlu0 %v978_v20 }
 0x2fc   :  { %1039 = vadd.xlane.f32.xlu2 %v977_v25  ;;  %v981_v25 = vld [vmem:[#allocation3 + $0x10] sm:$0xff] }
 0x2fd   :  { %v1145_v26 = vpop.permute.xlu0 %1144  ;;  %v997_v58 = vmul.f32 %v2791_v50, %v981_v25  ;;  %v1082_v50 = vld [vmem:[#allocation4 + $0x8] sm:$0xff] }
 0x2fe   :  { %v1182_v6 = vmul.f32 %v1145_v26, %v1086_v14 }
 0x305   :  { %1169 = vperm.xlu1 %2016, %v2940_v18  }
 0x30e   :  { %1159 = vperm.xlu0 %2018, %v2948_v5  }
 0x314   :  { %1164 = vperm.xlu2 %2017, %v2953_v27  }
 0x31a   :  { %v1253_v47 = vpop.f32.mrf.mxu1 }
 0x31b   :  { %v1293_v63 = vadd.f32 %v1253_v47, %v1172_v57 }
 0x31d   :  { %1309 = vst [vmem:[#allocation4 + $0x30] sm:$0xff] %v1293_v63 }
 0x322   :  { %v1255_v21 = vpop.f32.mrf.mxu1  ;;  %v1014_v7 = vpop.xlane.xlu1 %1013 }
 0x323   :  { %v1294_v46 = vadd.f32 %v1255_v21, %v1173_v59  ;;  %v1044_v16 = vadd.f32 %v1014_v7, %v996_v35  ;;  %v983_v59 = vld [vmem:[#allocation3 + $0x20] sm:$0xff]  ;;  %v1087_v21 = vld [vmem:[#allocation4 + $0x38] sm:$0xff] }
 0x324   :  { %v987_v35 = vld [vmem:[#allocation3 + $0x40] sm:$0xff]  ;;  %v999_v44 = vmul.f32 %v2810_v60, %v983_v59  ;;  %v1183_v7 = vmul.f32 %v2960_v51, %v1087_v21  ;;  %v982_v60 = vld [vmem:[#allocation3 + $0x18] sm:$0xff]  ;;  %v993_v59 = vld [vmem:[#allocation3 + $0x70] sm:$0xff] }
 0x325   :  { %1310 = vst [vmem:[#allocation4] sm:$0xff] %v1294_v46  ;;  %v1003_v10 = vmul.f32 %v2825_v41, %v987_v35  ;;  %v1083_v41 = vld [vmem:[#allocation4 + $0x48] sm:$0xff]  ;;  %v998_v19 = vmul.f32 %v2778_v42, %v982_v60  ;;  %v1085_v35 = vld [vmem:[#allocation4 + $0x20] sm:$0xff] }
 0x326   :  { %1061 = vst.msk [vmem:[#allocation3 + $0x8] sm:$0xff] %vm3141_vm0, %v1044_v16  ;;  %v1179_v56 = vmul.f32 %v2966_v9, %v1083_v41 }
 0x327   :  { %v1012_v45 = vpop.xlane.xlu2 %1011 }
 0x328   :  { %v1043_v31 = vadd.f32 %v1012_v45, %v995_v55  ;;  %v1178_v45 = vmul.f32 %v2943_v15, %v1082_v50 }
 0x32a   :  { %1060 = vst.msk [vmem:[#allocation3] sm:$0xff] %vm3142_vm14, %v1043_v31 }
 0x330   :  { %v1258_v49 = vpop.f32.mrf.mxu1 }
 0x331   :  { %v1295_v43 = vadd.f32 %v1258_v49, %v1174_v13  ;;  %v989_v49 = vld [vmem:[#allocation3 + $0x50] sm:$0xff] }
 0x332   :  { %v1005_v51 = vmul.f32 %v2832_v28, %v989_v49  ;;  %v992_v28 = vld [vmem:[#allocation3 + $0x68] sm:$0xff] }
 0x333   :  { %1311 = vst [vmem:[#allocation4 + $0x58] sm:$0xff] %v1295_v43  ;;  %v1088_v43 = vld [vmem:[#allocation4 + $0x60] sm:$0xff]  ;;  %v1008_v25 = vmul.f32 %v2948_v5, %v992_v28 }
 0x338   :  { %v1260_v12 = vpop.f32.mrf.mxu1 }
 0x339   :  { %v1296_v30 = vadd.f32 %v1260_v12, %v1175_v48  ;;  %v1184_v48 = vmul.f32 %v2958_v1, %v1088_v43 }
 0x33b   :  { %1312 = vst [vmem:[#allocation4 + $0x18] sm:$0xff] %v1296_v30 }
 0x33f   :  { %v1024_v40 = vpop.xlane.xlu0 %1023 }
 0x340   :  { %v1049_v22 = vadd.f32 %v1024_v40, %v1001_v34  ;;  %v1263_v20 = vpop.f32.mrf.mxu1 }
 0x341   :  { %v1297_v61 = vadd.f32 %v1263_v20, %v1176_v2  ;;  %v988_v2 = vld [vmem:[#allocation3 + $0x48] sm:$0xff] }
 0x342   :  { %1066 = vst.msk [vmem:[#allocation3 + $0x30] sm:$0xff] %vm3143_vm5, %v1049_v22  ;;  %v984_v20 = vld [vmem:[#allocation3 + $0x28] sm:$0xff]  ;;  %v1004_v42 = vmul.f32 %v2818_v62, %v988_v2  ;;  %v1084_v62 = vld [vmem:[#allocation4 + $0x40] sm:$0xff] }
 0x343   :  { %1313 = vst [vmem:[#allocation4 + $0x50] sm:$0xff] %v1297_v61  ;;  %v1000_v9 = vmul.f32 %v2812_v36, %v984_v20 }
 0x347   :  { %v1016_v23 = vpop.xlane.xlu0 %1015  ;;  %v1026_v24 = vpop.xlane.xlu1 %1025 }
 0x348   :  { %v1045_v57 = vadd.f32 %v1016_v23, %v997_v58  ;;  %v1050_v0 = vadd.f32 %v1026_v24, %v1002_v8  ;;  %v1265_v47 = vpop.f32.mrf.mxu1  ;;  %v1278_v63 = vpop.f32.mrf.mxu3  ;;  %v991_v8 = vld [vmem:[#allocation3 + $0x60] sm:$0xff] }
 0x349   :  { %v1298_v38 = vadd.f32 %v1265_v47, %v1177_v53  ;;  %v1303_v11 = vadd.f32 %v1278_v63, %v1182_v6  ;;  %v990_v53 = vld [vmem:[#allocation3 + $0x58] sm:$0xff]  ;;  %v1007_v6 = vmul.f32 %v2829_v54, %v991_v8 }
 0x34a   :  { %1062 = vst.msk [vmem:[#allocation3 + $0x10] sm:$0xff] %vm3144_vm11, %v1045_v57  ;;  %v1006_v36 = vmul.f32 %v2834_v4, %v990_v53  ;;  %v1180_v57 = vmul.f32 %v2956_v29, %v1084_v62  ;;  %v1009_v4 = vmul.f32 %v2953_v27, %v993_v59  ;;  %v1181_v29 = vmul.f32 %v2951_v52, %v1085_v35  ;;  %v1089_v52 = vld [vmem:[#allocation4 + $0x70] sm:$0xff] }
 0x34b   :  { %1067 = vst.msk [vmem:[#allocation3 + $0x38] sm:$0xff] %vm3145_vm13, %v1050_v0 }
 0x34c   :  { %1314 = vst [vmem:[#allocation4 + $0x68] sm:$0xff] %v1298_v38 }
 0x34d   :  { %1319 = vst [vmem:[#allocation4 + $0x10] sm:$0xff] %v1303_v11  ;;  %v994_v11 = vld [vmem:[#allocation3 + $0x78] sm:$0xff] }
 0x34e   :  { %v1010_v54 = vmul.f32 %v2940_v18, %v994_v11 }
 0x34f   :  { %v1020_v17 = vpop.xlane.xlu1 %1019  ;;  %v1028_v46 = vpop.xlane.xlu2 %1027 }
 0x350   :  { %v1047_v16 = vadd.f32 %v1020_v17, %v999_v44  ;;  %v1051_v3 = vadd.f32 %v1028_v46, %v1003_v10  ;;  %v1280_v55 = vpop.f32.mrf.mxu3 }
 0x351   :  { %v1304_v31 = vadd.f32 %v1280_v55, %v1183_v7 }
 0x352   :  { %1064 = vst.msk [vmem:[#allocation3 + $0x20] sm:$0xff] %vm3146_vm1, %v1047_v16  ;;  %v1268_v37 = vpop.f32.mrf.mxu1  ;;  %v1091_v16 = vld [vmem:[#allocation4 + $0x28] sm:$0xff] }
 0x353   :  { %1068 = vst.msk [vmem:[#allocation3 + $0x40] sm:$0xff] %vm3147_vm8, %v1051_v3  ;;  %v1299_v13 = vadd.f32 %v1268_v37, %v1178_v45  ;;  %v1090_v3 = vld [vmem:[#allocation4 + $0x78] sm:$0xff] }
 0x354   :  { %1320 = vst [vmem:[#allocation4 + $0x38] sm:$0xff] %v1304_v31 }
 0x355   :  { %1315 = vst [vmem:[#allocation4 + $0x8] sm:$0xff] %v1299_v13 }
 0x357   :  { %v1032_v15 = vpop.xlane.xlu1 %1031  ;;  %v1018_v26 = vpop.xlane.xlu2 %1017 }
 0x358   :  { %v1053_v12 = vadd.f32 %v1032_v15, %v1005_v51  ;;  %v1046_v30 = vadd.f32 %v1018_v26, %v998_v19  ;;  %v1283_v39 = vpop.f32.mrf.mxu3 }
 0x359   :  { %v1305_v34 = vadd.f32 %v1283_v39, %v1184_v48 }
 0x35a   :  { %1070 = vst.msk [vmem:[#allocation3 + $0x50] sm:$0xff] %vm3148_vm3, %v1053_v12  ;;  %v1270_v40 = vpop.f32.mrf.mxu1 }
 0x35b   :  { %1063 = vst.msk [vmem:[#allocation3 + $0x18] sm:$0xff] %vm3149_vm10, %v1046_v30  ;;  %v1300_v22 = vadd.f32 %v1270_v40, %v1179_v56 }
 0x35c   :  { %1321 = vst [vmem:[#allocation4 + $0x60] sm:$0xff] %v1305_v34 }
 0x35d   :  { %1316 = vst [vmem:[#allocation4 + $0x48] sm:$0xff] %v1300_v22  ;;  %v1030_v1 = vpop.xlane.xlu0 %1029 }
 0x35e   :  { %v1052_v61 = vadd.f32 %v1030_v1, %v1004_v42 }
 0x35f   :  { %v1038_v32 = vpop.xlane.xlu1 %1037  ;;  %v1022_v33 = vpop.xlane.xlu2 %1021 }
 0x360   :  { %1069 = vst.msk [vmem:[#allocation3 + $0x48] sm:$0xff] %vm3150_vm4, %v1052_v61  ;;  %v1056_v14 = vadd.f32 %v1038_v32, %v1008_v25  ;;  %v1048_v58 = vadd.f32 %v1022_v33, %v1000_v9  ;;  %v1285_v23 = vpop.f32.mrf.mxu3 }
 0x362   :  { %1073 = vst.msk [vmem:[#allocation3 + $0x68] sm:$0xff] %vm3151_vm2, %v1056_v14 }
 0x363   :  { %1065 = vst.msk [vmem:[#allocation3 + $0x28] sm:$0xff] %vm3152_vm6, %v1048_v58 }
 0x365   :  { %v1036_v24 = vpop.xlane.xlu0 %1035 }
 0x366   :  { %v1055_v5 = vadd.f32 %v1036_v24, %v1007_v6 }
 0x367   :  { %v1034_v0 = vpop.xlane.xlu2 %1033 }
 0x368   :  { %1072 = vst.msk [vmem:[#allocation3 + $0x60] sm:$0xff] %vm3153_vm9, %v1055_v5  ;;  %v1054_v47 = vadd.f32 %v1034_v0, %v1006_v36  ;;  %v1273_v63 = vpop.f32.mrf.mxu1  ;;  %v1288_v44 = vpop.f32.mrf.mxu3 }
 0x369   :  { %v1301_v38 = vadd.f32 %v1273_v63, %v1180_v57 }
 0x36a   :  { %1071 = vst.msk [vmem:[#allocation3 + $0x58] sm:$0xff] %vm3154_vm12, %v1054_v47 }
 0x36b   :  { %1317 = vst [vmem:[#allocation4 + $0x40] sm:$0xff] %v1301_v38 }
 0x36d   :  { %v1042_v21 = vpop.xlane.xlu0 %1041 }
 0x36e   :  { %v1058_v50 = vadd.f32 %v1042_v21, %v1010_v54 }
 0x36f   :  { %v1040_v10 = vpop.xlane.xlu2 %1039 }
 0x370   :  { %1075 = vst.msk [vmem:[#allocation3 + $0x78] sm:$0xff] %vm3155_vm7, %v1058_v50  ;;  %v1057_v7 = vadd.f32 %v1040_v10, %v1009_v4  ;;  %v1275_v17 = vpop.f32.mrf.mxu1  ;;  %v1290_v37 = vpop.f32.mrf.mxu3 }
 0x371   :  { %v1302_v46 = vadd.f32 %v1275_v17, %v1181_v29 }
 0x372   :  { %1074 = vst.msk [vmem:[#allocation3 + $0x70] sm:$0xff] %vm3156_vm15, %v1057_v7 }
 0x373   :  { %1318 = vst [vmem:[#allocation4 + $0x20] sm:$0xff] %v1302_v46 }
 0x377   :  { %v1170_v55 = vpop.permute.xlu1 %1169  ;;  %v1165_v18 = vpop.permute.xlu2 %1164 }
 0x378   :  { %v1187_v45 = vmul.f32 %v1170_v55, %v1091_v16  ;;  %v1186_v31 = vmul.f32 %v1165_v18, %v1090_v3 }
 0x37a   :  { %v1308_v27 = vadd.f32 %v1290_v37, %v1187_v45  ;;  %v1307_v13 = vadd.f32 %v1288_v44, %v1186_v31 }
 0x37c   :  { %1324 = vst [vmem:[#allocation4 + $0x28] sm:$0xff] %v1308_v27 }
 0x37d   :  { %1323 = vst [vmem:[#allocation4 + $0x78] sm:$0xff] %v1307_v13 }
 0x380   :  { %v1160_v49 = vpop.permute.xlu0 %1159 }
 0x381   :  { %v1185_v60 = vmul.f32 %v1160_v49, %v1089_v52 }
 0x383   :  { %v1306_v43 = vadd.f32 %v1285_v23, %v1185_v60 }
 0x385   :  { %1322 = vst [vmem:[#allocation4 + $0x70] sm:$0xff] %v1306_v43 }
 0x386 PF:  { %v1364_v41 = vld [vmem:[#allocation3 + $0x20] sm:$0xff]  ;;  %v1362_v51 = vld [vmem:[#allocation3 + $0x10] sm:$0xff]  ;;  %v2121_v48 = vmov 0   ;;  %v1365_v15 = vld [vmem:[#allocation3 + $0x28] sm:$0xff] }
 0x387   :  { %v1360_v19 = vld [vmem:[#allocation3] sm:$0xff]  ;;  %2085 = vset.pattern.permute.xlu2 %v2121_v48  ;;  %2084 = vset.pattern.permute.xlu1 %v2121_v48  ;;  %vm1380_vm0 = vcmp.eq.f32.partialorder %v1364_v41, 0.0  ;;  %vm1378_vm14 = vcmp.eq.f32.partialorder %v1362_v51, 0.0  ;;  %v1363_v26 = vld [vmem:[#allocation3 + $0x18] sm:$0xff]  ;;  %v1361_v56 = vld [vmem:[#allocation3 + $0x8] sm:$0xff]  ;;  %vm1381_vm11 = vcmp.eq.f32.partialorder %v1365_v15, 0.0 }
 0x388   :  { %vm1376_vm5 = vcmp.eq.f32.partialorder %v1360_v19, 0.0  ;;  %2083 = vset.pattern.permute.xlu0 %v2121_v48  ;;  %v1396_v12 = vsel %vm1380_vm0, 1.0, %v1364_v41  ;;  %v1394_v30 = vsel %vm1378_vm14, 1.0, %v1362_v51  ;;  %vm1379_vm13 = vcmp.eq.f32.partialorder %v1363_v26, 0.0  ;;  %v1368_v22 = vld [vmem:[#allocation3 + $0x40] sm:$0xff]  ;;  %v1367_v20 = vld [vmem:[#allocation3 + $0x38] sm:$0xff] }
 0x389   :  { %v1392_v39 = vsel %vm1376_vm5, 1.0, %v1360_v19  ;;  %2086 = vrcp.f32 %v1396_v12  ;;  %vm1377_vm1 = vcmp.eq.f32.partialorder %v1361_v56, 0.0  ;;  %v1397_v34 = vsel %vm1381_vm11, 1.0, %v1365_v15  ;;  %v1366_v1 = vld [vmem:[#allocation3 + $0x30] sm:$0xff]  ;;  %v1371_v58 = vld [vmem:[#allocation3 + $0x58] sm:$0xff]  ;;  %v1369_v62 = vld [vmem:[#allocation3 + $0x48] sm:$0xff] }
 0x38a   :  { %2088 = vrcp.f32 %v1394_v30  ;;  %v1395_v2 = vsel %vm1379_vm13, 1.0, %v1363_v26  ;;  %v1393_v40 = vsel %vm1377_vm1, 1.0, %v1361_v56  ;;  %vm1384_vm8 = vcmp.eq.f32.partialorder %v1368_v22, 0.0  ;;  %v1370_v53 = vld [vmem:[#allocation3 + $0x50] sm:$0xff]  ;;  %v1373_v47 = vld [vmem:[#allocation3 + $0x68] sm:$0xff]  ;;  %v1372_v63 = vld [vmem:[#allocation3 + $0x60] sm:$0xff] }
 0x38b   :  { %2090 = vrcp.f32 %v1392_v39  ;;  %vm1383_vm3 = vcmp.eq.f32.partialorder %v1367_v20, 0.0  ;;  %vm1382_vm10 = vcmp.eq.f32.partialorder %v1366_v1, 0.0  ;;  %v1400_v25 = vsel %vm1384_vm8, 1.0, %v1368_v22  ;;  %v1374_v57 = vld [vmem:[#allocation3 + $0x70] sm:$0xff]  ;;  %v1375_v50 = vld [vmem:[#allocation3 + $0x78] sm:$0xff]  ;;  %v1413_v45 = vld [vmem:[#allocation4 + $0x68] sm:$0xff] }
 0x38c   :  { %2092 = vrcp.f32 %v1397_v34  ;;  %v1399_v32 = vsel %vm1383_vm3, 1.0, %v1367_v20  ;;  %v1398_v14 = vsel %vm1382_vm10, 1.0, %v1366_v1  ;;  %vm1387_vm4 = vcmp.eq.f32.partialorder %v1371_v58, 0.0  ;;  %v1412_v17 = vld [vmem:[#allocation4 + $0x50] sm:$0xff]  ;;  %v1348_v3 = vld [vmem:[#allocation5 + $0xf8] sm:$0xff]  ;;  %v1349_v37 = vld [vmem:[#allocation5 + $0x88] sm:$0xff] }
 0x38d   :  { %2094 = vrcp.f32 %v1395_v2  ;;  %vm1386_vm2 = vcmp.eq.f32.partialorder %v1370_v53, 0.0  ;;  %vm1385_vm6 = vcmp.eq.f32.partialorder %v1369_v62, 0.0  ;;  %v1403_v6 = vsel %vm1387_vm4, 1.0, %v1371_v58  ;;  %v1967_v18 = vld [vmem:[%s3053_s7 + $0x10] sm:$0xff]   ;;  %v1410_v48 = vld [vmem:[#allocation4 + $0x58] sm:$0xff]  ;;  %v1344_v2 = vld [vmem:[#allocation5 + $0x68] sm:$0xff] }
 0x38e   :  { %2096 = vrcp.f32 %v1393_v40  ;;  %v1402_v24 = vsel %vm1386_vm2, 1.0, %v1370_v53  ;;  %v1401_v36 = vsel %vm1385_vm6, 1.0, %v1369_v62  ;;  %vm1390_vm9 = vcmp.eq.f32.partialorder %v1374_v57, 0.0  ;;  %v1408_v12 = vld [vmem:[#allocation4 + $0x30] sm:$0xff]  ;;  %v1966_v40 = vld [vmem:[%s3053_s7 + $0x8] sm:$0xff]   ;;  %v1411_v22 = vld [vmem:[#allocation4 + $0x18] sm:$0xff] }
 0x38f   :  { %v2087_v28 = vpop.eup %2086  ;;  %2098 = vrcp.f32 %v1400_v25  ;;  %vm1389_vm12 = vcmp.eq.f32.partialorder %v1373_v47, 0.0  ;;  %vm1388_vm7 = vcmp.eq.f32.partialorder %v1372_v63, 0.0  ;;  %v1406_v38 = vsel %vm1390_vm9, 1.0, %v1374_v57  ;;  %v1346_v39 = vld [vmem:[#allocation5 + $0xb0] sm:$0xff]  ;;  %v1345_v58 = vld [vmem:[#allocation5 + $0xc0] sm:$0xff] }
 0x390   :  { %v2089_v42 = vpop.eup %2088  ;;  %1462 = vperm.xlu2 %2085, %v2087_v28   ;;  %2100 = vrcp.f32 %v1399_v32  ;;  %v1405_v59 = vsel %vm1389_vm12, 1.0, %v1373_v47  ;;  %v1404_v54 = vsel %vm1388_vm7, 1.0, %v1372_v63  ;;  %vm1391_vm15 = vcmp.eq.f32.partialorder %v1375_v50, 0.0  ;;  %v1409_v28 = vld [vmem:[#allocation4] sm:$0xff]  ;;  %v1415_v47 = vld [vmem:[#allocation4 + $0x48] sm:$0xff] }
 0x391   :  { %v2091_v61 = vpop.eup %2090  ;;  %1452 = vperm.xlu1 %2084, %v2089_v42   ;;  %2102 = vrcp.f32 %v1398_v14  ;;  %v1407_v44 = vsel %vm1391_vm15, 1.0, %v1375_v50  ;;  %v1904_v27 = vunpack.c.l.bf16 %v1967_v18  ;;  %v1905_v49 = vunpack.c.h.bf16 %v1967_v18  ;;  %v1895_v32 = vld [vmem:[%s3053_s7] sm:$0xff]   ;;  %v1351_v50 = vld [vmem:[#allocation5 + $0x50] sm:$0xff] }
 0x392   :  { %1442 = vperm.xlu0 %2083, %v2091_v61   ;;  %v2093_v9 = vpop.eup %2092  ;;  %2104 = vrcp.f32 %v1403_v6  ;;  %v1347_v61 = vld [vmem:[#allocation5 + $0x38] sm:$0xff]  ;;  %v1900_v25 = vunpack.c.l.bf16 %v1966_v40  ;;  %v1901_v53 = vunpack.c.h.bf16 %v1966_v40  ;;  %v1896_v6 = vunpack.c.l.bf16 %v1895_v32 }
 0x393   :  { %v2095_v33 = vpop.eup %2094  ;;  %2106 = vrcp.f32 %v1402_v24  ;;  %v1897_v24 = vunpack.c.h.bf16 %v1895_v32 }
 0x394   :  { %v2097_v8 = vpop.eup %2096  ;;  %2108 = vrcp.f32 %v1401_v36 }
 0x395   :  { %v2099_v23 = vpop.eup %2098  ;;  %2110 = vrcp.f32 %v1406_v38  ;;  %v1414_v38 = vld [vmem:[#allocation4 + $0x8] sm:$0xff] }
 0x396   :  { %v2101_v5 = vpop.eup %2100  ;;  %2112 = vrcp.f32 %v1405_v59 }
 0x397   :  { %v2103_v0 = vpop.eup %2102  ;;  %2114 = vrcp.f32 %v1404_v54  ;;  %v1968_v54 = vld [vmem:[%s3053_s7 + $0x18] sm:$0xff]  }
 0x398   :  { %1467 = vperm.xlu2 %2085, %v2093_v9   ;;  %v2105_v11 = vpop.eup %2104  ;;  %2116 = vrcp.f32 %v1407_v44 }
 0x399   :  { %1457 = vperm.xlu1 %2084, %v2095_v33   ;;  %v2107_v35 = vpop.eup %2106 }
 0x39a   :  { %1447 = vperm.xlu0 %2083, %v2097_v8   ;;  %v2109_v21 = vpop.eup %2108 }
 0x39b   :  { %v2111_v4 = vpop.eup %2110 }
 0x39c   :  { %v2113_v29 = vpop.eup %2112 }
 0x39d   :  { %v2115_v10 = vpop.eup %2114 }
 0x39e   :  { %v2117_v7 = vpop.eup %2116 }
 0x3a0   :  { %1482 = vperm.xlu2 %2085, %v2099_v23  }
 0x3a1   :  { %1477 = vperm.xlu1 %2084, %v2101_v5  }
 0x3a2   :  { %1472 = vperm.xlu0 %2083, %v2103_v0  }
 0x3a8   :  { %1497 = vperm.xlu2 %2085, %v2105_v11   ;;  %v1419_v11 = vld [vmem:[#allocation4 + $0x38] sm:$0xff] }
 0x3a9   :  { %1492 = vperm.xlu1 %2084, %v2107_v35  }
 0x3aa   :  { %1487 = vperm.xlu0 %2083, %v2109_v21  }
 0x3b0   :  { %1512 = vperm.xlu2 %2085, %v2111_v4   ;;  %v1416_v4 = vld [vmem:[#allocation4 + $0x40] sm:$0xff] }
 0x3b1   :  { %1507 = vperm.xlu1 %2084, %v2113_v29  }
 0x3b2   :  { %1502 = vperm.xlu0 %2083, %v2115_v10  }
 0x3ba   :  { %1517 = vperm.xlu0 %2083, %v2117_v7   ;;  %v1350_v7 = vld [vmem:[#allocation5 + $0x18] sm:$0xff] }
 0x3ea   :  { %v1463_v46 = vpop.permute.xlu2 %1462 }
 0x3eb   :  { %v1524_v16 = vmul.f32 %v1463_v46, %v1412_v17 }
 0x3ed   :  { %v1540_v55 = vadd.f32 %v1524_v16, %v1348_v3 }
 0x3ef   :  { %v1556_v13 = vmax.f32 %v1540_v55, 0.0  ;;  %v1909_v55 = vunpack.c.h.bf16 %v1968_v54 }
 0x3f1   :  { %v1604_v43 = vadd.f32 %v1904_v27, %v1556_v13  ;;  %v1352_v13 = vld [vmem:[#allocation5 + $0xd0] sm:$0xff] }
 0x3f2   :  { %v1468_v31 = vpop.permute.xlu2 %1467 }
 0x3f3   :  { %v1525_v52 = vmul.f32 %v1468_v31, %v1413_v45  ;;  %v1355_v31 = vld [vmem:[#allocation5] sm:$0xff] }
 0x3f5   :  { %v1541_v60 = vadd.f32 %v1525_v52, %v1349_v37  ;;  %v1908_v37 = vunpack.c.l.bf16 %v1968_v54 }
 0x3f7   :  { %v1557_v41 = vmax.f32 %v1541_v60, 0.0  ;;  %v1418_v60 = vld [vmem:[#allocation4 + $0x10] sm:$0xff] }
 0x3f9   :  { %v1605_v51 = vadd.f32 %v1905_v49, %v1557_v41 }
 0x3fa   :  { %v1483_v20 = vpop.permute.xlu2 %1482 }
 0x3fb   :  { %v1939_v19 = vpack.c.bf16 %v1605_v51, %v1604_v43  ;;  %v1528_v45 = vmul.f32 %v1483_v20, %v1416_v4  ;;  %v1417_v51 = vld [vmem:[#allocation4 + $0x20] sm:$0xff] }
 0x3fd   :  { %1974 = vst [vmem:[%s3054_s8 + $0x10] sm:$0xff] %v1939_v19   ;;  %v1544_v19 = vadd.f32 %v1528_v45, %v1352_v13 }
 0x402   :  { %v1498_v17 = vpop.permute.xlu2 %1497 }
 0x403   :  { %v1453_v15 = vpop.permute.xlu1 %1452  ;;  %v1531_v3 = vmul.f32 %v1498_v17, %v1419_v11  ;;  %v1423_v17 = vld [vmem:[#allocation4 + $0x28] sm:$0xff] }
 0x404   :  { %v1522_v26 = vmul.f32 %v1453_v15, %v1410_v48  ;;  %v1443_v30 = vpop.permute.xlu0 %1442  ;;  %v1970_v48 = vld [vmem:[%s3053_s7 + $0x28] sm:$0xff]  }
 0x405   :  { %v1520_v56 = vmul.f32 %v1443_v30, %v1408_v12  ;;  %v1547_v43 = vadd.f32 %v1531_v3, %v1355_v31  ;;  %v1354_v12 = vld [vmem:[#allocation5 + $0x40] sm:$0xff]  ;;  %v1916_v20 = vunpack.c.l.bf16 %v1970_v48  ;;  %v1972_v3 = vld [vmem:[%s3053_s7 + $0x38] sm:$0xff]  }
 0x406   :  { %v1538_v34 = vadd.f32 %v1522_v26, %v1346_v39  ;;  %v1969_v30 = vld [vmem:[%s3053_s7 + $0x20] sm:$0xff]   ;;  %v1925_v13 = vunpack.c.h.bf16 %v1972_v3 }
 0x407   :  { %v1536_v42 = vadd.f32 %v1520_v56, %v1344_v2 }
 0x408   :  { %v1554_v9 = vmax.f32 %v1538_v34, 0.0  ;;  %v1353_v34 = vld [vmem:[#allocation5 + $0x58] sm:$0xff] }
 0x409   :  { %v1552_v23 = vmax.f32 %v1536_v42, 0.0 }
 0x40a   :  { %v1602_v36 = vadd.f32 %v1900_v25, %v1554_v9  ;;  %v1913_v25 = vunpack.c.h.bf16 %v1969_v30 }
 0x40b   :  { %v1458_v1 = vpop.permute.xlu1 %1457  ;;  %v1600_v59 = vadd.f32 %v1896_v6, %v1552_v23  ;;  %v1971_v23 = vld [vmem:[%s3053_s7 + $0x30] sm:$0xff]  }
 0x40c   :  { %v1523_v33 = vmul.f32 %v1458_v1, %v1411_v22  ;;  %v1448_v14 = vpop.permute.xlu0 %1447  ;;  %v1917_v22 = vunpack.c.h.bf16 %v1970_v48  ;;  %v1912_v1 = vunpack.c.l.bf16 %v1969_v30 }
 0x40d   :  { %v1521_v8 = vmul.f32 %v1448_v14, %v1409_v28  ;;  %v1563_v28 = vmax.f32 %v1547_v43, 0.0  ;;  %v1421_v14 = vld [vmem:[#allocation4 + $0x70] sm:$0xff] }
 0x40e   :  { %v1539_v62 = vadd.f32 %v1523_v33, %v1347_v61  ;;  %v1560_v61 = vmax.f32 %v1544_v19, 0.0 }
 0x40f   :  { %v1537_v5 = vadd.f32 %v1521_v8, %v1345_v58  ;;  %v1611_v58 = vadd.f32 %v1917_v22, %v1563_v28 }
 0x410   :  { %v1555_v57 = vmax.f32 %v1539_v62, 0.0  ;;  %v1608_v62 = vadd.f32 %v1912_v1, %v1560_v61 }
 0x411   :  { %v1553_v0 = vmax.f32 %v1537_v5, 0.0  ;;  %v1357_v5 = vld [vmem:[#allocation5 + $0x20] sm:$0xff] }
 0x412   :  { %v1603_v63 = vadd.f32 %v1901_v53, %v1555_v57  ;;  %v1420_v53 = vld [vmem:[#allocation4 + $0x60] sm:$0xff]  ;;  %v1513_v57 = vpop.permute.xlu2 %1512 }
 0x413   :  { %v1601_v35 = vadd.f32 %v1897_v24, %v1553_v0  ;;  %v1478_v21 = vpop.permute.xlu1 %1477 }
 0x414   :  { %v1934_v29 = vpack.c.bf16 %v1603_v63, %v1602_v36  ;;  %v1527_v44 = vmul.f32 %v1478_v21, %v1415_v47  ;;  %v1473_v10 = vpop.permute.xlu0 %1472  ;;  %v1422_v36 = vld [vmem:[#allocation4 + $0x78] sm:$0xff] }
 0x415   :  { %v1929_v46 = vpack.c.bf16 %v1601_v35, %v1600_v59  ;;  %v1526_v16 = vmul.f32 %v1473_v10, %v1414_v38  ;;  %v1356_v38 = vld [vmem:[#allocation5 + $0xe8] sm:$0xff]  ;;  %v1921_v35 = vunpack.c.h.bf16 %v1971_v23  ;;  %v1534_v21 = vmul.f32 %v1513_v57, %v1422_v36 }
 0x416   :  { %1973 = vst [vmem:[%s3054_s8 + $0x8] sm:$0xff] %v1934_v29   ;;  %v1543_v18 = vadd.f32 %v1527_v44, %v1351_v50  ;;  %v1920_v50 = vunpack.c.l.bf16 %v1971_v23  ;;  %v1358_v29 = vld [vmem:[#allocation5 + $0xe0] sm:$0xff] }
 0x417   :  { %1930 = vst [vmem:[%s3054_s8] sm:$0xff] %v1929_v46   ;;  %v1542_v27 = vadd.f32 %v1526_v16, %v1350_v7  ;;  %v1550_v46 = vadd.f32 %v1534_v21, %v1358_v29 }
 0x418   :  { %v1559_v52 = vmax.f32 %v1543_v18, 0.0  ;;  %v1359_v18 = vld [vmem:[#allocation5 + $0x98] sm:$0xff] }
 0x419   :  { %v1558_v49 = vmax.f32 %v1542_v27, 0.0  ;;  %v1566_v27 = vmax.f32 %v1550_v46, 0.0 }
 0x41a   :  { %v1607_v41 = vadd.f32 %v1909_v55, %v1559_v52 }
 0x41b   :  { %v1606_v15 = vadd.f32 %v1908_v37, %v1558_v49  ;;  %v1493_v26 = vpop.permute.xlu1 %1492  ;;  %v1924_v37 = vunpack.c.l.bf16 %v1972_v3 }
 0x41c   :  { %v1530_v39 = vmul.f32 %v1493_v26, %v1418_v60  ;;  %v1488_v56 = vpop.permute.xlu0 %1487 }
 0x41d   :  { %v1944_v2 = vpack.c.bf16 %v1607_v41, %v1606_v15  ;;  %v1529_v40 = vmul.f32 %v1488_v56, %v1417_v51  ;;  %v1614_v60 = vadd.f32 %v1924_v37, %v1566_v27 }
 0x41e   :  { %v1546_v42 = vadd.f32 %v1530_v39, %v1354_v12 }
 0x41f   :  { %1975 = vst [vmem:[%s3054_s8 + $0x18] sm:$0xff] %v1944_v2   ;;  %v1545_v9 = vadd.f32 %v1529_v40, %v1353_v34 }
 0x420   :  { %v1562_v32 = vmax.f32 %v1546_v42, 0.0 }
 0x421   :  { %v1561_v33 = vmax.f32 %v1545_v9, 0.0 }
 0x422   :  { %v1610_v8 = vadd.f32 %v1916_v20, %v1562_v32 }
 0x423   :  { %v1609_v6 = vadd.f32 %v1913_v25, %v1561_v33  ;;  %v1508_v24 = vpop.permute.xlu1 %1507 }
 0x424   :  { %v1954_v0 = vpack.c.bf16 %v1611_v58, %v1610_v8  ;;  %v1533_v47 = vmul.f32 %v1508_v24, %v1421_v14  ;;  %v1503_v63 = vpop.permute.xlu0 %1502 }
 0x425   :  { %v1949_v11 = vpack.c.bf16 %v1609_v6, %v1608_v62  ;;  %v1532_v59 = vmul.f32 %v1503_v63, %v1420_v53 }
 0x426   :  { %1977 = vst [vmem:[%s3054_s8 + $0x28] sm:$0xff] %v1954_v0   ;;  %v1549_v54 = vadd.f32 %v1533_v47, %v1357_v5 }
 0x427   :  { %1976 = vst [vmem:[%s3054_s8 + $0x20] sm:$0xff] %v1949_v11   ;;  %v1548_v4 = vadd.f32 %v1532_v59, %v1356_v38 }
 0x428   :  { %v1565_v44 = vmax.f32 %v1549_v54, 0.0 }
 0x429   :  { %v1564_v10 = vmax.f32 %v1548_v4, 0.0 }
 0x42a   :  { %v1613_v7 = vadd.f32 %v1921_v35, %v1565_v44 }
 0x42b   :  { %v1612_v16 = vadd.f32 %v1920_v50, %v1564_v10 }
 0x42c   :  { %v1518_v55 = vpop.permute.xlu0 %1517 }
 0x42d   :  { %v1959_v45 = vpack.c.bf16 %v1613_v7, %v1612_v16  ;;  %v1535_v31 = vmul.f32 %v1518_v55, %v1423_v17 }
 0x42f   :  { %1978 = vst [vmem:[%s3054_s8 + $0x30] sm:$0xff] %v1959_v45   ;;  %v1551_v52 = vadd.f32 %v1535_v31, %v1359_v18 }
 0x431   :  { %v1567_v49 = vmax.f32 %v1551_v52, 0.0 }
 0x433   :  { %v1615_v43 = vadd.f32 %v1925_v13, %v1567_v49 }
 0x435   :  { %v1964_v41 = vpack.c.bf16 %v1615_v43, %v1614_v60 }
 0x437   :  { %1979 = vst [vmem:[%s3054_s8 + $0x38] sm:$0xff] %v1964_v41  }

// kernel: forward.19
= control target key start
LH: loop header
LB: loop body
LE: loop exit
PB: predicated region body
PF: predicated region fallthrough
CT: control target
= control target key end

     0   :  { %v1681_v54 = vmov 128.0   ;;  %s2546_s2 = inlined_call_operand.vmem [shape: bf16[128,128], index: 2, kind: input, shape index: {}]   ;;  %s2547_s3 = inlined_call_operand.vmem [shape: f32[1,128], index: 3, kind: input, shape index: {}]   ;;  %s2548_s1 = inlined_call_operand.vmem [shape: f32[128,128], index: 1, kind: input, shape index: {}]   ;;  %s2549_s4 = inlined_call_operand.vmem [shape: f32[1,128], index: 4, kind: input, shape index: {}]   ;;  %s2550_s5 = inlined_call_operand.vmem [shape: f32[1,128], index: 5, kind: input, shape index: {}]   ;;  %s2551_s6 = inlined_call_operand.vmem [shape: bf16[128,128], index: 6, kind: input, shape index: {}]   ;;  %s2552_s7 = inlined_call_operand.vmem [shape: bf16[128,128], index: 7, kind: input, shape index: {}]   ;;  %s2553_s0 = inlined_call_operand.vmem [shape: bf16[128,128], index: 0, kind: input, shape index: {}]   ;;  %s2554_s8 = inlined_call_operand.vmem [shape: f32[1,128], index: 8, kind: input, shape index: {}]   ;;  %s2555_s9 = inlined_call_operand.vmem [shape: f32[1,128], index: 9, kind: input, shape index: {}]   ;;  %s2556_s10 = inlined_call_operand.vmem [shape: f32[1,128], index: 10, kind: input, shape index: {}]   ;;  %s2557_s11 = inlined_call_operand.vmem [shape: bf16[128,128], index: 11, kind: input, shape index: {}]   ;;  %s2558_s12 = inlined_call_operand.vmem [shape: f32[1,128], index: 12, kind: input, shape index: {}]   ;;  %s2559_s13 = inlined_call_operand.vmem [shape: f32[128,128], index: 13, kind: output, shape index: {}]  }
   0x1   :  { %v1574_v0 = vld [vmem:[%s2546_s2 + $0x38] sm:$0xff]  ;;  %v1573_v1 = vld [vmem:[%s2546_s2 + $0x30] sm:$0xff]  ;;  %v1572_v2 = vld [vmem:[%s2546_s2 + $0x28] sm:$0xff]  ;;  %1615 = vrcp.f32 %v1681_v54 }
   0x2   :  { %136 = vmatpush.bf16.msra.mxu0 %v1574_v0  ;;  %v1571_v3 = vld [vmem:[%s2546_s2 + $0x20] sm:$0xff]  ;;  %v1570_v4 = vld [vmem:[%s2546_s2 + $0x18] sm:$0xff]  ;;  %v1569_v5 = vld [vmem:[%s2546_s2 + $0x10] sm:$0xff] }
   0x3   :  { %v1568_v6 = vld [vmem:[%s2546_s2 + $0x8] sm:$0xff]  ;;  %v1567_v7 = vld [vmem:[%s2546_s2] sm:$0xff]  ;;  %v46_v11 = vld [vmem:[%s2548_s1 + $0x10] sm:$0xff] }
   0x4   :  { %v44_v8 = vld [vmem:[%s2548_s1] sm:$0xff]  ;;  %v45_v9 = vld [vmem:[%s2548_s1 + $0x8] sm:$0xff]  ;;  %v47_v12 = vld [vmem:[%s2548_s1 + $0x18] sm:$0xff] }
   0x5   :  { %v60_v10 = vpack.c.bf16 %v45_v9, %v44_v8  ;;  %v61_v13 = vpack.c.bf16 %v47_v12, %v46_v11  ;;  %v48_v14 = vld [vmem:[%s2548_s1 + $0x20] sm:$0xff]  ;;  %v49_v15 = vld [vmem:[%s2548_s1 + $0x28] sm:$0xff]  ;;  %v50_v17 = vld [vmem:[%s2548_s1 + $0x30] sm:$0xff] }
   0x6   :  { %137 = vmatpush.bf16.msra.mxu0 %v1573_v1  ;;  %v62_v16 = vpack.c.bf16 %v49_v15, %v48_v14  ;;  %v51_v18 = vld [vmem:[%s2548_s1 + $0x38] sm:$0xff]  ;;  %v52_v20 = vld [vmem:[%s2548_s1 + $0x40] sm:$0xff]  ;;  %v53_v21 = vld [vmem:[%s2548_s1 + $0x48] sm:$0xff] }
   0x7   :  { %v63_v19 = vpack.c.bf16 %v51_v18, %v50_v17  ;;  %v64_v22 = vpack.c.bf16 %v53_v21, %v52_v20  ;;  %v54_v23 = vld [vmem:[%s2548_s1 + $0x50] sm:$0xff]  ;;  %v55_v24 = vld [vmem:[%s2548_s1 + $0x58] sm:$0xff]  ;;  %v1815_v26 = vld [vmem:[%s2547_s3] ss:$0 sm:$0xff]  ;;  %v1616_v55 = vpop.eup %1615 }
   0x8   :  { %v65_v25 = vpack.c.bf16 %v55_v24, %v54_v23  ;;  %v56_v32 = vld [vmem:[%s2548_s1 + $0x60] sm:$0xff]  ;;  %v57_v33 = vld [vmem:[%s2548_s1 + $0x68] sm:$0xff]  ;;  %v58_v39 = vld [vmem:[%s2548_s1 + $0x70] sm:$0xff]  ;;  %v236_v56 = vmul.f32 128.0, %v1616_v55  ;;  %vm240_vm0 = vweird.f32 %v1616_v55 }
   0x9   :  { %v66_v35 = vpack.c.bf16 %v57_v33, %v56_v32  ;;  %v59_v40 = vld [vmem:[%s2548_s1 + $0x78] sm:$0xff] }
   0xa   :  { %138 = vmatpush.bf16.msra.mxu0 %v1572_v2  ;;  %v67_v43 = vpack.c.bf16 %v59_v40, %v58_v39  ;;  %v237_v57 = vsub.f32 1.0, %v236_v56  ;;  %v1590_v32 = vld [vmem:[%s2551_s6 + $0x38] sm:$0xff]  ;;  %v1597_v56 = vld [vmem:[%s2552_s7 + $0x30] sm:$0xff] }
   0xb   :  { %817 = vmatpush.bf16.msra.mxu2 %v1590_v32  ;;  %v1598_v54 = vld [vmem:[%s2552_s7 + $0x38] sm:$0xff]  ;;  %v1576_v32 = vld [vmem:[%s2553_s0 + $0x8] sm:$0xff] }
   0xc   :  { %v238_v58 = vmul.f32 %v1616_v55, %v237_v57  ;;  %672 = vmatpush.bf16.msra.mxu1 %v1598_v54  ;;  %v1585_v57 = vld [vmem:[%s2551_s6 + $0x10] sm:$0xff] }
   0xe   :  { %139 = vmatpush.bf16.msra.mxu0 %v1571_v3  ;;  %v239_v60 = vadd.f32 %v1616_v55, %v238_v58  ;;  %v1596_v58 = vld [vmem:[%s2552_s7 + $0x28] sm:$0xff] }
  0x10   :  { %v1846_v61 = vsel %vm240_vm0, %v1616_v55, %v239_v60  ;;  %v1586_v55 = vld [vmem:[%s2551_s6 + $0x18] sm:$0xff]  ;;  %673 = vmatpush.bf16.msra.mxu1 %v1597_v56  ;;  %v1595_v60 = vld [vmem:[%s2552_s7 + $0x20] sm:$0xff] }
  0x12   :  { %140 = vmatpush.bf16.msra.mxu0 %v1570_v4 }
  0x14   :  { %674 = vmatpush.bf16.msra.mxu1 %v1596_v58 }
  0x16   :  { %141 = vmatpush.bf16.msra.mxu0 %v1569_v5 }
  0x18   :  { %675 = vmatpush.bf16.msra.mxu1 %v1595_v60 }
  0x1a   :  { %142 = vmatpush.bf16.msra.mxu0 %v1568_v6 }
  0x1e   :  { %143 = vmatpush.bf16.msra.mxu0 %v1567_v7 }
  0x21   :  { %144 = vmatmul.bf16.vlgmr.msra.gmra.mxu0 %v60_v10 }
  0x31   :  { %149 = vmatmul.bf16.gmra.mxu0 %v61_v13 }
  0x41   :  { %154 = vmatmul.bf16.gmra.mxu0 %v62_v16 }
  0x51   :  { %159 = vmatmul.bf16.gmra.mxu0 %v63_v19 }
  0x61   :  { %164 = vmatmul.bf16.gmra.mxu0 %v64_v22 }
  0x71   :  { %169 = vmatmul.bf16.gmra.mxu0 %v65_v25 }
  0x81   :  { %174 = vmatmul.bf16.gmra.mxu0 %v66_v35 }
  0x91   :  { %179 = vmatmul.bf16.gmra.mxu0 %v67_v43 }
  0x9e   :  { %v145_v27 = vpop.f32.mrf.mxu0 }
  0x9f   :  { %v146_v28 = vadd.f32 %v1815_v26, %v145_v27 }
  0xa1   :  { %v185_v29 = vmax.f32 %v146_v28, 0.0 }
  0xa3   :  { %203 = vadd.xlane.f32.xlu0 %v185_v29 }
  0xa6   :  { %v147_v30 = vpop.f32.mrf.mxu0 }
  0xa7   :  { %v148_v31 = vadd.f32 %v1815_v26, %v147_v30 }
  0xa9   :  { %v186_v34 = vmax.f32 %v148_v31, 0.0 }
  0xab   :  { %205 = vadd.xlane.f32.xlu0 %v186_v34 }
  0xae   :  { %v150_v36 = vpop.f32.mrf.mxu0 }
  0xaf   :  { %v151_v37 = vadd.f32 %v1815_v26, %v150_v36  ;;  %v1589_v36 = vld [vmem:[%s2551_s6 + $0x30] sm:$0xff] }
  0xb0   :  { %818 = vmatpush.bf16.msra.mxu2 %v1589_v36 }
  0xb1   :  { %v187_v38 = vmax.f32 %v151_v37, 0.0 }
  0xb3   :  { %207 = vadd.xlane.f32.xlu1 %v187_v38 }
  0xb6   :  { %v152_v41 = vpop.f32.mrf.mxu0 }
  0xb7   :  { %v153_v42 = vadd.f32 %v1815_v26, %v152_v41 }
  0xb9   :  { %v188_v44 = vmax.f32 %v153_v42, 0.0 }
  0xbb   :  { %209 = vadd.xlane.f32.xlu1 %v188_v44 }
  0xbe   :  { %v155_v45 = vpop.f32.mrf.mxu0 }
  0xbf   :  { %v156_v46 = vadd.f32 %v1815_v26, %v155_v45 }
  0xc1   :  { %v189_v47 = vmax.f32 %v156_v46, 0.0 }
  0xc3   :  { %211 = vadd.xlane.f32.xlu2 %v189_v47 }
  0xc6   :  { %v157_v48 = vpop.f32.mrf.mxu0 }
  0xc7   :  { %v1835_v49 = vadd.f32 %v1815_v26, %v157_v48 }
  0xc9   :  { %v190_v50 = vmax.f32 %v1835_v49, 0.0 }
  0xcb   :  { %213 = vadd.xlane.f32.xlu2 %v190_v50 }
  0xce   :  { %v160_v51 = vpop.f32.mrf.mxu0 }
  0xcf   :  { %v1841_v52 = vadd.f32 %v1815_v26, %v160_v51 }
  0xd1   :  { %v191_v53 = vmax.f32 %v1841_v52, 0.0  ;;  %v1588_v52 = vld [vmem:[%s2551_s6 + $0x28] sm:$0xff] }
  0xd2   :  { %819 = vmatpush.bf16.msra.mxu2 %v1588_v52 }
  0xd3   :  { %215 = vadd.xlane.f32.xlu2 %v191_v53 }
  0xd6   :  { %v162_v59 = vpop.f32.mrf.mxu0 }
  0xd7   :  { %v1854_v4 = vadd.f32 %v1815_v26, %v162_v59  ;;  %v1584_v59 = vld [vmem:[%s2551_s6 + $0x8] sm:$0xff] }
  0xd9   :  { %v192_v8 = vmax.f32 %v1854_v4, 0.0 }
  0xde   :  { %v165_v0 = vpop.f32.mrf.mxu0 }
  0xdf   :  { %v1863_v10 = vadd.f32 %v1815_v26, %v165_v0  ;;  %v1575_v0 = vld [vmem:[%s2553_s0] sm:$0xff] }
  0xe1   :  { %v193_v13 = vmax.f32 %v1863_v10, 0.0 }
  0xe6   :  { %v167_v7 = vpop.f32.mrf.mxu0 }
  0xe7   :  { %v1876_v18 = vadd.f32 %v1815_v26, %v167_v7 }
  0xe9   :  { %v194_v21 = vmax.f32 %v1876_v18, 0.0 }
  0xee   :  { %v170_v15 = vpop.f32.mrf.mxu0 }
  0xef   :  { %v1887_v24 = vadd.f32 %v1815_v26, %v170_v15 }
  0xf6   :  { %v172_v23 = vpop.f32.mrf.mxu0 }
  0xf7   :  { %v1898_v31 = vadd.f32 %v1815_v26, %v172_v23 }
 0x116   :  { %v204_v62 = vpop.xlane.xlu0 %203 }
 0x117   :  { %v242_v63 = vmul.f32 %v1846_v61, %v204_v62  ;;  %v1583_v62 = vld [vmem:[%s2551_s6] sm:$0xff] }
 0x119   :  { %v1849_v1 = vsub.f32 %v185_v29, %v242_v63  ;;  %v195_v29 = vmax.f32 %v1887_v24, 0.0  ;;  %v1594_v63 = vld [vmem:[%s2552_s7 + $0x18] sm:$0xff] }
 0x11a   :  { %676 = vmatpush.bf16.msra.mxu1 %v1594_v63 }
 0x11b   :  { %v274_v2 = vmul.f32 %v1849_v1, %v1849_v1 }
 0x11d   :  { %290 = vadd.xlane.f32.xlu0 %v274_v2  ;;  %v1593_v2 = vld [vmem:[%s2552_s7 + $0x10] sm:$0xff] }
 0x11e   :  { %v206_v3 = vpop.xlane.xlu0 %205  ;;  %677 = vmatpush.bf16.msra.mxu1 %v1593_v2  ;;  %v2022_v2 = vld [vmem:[%s2549_s4] ss:$0 sm:$0xff] }
 0x11f   :  { %v243_v5 = vmul.f32 %v1846_v61, %v206_v3  ;;  %v1592_v3 = vld [vmem:[%s2552_s7 + $0x8] sm:$0xff] }
 0x121   :  { %v1857_v6 = vsub.f32 %v186_v34, %v243_v5  ;;  %v175_v34 = vpop.f32.mrf.mxu0 }
 0x122   :  { %v1917_v40 = vadd.f32 %v1815_v26, %v175_v34  ;;  %678 = vmatpush.bf16.msra.mxu1 %v1592_v3 }
 0x123   :  { %v275_v9 = vmul.f32 %v1857_v6, %v1857_v6 }
 0x124   :  { %v197_v45 = vmax.f32 %v1917_v40, 0.0 }
 0x125   :  { %217 = vadd.xlane.f32.xlu0 %v192_v8  ;;  %292 = vadd.xlane.f32.xlu1 %v275_v9  ;;  %v1591_v9 = vld [vmem:[%s2552_s7] sm:$0xff] }
 0x126   :  { %v208_v11 = vpop.xlane.xlu1 %207  ;;  %679 = vmatpush.bf16.msra.mxu1 %v1591_v9 }
 0x127   :  { %v244_v12 = vmul.f32 %v1846_v61, %v208_v11 }
 0x129   :  { %v1869_v14 = vsub.f32 %v187_v38, %v244_v12  ;;  %v196_v38 = vmax.f32 %v1898_v31, 0.0  ;;  %v177_v43 = vpop.f32.mrf.mxu0 }
 0x12b   :  { %v276_v16 = vmul.f32 %v1869_v14, %v1869_v14 }
 0x12d   :  { %219 = vadd.xlane.f32.xlu0 %v193_v13  ;;  %294 = vadd.xlane.f32.xlu1 %v276_v16 }
 0x12e   :  { %v210_v17 = vpop.xlane.xlu1 %209 }
 0x12f   :  { %v245_v19 = vmul.f32 %v1846_v61, %v210_v17 }
 0x131   :  { %v1879_v20 = vsub.f32 %v188_v44, %v245_v19  ;;  %v180_v49 = vpop.f32.mrf.mxu0 }
 0x133   :  { %v277_v22 = vmul.f32 %v1879_v20, %v1879_v20 }
 0x135   :  { %296 = vadd.xlane.f32.xlu2 %v277_v22  ;;  %221 = vadd.xlane.f32.xlu1 %v194_v21 }
 0x136   :  { %v212_v25 = vpop.xlane.xlu2 %211 }
 0x137   :  { %v246_v27 = vmul.f32 %v1846_v61, %v212_v25 }
 0x139   :  { %v1890_v28 = vsub.f32 %v189_v47, %v246_v27  ;;  %v1930_v47 = vadd.f32 %v1815_v26, %v177_v43 }
 0x13b   :  { %v278_v30 = vmul.f32 %v1890_v28, %v1890_v28  ;;  %v198_v48 = vmax.f32 %v1930_v47, 0.0 }
 0x13d   :  { %298 = vadd.xlane.f32.xlu2 %v278_v30  ;;  %223 = vadd.xlane.f32.xlu1 %v195_v29 }
 0x13e   :  { %v214_v33 = vpop.xlane.xlu2 %213 }
 0x13f   :  { %v247_v35 = vmul.f32 %v1846_v61, %v214_v33 }
 0x141   :  { %v1909_v37 = vsub.f32 %v190_v50, %v247_v35  ;;  %v1936_v50 = vadd.f32 %v1815_v26, %v180_v49 }
 0x143   :  { %v279_v39 = vmul.f32 %v1909_v37, %v1909_v37  ;;  %v199_v51 = vmax.f32 %v1936_v50, 0.0 }
 0x145   :  { %225 = vadd.xlane.f32.xlu2 %v196_v38  ;;  %300 = vadd.xlane.f32.xlu0 %v279_v39 }
 0x146   :  { %v216_v41 = vpop.xlane.xlu2 %215 }
 0x147   :  { %v248_v42 = vmul.f32 %v1846_v61, %v216_v41 }
 0x149   :  { %v1922_v44 = vsub.f32 %v191_v53, %v248_v42  ;;  %v1587_v53 = vld [vmem:[%s2551_s6 + $0x20] sm:$0xff] }
 0x14a   :  { %820 = vmatpush.bf16.msra.mxu2 %v1587_v53  ;;  %v182_v53 = vpop.f32.mrf.mxu0 }
 0x14b   :  { %v280_v46 = vmul.f32 %v1922_v44, %v1922_v44  ;;  %v2010_v10 = vadd.f32 %v1815_v26, %v182_v53 }
 0x14d   :  { %227 = vadd.xlane.f32.xlu2 %v197_v45  ;;  %302 = vadd.xlane.f32.xlu0 %v280_v46 }
 0x14e   :  { %821 = vmatpush.bf16.msra.mxu2 %v1586_v55 }
 0x152   :  { %822 = vmatpush.bf16.msra.mxu2 %v1585_v57 }
 0x155   :  { %229 = vadd.xlane.f32.xlu0 %v198_v48 }
 0x156   :  { %823 = vmatpush.bf16.msra.mxu2 %v1584_v59 }
 0x15a   :  { %824 = vmatpush.bf16.msra.mxu2 %v1583_v62 }
 0x15d   :  { %231 = vadd.xlane.f32.xlu0 %v199_v51  ;;  %825 = vmatmul.bf16.vlgmr.msra.gmra.mxu2 %v1575_v0 }
 0x16d   :  { %830 = vmatmul.bf16.gmra.mxu2 %v1576_v32 }
 0x190   :  { %v291_v5 = vpop.xlane.xlu0 %290 }
 0x191   :  { %v322_v7 = vmul.f32 %v291_v5, %v1846_v61  ;;  %v200_v5 = vmax.f32 %v2010_v10, 0.0  ;;  %v1580_v10 = vld [vmem:[%s2553_s0 + $0x28] sm:$0xff] }
 0x193   :  { %v338_v11 = vadd.f32 1e-05, %v322_v7 }
 0x195   :  { %1617 = vrsqrt.f32 %v338_v11  ;;  %vm360_vm2 = vweird.f32 %v338_v11 }
 0x198   :  { %v293_v12 = vpop.xlane.xlu1 %292  ;;  %v218_v15 = vpop.xlane.xlu0 %217 }
 0x199   :  { %v323_v16 = vmul.f32 %v293_v12, %v1846_v61  ;;  %v249_v17 = vmul.f32 %v1846_v61, %v218_v15  ;;  %v1577_v12 = vld [vmem:[%s2553_s0 + $0x10] sm:$0xff] }
 0x19a   :  { %835 = vmatmul.bf16.gmra.mxu2 %v1577_v12 }
 0x19b   :  { %v1618_v19 = vpop.eup %1617  ;;  %v339_v22 = vadd.f32 1e-05, %v323_v16  ;;  %v1991_v23 = vsub.f32 %v192_v8, %v249_v17 }
 0x19c   :  { %v355_v25 = vmul.f32 %v1618_v19, %v338_v11  ;;  %vm361_vm1 = vweird.f32 %v1618_v19  ;;  %v2035_v11 = vld [vmem:[%s2550_s5] ss:$0 sm:$0xff] }
 0x19d   :  { %1619 = vrsqrt.f32 %v339_v22  ;;  %v281_v27 = vmul.f32 %v1991_v23, %v1991_v23  ;;  %vm362_vm3 = vmor %vm360_vm2, %vm361_vm1  ;;  %vm370_vm5 = vweird.f32 %v339_v22 }
 0x19e   :  { %v356_v30 = vmul.f32 %v1618_v19, %v355_v25 }
 0x19f   :  { %304 = vadd.xlane.f32.xlu1 %v281_v27 }
 0x1a0   :  { %v357_v33 = vmul.f32 0.5, %v356_v30  ;;  %v295_v34 = vpop.xlane.xlu1 %294  ;;  %v220_v35 = vpop.xlane.xlu0 %219 }
 0x1a1   :  { %v324_v36 = vmul.f32 %v295_v34, %v1846_v61  ;;  %v250_v4 = vmul.f32 %v1846_v61, %v220_v35 }
 0x1a2   :  { %v358_v8 = vsub.f32 1.5, %v357_v33 }
 0x1a3   :  { %v1620_v39 = vpop.eup %1619  ;;  %v2000_v41 = vadd.f32 1e-05, %v324_v36  ;;  %v2004_v42 = vsub.f32 %v193_v13, %v250_v4 }
 0x1a4   :  { %v359_v43 = vmul.f32 %v1618_v19, %v358_v8  ;;  %v365_v46 = vmul.f32 %v1620_v39, %v339_v22  ;;  %vm371_vm4 = vweird.f32 %v1620_v39 }
 0x1a5   :  { %1621 = vrsqrt.f32 %v2000_v41  ;;  %v282_v49 = vmul.f32 %v2004_v42, %v2004_v42  ;;  %vm372_vm6 = vmor %vm370_vm5, %vm371_vm4  ;;  %vm380_vm8 = vweird.f32 %v2000_v41 }
 0x1a6   :  { %v366_v52 = vmul.f32 %v1620_v39, %v365_v46  ;;  %v363_v57 = vsel %vm362_vm3, %v1618_v19, %v359_v43 }
 0x1a7   :  { %306 = vadd.xlane.f32.xlu1 %v282_v49  ;;  %v514_v0 = vmul.f32 %v363_v57, %v1849_v1 }
 0x1a8   :  { %v367_v54 = vmul.f32 0.5, %v366_v52  ;;  %v297_v55 = vpop.xlane.xlu2 %296  ;;  %v222_v56 = vpop.xlane.xlu1 %221 }
 0x1a9   :  { %v325_v13 = vmul.f32 %v297_v55, %v1846_v61  ;;  %v251_v58 = vmul.f32 %v1846_v61, %v222_v56  ;;  %v533_v9 = vmul.f32 %v2022_v2, %v514_v0 }
 0x1aa   :  { %v368_v59 = vsub.f32 1.5, %v367_v54 }
 0x1ab   :  { %v1622_v60 = vpop.eup %1621  ;;  %v341_v62 = vadd.f32 1e-05, %v325_v13  ;;  %v2016_v63 = vsub.f32 %v194_v21, %v251_v58  ;;  %v552_v33 = vadd.f32 %v2035_v11, %v533_v9 }
 0x1ac   :  { %v369_v26 = vmul.f32 %v1620_v39, %v368_v59  ;;  %v375_v3 = vmul.f32 %v1622_v60, %v2000_v41  ;;  %vm381_vm7 = vweird.f32 %v1622_v60 }
 0x1ad   :  { %1623 = vrsqrt.f32 %v341_v62  ;;  %v283_v18 = vmul.f32 %v2016_v63, %v2016_v63  ;;  %vm382_vm9 = vmor %vm380_vm8, %vm381_vm7  ;;  %vm390_vm11 = vweird.f32 %v341_v62 }
 0x1ae   :  { %v376_v21 = vmul.f32 %v1622_v60, %v375_v3  ;;  %v373_v7 = vsel %vm372_vm6, %v1620_v39, %v369_v26 }
 0x1af   :  { %308 = vadd.xlane.f32.xlu2 %v283_v18  ;;  %233 = vadd.xlane.f32.xlu1 %v200_v5  ;;  %v515_v1 = vmul.f32 %v373_v7, %v1857_v6 }
 0x1b0   :  { %v377_v15 = vmul.f32 0.5, %v376_v21  ;;  %v299_v16 = vpop.xlane.xlu2 %298  ;;  %v224_v17 = vpop.xlane.xlu1 %223 }
 0x1b1   :  { %v326_v19 = vmul.f32 %v299_v16, %v1846_v61  ;;  %v252_v22 = vmul.f32 %v1846_v61, %v224_v17  ;;  %v534_v6 = vmul.f32 %v2022_v2, %v515_v1 }
 0x1b2   :  { %v378_v25 = vsub.f32 1.5, %v377_v15 }
 0x1b3   :  { %v1624_v27 = vpop.eup %1623  ;;  %v342_v30 = vadd.f32 1e-05, %v326_v19  ;;  %v2045_v32 = vsub.f32 %v195_v29, %v252_v22  ;;  %v553_v34 = vadd.f32 %v2035_v11, %v534_v6 }
 0x1b4   :  { %v379_v35 = vmul.f32 %v1622_v60, %v378_v25  ;;  %v385_v36 = vmul.f32 %v1624_v27, %v341_v62  ;;  %vm391_vm10 = vweird.f32 %v1624_v27 }
 0x1b5   :  { %1625 = vrsqrt.f32 %v342_v30  ;;  %v284_v4 = vmul.f32 %v2045_v32, %v2045_v32  ;;  %v600_v8 = vpack.c.bf16 %v553_v34, %v552_v33  ;;  %vm392_vm12 = vmor %vm390_vm11, %vm391_vm10  ;;  %vm400_vm14 = vweird.f32 %v342_v30 }
 0x1b6   :  { %v386_v39 = vmul.f32 %v1624_v27, %v385_v36  ;;  %v383_v46 = vsel %vm382_vm9, %v1622_v60, %v379_v35 }
 0x1b7   :  { %310 = vadd.xlane.f32.xlu2 %v284_v4  ;;  %680 = vmatmul.bf16.vlgmr.msra.gmra.mxu1 %v600_v8  ;;  %v516_v56 = vmul.f32 %v383_v46, %v1869_v14  ;;  %v1578_v46 = vld [vmem:[%s2553_s0 + $0x18] sm:$0xff] }
 0x1b8   :  { %v387_v24 = vmul.f32 0.5, %v386_v39  ;;  %v226_v29 = vpop.xlane.xlu2 %225  ;;  %v301_v43 = vpop.xlane.xlu0 %300  ;;  %840 = vmatmul.bf16.gmra.mxu2 %v1578_v46  ;;  %v2124_v46 = vld [vmem:[%s2554_s8] ss:$0 sm:$0xff] }
 0x1b9   :  { %v253_v49 = vmul.f32 %v1846_v61, %v226_v29  ;;  %v327_v52 = vmul.f32 %v301_v43, %v1846_v61  ;;  %v535_v31 = vmul.f32 %v2022_v2, %v516_v56 }
 0x1ba   :  { %v388_v53 = vsub.f32 1.5, %v387_v24 }
 0x1bb   :  { %v1626_v54 = vpop.eup %1625  ;;  %v2056_v55 = vsub.f32 %v196_v38, %v253_v49  ;;  %v343_v41 = vadd.f32 1e-05, %v327_v52  ;;  %v554_v1 = vadd.f32 %v2035_v11, %v535_v31  ;;  %v1579_v49 = vld [vmem:[%s2553_s0 + $0x20] sm:$0xff] }
 0x1bc   :  { %v389_v57 = vmul.f32 %v1624_v27, %v388_v53  ;;  %v395_v13 = vmul.f32 %v1626_v54, %v342_v30  ;;  %vm401_vm13 = vweird.f32 %v1626_v54 }
 0x1bd   :  { %1627 = vrsqrt.f32 %v343_v41  ;;  %v285_v58 = vmul.f32 %v2056_v55, %v2056_v55  ;;  %vm402_vm15 = vmor %vm400_vm14, %vm401_vm13  ;;  %vm410_vm1 = vweird.f32 %v343_v41 }
 0x1be   :  { %v396_v59 = vmul.f32 %v1626_v54, %v395_v13  ;;  %v393_v60 = vsel %vm392_vm12, %v1624_v27, %v389_v57 }
 0x1bf   :  { %312 = vadd.xlane.f32.xlu0 %v285_v58  ;;  %v517_v0 = vmul.f32 %v393_v60, %v1879_v20 }
 0x1c0   :  { %v397_v38 = vmul.f32 0.5, %v396_v59  ;;  %v228_v26 = vpop.xlane.xlu2 %227  ;;  %v303_v3 = vpop.xlane.xlu0 %302 }
 0x1c1   :  { %v254_v14 = vmul.f32 %v1846_v61, %v228_v26  ;;  %v536_v62 = vmul.f32 %v2022_v2, %v517_v0 }
 0x1c2   :  { %v398_v18 = vsub.f32 1.5, %v397_v38 }
 0x1c3   :  { %v1628_v21 = vpop.eup %1627  ;;  %v2067_v7 = vsub.f32 %v197_v45, %v254_v14  ;;  %v555_v9 = vadd.f32 %v2035_v11, %v536_v62 }
 0x1c4   :  { %v399_v20 = vmul.f32 %v1626_v54, %v398_v18  ;;  %v405_v12 = vmul.f32 %v1628_v21, %v343_v41  ;;  %vm411_vm0 = vweird.f32 %v1628_v21 }
 0x1c5   :  { %v601_v15 = vpack.c.bf16 %v555_v9, %v554_v1  ;;  %v286_v16 = vmul.f32 %v2067_v7, %v2067_v7  ;;  %vm412_vm2 = vmor %vm410_vm1, %vm411_vm0 }
 0x1c6   :  { %v406_v17 = vmul.f32 %v1628_v21, %v405_v12  ;;  %v403_v45 = vsel %vm402_vm15, %v1626_v54, %v399_v20 }
 0x1c7   :  { %685 = vmatmul.bf16.gmra.mxu1 %v601_v15  ;;  %314 = vadd.xlane.f32.xlu1 %v286_v16  ;;  %v518_v27 = vmul.f32 %v403_v45, %v1890_v28 }
 0x1c8   :  { %v407_v19 = vmul.f32 0.5, %v406_v17  ;;  %v230_v40 = vpop.xlane.xlu0 %229  ;;  %845 = vmatmul.bf16.gmra.mxu2 %v1579_v49 }
 0x1c9   :  { %v255_v22 = vmul.f32 %v1846_v61, %v230_v40  ;;  %v537_v36 = vmul.f32 %v2022_v2, %v518_v27 }
 0x1ca   :  { %v408_v6 = vsub.f32 1.5, %v407_v19 }
 0x1cb   :  { %v2076_v25 = vsub.f32 %v198_v48, %v255_v22  ;;  %v556_v48 = vadd.f32 %v2035_v11, %v537_v36 }
 0x1cc   :  { %v409_v33 = vmul.f32 %v1628_v21, %v408_v6 }
 0x1cd   :  { %v287_v30 = vmul.f32 %v2076_v25, %v2076_v25 }
 0x1ce   :  { %v413_v34 = vsel %vm412_vm2, %v1628_v21, %v409_v33 }
 0x1cf   :  { %316 = vadd.xlane.f32.xlu2 %v287_v30  ;;  %v519_v35 = vmul.f32 %v413_v34, %v1909_v37  ;;  %v328_v37 = vmul.f32 %v303_v3, %v1846_v61 }
 0x1d0   :  { %v232_v4 = vpop.xlane.xlu0 %231 }
 0x1d1   :  { %v256_v8 = vmul.f32 %v1846_v61, %v232_v4  ;;  %v538_v47 = vmul.f32 %v2022_v2, %v519_v35  ;;  %v344_v43 = vadd.f32 1e-05, %v328_v37 }
 0x1d3   :  { %v2087_v28 = vsub.f32 %v199_v51, %v256_v8  ;;  %v557_v39 = vadd.f32 %v2035_v11, %v538_v47  ;;  %1629 = vrsqrt.f32 %v344_v43  ;;  %vm420_vm4 = vweird.f32 %v344_v43 }
 0x1d5   :  { %v602_v24 = vpack.c.bf16 %v557_v39, %v556_v48  ;;  %v288_v29 = vmul.f32 %v2087_v28, %v2087_v28 }
 0x1d7   :  { %690 = vmatmul.bf16.gmra.mxu1 %v602_v24  ;;  %318 = vadd.xlane.f32.xlu0 %v288_v29 }
 0x1d8   :  { %850 = vmatmul.bf16.gmra.mxu2 %v1580_v10 }
 0x1d9   :  { %v1630_v50 = vpop.eup %1629 }
 0x1da   :  { %v415_v51 = vmul.f32 %v1630_v50, %v344_v43  ;;  %vm421_vm3 = vweird.f32 %v1630_v50 }
 0x1db   :  { %vm422_vm5 = vmor %vm420_vm4, %vm421_vm3 }
 0x1dc   :  { %v416_v52 = vmul.f32 %v1630_v50, %v415_v51 }
 0x1de   :  { %v417_v56 = vmul.f32 0.5, %v416_v52 }
 0x1e0   :  { %v418_v57 = vsub.f32 1.5, %v417_v56  ;;  %v826_v27 = vpop.f32.mrf.mxu2 }
 0x1e2   :  { %v419_v0 = vmul.f32 %v1630_v50, %v418_v57 }
 0x1e4   :  { %v423_v62 = vsel %vm422_vm5, %v1630_v50, %v419_v0 }
 0x1e5   :  { %v520_v15 = vmul.f32 %v423_v62, %v1922_v44 }
 0x1e7   :  { %v539_v6 = vmul.f32 %v2022_v2, %v520_v15 }
 0x1e8   :  { %v828_v49 = vpop.f32.mrf.mxu2 }
 0x1e9   :  { %v558_v4 = vadd.f32 %v2035_v11, %v539_v6 }
 0x212   :  { %v305_v53 = vpop.xlane.xlu1 %304 }
 0x213   :  { %v329_v54 = vmul.f32 %v305_v53, %v1846_v61 }
 0x215   :  { %v345_v41 = vadd.f32 1e-05, %v329_v54 }
 0x217   :  { %1631 = vrsqrt.f32 %v345_v41  ;;  %vm430_vm7 = vweird.f32 %v345_v41 }
 0x21a   :  { %v307_v13 = vpop.xlane.xlu1 %306 }
 0x21b   :  { %v330_v58 = vmul.f32 %v307_v13, %v1846_v61 }
 0x21d   :  { %v1632_v59 = vpop.eup %1631  ;;  %v346_v60 = vadd.f32 1e-05, %v330_v58 }
 0x21e   :  { %v425_v31 = vmul.f32 %v1632_v59, %v345_v41  ;;  %vm431_vm6 = vweird.f32 %v1632_v59 }
 0x21f   :  { %1633 = vrsqrt.f32 %v346_v60  ;;  %vm432_vm8 = vmor %vm430_vm7, %vm431_vm6  ;;  %vm440_vm10 = vweird.f32 %v346_v60 }
 0x220   :  { %v426_v38 = vmul.f32 %v1632_v59, %v425_v31 }
 0x222   :  { %v427_v26 = vmul.f32 0.5, %v426_v38  ;;  %v309_v3 = vpop.xlane.xlu2 %308  ;;  %v234_v14 = vpop.xlane.xlu1 %233 }
 0x223   :  { %v331_v18 = vmul.f32 %v309_v3, %v1846_v61  ;;  %v257_v21 = vmul.f32 %v1846_v61, %v234_v14 }
 0x224   :  { %v428_v1 = vsub.f32 1.5, %v427_v26 }
 0x225   :  { %v1634_v9 = vpop.eup %1633  ;;  %v347_v20 = vadd.f32 1e-05, %v331_v18  ;;  %v2106_v12 = vsub.f32 %v200_v5, %v257_v21  ;;  %v831_v21 = vpop.f32.mrf.mxu2 }
 0x226   :  { %v429_v16 = vmul.f32 %v1632_v59, %v428_v1  ;;  %v435_v17 = vmul.f32 %v1634_v9, %v346_v60  ;;  %vm441_vm9 = vweird.f32 %v1634_v9 }
 0x227   :  { %1635 = vrsqrt.f32 %v347_v20  ;;  %v289_v19 = vmul.f32 %v2106_v12, %v2106_v12  ;;  %vm442_vm11 = vmor %vm440_vm10, %vm441_vm9  ;;  %vm450_vm13 = vweird.f32 %v347_v20 }
 0x228   :  { %v436_v40 = vmul.f32 %v1634_v9, %v435_v17  ;;  %v433_v45 = vsel %vm432_vm8, %v1632_v59, %v429_v16 }
 0x229   :  { %320 = vadd.xlane.f32.xlu1 %v289_v19  ;;  %v521_v22 = vmul.f32 %v433_v45, %v1991_v23 }
 0x22a   :  { %v437_v44 = vmul.f32 0.5, %v436_v40  ;;  %v311_v5 = vpop.xlane.xlu2 %310 }
 0x22b   :  { %v332_v33 = vmul.f32 %v311_v5, %v1846_v61  ;;  %v540_v30 = vmul.f32 %v2022_v2, %v521_v22 }
 0x22c   :  { %v438_v34 = vsub.f32 1.5, %v437_v44 }
 0x22d   :  { %v1636_v35 = vpop.eup %1635  ;;  %v348_v36 = vadd.f32 1e-05, %v332_v33  ;;  %v559_v23 = vadd.f32 %v2035_v11, %v540_v30 }
 0x22e   :  { %v439_v8 = vmul.f32 %v1634_v9, %v438_v34  ;;  %v445_v47 = vmul.f32 %v1636_v35, %v347_v20  ;;  %vm451_vm12 = vweird.f32 %v1636_v35 }
 0x22f   :  { %1637 = vrsqrt.f32 %v348_v36  ;;  %v603_v48 = vpack.c.bf16 %v559_v23, %v558_v4  ;;  %vm452_vm14 = vmor %vm450_vm13, %vm451_vm12  ;;  %vm460_vm0 = vweird.f32 %v348_v36 }
 0x230   :  { %v446_v39 = vmul.f32 %v1636_v35, %v445_v47  ;;  %v443_v37 = vsel %vm442_vm11, %v1634_v9, %v439_v8  ;;  %v833_v8 = vpop.f32.mrf.mxu2 }
 0x231   :  { %695 = vmatmul.bf16.gmra.mxu1 %v603_v48  ;;  %v522_v41 = vmul.f32 %v443_v37, %v2004_v42  ;;  %v1581_v42 = vld [vmem:[%s2553_s0 + $0x30] sm:$0xff] }
 0x232   :  { %v447_v24 = vmul.f32 0.5, %v446_v39  ;;  %v313_v29 = vpop.xlane.xlu0 %312  ;;  %855 = vmatmul.bf16.gmra.mxu2 %v1581_v42 }
 0x233   :  { %v333_v43 = vmul.f32 %v313_v29, %v1846_v61  ;;  %v541_v31 = vmul.f32 %v2022_v2, %v522_v41 }
 0x234   :  { %v448_v50 = vsub.f32 1.5, %v447_v24  ;;  %v681_v51 = vpop.f32.mrf.mxu1 }
 0x235   :  { %v1638_v52 = vpop.eup %1637  ;;  %v349_v53 = vadd.f32 1e-05, %v333_v43  ;;  %v827_v54 = vadd.f32 %v826_v27, %v681_v51  ;;  %v560_v20 = vadd.f32 %v2035_v11, %v541_v31 }
 0x236   :  { %v449_v56 = vmul.f32 %v1636_v35, %v448_v50  ;;  %v455_v57 = vmul.f32 %v1638_v52, %v348_v36  ;;  %vm461_vm15 = vweird.f32 %v1638_v52 }
 0x237   :  { %1639 = vrsqrt.f32 %v349_v53  ;;  %v2128_v13 = vadd.f32 %v2124_v46, %v827_v54  ;;  %vm462_vm1 = vmor %vm460_vm0, %vm461_vm15  ;;  %vm470_vm3 = vweird.f32 %v349_v53 }
 0x238   :  { %v456_v58 = vmul.f32 %v1638_v52, %v455_v57  ;;  %v453_v59 = vsel %vm452_vm14, %v1636_v35, %v449_v56 }
 0x239   :  { %v886_v60 = vmax.f32 %v2128_v13, 0.0  ;;  %v523_v0 = vmul.f32 %v453_v59, %v2016_v63  ;;  %v836_v59 = vpop.f32.mrf.mxu2 }
 0x23a   :  { %v457_v38 = vmul.f32 0.5, %v456_v58  ;;  %v315_v26 = vpop.xlane.xlu1 %314 }
 0x23b   :  { %v334_v3 = vmul.f32 %v315_v26, %v1846_v61  ;;  %904 = vadd.xlane.f32.xlu2 %v886_v60  ;;  %v542_v14 = vmul.f32 %v2022_v2, %v523_v0 }
 0x23c   :  { %v458_v62 = vsub.f32 1.5, %v457_v38  ;;  %v683_v18 = vpop.f32.mrf.mxu1 }
 0x23d   :  { %v1640_v63 = vpop.eup %1639  ;;  %v350_v1 = vadd.f32 1e-05, %v334_v3  ;;  %v829_v9 = vadd.f32 %v828_v49, %v683_v18  ;;  %v561_v15 = vadd.f32 %v2035_v11, %v542_v14 }
 0x23e   :  { %v459_v16 = vmul.f32 %v1638_v52, %v458_v62  ;;  %v465_v17 = vmul.f32 %v1640_v63, %v349_v53  ;;  %vm471_vm2 = vweird.f32 %v1640_v63 }
 0x23f   :  { %1641 = vrsqrt.f32 %v350_v1  ;;  %v604_v19 = vpack.c.bf16 %v561_v15, %v560_v20  ;;  %v2143_v40 = vadd.f32 %v2124_v46, %v829_v9  ;;  %vm472_vm4 = vmor %vm470_vm3, %vm471_vm2  ;;  %vm480_vm6 = vweird.f32 %v350_v1 }
 0x240   :  { %v466_v45 = vmul.f32 %v1640_v63, %v465_v17  ;;  %v463_v44 = vsel %vm462_vm1, %v1638_v52, %v459_v16 }
 0x241   :  { %700 = vmatmul.bf16.gmra.mxu1 %v604_v19  ;;  %v887_v22 = vmax.f32 %v2143_v40, 0.0  ;;  %v524_v36 = vmul.f32 %v463_v44, %v2045_v32  ;;  %v838_v20 = vpop.f32.mrf.mxu2 }
 0x242   :  { %v467_v6 = vmul.f32 0.5, %v466_v45  ;;  %v317_v10 = vpop.xlane.xlu2 %316 }
 0x243   :  { %v335_v5 = vmul.f32 %v317_v10, %v1846_v61  ;;  %906 = vadd.xlane.f32.xlu0 %v887_v22  ;;  %v543_v37 = vmul.f32 %v2022_v2, %v524_v36 }
 0x244   :  { %v468_v27 = vsub.f32 1.5, %v467_v6  ;;  %v686_v33 = vpop.f32.mrf.mxu1 }
 0x245   :  { %v1642_v30 = vpop.eup %1641  ;;  %v351_v34 = vadd.f32 1e-05, %v335_v5  ;;  %v832_v35 = vadd.f32 %v831_v21, %v686_v33  ;;  %v562_v53 = vadd.f32 %v2035_v11, %v543_v37 }
 0x246   :  { %v469_v4 = vmul.f32 %v1640_v63, %v468_v27  ;;  %v475_v23 = vmul.f32 %v1642_v30, %v350_v1  ;;  %vm481_vm5 = vweird.f32 %v1642_v30  ;;  %v1582_v27 = vld [vmem:[%s2553_s0 + $0x38] sm:$0xff] }
 0x247   :  { %1643 = vrsqrt.f32 %v351_v34  ;;  %v2151_v47 = vadd.f32 %v2124_v46, %v832_v35  ;;  %vm482_vm7 = vmor %vm480_vm6, %vm481_vm5  ;;  %vm490_vm9 = vweird.f32 %v351_v34  ;;  %860 = vmatmul.bf16.gmra.mxu2 %v1582_v27 }
 0x248   :  { %v476_v48 = vmul.f32 %v1642_v30, %v475_v23  ;;  %v473_v39 = vsel %vm472_vm4, %v1640_v63, %v469_v4 }
 0x249   :  { %v888_v24 = vmax.f32 %v2151_v47, 0.0  ;;  %v525_v29 = vmul.f32 %v473_v39, %v2056_v55 }
 0x24a   :  { %v477_v43 = vmul.f32 0.5, %v476_v48  ;;  %v319_v10 = vpop.xlane.xlu0 %318 }
 0x24b   :  { %908 = vadd.xlane.f32.xlu1 %v888_v24  ;;  %v544_v32 = vmul.f32 %v2022_v2, %v525_v29  ;;  %v336_v44 = vmul.f32 %v319_v10, %v1846_v61 }
 0x24c   :  { %v478_v50 = vsub.f32 1.5, %v477_v43  ;;  %v688_v51 = vpop.f32.mrf.mxu1 }
 0x24d   :  { %v1644_v49 = vpop.eup %1643  ;;  %v834_v52 = vadd.f32 %v833_v8, %v688_v51  ;;  %v563_v54 = vadd.f32 %v2035_v11, %v544_v32  ;;  %v352_v5 = vadd.f32 1e-05, %v336_v44  ;;  %v841_v8 = vpop.f32.mrf.mxu2 }
 0x24e   :  { %v479_v41 = vmul.f32 %v1642_v30, %v478_v50  ;;  %v485_v56 = vmul.f32 %v1644_v49, %v351_v34  ;;  %vm491_vm8 = vweird.f32 %v1644_v49 }
 0x24f   :  { %v605_v55 = vpack.c.bf16 %v563_v54, %v562_v53  ;;  %v2162_v57 = vadd.f32 %v2124_v46, %v834_v52  ;;  %vm492_vm10 = vmor %vm490_vm9, %vm491_vm8  ;;  %1645 = vrsqrt.f32 %v352_v5  ;;  %vm500_vm12 = vweird.f32 %v352_v5 }
 0x250   :  { %v486_v58 = vmul.f32 %v1644_v49, %v485_v56  ;;  %v483_v42 = vsel %vm482_vm7, %v1642_v30, %v479_v41 }
 0x251   :  { %705 = vmatmul.bf16.gmra.mxu1 %v605_v55  ;;  %v889_v0 = vmax.f32 %v2162_v57, 0.0  ;;  %v526_v14 = vmul.f32 %v483_v42, %v2067_v7 }
 0x252   :  { %v487_v31 = vmul.f32 0.5, %v486_v58 }
 0x253   :  { %910 = vadd.xlane.f32.xlu2 %v889_v0  ;;  %v545_v9 = vmul.f32 %v2022_v2, %v526_v14 }
 0x254   :  { %v488_v38 = vsub.f32 1.5, %v487_v31  ;;  %v691_v26 = vpop.f32.mrf.mxu1 }
 0x255   :  { %v837_v3 = vadd.f32 %v836_v59, %v691_v26  ;;  %v564_v17 = vadd.f32 %v2035_v11, %v545_v9  ;;  %v1646_v33 = vpop.eup %1645  ;;  %v843_v32 = vpop.f32.mrf.mxu2 }
 0x256   :  { %v489_v62 = vmul.f32 %v1644_v49, %v488_v38  ;;  %v495_v30 = vmul.f32 %v1646_v33, %v352_v5  ;;  %vm501_vm11 = vweird.f32 %v1646_v33 }
 0x257   :  { %v2169_v18 = vadd.f32 %v2124_v46, %v837_v3  ;;  %vm502_vm13 = vmor %vm500_vm12, %vm501_vm11 }
 0x258   :  { %v493_v21 = vsel %vm492_vm10, %v1644_v49, %v489_v62  ;;  %v496_v34 = vmul.f32 %v1646_v33, %v495_v30 }
 0x259   :  { %v890_v63 = vmax.f32 %v2169_v18, 0.0  ;;  %v527_v1 = vmul.f32 %v493_v21, %v2076_v25 }
 0x25a   :  { %v497_v23 = vmul.f32 0.5, %v496_v34 }
 0x25b   :  { %912 = vadd.xlane.f32.xlu0 %v890_v63  ;;  %v546_v15 = vmul.f32 %v2022_v2, %v527_v1 }
 0x25c   :  { %v693_v7 = vpop.f32.mrf.mxu1  ;;  %v498_v48 = vsub.f32 1.5, %v497_v23 }
 0x25d   :  { %v839_v16 = vadd.f32 %v838_v20, %v693_v7  ;;  %v565_v19 = vadd.f32 %v2035_v11, %v546_v15  ;;  %v846_v13 = vpop.f32.mrf.mxu2 }
 0x25e   :  { %v499_v29 = vmul.f32 %v1646_v33, %v498_v48 }
 0x25f   :  { %v606_v45 = vpack.c.bf16 %v565_v19, %v564_v17  ;;  %v2180_v6 = vadd.f32 %v2124_v46, %v839_v16 }
 0x260   :  { %v503_v51 = vsel %vm502_vm13, %v1646_v33, %v499_v29 }
 0x261   :  { %710 = vmatmul.bf16.gmra.mxu1 %v606_v45  ;;  %v891_v25 = vmax.f32 %v2180_v6, 0.0  ;;  %v528_v56 = vmul.f32 %v503_v51, %v2087_v28 }
 0x263   :  { %914 = vadd.xlane.f32.xlu1 %v891_v25  ;;  %v547_v28 = vmul.f32 %v2022_v2, %v528_v56 }
 0x265   :  { %v566_v1 = vadd.f32 %v2035_v11, %v547_v28  ;;  %v1601_v28 = vld [vmem:[%s2557_s11 + $0x10] sm:$0xff] }
 0x29c   :  { %v321_v35 = vpop.xlane.xlu1 %320 }
 0x29d   :  { %v337_v36 = vmul.f32 %v321_v35, %v1846_v61 }
 0x29f   :  { %v353_v4 = vadd.f32 1e-05, %v337_v36 }
 0x2a1   :  { %1647 = vrsqrt.f32 %v353_v4  ;;  %vm510_vm15 = vweird.f32 %v353_v4 }
 0x2a7   :  { %v1648_v39 = vpop.eup %1647 }
 0x2a8   :  { %v505_v37 = vmul.f32 %v1648_v39, %v353_v4  ;;  %vm511_vm14 = vweird.f32 %v1648_v39 }
 0x2a9   :  { %vm512_vm0 = vmor %vm510_vm15, %vm511_vm14 }
 0x2aa   :  { %v506_v43 = vmul.f32 %v1648_v39, %v505_v37 }
 0x2ac   :  { %v507_v50 = vmul.f32 0.5, %v506_v43 }
 0x2ae   :  { %v508_v49 = vsub.f32 1.5, %v507_v50  ;;  %v696_v52 = vpop.f32.mrf.mxu1  ;;  %v905_v53 = vpop.xlane.xlu2 %904 }
 0x2af   :  { %v842_v54 = vadd.f32 %v841_v8, %v696_v52  ;;  %v936_v41 = vmul.f32 %v905_v53, %v1846_v61 }
 0x2b0   :  { %v509_v55 = vmul.f32 %v1648_v39, %v508_v49 }
 0x2b1   :  { %v2194_v58 = vsub.f32 %v886_v60, %v936_v41  ;;  %v2197_v59 = vadd.f32 %v2124_v46, %v842_v54 }
 0x2b2   :  { %v513_v31 = vsel %vm512_vm0, %v1648_v39, %v509_v55  ;;  %v1605_v55 = vld [vmem:[%s2557_s11 + $0x30] sm:$0xff] }
 0x2b3   :  { %v892_v42 = vmax.f32 %v2197_v59, 0.0  ;;  %v968_v38 = vmul.f32 %v2194_v58, %v2194_v58  ;;  %v529_v26 = vmul.f32 %v513_v31, %v2106_v12  ;;  %v1604_v31 = vld [vmem:[%s2557_s11 + $0x28] sm:$0xff] }
 0x2b5   :  { %916 = vadd.xlane.f32.xlu1 %v892_v42  ;;  %984 = vadd.xlane.f32.xlu2 %v968_v38  ;;  %v548_v60 = vmul.f32 %v2022_v2, %v529_v26  ;;  %v1603_v38 = vld [vmem:[%s2557_s11 + $0x20] sm:$0xff]  ;;  %v1602_v26 = vld [vmem:[%s2557_s11 + $0x18] sm:$0xff] }
 0x2b6   :  { %v698_v3 = vpop.f32.mrf.mxu1  ;;  %v907_v14 = vpop.xlane.xlu0 %906 }
 0x2b7   :  { %v844_v62 = vadd.f32 %v843_v32, %v698_v3  ;;  %v937_v21 = vmul.f32 %v907_v14, %v1846_v61  ;;  %v567_v9 = vadd.f32 %v2035_v11, %v548_v60 }
 0x2b9   :  { %v2212_v12 = vsub.f32 %v887_v22, %v937_v21  ;;  %v607_v20 = vpack.c.bf16 %v567_v9, %v566_v1  ;;  %v2215_v15 = vadd.f32 %v2124_v46, %v844_v62  ;;  %v848_v22 = vpop.f32.mrf.mxu2 }
 0x2bb   :  { %715 = vmatmul.bf16.gmra.mxu1 %v607_v20  ;;  %v969_v2 = vmul.f32 %v2212_v12, %v2212_v12  ;;  %v893_v7 = vmax.f32 %v2215_v15, 0.0 }
 0x2bd   :  { %986 = vadd.xlane.f32.xlu0 %v969_v2  ;;  %918 = vadd.xlane.f32.xlu2 %v893_v7  ;;  %v1599_v2 = vld [vmem:[%s2557_s11] sm:$0xff] }
 0x2be   :  { %v701_v16 = vpop.f32.mrf.mxu1  ;;  %v909_v11 = vpop.xlane.xlu1 %908 }
 0x2bf   :  { %v847_v17 = vadd.f32 %v846_v13, %v701_v16  ;;  %v938_v40 = vmul.f32 %v909_v11, %v1846_v61  ;;  %v1600_v13 = vld [vmem:[%s2557_s11 + $0x8] sm:$0xff] }
 0x2c1   :  { %v2225_v19 = vsub.f32 %v888_v24, %v938_v40  ;;  %v2228_v45 = vadd.f32 %v2124_v46, %v847_v17  ;;  %v851_v47 = vpop.f32.mrf.mxu2 }
 0x2c3   :  { %v970_v10 = vmul.f32 %v2225_v19, %v2225_v19  ;;  %v894_v44 = vmax.f32 %v2228_v45, 0.0 }
 0x2c5   :  { %988 = vadd.xlane.f32.xlu0 %v970_v10  ;;  %920 = vadd.xlane.f32.xlu2 %v894_v44 }
 0x2c6   :  { %v703_v5 = vpop.f32.mrf.mxu1  ;;  %v911_v27 = vpop.xlane.xlu2 %910 }
 0x2c7   :  { %v849_v33 = vadd.f32 %v848_v22, %v703_v5  ;;  %v939_v30 = vmul.f32 %v911_v27, %v1846_v61 }
 0x2c9   :  { %v2238_v24 = vsub.f32 %v889_v0, %v939_v30  ;;  %v2241_v34 = vadd.f32 %v2124_v46, %v849_v33  ;;  %v853_v39 = vpop.f32.mrf.mxu2 }
 0x2cb   :  { %v895_v35 = vmax.f32 %v2241_v34, 0.0  ;;  %v971_v36 = vmul.f32 %v2238_v24, %v2238_v24 }
 0x2cd   :  { %922 = vadd.xlane.f32.xlu0 %v895_v35  ;;  %990 = vadd.xlane.f32.xlu1 %v971_v36 }
 0x2ce   :  { %v706_v4 = vpop.f32.mrf.mxu1  ;;  %v913_v23 = vpop.xlane.xlu0 %912 }
 0x2cf   :  { %v852_v8 = vadd.f32 %v851_v47, %v706_v4  ;;  %v940_v48 = vmul.f32 %v913_v23, %v1846_v61 }
 0x2d1   :  { %v2251_v57 = vsub.f32 %v890_v63, %v940_v48  ;;  %v2254_v0 = vadd.f32 %v2124_v46, %v852_v8  ;;  %v856_v53 = vpop.f32.mrf.mxu2 }
 0x2d3   :  { %v896_v29 = vmax.f32 %v2254_v0, 0.0  ;;  %v972_v37 = vmul.f32 %v2251_v57, %v2251_v57 }
 0x2d5   :  { %924 = vadd.xlane.f32.xlu0 %v896_v29  ;;  %992 = vadd.xlane.f32.xlu1 %v972_v37 }
 0x2d6   :  { %v708_v43 = vpop.f32.mrf.mxu1  ;;  %v915_v32 = vpop.xlane.xlu1 %914 }
 0x2d7   :  { %v854_v50 = vadd.f32 %v853_v39, %v708_v43  ;;  %v941_v18 = vmul.f32 %v915_v32, %v1846_v61 }
 0x2d9   :  { %v2264_v63 = vsub.f32 %v891_v25, %v941_v18  ;;  %v2267_v51 = vadd.f32 %v2124_v46, %v854_v50  ;;  %v1606_v25 = vld [vmem:[%s2557_s11 + $0x38] sm:$0xff]  ;;  %v858_v1 = vpop.f32.mrf.mxu2 }
 0x2da   :  { %1338 = vmatpush.bf16.msra.mxu3 %v1606_v25 }
 0x2db   :  { %v973_v49 = vmul.f32 %v2264_v63, %v2264_v63  ;;  %v897_v52 = vmax.f32 %v2267_v51, 0.0 }
 0x2dd   :  { %994 = vadd.xlane.f32.xlu2 %v973_v49  ;;  %926 = vadd.xlane.f32.xlu1 %v897_v52 }
 0x2de   :  { %v711_v54 = vpop.f32.mrf.mxu1  ;;  %1339 = vmatpush.bf16.msra.mxu3 %v1605_v55 }
 0x2df   :  { %v857_v41 = vadd.f32 %v856_v53, %v711_v54 }
 0x2e1   :  { %v2275_v56 = vadd.f32 %v2124_v46, %v857_v41  ;;  %v861_v30 = vpop.f32.mrf.mxu2 }
 0x2e2   :  { %1340 = vmatpush.bf16.msra.mxu3 %v1604_v31 }
 0x2e3   :  { %v898_v6 = vmax.f32 %v2275_v56, 0.0 }
 0x2e5   :  { %928 = vadd.xlane.f32.xlu1 %v898_v6 }
 0x2e6   :  { %1341 = vmatpush.bf16.msra.mxu3 %v1603_v38  ;;  %v713_v21 = vpop.f32.mrf.mxu1 }
 0x2e7   :  { %v859_v16 = vadd.f32 %v858_v1, %v713_v21 }
 0x2e9   :  { %v863_v38 = vpop.f32.mrf.mxu2 }
 0x2ea   :  { %1342 = vmatpush.bf16.msra.mxu3 %v1602_v26 }
 0x2ee   :  { %1343 = vmatpush.bf16.msra.mxu3 %v1601_v28 }
 0x2f2   :  { %1344 = vmatpush.bf16.msra.mxu3 %v1600_v13 }
 0x2f6   :  { %1345 = vmatpush.bf16.msra.mxu3 %v1599_v2 }
 0x328   :  { %v917_v60 = vpop.xlane.xlu1 %916  ;;  %v985_v3 = vpop.xlane.xlu2 %984 }
 0x329   :  { %v942_v14 = vmul.f32 %v917_v60, %v1846_v61  ;;  %v1016_v62 = vmul.f32 %v985_v3, %v1846_v61 }
 0x32b   :  { %v2305_v9 = vsub.f32 %v892_v42, %v942_v14  ;;  %v1032_v20 = vadd.f32 1e-05, %v1016_v62  ;;  %v2315_v42 = vadd.f32 %v2124_v46, %v859_v16  ;;  %v2362_v16 = vld [vmem:[%s2555_s9] ss:$0 sm:$0xff] }
 0x32d   :  { %1649 = vrsqrt.f32 %v1032_v20  ;;  %v974_v11 = vmul.f32 %v2305_v9, %v2305_v9  ;;  %v899_v47 = vmax.f32 %v2315_v42, 0.0  ;;  %vm1054_vm2 = vweird.f32 %v1032_v20 }
 0x32f   :  { %996 = vadd.xlane.f32.xlu2 %v974_v11 }
 0x330   :  { %v987_v17 = vpop.xlane.xlu0 %986  ;;  %v919_v40 = vpop.xlane.xlu2 %918 }
 0x331   :  { %v1017_v22 = vmul.f32 %v987_v17, %v1846_v61  ;;  %v943_v59 = vmul.f32 %v919_v40, %v1846_v61 }
 0x333   :  { %v1650_v10 = vpop.eup %1649  ;;  %v1033_v5 = vadd.f32 1e-05, %v1017_v22  ;;  %v2319_v27 = vsub.f32 %v893_v7, %v943_v59 }
 0x334   :  { %v1049_v33 = vmul.f32 %v1650_v10, %v1032_v20  ;;  %vm1055_vm1 = vweird.f32 %v1650_v10 }
 0x335   :  { %1651 = vrsqrt.f32 %v1033_v5  ;;  %v975_v36 = vmul.f32 %v2319_v27, %v2319_v27  ;;  %vm2341_vm3 = vmor %vm1054_vm2, %vm1055_vm1  ;;  %vm1064_vm5 = vweird.f32 %v1033_v5 }
 0x336   :  { %v1050_v4 = vmul.f32 %v1650_v10, %v1049_v33 }
 0x337   :  { %930 = vadd.xlane.f32.xlu2 %v899_v47  ;;  %998 = vadd.xlane.f32.xlu0 %v975_v36 }
 0x338   :  { %v1051_v23 = vmul.f32 0.5, %v1050_v4  ;;  %v716_v8 = vpop.f32.mrf.mxu1  ;;  %v989_v48 = vpop.xlane.xlu0 %988 }
 0x339   :  { %v862_v39 = vadd.f32 %v861_v30, %v716_v8  ;;  %v1018_v15 = vmul.f32 %v989_v48, %v1846_v61  ;;  %v921_v7 = vpop.xlane.xlu2 %920 }
 0x33a   :  { %v1052_v37 = vsub.f32 1.5, %v1051_v23  ;;  %v944_v43 = vmul.f32 %v921_v7, %v1846_v61 }
 0x33b   :  { %v1652_v32 = vpop.eup %1651  ;;  %v2328_v50 = vadd.f32 1e-05, %v1018_v15  ;;  %v2331_v18 = vadd.f32 %v2124_v46, %v862_v39 }
 0x33c   :  { %v1053_v49 = vmul.f32 %v1650_v10, %v1052_v37  ;;  %v1059_v53 = vmul.f32 %v1652_v32, %v1033_v5  ;;  %v2335_v54 = vsub.f32 %v894_v44, %v944_v43  ;;  %vm1065_vm4 = vweird.f32 %v1652_v32 }
 0x33d   :  { %1653 = vrsqrt.f32 %v2328_v50  ;;  %v900_v41 = vmax.f32 %v2331_v18, 0.0  ;;  %vm1066_vm6 = vmor %vm1064_vm5, %vm1065_vm4  ;;  %vm1074_vm8 = vweird.f32 %v2328_v50 }
 0x33e   :  { %v1060_v25 = vmul.f32 %v1652_v32, %v1059_v53  ;;  %v976_v55 = vmul.f32 %v2335_v54, %v2335_v54  ;;  %v1057_v28 = vsel %vm2341_vm3, %v1650_v10, %v1053_v49  ;;  %v2373_v10 = vld [vmem:[%s2556_s10] ss:$0 sm:$0xff] }
 0x33f   :  { %932 = vadd.xlane.f32.xlu2 %v900_v41  ;;  %v1208_v2 = vmul.f32 %v1057_v28, %v2194_v58 }
 0x340   :  { %v1061_v45 = vmul.f32 0.5, %v1060_v25  ;;  %1000 = vadd.xlane.f32.xlu0 %v976_v55  ;;  %v718_v44 = vpop.f32.mrf.mxu1  ;;  %v923_v26 = vpop.xlane.xlu0 %922 }
 0x341   :  { %v864_v13 = vadd.f32 %v863_v38, %v718_v44  ;;  %v945_v60 = vmul.f32 %v923_v26, %v1846_v61  ;;  %v991_v3 = vpop.xlane.xlu1 %990  ;;  %v1227_v59 = vmul.f32 %v2362_v16, %v1208_v2 }
 0x342   :  { %v1062_v14 = vsub.f32 1.5, %v1061_v45  ;;  %v1019_v62 = vmul.f32 %v991_v3, %v1846_v61 }
 0x343   :  { %v1654_v21 = vpop.eup %1653  ;;  %v2353_v1 = vsub.f32 %v895_v35, %v945_v60  ;;  %v2356_v20 = vadd.f32 %v2124_v46, %v864_v13  ;;  %v1246_v48 = vadd.f32 %v2373_v10, %v1227_v59 }
 0x344   :  { %v1063_v11 = vmul.f32 %v1652_v32, %v1062_v14  ;;  %v1069_v17 = vmul.f32 %v1654_v21, %v2328_v50  ;;  %v1035_v40 = vadd.f32 1e-05, %v1019_v62  ;;  %vm1075_vm7 = vweird.f32 %v1654_v21 }
 0x345   :  { %v977_v34 = vmul.f32 %v2353_v1, %v2353_v1  ;;  %v901_v35 = vmax.f32 %v2356_v20, 0.0  ;;  %vm1076_vm9 = vmor %vm1074_vm8, %vm1075_vm7 }
 0x346   :  { %v1070_v46 = vmul.f32 %v1654_v21, %v1069_v17  ;;  %1655 = vrsqrt.f32 %v1035_v40  ;;  %v1067_v22 = vsel %vm1066_vm6, %v1652_v32, %v1063_v11  ;;  %vm1084_vm11 = vweird.f32 %v1035_v40 }
 0x347   :  { %1002 = vadd.xlane.f32.xlu1 %v977_v34  ;;  %v1209_v58 = vmul.f32 %v1067_v22, %v2212_v12 }
 0x348   :  { %v1071_v5 = vmul.f32 0.5, %v1070_v46  ;;  %934 = vadd.xlane.f32.xlu0 %v901_v35  ;;  %v925_v33 = vpop.xlane.xlu0 %924 }
 0x349   :  { %v946_v30 = vmul.f32 %v925_v33, %v1846_v61  ;;  %v993_v36 = vpop.xlane.xlu1 %992  ;;  %v1228_v4 = vmul.f32 %v2362_v16, %v1209_v58 }
 0x34a   :  { %v1072_v23 = vsub.f32 1.5, %v1071_v5  ;;  %v1020_v12 = vmul.f32 %v993_v36, %v1846_v61 }
 0x34b   :  { %v2382_v8 = vsub.f32 %v896_v29, %v946_v30  ;;  %v1247_v39 = vadd.f32 %v2373_v10, %v1228_v4 }
 0x34c   :  { %v1656_v15 = vpop.eup %1655  ;;  %v1073_v7 = vmul.f32 %v1654_v21, %v1072_v23  ;;  %v1036_v37 = vadd.f32 1e-05, %v1020_v12 }
 0x34d   :  { %v1079_v43 = vmul.f32 %v1656_v15, %v1035_v40  ;;  %v978_v32 = vmul.f32 %v2382_v8, %v2382_v8  ;;  %v1262_v49 = vpack.c.bf16 %v1247_v39, %v1246_v48  ;;  %vm1085_vm10 = vweird.f32 %v1656_v15 }
 0x34e   :  { %1657 = vrsqrt.f32 %v1036_v37  ;;  %v1077_v53 = vsel %vm1076_vm9, %v1654_v21, %v1073_v7  ;;  %vm1086_vm12 = vmor %vm1084_vm11, %vm1085_vm10  ;;  %vm1094_vm14 = vweird.f32 %v1036_v37 }
 0x34f   :  { %v1080_v0 = vmul.f32 %v1656_v15, %v1079_v43  ;;  %1004 = vadd.xlane.f32.xlu1 %v978_v32  ;;  %1346 = vmatmul.bf16.vlgmr.msra.gmra.mxu3 %v1262_v49  ;;  %v1210_v26 = vmul.f32 %v1077_v53, %v2225_v19 }
 0x350   :  { %v995_v29 = vpop.xlane.xlu2 %994 }
 0x351   :  { %v1081_v25 = vmul.f32 0.5, %v1080_v0  ;;  %v927_v55 = vpop.xlane.xlu1 %926  ;;  %v1021_v31 = vmul.f32 %v995_v29, %v1846_v61  ;;  %v1229_v21 = vmul.f32 %v2362_v16, %v1210_v26 }
 0x352   :  { %v947_v38 = vmul.f32 %v927_v55, %v1846_v61 }
 0x353   :  { %v1082_v45 = vsub.f32 1.5, %v1081_v25  ;;  %v1037_v44 = vadd.f32 1e-05, %v1021_v31  ;;  %v1248_v34 = vadd.f32 %v2373_v10, %v1229_v21 }
 0x354   :  { %v1658_v28 = vpop.eup %1657  ;;  %v2394_v50 = vsub.f32 %v897_v52, %v947_v38 }
 0x355   :  { %v1083_v13 = vmul.f32 %v1656_v15, %v1082_v45  ;;  %v1089_v60 = vmul.f32 %v1658_v28, %v1036_v37  ;;  %1659 = vrsqrt.f32 %v1037_v44  ;;  %vm1095_vm13 = vweird.f32 %v1658_v28 }
 0x356   :  { %v979_v3 = vmul.f32 %v2394_v50, %v2394_v50  ;;  %vm1096_vm15 = vmor %vm1094_vm14, %vm1095_vm13  ;;  %vm1104_vm1 = vweird.f32 %v1037_v44 }
 0x357   :  { %v1090_v14 = vmul.f32 %v1658_v28, %v1089_v60  ;;  %v1087_v62 = vsel %vm1086_vm12, %v1656_v15, %v1083_v13 }
 0x358   :  { %1006 = vadd.xlane.f32.xlu2 %v979_v3  ;;  %v1211_v19 = vmul.f32 %v1087_v62, %v2238_v24 }
 0x359   :  { %v1091_v2 = vmul.f32 0.5, %v1090_v14  ;;  %v929_v11 = vpop.xlane.xlu1 %928 }
 0x35a   :  { %v948_v51 = vmul.f32 %v929_v11, %v1846_v61  ;;  %v1230_v52 = vmul.f32 %v2362_v16, %v1211_v19 }
 0x35b   :  { %v1660_v17 = vpop.eup %1659  ;;  %v1092_v40 = vsub.f32 1.5, %v1091_v2 }
 0x35c   :  { %v1099_v46 = vmul.f32 %v1660_v17, %v1037_v44  ;;  %v2405_v22 = vsub.f32 %v898_v6, %v948_v51  ;;  %v1249_v58 = vadd.f32 %v2373_v10, %v1230_v52  ;;  %vm1105_vm0 = vweird.f32 %v1660_v17 }
 0x35d   :  { %v1093_v59 = vmul.f32 %v1658_v28, %v1092_v40  ;;  %vm1106_vm2 = vmor %vm1104_vm1, %vm1105_vm0 }
 0x35e   :  { %v1100_v24 = vmul.f32 %v1660_v17, %v1099_v46  ;;  %v1263_v5 = vpack.c.bf16 %v1249_v58, %v1248_v34  ;;  %v980_v33 = vmul.f32 %v2405_v22, %v2405_v22 }
 0x35f   :  { %v1097_v36 = vsel %vm1096_vm15, %v1658_v28, %v1093_v59 }
 0x360   :  { %v1101_v30 = vmul.f32 0.5, %v1100_v24  ;;  %1351 = vmatmul.bf16.gmra.mxu3 %v1263_v5  ;;  %1008 = vadd.xlane.f32.xlu0 %v980_v33  ;;  %v1212_v56 = vmul.f32 %v1097_v36, %v2251_v57 }
 0x362   :  { %v1102_v4 = vsub.f32 1.5, %v1101_v30  ;;  %v1231_v48 = vmul.f32 %v2362_v16, %v1212_v56 }
 0x364   :  { %v1103_v6 = vmul.f32 %v1660_v17, %v1102_v4  ;;  %v1250_v15 = vadd.f32 %v2373_v10, %v1231_v48 }
 0x366   :  { %v1107_v23 = vsel %vm1106_vm2, %v1660_v17, %v1103_v6 }
 0x367   :  { %v1213_v12 = vmul.f32 %v1107_v23, %v2264_v63 }
 0x369   :  { %v1232_v39 = vmul.f32 %v2362_v16, %v1213_v12 }
 0x36b   :  { %v1251_v7 = vadd.f32 %v2373_v10, %v1232_v39 }
 0x36d   :  { %v1264_v37 = vpack.c.bf16 %v1251_v7, %v1250_v15 }
 0x370   :  { %1356 = vmatmul.bf16.gmra.mxu3 %v1264_v37 }
 0x3a2   :  { %v997_v43 = vpop.xlane.xlu2 %996 }
 0x3a3   :  { %v1022_v32 = vmul.f32 %v997_v43, %v1846_v61 }
 0x3a5   :  { %v1038_v57 = vadd.f32 1e-05, %v1022_v32 }
 0x3a7   :  { %1661 = vrsqrt.f32 %v1038_v57  ;;  %vm1114_vm4 = vweird.f32 %v1038_v57 }
 0x3aa   :  { %v999_v49 = vpop.xlane.xlu0 %998  ;;  %v931_v0 = vpop.xlane.xlu2 %930 }
 0x3ab   :  { %v1023_v29 = vmul.f32 %v999_v49, %v1846_v61  ;;  %v949_v63 = vmul.f32 %v931_v0, %v1846_v61 }
 0x3ad   :  { %v1662_v53 = vpop.eup %1661  ;;  %v1039_v25 = vadd.f32 1e-05, %v1023_v29  ;;  %v2421_v55 = vsub.f32 %v899_v47, %v949_v63 }
 0x3ae   :  { %v1109_v31 = vmul.f32 %v1662_v53, %v1038_v57  ;;  %vm1115_vm3 = vweird.f32 %v1662_v53 }
 0x3af   :  { %1663 = vrsqrt.f32 %v1039_v25  ;;  %v981_v38 = vmul.f32 %v2421_v55, %v2421_v55  ;;  %vm1116_vm5 = vmor %vm1114_vm4, %vm1115_vm3  ;;  %vm1124_vm7 = vweird.f32 %v1039_v25 }
 0x3b0   :  { %v1110_v45 = vmul.f32 %v1662_v53, %v1109_v31 }
 0x3b1   :  { %1010 = vadd.xlane.f32.xlu1 %v981_v38 }
 0x3b2   :  { %v1111_v44 = vmul.f32 0.5, %v1110_v45  ;;  %v933_v26 = vpop.xlane.xlu2 %932  ;;  %v2453_v45 = vld [vmem:[%s2558_s12] ss:$0 sm:$0xff] }
 0x3b3   :  { %v1001_v28 = vpop.xlane.xlu0 %1000  ;;  %v950_v13 = vmul.f32 %v933_v26, %v1846_v61 }
 0x3b4   :  { %v1112_v60 = vsub.f32 1.5, %v1111_v44  ;;  %v1024_v3 = vmul.f32 %v1001_v28, %v1846_v61 }
 0x3b5   :  { %v1664_v14 = vpop.eup %1663  ;;  %v2429_v42 = vsub.f32 %v900_v41, %v950_v13 }
 0x3b6   :  { %v1113_v47 = vmul.f32 %v1662_v53, %v1112_v60  ;;  %v1119_v62 = vmul.f32 %v1664_v14, %v1039_v25  ;;  %v1040_v21 = vadd.f32 1e-05, %v1024_v3  ;;  %vm1125_vm6 = vweird.f32 %v1664_v14 }
 0x3b7   :  { %v982_v19 = vmul.f32 %v2429_v42, %v2429_v42  ;;  %vm1126_vm8 = vmor %vm1124_vm7, %vm1125_vm6 }
 0x3b8   :  { %v1120_v2 = vmul.f32 %v1664_v14, %v1119_v62  ;;  %1665 = vrsqrt.f32 %v1040_v21  ;;  %v1117_v52 = vsel %vm1116_vm5, %v1662_v53, %v1113_v47  ;;  %vm1134_vm10 = vweird.f32 %v1040_v21 }
 0x3b9   :  { %1012 = vadd.xlane.f32.xlu2 %v982_v19  ;;  %v1214_v46 = vmul.f32 %v1117_v52, %v2305_v9 }
 0x3ba   :  { %v1121_v11 = vmul.f32 0.5, %v1120_v2  ;;  %v1003_v51 = vpop.xlane.xlu1 %1002 }
 0x3bb   :  { %v1025_v17 = vmul.f32 %v1003_v51, %v1846_v61  ;;  %v935_v18 = vpop.xlane.xlu0 %934  ;;  %v1233_v56 = vmul.f32 %v2362_v16, %v1214_v46 }
 0x3bc   :  { %v1122_v41 = vsub.f32 1.5, %v1121_v11  ;;  %v951_v40 = vmul.f32 %v935_v18, %v1846_v61 }
 0x3bd   :  { %v1041_v34 = vadd.f32 1e-05, %v1025_v17  ;;  %v1252_v39 = vadd.f32 %v2373_v10, %v1233_v56 }
 0x3be   :  { %v1666_v58 = vpop.eup %1665  ;;  %v1123_v59 = vmul.f32 %v1664_v14, %v1122_v41  ;;  %v2438_v24 = vsub.f32 %v901_v35, %v951_v40 }
 0x3bf   :  { %v1129_v5 = vmul.f32 %v1666_v58, %v1040_v21  ;;  %1667 = vrsqrt.f32 %v1041_v34  ;;  %vm1135_vm9 = vweird.f32 %v1666_v58  ;;  %vm1144_vm13 = vweird.f32 %v1041_v34 }
 0x3c0   :  { %v983_v33 = vmul.f32 %v2438_v24, %v2438_v24  ;;  %v1127_v30 = vsel %vm1126_vm8, %v1664_v14, %v1123_v59  ;;  %vm1136_vm11 = vmor %vm1134_vm10, %vm1135_vm9 }
 0x3c1   :  { %v1130_v36 = vmul.f32 %v1666_v58, %v1129_v5  ;;  %v1215_v4 = vmul.f32 %v1127_v30, %v2319_v27 }
 0x3c2   :  { %1014 = vadd.xlane.f32.xlu0 %v983_v33  ;;  %v1005_v9 = vpop.xlane.xlu1 %1004 }
 0x3c3   :  { %v1131_v6 = vmul.f32 0.5, %v1130_v36  ;;  %v1026_v23 = vmul.f32 %v1005_v9, %v1846_v61  ;;  %v1234_v20 = vmul.f32 %v2362_v16, %v1215_v4 }
 0x3c5   :  { %v1668_v35 = vpop.eup %1667  ;;  %v1132_v12 = vsub.f32 1.5, %v1131_v6  ;;  %v1042_v48 = vadd.f32 1e-05, %v1026_v23  ;;  %v1253_v15 = vadd.f32 %v2373_v10, %v1234_v20 }
 0x3c6   :  { %v1139_v7 = vmul.f32 %v1668_v35, %v1041_v34  ;;  %vm1145_vm12 = vweird.f32 %v1668_v35 }
 0x3c7   :  { %v1133_v37 = vmul.f32 %v1666_v58, %v1132_v12  ;;  %1669 = vrsqrt.f32 %v1042_v48  ;;  %v1265_v27 = vpack.c.bf16 %v1253_v15, %v1252_v39  ;;  %vm1146_vm14 = vmor %vm1144_vm13, %vm1145_vm12  ;;  %vm1154_vm0 = vweird.f32 %v1042_v48 }
 0x3c8   :  { %v1140_v43 = vmul.f32 %v1668_v35, %v1139_v7 }
 0x3c9   :  { %1361 = vmatmul.bf16.gmra.mxu3 %v1265_v27  ;;  %v1137_v57 = vsel %vm1136_vm11, %v1666_v58, %v1133_v37 }
 0x3ca   :  { %v1141_v32 = vmul.f32 0.5, %v1140_v43  ;;  %v1216_v53 = vmul.f32 %v1137_v57, %v2335_v54 }
 0x3cb   :  { %v1007_v49 = vpop.xlane.xlu2 %1006 }
 0x3cc   :  { %v1142_v0 = vsub.f32 1.5, %v1141_v32  ;;  %v1027_v29 = vmul.f32 %v1007_v49, %v1846_v61  ;;  %v1235_v13 = vmul.f32 %v2362_v16, %v1216_v53 }
 0x3cd   :  { %v1670_v63 = vpop.eup %1669 }
 0x3ce   :  { %v1143_v25 = vmul.f32 %v1668_v35, %v1142_v0  ;;  %v1149_v31 = vmul.f32 %v1670_v63, %v1042_v48  ;;  %v1043_v38 = vadd.f32 1e-05, %v1027_v29  ;;  %v1254_v62 = vadd.f32 %v2373_v10, %v1235_v13 }
 0x3cf   :  { %vm1155_vm15 = vweird.f32 %v1670_v63 }
 0x3d0   :  { %v1150_v44 = vmul.f32 %v1670_v63, %v1149_v31  ;;  %1671 = vrsqrt.f32 %v1043_v38  ;;  %v1147_v26 = vsel %vm1146_vm14, %v1668_v35, %v1143_v25  ;;  %vm1156_vm1 = vmor %vm1154_vm0, %vm1155_vm15  ;;  %vm1164_vm3 = vweird.f32 %v1043_v38 }
 0x3d1   :  { %v1217_v28 = vmul.f32 %v1147_v26, %v2353_v1 }
 0x3d2   :  { %v1151_v60 = vmul.f32 0.5, %v1150_v44  ;;  %v1347_v3 = vpop.f32.mrf.mxu3 }
 0x3d3   :  { %v1348_v54 = vadd.f32 %v2453_v45, %v1347_v3  ;;  %v1236_v14 = vmul.f32 %v2362_v16, %v1217_v28  ;;  %v1009_v12 = vpop.xlane.xlu0 %1008 }
 0x3d4   :  { %v1152_v47 = vsub.f32 1.5, %v1151_v60  ;;  %v1028_v48 = vmul.f32 %v1009_v12, %v1846_v61 }
 0x3d5   :  { %1387 = vst [vmem:[%s2559_s13] sm:$0xff] %v1348_v54  ;;  %v1255_v21 = vadd.f32 %v2373_v10, %v1236_v14 }
 0x3d6   :  { %v1672_v19 = vpop.eup %1671  ;;  %v1153_v2 = vmul.f32 %v1670_v63, %v1152_v47  ;;  %v1044_v39 = vadd.f32 1e-05, %v1028_v48 }
 0x3d7   :  { %v1159_v1 = vmul.f32 %v1672_v19, %v1043_v38  ;;  %v1266_v11 = vpack.c.bf16 %v1255_v21, %v1254_v62  ;;  %vm1165_vm2 = vweird.f32 %v1672_v19 }
 0x3d8   :  { %v1157_v41 = vsel %vm1156_vm1, %v1670_v63, %v1153_v2  ;;  %vm1166_vm4 = vmor %vm1164_vm3, %vm1165_vm2  ;;  %1673 = vrsqrt.f32 %v1044_v39  ;;  %vm1174_vm6 = vweird.f32 %v1044_v39 }
 0x3d9   :  { %v1160_v51 = vmul.f32 %v1672_v19, %v1159_v1  ;;  %1366 = vmatmul.bf16.gmra.mxu3 %v1266_v11  ;;  %v1218_v34 = vmul.f32 %v1157_v41, %v2382_v8 }
 0x3da   :  { %v1349_v52 = vpop.f32.mrf.mxu3 }
 0x3db   :  { %v1161_v17 = vmul.f32 0.5, %v1160_v51  ;;  %v1350_v18 = vadd.f32 %v2453_v45, %v1349_v52  ;;  %v1237_v5 = vmul.f32 %v2362_v16, %v1218_v34 }
 0x3dd   :  { %v1162_v40 = vsub.f32 1.5, %v1161_v17  ;;  %1388 = vst [vmem:[%s2559_s13 + $0x8] sm:$0xff] %v1350_v18  ;;  %v1256_v4 = vadd.f32 %v2373_v10, %v1237_v5 }
 0x3de   :  { %v1674_v15 = vpop.eup %1673 }
 0x3df   :  { %v1163_v46 = vmul.f32 %v1672_v19, %v1162_v40  ;;  %v1169_v7 = vmul.f32 %v1674_v15, %v1044_v39  ;;  %vm1175_vm5 = vweird.f32 %v1674_v15 }
 0x3e0   :  { %vm1176_vm7 = vmor %vm1174_vm6, %vm1175_vm5 }
 0x3e1   :  { %v1167_v58 = vsel %vm1166_vm4, %v1672_v19, %v1163_v46  ;;  %v1170_v37 = vmul.f32 %v1674_v15, %v1169_v7 }
 0x3e2   :  { %v1219_v59 = vmul.f32 %v1167_v58, %v2394_v50 }
 0x3e3   :  { %v1352_v33 = vpop.f32.mrf.mxu3  ;;  %v1171_v57 = vmul.f32 0.5, %v1170_v37 }
 0x3e4   :  { %v1353_v30 = vadd.f32 %v2453_v45, %v1352_v33  ;;  %v1238_v36 = vmul.f32 %v2362_v16, %v1219_v59 }
 0x3e5   :  { %v1172_v49 = vsub.f32 1.5, %v1171_v57 }
 0x3e6   :  { %1389 = vst [vmem:[%s2559_s13 + $0x10] sm:$0xff] %v1353_v30  ;;  %v1257_v8 = vadd.f32 %v2373_v10, %v1238_v36 }
 0x3e7   :  { %v1173_v25 = vmul.f32 %v1674_v15, %v1172_v49 }
 0x3e8   :  { %v1267_v56 = vpack.c.bf16 %v1257_v8, %v1256_v4 }
 0x3e9   :  { %v1177_v26 = vsel %vm1176_vm7, %v1674_v15, %v1173_v25 }
 0x3ea   :  { %1371 = vmatmul.bf16.gmra.mxu3 %v1267_v56  ;;  %v1220_v54 = vmul.f32 %v1177_v26, %v2405_v22 }
 0x3eb   :  { %v1354_v9 = vpop.f32.mrf.mxu3 }
 0x3ec   :  { %v1355_v50 = vadd.f32 %v2453_v45, %v1354_v9  ;;  %v1239_v1 = vmul.f32 %v2362_v16, %v1220_v54 }
 0x3ee   :  { %1390 = vst [vmem:[%s2559_s13 + $0x18] sm:$0xff] %v1355_v50 }
 0x3f3   :  { %v1357_v6 = vpop.f32.mrf.mxu3 }
 0x3f4   :  { %v1358_v23 = vadd.f32 %v2453_v45, %v1357_v6 }
 0x3f6   :  { %1391 = vst [vmem:[%s2559_s13 + $0x20] sm:$0xff] %v1358_v23 }
 0x3fb   :  { %v1359_v20 = vpop.f32.mrf.mxu3 }
 0x3fc   :  { %v1360_v35 = vadd.f32 %v2453_v45, %v1359_v20 }
 0x3fe   :  { %1392 = vst [vmem:[%s2559_s13 + $0x28] sm:$0xff] %v1360_v35 }
 0x424   :  { %v1011_v27 = vpop.xlane.xlu1 %1010 }
 0x425   :  { %v1029_v43 = vmul.f32 %v1011_v27, %v1846_v61 }
 0x427   :  { %v1045_v32 = vadd.f32 1e-05, %v1029_v43 }
 0x429   :  { %1675 = vrsqrt.f32 %v1045_v32  ;;  %vm1184_vm9 = vweird.f32 %v1045_v32 }
 0x42c   :  { %v1013_v0 = vpop.xlane.xlu2 %1012 }
 0x42d   :  { %v1030_v29 = vmul.f32 %v1013_v0, %v1846_v61 }
 0x42f   :  { %v1676_v63 = vpop.eup %1675  ;;  %v1046_v53 = vadd.f32 1e-05, %v1030_v29 }
 0x430   :  { %v1179_v31 = vmul.f32 %v1676_v63, %v1045_v32  ;;  %vm1185_vm8 = vweird.f32 %v1676_v63 }
 0x431   :  { %1677 = vrsqrt.f32 %v1046_v53  ;;  %vm1186_vm10 = vmor %vm1184_vm9, %vm1185_vm8  ;;  %vm1194_vm12 = vweird.f32 %v1046_v53 }
 0x432   :  { %v1180_v38 = vmul.f32 %v1676_v63, %v1179_v31 }
 0x434   :  { %v1181_v44 = vmul.f32 0.5, %v1180_v38 }
 0x435   :  { %v1015_v28 = vpop.xlane.xlu0 %1014 }
 0x436   :  { %v1182_v13 = vsub.f32 1.5, %v1181_v44  ;;  %v1031_v60 = vmul.f32 %v1015_v28, %v1846_v61  ;;  %v1258_v61 = vadd.f32 %v2373_v10, %v1239_v1 }
 0x437   :  { %v1678_v3 = vpop.eup %1677 }
 0x438   :  { %v1183_v14 = vmul.f32 %v1676_v63, %v1182_v13  ;;  %v1189_v47 = vmul.f32 %v1678_v3, %v1046_v53  ;;  %v1047_v62 = vadd.f32 1e-05, %v1031_v60  ;;  %vm1195_vm11 = vweird.f32 %v1678_v3 }
 0x439   :  { %vm1196_vm13 = vmor %vm1194_vm12, %vm1195_vm11 }
 0x43a   :  { %v1190_v21 = vmul.f32 %v1678_v3, %v1189_v47  ;;  %1679 = vrsqrt.f32 %v1047_v62  ;;  %v1187_v19 = vsel %vm1186_vm10, %v1676_v63, %v1183_v14  ;;  %vm1204_vm15 = vweird.f32 %v1047_v62 }
 0x43b   :  { %v1221_v2 = vmul.f32 %v1187_v19, %v2421_v55 }
 0x43c   :  { %v1191_v11 = vmul.f32 0.5, %v1190_v21 }
 0x43d   :  { %v1240_v51 = vmul.f32 %v2362_v16, %v1221_v2 }
 0x43e   :  { %v1192_v52 = vsub.f32 1.5, %v1191_v11 }
 0x43f   :  { %v1259_v22 = vadd.f32 %v2373_v10, %v1240_v51 }
 0x440   :  { %v1680_v17 = vpop.eup %1679  ;;  %v1193_v18 = vmul.f32 %v1678_v3, %v1192_v52 }
 0x441   :  { %v1199_v41 = vmul.f32 %v1680_v17, %v1047_v62  ;;  %v1268_v40 = vpack.c.bf16 %v1259_v22, %v1258_v61  ;;  %vm1205_vm14 = vweird.f32 %v1680_v17 }
 0x442   :  { %v1197_v46 = vsel %vm1196_vm13, %v1678_v3, %v1193_v18  ;;  %vm1206_vm0 = vmor %vm1204_vm15, %vm1205_vm14 }
 0x443   :  { %v1200_v34 = vmul.f32 %v1680_v17, %v1199_v41  ;;  %1376 = vmatmul.bf16.gmra.mxu3 %v1268_v40  ;;  %v1222_v59 = vmul.f32 %v1197_v46, %v2429_v42 }
 0x445   :  { %v1201_v55 = vmul.f32 0.5, %v1200_v34  ;;  %v1241_v4 = vmul.f32 %v2362_v16, %v1222_v59 }
 0x447   :  { %v1202_v58 = vsub.f32 1.5, %v1201_v55  ;;  %v1260_v9 = vadd.f32 %v2373_v10, %v1241_v4 }
 0x449   :  { %v1203_v5 = vmul.f32 %v1680_v17, %v1202_v58 }
 0x44b   :  { %v1207_v33 = vsel %vm1206_vm0, %v1680_v17, %v1203_v5 }
 0x44c   :  { %v1362_v30 = vpop.f32.mrf.mxu3  ;;  %v1223_v36 = vmul.f32 %v1207_v33, %v2438_v24 }
 0x44d   :  { %v1363_v8 = vadd.f32 %v2453_v45, %v1362_v30 }
 0x44e   :  { %v1242_v56 = vmul.f32 %v2362_v16, %v1223_v36 }
 0x44f   :  { %1393 = vst [vmem:[%s2559_s13 + $0x30] sm:$0xff] %v1363_v8 }
 0x450   :  { %v1261_v42 = vadd.f32 %v2373_v10, %v1242_v56 }
 0x452   :  { %v1269_v50 = vpack.c.bf16 %v1261_v42, %v1260_v9 }
 0x454   :  { %1381 = vmatmul.bf16.gmra.mxu3 %v1269_v50  ;;  %v1364_v6 = vpop.f32.mrf.mxu3 }
 0x455   :  { %v1365_v23 = vadd.f32 %v2453_v45, %v1364_v6 }
 0x457   :  { %1394 = vst [vmem:[%s2559_s13 + $0x38] sm:$0xff] %v1365_v23 }
 0x45c   :  { %v1367_v24 = vpop.f32.mrf.mxu3 }
 0x45d   :  { %v1368_v16 = vadd.f32 %v2453_v45, %v1367_v24 }
 0x45f   :  { %1395 = vst [vmem:[%s2559_s13 + $0x40] sm:$0xff] %v1368_v16 }
 0x464   :  { %v1369_v20 = vpop.f32.mrf.mxu3 }
 0x465   :  { %v1370_v35 = vadd.f32 %v2453_v45, %v1369_v20 }
 0x467   :  { %1396 = vst [vmem:[%s2559_s13 + $0x48] sm:$0xff] %v1370_v35 }
 0x46d   :  { %v1372_v10 = vpop.f32.mrf.mxu3 }
 0x46e   :  { %v1373_v12 = vadd.f32 %v2453_v45, %v1372_v10 }
 0x470   :  { %1397 = vst [vmem:[%s2559_s13 + $0x50] sm:$0xff] %v1373_v12 }
 0x475   :  { %v1374_v48 = vpop.f32.mrf.mxu3 }
 0x476   :  { %v1375_v39 = vadd.f32 %v2453_v45, %v1374_v48 }
 0x478   :  { %1398 = vst [vmem:[%s2559_s13 + $0x58] sm:$0xff] %v1375_v39 }
 0x4c6   :  { %v1377_v15 = vpop.f32.mrf.mxu3 }
 0x4c7   :  { %v1378_v7 = vadd.f32 %v2453_v45, %v1377_v15 }
 0x4c9   :  { %1399 = vst [vmem:[%s2559_s13 + $0x60] sm:$0xff] %v1378_v7 }
 0x4ce   :  { %v1379_v37 = vpop.f32.mrf.mxu3 }
 0x4cf   :  { %v1380_v27 = vadd.f32 %v2453_v45, %v1379_v37 }
 0x4d1   :  { %1400 = vst [vmem:[%s2559_s13 + $0x68] sm:$0xff] %v1380_v27 }
 0x4d7   :  { %v1382_v43 = vpop.f32.mrf.mxu3 }
 0x4d8   :  { %v1383_v32 = vadd.f32 %v2453_v45, %v1382_v43 }
 0x4da   :  { %1401 = vst [vmem:[%s2559_s13 + $0x70] sm:$0xff] %v1383_v32 }
 0x4df   :  { %v1384_v57 = vpop.f32.mrf.mxu3 }
 0x4e0   :  { %v1385_v49 = vadd.f32 %v2453_v45, %v1384_v57 }
 0x4e2   :  { %1402 = vst [vmem:[%s2559_s13 + $0x78] sm:$0xff] %v1385_v49 }

</bundles_post_ra>
